<compile_context>
chip_gen: v7x
topology: tpu7x:2x2x1
jax: 0.10.0
libtpu: 0.0.40
codegen_flags: <defaults>
</compile_context>

<pallas_src>
import functools
import math

import jax
import jax.numpy as jnp
from jax import lax
from jax.experimental import pallas as pl
from jax.experimental.pallas import tpu as pltpu


# ---------------------------------------------------------------------------
# static geometry helpers (shared by weight packing and the kernel)
# ---------------------------------------------------------------------------
def _valid_taps(d, h, w):
    """Non-center 3x3 taps of a dilated conv that can touch the image."""
    taps = []
    for ky in range(3):
        if ky != 1 and d >= h:          # row shift lands fully in zero padding
            continue
        for kx in range(3):
            if kx != 1 and d >= w:      # col shift lands fully in zero padding
                continue
            if ky == 1 and kx == 1:
                continue                # center tap handled by the fused matmul
            taps.append((ky, kx))
    return taps


def _tap_plan(rates, h, w, cin):
    """Per rate: (pixel offsets of valid non-center taps, row offset in wdil)."""
    plan, row0 = [], 0
    for d in rates:
        taps = _valid_taps(d, h, w)
        offs = tuple(((ky - 1) * d, (kx - 1) * d) for ky, kx in taps)
        plan.append((offs, row0))
        row0 += len(taps) * cin
    return tuple(plan), row0


def _choose_band_rows(h, w):
    """Row-band height: divides H, band*W sublane-aligned & >=128, >=2 bands."""
    for tb in range(1, h + 1):
        if h % tb or (tb * w) % 8:
            continue
        if tb * w >= 128 and h // tb >= 2:
            return tb
    return h


# ---------------------------------------------------------------------------
# Fused ASPP kernel (one grid step == one (batch, row-band) tile)
# ---------------------------------------------------------------------------
def _aspp_band_kernel(xpad_hbm, xmean_ref, wc_ref, wdil_ref, wpool_ref,
                      wproj_ref, bias_ref, o_ref,
                      xs_ref, center_ref, taps_ref, cat_ref, dma_sem,
                      *, tb, w, cin, cout, halo_h, halo_w, tap_plan, n_rates):
    n = pl.program_id(0)
    b = pl.program_id(1)
    band_rows = tb + 2 * halo_h
    mb = tb * w
    hh, hw_ = halo_h, halo_w

    # ---- band (+halo) of the zero-padded bf16 activations: HBM -> VMEM ----
    row0 = pl.multiple_of(b * tb, tb)
    cp = pltpu.make_async_copy(xpad_hbm.at[n, pl.ds(row0, band_rows)],
                               xs_ref, dma_sem)
    cp.start()
    cp.wait()

    # center window of the band, flattened to (mb, cin); already bf16
    x2 = xs_ref[hh:hh + tb, hw_:hw_ + w, :].reshape(mb, cin)

    # ---- fused 1x1-branch + center-tap matmul: (mb,cin) x (cin,(1+R)*cout) --
    center_ref[...] = jnp.dot(x2, wc_ref[...],
                              preferred_element_type=jnp.float32)

    # branch 0: 1x1 conv (+folded BN) + ReLU -> concat slot 0
    cat_ref[:, 0:cout] = jnp.maximum(center_ref[:, 0:cout] + bias_ref[0],
                                     0.0).astype(cat_ref.dtype)

    # dilated 3x3 branches: per rate, ONE im2col matmul over the valid taps
    for ri in range(n_rates):
        offs, wrow0 = tap_plan[ri]
        s = center_ref[:, (1 + ri) * cout:(2 + ri) * cout]
        if offs:
            for t, (dy, dx) in enumerate(offs):
                taps_ref[:, t * cin:(t + 1) * cin] = (
                    xs_ref[hh + dy:hh + dy + tb, hw_ + dx:hw_ + dx + w, :]
                    .reshape(mb, cin))
            k = len(offs) * cin
            s = s + jnp.dot(taps_ref[:, 0:k], wdil_ref[wrow0:wrow0 + k, :],
                            preferred_element_type=jnp.float32)
        cat_ref[:, (1 + ri) * cout:(2 + ri) * cout] = jnp.maximum(
            s + bias_ref[1 + ri], 0.0).astype(cat_ref.dtype)

    # pooling branch: f32 global mean (wrapper) -> 1x1 conv (+BN) -> ReLU.
    # bilinear resize from 1x1 back to (H, W) is just a broadcast.
    pooled = jnp.maximum(
        jnp.dot(xmean_ref[...].astype(jnp.bfloat16), wpool_ref[...],
                preferred_element_type=jnp.float32) + bias_ref[1 + n_rates],
        0.0).astype(cat_ref.dtype)                                  # (1, cout)
    cat_ref[:, (1 + n_rates) * cout:(2 + n_rates) * cout] = jnp.broadcast_to(
        pooled, (mb, cout))

    # projection over the (implicit) concat: single K=(2+R)*cout matmul,
    # single f32 accumulator.  Dropout(0.5) == identity in eval mode.
    acc = jnp.dot(cat_ref[...], wproj_ref[...],
                  preferred_element_type=jnp.float32)
    o_ref[...] = jnp.maximum(acc + bias_ref[2 + n_rates],
                             0.0).astype(o_ref.dtype)


def aspp_forward(x_nchw, folded, rates):
    """x_nchw: (N, Cin, H, W) float32 -> (N, Cout, H, W) float32 (eval ASPP)."""
    wc, wdil, wpool, wproj, biases = folded
    n, cin, h, w = x_nchw.shape
    cout = wpool.shape[1]
    n_rates = len(rates)

    x = jnp.transpose(x_nchw, (0, 2, 3, 1))                 # NHWC f32

    # global average pool with f32 accumulation (grid is spatially tiled, so
    # the full-image reduction lives in the wrapper -- a tiny XLA op)
    xmean = jnp.mean(x, axis=(1, 2)).reshape(n, 1, cin)

    # cast activations to bf16 once; pad only by the largest effective
    # dilation per axis (taps with d >= H / d >= W are statically skipped)
    halo_h = max([d for d in rates if d < h], default=0)
    halo_w = max([d for d in rates if d < w], default=0)
    xpad = jnp.pad(x.astype(jnp.bfloat16),
                   ((0, 0), (halo_h, halo_h), (halo_w, halo_w), (0, 0)))
    wp = w + 2 * halo_w

    tb = _choose_band_rows(h, w)
    nb = h // tb
    mb = tb * w
    band_rows = tb + 2 * halo_h

    tap_plan, dil_rows = _tap_plan(rates, h, w, cin)
    assert wdil.shape[0] == (dil_rows if dil_rows else 8), "weight packing mismatch"
    max_taps = max((len(o) for o, _ in tap_plan), default=0)

    kern = functools.partial(
        _aspp_band_kernel, tb=tb, w=w, cin=cin, cout=cout,
        halo_h=halo_h, halo_w=halo_w, tap_plan=tap_plan, n_rates=n_rates)

    scratch_shapes = [
        pltpu.VMEM((band_rows, wp, cin), jnp.bfloat16),          # band + halo
        pltpu.VMEM((mb, (1 + n_rates) * cout), jnp.float32),     # fused center
        pltpu.VMEM((mb, max(max_taps, 1) * cin), jnp.bfloat16),  # im2col taps
        pltpu.VMEM((mb, (2 + n_rates) * cout), jnp.bfloat16),    # branch concat
        pltpu.SemaphoreType.DMA,
    ]

    weight_bytes = ((wc.size + wdil.size + wpool.size + wproj.size) * 2
                    + biases.size * 4)
    scratch_bytes = (band_rows * wp * cin * 2
                     + mb * (1 + n_rates) * cout * 4
                     + mb * max(max_taps, 1) * cin * 2
                     + mb * (2 + n_rates) * cout * 2)
    io_bytes = 2 * (mb * cout * 4 + cin * 4)

    def run(weight_mode, wbuf):
        def wspec(shape, idx):
            if weight_mode is None:
                return pl.BlockSpec(shape, idx)
            return pl.BlockSpec(shape, idx, pipeline_mode=weight_mode)

        budget = scratch_bytes + io_bytes + weight_bytes * wbuf
        vmem_limit = int(min(110 * 2 ** 20, max(32 * 2 ** 20, 2 * budget)))

        return pl.pallas_call(
            kern,
            out_shape=jax.ShapeDtypeStruct((n, h * w, cout), jnp.float32),
            grid=(n, nb),
            in_specs=[
                pl.BlockSpec(memory_space=pl.ANY),               # padded acts (HBM)
                pl.BlockSpec((None, 1, cin), lambda i, j: (i, 0, 0)),
                wspec(wc.shape, lambda i, j: (0, 0)),
                wspec(wdil.shape, lambda i, j: (0, 0)),
                wspec(wpool.shape, lambda i, j: (0, 0)),
                wspec(wproj.shape, lambda i, j: (0, 0)),
                wspec(biases.shape, lambda i, j: (0, 0, 0)),
            ],
            out_specs=pl.BlockSpec((None, mb, cout), lambda i, j: (i, j, 0)),
            scratch_shapes=scratch_shapes,
            compiler_params=pltpu.CompilerParams(
                dimension_semantics=("parallel", "parallel"),
                vmem_limit_bytes=vmem_limit),
        )(xpad, xmean, wc, wdil, wpool, wproj, biases)

    try:
        # grid-invariant weights: single-buffered (halves their VMEM footprint)
        out = run(pl.Buffered(1), 1)
    except Exception:
        # fallback for jax versions without BlockSpec(pipeline_mode=...)
        out = run(None, 2)

    return jnp.transpose(out.reshape(n, h, w, cout), (0, 3, 1, 2))  # NCHW


# ---------------------------------------------------------------------------
# Parameter init (deterministic, synthetic), eval-mode BN folding & packing
# ---------------------------------------------------------------------------
def init_params(key, cin, cout, rates):
    keys = iter(jax.random.split(key, 64))

    def bn(c):
        gamma = jax.random.uniform(next(keys), (c,), jnp.float32, 0.5, 1.5)
        beta = jax.random.normal(next(keys), (c,), jnp.float32) * 0.1
        mean = jax.random.normal(next(keys), (c,), jnp.float32) * 0.1
        var = jax.random.uniform(next(keys), (c,), jnp.float32, 0.5, 1.5)
        scale = gamma / jnp.sqrt(var + 1e-5)
        shift = beta - mean * scale
        return scale, shift

    n_br = len(rates) + 2
    p = {}
    p["w0"] = jax.random.normal(next(keys), (cin, cout), jnp.float32) / math.sqrt(cin)
    p["bn0"] = bn(cout)
    p["wdil"] = [jax.random.normal(next(keys), (3, 3, cin, cout), jnp.float32)
                 / math.sqrt(9 * cin) for _ in rates]
    p["bndil"] = [bn(cout) for _ in rates]
    p["wpool"] = jax.random.normal(next(keys), (cin, cout), jnp.float32) / math.sqrt(cin)
    p["bnpool"] = bn(cout)
    p["wproj"] = (jax.random.normal(next(keys), (n_br * cout, cout), jnp.float32)
                  / math.sqrt(n_br * cout))
    p["bnproj"] = bn(cout)
    return p


def fold_params(p, rates, cin, cout, h, w):
    """Fold eval-mode BatchNorm into weights/bias; pack for the fused kernel."""
    n_rates = len(rates)

    # fused center RHS: [ w_1x1 | wdil_r1[1,1] | wdil_r2[1,1] | wdil_r3[1,1] ]
    center = [p["w0"] * p["bn0"][0][None, :]]
    for wk, (sc, _) in zip(p["wdil"], p["bndil"]):
        center.append(wk[1, 1] * sc[None, :])
    wc = jnp.concatenate(center, axis=1).astype(jnp.bfloat16)

    # per-rate im2col RHS for the valid non-center taps (skipped taps omitted)
    rows = []
    for wk, (sc, _), d in zip(p["wdil"], p["bndil"], rates):
        for ky, kx in _valid_taps(d, h, w):
            rows.append(wk[ky, kx] * sc[None, :])
    wdil = (jnp.concatenate(rows, axis=0) if rows
            else jnp.zeros((8, cout), jnp.float32)).astype(jnp.bfloat16)

    wpool = (p["wpool"] * p["bnpool"][0][None, :]).astype(jnp.bfloat16)
    wproj = (p["wproj"] * p["bnproj"][0][None, :]).astype(jnp.bfloat16)

    biases = jnp.stack([p["bn0"][1]] + [sh for _, sh in p["bndil"]]
                       + [p["bnpool"][1], p["bnproj"][1]], axis=0)
    biases = biases.reshape(n_rates + 3, 1, cout).astype(jnp.float32)
    return wc, wdil, wpool, wproj, biases


# ---------------------------------------------------------------------------
# Pure-JAX f32 reference (for correctness check)
# ---------------------------------------------------------------------------
def aspp_reference_nhwc(x, p, rates):
    hi = lax.Precision.HIGHEST
    n, h, w, _ = x.shape

    def bn_relu(y, scale, shift):
        return jnp.maximum(y * scale + shift, 0.0)

    branches = [bn_relu(jnp.einsum("nhwc,co->nhwo", x, p["w0"], precision=hi),
                        *p["bn0"])]
    for wk, bnp, d in zip(p["wdil"], p["bndil"], rates):
        y = lax.conv_general_dilated(
            x, wk, window_strides=(1, 1), padding=[(d, d), (d, d)],
            rhs_dilation=(d, d), dimension_numbers=("NHWC", "HWIO", "NHWC"),
            precision=hi)
        branches.append(bn_relu(y, *bnp))
    pooled = jnp.mean(x, axis=(1, 2))
    pooled = bn_relu(jnp.dot(pooled, p["wpool"], precision=hi), *p["bnpool"])
    branches.append(jnp.broadcast_to(pooled[:, None, None, :],
                                     (n, h, w, pooled.shape[-1])))
    cat = jnp.concatenate(branches, axis=-1)
    return bn_relu(jnp.einsum("nhwc,co->nhwo", cat, p["wproj"], precision=hi),
                   *p["bnproj"])


# ---------------------------------------------------------------------------
if __name__ == "__main__":
    key = jax.random.PRNGKey(0)
    k_x, k_p = jax.random.split(key)

    # small but lane-dense test shape (Cin multiple of 128 per perf review)
    batch, cin, cout, hw = 2, 128, 128, 16
    rates = (6, 12, 18)          # rate 18 >= H exercises the static tap-skip

    x_nchw = jax.random.normal(k_x, (batch, cin, hw, hw), jnp.float32)
    raw = init_params(k_p, cin, cout, rates)
    folded = fold_params(raw, rates, cin, cout, hw, hw)

    out = jax.block_until_ready(aspp_forward(x_nchw, folded, rates))

    assert out.shape == (batch, cout, hw, hw), out.shape
    assert bool(jnp.all(jnp.isfinite(out)))

    # correctness vs pure-JAX f32 reference (bf16-MXU / double-rounding tol)
    x_nhwc = jnp.transpose(x_nchw, (0, 2, 3, 1))
    ref = jnp.transpose(aspp_reference_nhwc(x_nhwc, raw, rates), (0, 3, 1, 2))
    err = float(jnp.max(jnp.abs(out - ref)) / (jnp.max(jnp.abs(ref)) + 1e-6))
    assert err < 2e-2, f"relative error too large: {err}"

    print("KERNEL_OK")
</pallas_src>

<mosaic_0001>
module attributes {stable_mosaic.version = 11 : i64} {
  func.func @_aspp_band_kernel(%arg0: i32, %arg1: i32, %arg2: memref<2x40x40x128xbf16, #tpu.memory_space<any>>, %arg3: memref<1x1x128xf32, #tpu.memory_space<vmem>>, %arg4: memref<128x512xbf16, #tpu.memory_space<vmem>>, %arg5: memref<2048x128xbf16, #tpu.memory_space<vmem>>, %arg6: memref<128x128xbf16, #tpu.memory_space<vmem>>, %arg7: memref<640x128xbf16, #tpu.memory_space<vmem>>, %arg8: memref<6x1x128xf32, #tpu.memory_space<vmem>>, %arg9: memref<1x128x128xf32, #tpu.memory_space<vmem>>, %arg10: memref<32x40x128xbf16, #tpu.memory_space<vmem>>, %arg11: memref<128x512xf32, #tpu.memory_space<vmem>>, %arg12: memref<128x1024xbf16, #tpu.memory_space<vmem>>, %arg13: memref<128x640xbf16, #tpu.memory_space<vmem>>, %arg14: memref<!tpu.dma_semaphore, #tpu.memory_space<semaphore_mem>>) attributes {dimension_semantics = [#tpu.dimension_semantics<parallel>, #tpu.dimension_semantics<parallel>], iteration_bounds = array<i64: 2, 2>, scalar_prefetch = 0 : i64, scratch_operands = 5 : i64, tpu.core_type = #tpu.core_type<tc>, window_params = [{}, {transform_indices = @transform_1, window_bounds = array<i64: 1, 1, 128>}, {pipeline_mode = #tpu.pipeline_mode<synchronous>, transform_indices = @transform_2, window_bounds = array<i64: 128, 512>}, {pipeline_mode = #tpu.pipeline_mode<synchronous>, transform_indices = @transform_3, window_bounds = array<i64: 2048, 128>}, {pipeline_mode = #tpu.pipeline_mode<synchronous>, transform_indices = @transform_4, window_bounds = array<i64: 128, 128>}, {pipeline_mode = #tpu.pipeline_mode<synchronous>, transform_indices = @transform_5, window_bounds = array<i64: 640, 128>}, {pipeline_mode = #tpu.pipeline_mode<synchronous>, transform_indices = @transform_6, window_bounds = array<i64: 6, 1, 128>}, {transform_indices = @transform_7, window_bounds = array<i64: 1, 128, 128>}]} {
    %c8_i32 = arith.constant 8 : i32
    %0 = arith.muli %arg1, %c8_i32 : i32
    %1 = tpu.assume_multiple %0, 8 : i32
    %c0_i32 = arith.constant 0 : i32
    %c0_i32_0 = arith.constant 0 : i32
    %2 = tpu.memref_slice %arg2[%arg0, %1, %c0_i32, %c0_i32_0] : memref<2x40x40x128xbf16, #tpu.memory_space<any>> -> memref<1x32x40x128xbf16, #tpu.memory_space<any>>
    %3 = tpu.memref_squeeze %2 : memref<1x32x40x128xbf16, #tpu.memory_space<any>> -> memref<32x40x128xbf16, #tpu.memory_space<any>>
    tpu.enqueue_dma source(%3 : memref<32x40x128xbf16, #tpu.memory_space<any>>) target(%arg10 : memref<32x40x128xbf16, #tpu.memory_space<vmem>>) target_semaphore(%arg14 : memref<!tpu.dma_semaphore, #tpu.memory_space<semaphore_mem>>)
    %c0_i32_1 = arith.constant 0 : i32
    %c0_i32_2 = arith.constant 0 : i32
    %4 = tpu.memref_slice %arg2[%arg0, %1, %c0_i32_1, %c0_i32_2] : memref<2x40x40x128xbf16, #tpu.memory_space<any>> -> memref<1x32x40x128xbf16, #tpu.memory_space<any>>
    %5 = tpu.memref_squeeze %4 : memref<1x32x40x128xbf16, #tpu.memory_space<any>> -> memref<32x40x128xbf16, #tpu.memory_space<any>>
    tpu.wait_dma2 semaphore(%arg14 : memref<!tpu.dma_semaphore, #tpu.memory_space<semaphore_mem>>) src(%5 : memref<32x40x128xbf16, #tpu.memory_space<any>>) dst(%arg10 : memref<32x40x128xbf16, #tpu.memory_space<vmem>>)
    %c12 = arith.constant 12 : index
    %c12_3 = arith.constant 12 : index
    %c0 = arith.constant 0 : index
    %6 = vector.load %arg10[%c12, %c12_3, %c0] : memref<32x40x128xbf16, #tpu.memory_space<vmem>>, vector<8x16x128xbf16>
    %7 = vector.shape_cast %6 : vector<8x16x128xbf16> to vector<128x128xbf16>
    %c0_4 = arith.constant 0 : index
    %c0_5 = arith.constant 0 : index
    %8 = vector.load %arg4[%c0_4, %c0_5] : memref<128x512xbf16, #tpu.memory_space<vmem>>, vector<128x512xbf16>
    %cst = arith.constant dense<0.000000e+00> : vector<128x512xf32>
    %9 = tpu.matmul %7, %8, %cst {dimension_numbers = #tpu.dot_dimension_numbers<[1], [0], [0], [1], [0, 0, 1, 1], [], []>} : vector<128x128xbf16>, vector<128x512xbf16>, vector<128x512xf32> -> vector<128x512xf32>
    %c0_6 = arith.constant 0 : index
    %c0_7 = arith.constant 0 : index
    %10 = vector.load %arg11[%c0_6, %c0_7] : memref<128x512xf32, #tpu.memory_space<vmem>>, vector<128x512xf32>
    tpu.vector_store %arg11[%c0_6, %c0_7], %9 {strides = array<i32>} : memref<128x512xf32, #tpu.memory_space<vmem>>, vector<128x512xf32>,
    %c0_8 = arith.constant 0 : index
    %c0_9 = arith.constant 0 : index
    %11 = vector.load %arg11[%c0_8, %c0_9] : memref<128x512xf32, #tpu.memory_space<vmem>>, vector<128x128xf32>
    %c0_10 = arith.constant 0 : index
    %c0_11 = arith.constant 0 : index
    %c0_12 = arith.constant 0 : index
    %12 = vector.load %arg8[%c0_10, %c0_11, %c0_12] : memref<6x1x128xf32, #tpu.memory_space<vmem>>, vector<1x1x128xf32>
    %13 = vector.shape_cast %12 : vector<1x1x128xf32> to vector<1x128xf32>
    %14 = vector.broadcast %13 : vector<1x128xf32> to vector<128x128xf32>
    %15 = arith.addf %11, %14 : vector<128x128xf32>
    %cst_13 = arith.constant 0.000000e+00 : f32
    %16 = vector.broadcast %cst_13 : f32 to vector<128x128xf32>
    %17 = arith.maximumf %15, %16 : vector<128x128xf32>
    %18 = arith.truncf %17 : vector<128x128xf32> to vector<128x128xbf16>
    %c0_14 = arith.constant 0 : index
    %c0_15 = arith.constant 0 : index
    %19 = vector.load %arg13[%c0_14, %c0_15] : memref<128x640xbf16, #tpu.memory_space<vmem>>, vector<128x128xbf16>
    tpu.vector_store %arg13[%c0_14, %c0_15], %18 {strides = array<i32>} : memref<128x640xbf16, #tpu.memory_space<vmem>>, vector<128x128xbf16>,
    %c0_16 = arith.constant 0 : index
    %c128 = arith.constant 128 : index
    %20 = vector.load %arg11[%c0_16, %c128] : memref<128x512xf32, #tpu.memory_space<vmem>>, vector<128x128xf32>
    %c6 = arith.constant 6 : index
    %c6_17 = arith.constant 6 : index
    %c0_18 = arith.constant 0 : index
    %21 = vector.load %arg10[%c6, %c6_17, %c0_18] : memref<32x40x128xbf16, #tpu.memory_space<vmem>>, vector<8x16x128xbf16>
    %22 = vector.shape_cast %21 : vector<8x16x128xbf16> to vector<128x128xbf16>
    %c0_19 = arith.constant 0 : index
    %c0_20 = arith.constant 0 : index
    %23 = vector.load %arg12[%c0_19, %c0_20] : memref<128x1024xbf16, #tpu.memory_space<vmem>>, vector<128x128xbf16>
    tpu.vector_store %arg12[%c0_19, %c0_20], %22 {strides = array<i32>} : memref<128x1024xbf16, #tpu.memory_space<vmem>>, vector<128x128xbf16>,
    %c6_21 = arith.constant 6 : index
    %c12_22 = arith.constant 12 : index
    %c0_23 = arith.constant 0 : index
    %24 = vector.load %arg10[%c6_21, %c12_22, %c0_23] : memref<32x40x128xbf16, #tpu.memory_space<vmem>>, vector<8x16x128xbf16>
    %25 = vector.shape_cast %24 : vector<8x16x128xbf16> to vector<128x128xbf16>
    %c0_24 = arith.constant 0 : index
    %c128_25 = arith.constant 128 : index
    %26 = vector.load %arg12[%c0_24, %c128_25] : memref<128x1024xbf16, #tpu.memory_space<vmem>>, vector<128x128xbf16>
    tpu.vector_store %arg12[%c0_24, %c128_25], %25 {strides = array<i32>} : memref<128x1024xbf16, #tpu.memory_space<vmem>>, vector<128x128xbf16>,
    %c6_26 = arith.constant 6 : index
    %c18 = arith.constant 18 : index
    %c0_27 = arith.constant 0 : index
    %27 = vector.load %arg10[%c6_26, %c18, %c0_27] : memref<32x40x128xbf16, #tpu.memory_space<vmem>>, vector<8x16x128xbf16>
    %28 = vector.shape_cast %27 : vector<8x16x128xbf16> to vector<128x128xbf16>
    %c0_28 = arith.constant 0 : index
    %c256 = arith.constant 256 : index
    %29 = vector.load %arg12[%c0_28, %c256] : memref<128x1024xbf16, #tpu.memory_space<vmem>>, vector<128x128xbf16>
    tpu.vector_store %arg12[%c0_28, %c256], %28 {strides = array<i32>} : memref<128x1024xbf16, #tpu.memory_space<vmem>>, vector<128x128xbf16>,
    %c12_29 = arith.constant 12 : index
    %c6_30 = arith.constant 6 : index
    %c0_31 = arith.constant 0 : index
    %30 = vector.load %arg10[%c12_29, %c6_30, %c0_31] : memref<32x40x128xbf16, #tpu.memory_space<vmem>>, vector<8x16x128xbf16>
    %31 = vector.shape_cast %30 : vector<8x16x128xbf16> to vector<128x128xbf16>
    %c0_32 = arith.constant 0 : index
    %c384 = arith.constant 384 : index
    %32 = vector.load %arg12[%c0_32, %c384] : memref<128x1024xbf16, #tpu.memory_space<vmem>>, vector<128x128xbf16>
    tpu.vector_store %arg12[%c0_32, %c384], %31 {strides = array<i32>} : memref<128x1024xbf16, #tpu.memory_space<vmem>>, vector<128x128xbf16>,
    %c12_33 = arith.constant 12 : index
    %c18_34 = arith.constant 18 : index
    %c0_35 = arith.constant 0 : index
    %33 = vector.load %arg10[%c12_33, %c18_34, %c0_35] : memref<32x40x128xbf16, #tpu.memory_space<vmem>>, vector<8x16x128xbf16>
    %34 = vector.shape_cast %33 : vector<8x16x128xbf16> to vector<128x128xbf16>
    %c0_36 = arith.constant 0 : index
    %c512 = arith.constant 512 : index
    %35 = vector.load %arg12[%c0_36, %c512] : memref<128x1024xbf16, #tpu.memory_space<vmem>>, vector<128x128xbf16>
    tpu.vector_store %arg12[%c0_36, %c512], %34 {strides = array<i32>} : memref<128x1024xbf16, #tpu.memory_space<vmem>>, vector<128x128xbf16>,
    %c18_37 = arith.constant 18 : index
    %c6_38 = arith.constant 6 : index
    %c0_39 = arith.constant 0 : index
    %36 = vector.load %arg10[%c18_37, %c6_38, %c0_39] : memref<32x40x128xbf16, #tpu.memory_space<vmem>>, vector<8x16x128xbf16>
    %37 = vector.shape_cast %36 : vector<8x16x128xbf16> to vector<128x128xbf16>
    %c0_40 = arith.constant 0 : index
    %c640 = arith.constant 640 : index
    %38 = vector.load %arg12[%c0_40, %c640] : memref<128x1024xbf16, #tpu.memory_space<vmem>>, vector<128x128xbf16>
    tpu.vector_store %arg12[%c0_40, %c640], %37 {strides = array<i32>} : memref<128x1024xbf16, #tpu.memory_space<vmem>>, vector<128x128xbf16>,
    %c18_41 = arith.constant 18 : index
    %c12_42 = arith.constant 12 : index
    %c0_43 = arith.constant 0 : index
    %39 = vector.load %arg10[%c18_41, %c12_42, %c0_43] : memref<32x40x128xbf16, #tpu.memory_space<vmem>>, vector<8x16x128xbf16>
    %40 = vector.shape_cast %39 : vector<8x16x128xbf16> to vector<128x128xbf16>
    %c0_44 = arith.constant 0 : index
    %c768 = arith.constant 768 : index
    %41 = vector.load %arg12[%c0_44, %c768] : memref<128x1024xbf16, #tpu.memory_space<vmem>>, vector<128x128xbf16>
    tpu.vector_store %arg12[%c0_44, %c768], %40 {strides = array<i32>} : memref<128x1024xbf16, #tpu.memory_space<vmem>>, vector<128x128xbf16>,
    %c18_45 = arith.constant 18 : index
    %c18_46 = arith.constant 18 : index
    %c0_47 = arith.constant 0 : index
    %42 = vector.load %arg10[%c18_45, %c18_46, %c0_47] : memref<32x40x128xbf16, #tpu.memory_space<vmem>>, vector<8x16x128xbf16>
    %43 = vector.shape_cast %42 : vector<8x16x128xbf16> to vector<128x128xbf16>
    %c0_48 = arith.constant 0 : index
    %c896 = arith.constant 896 : index
    %44 = vector.load %arg12[%c0_48, %c896] : memref<128x1024xbf16, #tpu.memory_space<vmem>>, vector<128x128xbf16>
    tpu.vector_store %arg12[%c0_48, %c896], %43 {strides = array<i32>} : memref<128x1024xbf16, #tpu.memory_space<vmem>>, vector<128x128xbf16>,
    %c0_49 = arith.constant 0 : index
    %c0_50 = arith.constant 0 : index
    %45 = vector.load %arg12[%c0_49, %c0_50] : memref<128x1024xbf16, #tpu.memory_space<vmem>>, vector<128x1024xbf16>
    %c0_51 = arith.constant 0 : index
    %c0_52 = arith.constant 0 : index
    %46 = vector.load %arg5[%c0_51, %c0_52] : memref<2048x128xbf16, #tpu.memory_space<vmem>>, vector<1024x128xbf16>
    %cst_53 = arith.constant dense<0.000000e+00> : vector<128x128xf32>
    %47 = tpu.matmul %45, %46, %cst_53 {dimension_numbers = #tpu.dot_dimension_numbers<[1], [0], [0], [1], [0, 0, 1, 1], [], []>} : vector<128x1024xbf16>, vector<1024x128xbf16>, vector<128x128xf32> -> vector<128x128xf32>
    %48 = arith.addf %20, %47 : vector<128x128xf32>
    %c1 = arith.constant 1 : index
    %c0_54 = arith.constant 0 : index
    %c0_55 = arith.constant 0 : index
    %49 = vector.load %arg8[%c1, %c0_54, %c0_55] : memref<6x1x128xf32, #tpu.memory_space<vmem>>, vector<1x1x128xf32>
    %50 = vector.shape_cast %49 : vector<1x1x128xf32> to vector<1x128xf32>
    %51 = vector.broadcast %50 : vector<1x128xf32> to vector<128x128xf32>
    %52 = arith.addf %48, %51 : vector<128x128xf32>
    %cst_56 = arith.constant 0.000000e+00 : f32
    %53 = vector.broadcast %cst_56 : f32 to vector<128x128xf32>
    %54 = arith.maximumf %52, %53 : vector<128x128xf32>
    %55 = arith.truncf %54 : vector<128x128xf32> to vector<128x128xbf16>
    %c0_57 = arith.constant 0 : index
    %c128_58 = arith.constant 128 : index
    %56 = vector.load %arg13[%c0_57, %c128_58] : memref<128x640xbf16, #tpu.memory_space<vmem>>, vector<128x128xbf16>
    tpu.vector_store %arg13[%c0_57, %c128_58], %55 {strides = array<i32>} : memref<128x640xbf16, #tpu.memory_space<vmem>>, vector<128x128xbf16>,
    %c0_59 = arith.constant 0 : index
    %c256_60 = arith.constant 256 : index
    %57 = vector.load %arg11[%c0_59, %c256_60] : memref<128x512xf32, #tpu.memory_space<vmem>>, vector<128x128xf32>
    %c0_61 = arith.constant 0 : index
    %c0_62 = arith.constant 0 : index
    %c0_63 = arith.constant 0 : index
    %58 = vector.load %arg10[%c0_61, %c0_62, %c0_63] : memref<32x40x128xbf16, #tpu.memory_space<vmem>>, vector<8x16x128xbf16>
    %59 = vector.shape_cast %58 : vector<8x16x128xbf16> to vector<128x128xbf16>
    %c0_64 = arith.constant 0 : index
    %c0_65 = arith.constant 0 : index
    %60 = vector.load %arg12[%c0_64, %c0_65] : memref<128x1024xbf16, #tpu.memory_space<vmem>>, vector<128x128xbf16>
    tpu.vector_store %arg12[%c0_64, %c0_65], %59 {strides = array<i32>} : memref<128x1024xbf16, #tpu.memory_space<vmem>>, vector<128x128xbf16>,
    %c0_66 = arith.constant 0 : index
    %c12_67 = arith.constant 12 : index
    %c0_68 = arith.constant 0 : index
    %61 = vector.load %arg10[%c0_66, %c12_67, %c0_68] : memref<32x40x128xbf16, #tpu.memory_space<vmem>>, vector<8x16x128xbf16>
    %62 = vector.shape_cast %61 : vector<8x16x128xbf16> to vector<128x128xbf16>
    %c0_69 = arith.constant 0 : index
    %c128_70 = arith.constant 128 : index
    %63 = vector.load %arg12[%c0_69, %c128_70] : memref<128x1024xbf16, #tpu.memory_space<vmem>>, vector<128x128xbf16>
    tpu.vector_store %arg12[%c0_69, %c128_70], %62 {strides = array<i32>} : memref<128x1024xbf16, #tpu.memory_space<vmem>>, vector<128x128xbf16>,
    %c0_71 = arith.constant 0 : index
    %c24 = arith.constant 24 : index
    %c0_72 = arith.constant 0 : index
    %64 = vector.load %arg10[%c0_71, %c24, %c0_72] : memref<32x40x128xbf16, #tpu.memory_space<vmem>>, vector<8x16x128xbf16>
    %65 = vector.shape_cast %64 : vector<8x16x128xbf16> to vector<128x128xbf16>
    %c0_73 = arith.constant 0 : index
    %c256_74 = arith.constant 256 : index
    %66 = vector.load %arg12[%c0_73, %c256_74] : memref<128x1024xbf16, #tpu.memory_space<vmem>>, vector<128x128xbf16>
    tpu.vector_store %arg12[%c0_73, %c256_74], %65 {strides = array<i32>} : memref<128x1024xbf16, #tpu.memory_space<vmem>>, vector<128x128xbf16>,
    %c12_75 = arith.constant 12 : index
    %c0_76 = arith.constant 0 : index
    %c0_77 = arith.constant 0 : index
    %67 = vector.load %arg10[%c12_75, %c0_76, %c0_77] : memref<32x40x128xbf16, #tpu.memory_space<vmem>>, vector<8x16x128xbf16>
    %68 = vector.shape_cast %67 : vector<8x16x128xbf16> to vector<128x128xbf16>
    %c0_78 = arith.constant 0 : index
    %c384_79 = arith.constant 384 : index
    %69 = vector.load %arg12[%c0_78, %c384_79] : memref<128x1024xbf16, #tpu.memory_space<vmem>>, vector<128x128xbf16>
    tpu.vector_store %arg12[%c0_78, %c384_79], %68 {strides = array<i32>} : memref<128x1024xbf16, #tpu.memory_space<vmem>>, vector<128x128xbf16>,
    %c12_80 = arith.constant 12 : index
    %c24_81 = arith.constant 24 : index
    %c0_82 = arith.constant 0 : index
    %70 = vector.load %arg10[%c12_80, %c24_81, %c0_82] : memref<32x40x128xbf16, #tpu.memory_space<vmem>>, vector<8x16x128xbf16>
    %71 = vector.shape_cast %70 : vector<8x16x128xbf16> to vector<128x128xbf16>
    %c0_83 = arith.constant 0 : index
    %c512_84 = arith.constant 512 : index
    %72 = vector.load %arg12[%c0_83, %c512_84] : memref<128x1024xbf16, #tpu.memory_space<vmem>>, vector<128x128xbf16>
    tpu.vector_store %arg12[%c0_83, %c512_84], %71 {strides = array<i32>} : memref<128x1024xbf16, #tpu.memory_space<vmem>>, vector<128x128xbf16>,
    %c24_85 = arith.constant 24 : index
    %c0_86 = arith.constant 0 : index
    %c0_87 = arith.constant 0 : index
    %73 = vector.load %arg10[%c24_85, %c0_86, %c0_87] : memref<32x40x128xbf16, #tpu.memory_space<vmem>>, vector<8x16x128xbf16>
    %74 = vector.shape_cast %73 : vector<8x16x128xbf16> to vector<128x128xbf16>
    %c0_88 = arith.constant 0 : index
    %c640_89 = arith.constant 640 : index
    %75 = vector.load %arg12[%c0_88, %c640_89] : memref<128x1024xbf16, #tpu.memory_space<vmem>>, vector<128x128xbf16>
    tpu.vector_store %arg12[%c0_88, %c640_89], %74 {strides = array<i32>} : memref<128x1024xbf16, #tpu.memory_space<vmem>>, vector<128x128xbf16>,
    %c24_90 = arith.constant 24 : index
    %c12_91 = arith.constant 12 : index
    %c0_92 = arith.constant 0 : index
    %76 = vector.load %arg10[%c24_90, %c12_91, %c0_92] : memref<32x40x128xbf16, #tpu.memory_space<vmem>>, vector<8x16x128xbf16>
    %77 = vector.shape_cast %76 : vector<8x16x128xbf16> to vector<128x128xbf16>
    %c0_93 = arith.constant 0 : index
    %c768_94 = arith.constant 768 : index
    %78 = vector.load %arg12[%c0_93, %c768_94] : memref<128x1024xbf16, #tpu.memory_space<vmem>>, vector<128x128xbf16>
    tpu.vector_store %arg12[%c0_93, %c768_94], %77 {strides = array<i32>} : memref<128x1024xbf16, #tpu.memory_space<vmem>>, vector<128x128xbf16>,
    %c24_95 = arith.constant 24 : index
    %c24_96 = arith.constant 24 : index
    %c0_97 = arith.constant 0 : index
    %79 = vector.load %arg10[%c24_95, %c24_96, %c0_97] : memref<32x40x128xbf16, #tpu.memory_space<vmem>>, vector<8x16x128xbf16>
    %80 = vector.shape_cast %79 : vector<8x16x128xbf16> to vector<128x128xbf16>
    %c0_98 = arith.constant 0 : index
    %c896_99 = arith.constant 896 : index
    %81 = vector.load %arg12[%c0_98, %c896_99] : memref<128x1024xbf16, #tpu.memory_space<vmem>>, vector<128x128xbf16>
    tpu.vector_store %arg12[%c0_98, %c896_99], %80 {strides = array<i32>} : memref<128x1024xbf16, #tpu.memory_space<vmem>>, vector<128x128xbf16>,
    %c0_100 = arith.constant 0 : index
    %c0_101 = arith.constant 0 : index
    %82 = vector.load %arg12[%c0_100, %c0_101] : memref<128x1024xbf16, #tpu.memory_space<vmem>>, vector<128x1024xbf16>
    %c1024 = arith.constant 1024 : index
    %c0_102 = arith.constant 0 : index
    %83 = vector.load %arg5[%c1024, %c0_102] : memref<2048x128xbf16, #tpu.memory_space<vmem>>, vector<1024x128xbf16>
    %cst_103 = arith.constant dense<0.000000e+00> : vector<128x128xf32>
    %84 = tpu.matmul %82, %83, %cst_103 {dimension_numbers = #tpu.dot_dimension_numbers<[1], [0], [0], [1], [0, 0, 1, 1], [], []>} : vector<128x1024xbf16>, vector<1024x128xbf16>, vector<128x128xf32> -> vector<128x128xf32>
    %85 = arith.addf %57, %84 : vector<128x128xf32>
    %c2 = arith.constant 2 : index
    %c0_104 = arith.constant 0 : index
    %c0_105 = arith.constant 0 : index
    %86 = vector.load %arg8[%c2, %c0_104, %c0_105] : memref<6x1x128xf32, #tpu.memory_space<vmem>>, vector<1x1x128xf32>
    %87 = vector.shape_cast %86 : vector<1x1x128xf32> to vector<1x128xf32>
    %88 = vector.broadcast %87 : vector<1x128xf32> to vector<128x128xf32>
    %89 = arith.addf %85, %88 : vector<128x128xf32>
    %cst_106 = arith.constant 0.000000e+00 : f32
    %90 = vector.broadcast %cst_106 : f32 to vector<128x128xf32>
    %91 = arith.maximumf %89, %90 : vector<128x128xf32>
    %92 = arith.truncf %91 : vector<128x128xf32> to vector<128x128xbf16>
    %c0_107 = arith.constant 0 : index
    %c256_108 = arith.constant 256 : index
    %93 = vector.load %arg13[%c0_107, %c256_108] : memref<128x640xbf16, #tpu.memory_space<vmem>>, vector<128x128xbf16>
    tpu.vector_store %arg13[%c0_107, %c256_108], %92 {strides = array<i32>} : memref<128x640xbf16, #tpu.memory_space<vmem>>, vector<128x128xbf16>,
    %c0_109 = arith.constant 0 : index
    %c384_110 = arith.constant 384 : index
    %94 = vector.load %arg11[%c0_109, %c384_110] : memref<128x512xf32, #tpu.memory_space<vmem>>, vector<128x128xf32>
    %c3 = arith.constant 3 : index
    %c0_111 = arith.constant 0 : index
    %c0_112 = arith.constant 0 : index
    %95 = vector.load %arg8[%c3, %c0_111, %c0_112] : memref<6x1x128xf32, #tpu.memory_space<vmem>>, vector<1x1x128xf32>
    %96 = vector.shape_cast %95 : vector<1x1x128xf32> to vector<1x128xf32>
    %97 = vector.broadcast %96 : vector<1x128xf32> to vector<128x128xf32>
    %98 = arith.addf %94, %97 : vector<128x128xf32>
    %cst_113 = arith.constant 0.000000e+00 : f32
    %99 = vector.broadcast %cst_113 : f32 to vector<128x128xf32>
    %100 = arith.maximumf %98, %99 : vector<128x128xf32>
    %101 = arith.truncf %100 : vector<128x128xf32> to vector<128x128xbf16>
    %c0_114 = arith.constant 0 : index
    %c384_115 = arith.constant 384 : index
    %102 = vector.load %arg13[%c0_114, %c384_115] : memref<128x640xbf16, #tpu.memory_space<vmem>>, vector<128x128xbf16>
    tpu.vector_store %arg13[%c0_114, %c384_115], %101 {strides = array<i32>} : memref<128x640xbf16, #tpu.memory_space<vmem>>, vector<128x128xbf16>,
    %c0_116 = arith.constant 0 : index
    %c0_117 = arith.constant 0 : index
    %c0_118 = arith.constant 0 : index
    %103 = vector.load %arg3[%c0_116, %c0_117, %c0_118] : memref<1x1x128xf32, #tpu.memory_space<vmem>>, vector<1x1x128xf32>
    %104 = vector.shape_cast %103 : vector<1x1x128xf32> to vector<1x128xf32>
    %105 = arith.truncf %104 : vector<1x128xf32> to vector<1x128xbf16>
    %c0_119 = arith.constant 0 : index
    %c0_120 = arith.constant 0 : index
    %106 = vector.load %arg6[%c0_119, %c0_120] : memref<128x128xbf16, #tpu.memory_space<vmem>>, vector<128x128xbf16>
    %cst_121 = arith.constant dense<0.000000e+00> : vector<1x128xf32>
    %107 = tpu.matmul %105, %106, %cst_121 {dimension_numbers = #tpu.dot_dimension_numbers<[1], [0], [0], [1], [0, 0, 1, 1], [], []>} : vector<1x128xbf16>, vector<128x128xbf16>, vector<1x128xf32> -> vector<1x128xf32>
    %c4 = arith.constant 4 : index
    %c0_122 = arith.constant 0 : index
    %c0_123 = arith.constant 0 : index
    %108 = vector.load %arg8[%c4, %c0_122, %c0_123] : memref<6x1x128xf32, #tpu.memory_space<vmem>>, vector<1x1x128xf32>
    %109 = vector.shape_cast %108 : vector<1x1x128xf32> to vector<1x128xf32>
    %110 = arith.addf %107, %109 : vector<1x128xf32>
    %cst_124 = arith.constant 0.000000e+00 : f32
    %111 = vector.broadcast %cst_124 : f32 to vector<1x128xf32>
    %112 = arith.maximumf %110, %111 : vector<1x128xf32>
    %113 = arith.truncf %112 : vector<1x128xf32> to vector<1x128xbf16>
    %114 = vector.shape_cast %113 : vector<1x128xbf16> to vector<1x128xbf16>
    %115 = vector.broadcast %114 : vector<1x128xbf16> to vector<128x128xbf16>
    %c0_125 = arith.constant 0 : index
    %c512_126 = arith.constant 512 : index
    %116 = vector.load %arg13[%c0_125, %c512_126] : memref<128x640xbf16, #tpu.memory_space<vmem>>, vector<128x128xbf16>
    tpu.vector_store %arg13[%c0_125, %c512_126], %115 {strides = array<i32>} : memref<128x640xbf16, #tpu.memory_space<vmem>>, vector<128x128xbf16>,
    %c0_127 = arith.constant 0 : index
    %c0_128 = arith.constant 0 : index
    %117 = vector.load %arg13[%c0_127, %c0_128] : memref<128x640xbf16, #tpu.memory_space<vmem>>, vector<128x640xbf16>
    %c0_129 = arith.constant 0 : index
    %c0_130 = arith.constant 0 : index
    %118 = vector.load %arg7[%c0_129, %c0_130] : memref<640x128xbf16, #tpu.memory_space<vmem>>, vector<640x128xbf16>
    %cst_131 = arith.constant dense<0.000000e+00> : vector<128x128xf32>
    %119 = tpu.matmul %117, %118, %cst_131 {dimension_numbers = #tpu.dot_dimension_numbers<[1], [0], [0], [1], [0, 0, 1, 1], [], []>} : vector<128x640xbf16>, vector<640x128xbf16>, vector<128x128xf32> -> vector<128x128xf32>
    %c5 = arith.constant 5 : index
    %c0_132 = arith.constant 0 : index
    %c0_133 = arith.constant 0 : index
    %120 = vector.load %arg8[%c5, %c0_132, %c0_133] : memref<6x1x128xf32, #tpu.memory_space<vmem>>, vector<1x1x128xf32>
    %121 = vector.shape_cast %120 : vector<1x1x128xf32> to vector<1x128xf32>
    %122 = vector.broadcast %121 : vector<1x128xf32> to vector<128x128xf32>
    %123 = arith.addf %119, %122 : vector<128x128xf32>
    %cst_134 = arith.constant 0.000000e+00 : f32
    %124 = vector.broadcast %cst_134 : f32 to vector<128x128xf32>
    %125 = arith.maximumf %123, %124 : vector<128x128xf32>
    %c0_135 = arith.constant 0 : index
    %c0_136 = arith.constant 0 : index
    %c0_137 = arith.constant 0 : index
    %126 = vector.load %arg9[%c0_135, %c0_136, %c0_137] : memref<1x128x128xf32, #tpu.memory_space<vmem>>, vector<1x128x128xf32>
    %127 = vector.shape_cast %126 : vector<1x128x128xf32> to vector<128x128xf32>
    %128 = vector.shape_cast %125 : vector<128x128xf32> to vector<1x128x128xf32>
    tpu.vector_store %arg9[%c0_135, %c0_136, %c0_137], %128 {strides = array<i32>} : memref<1x128x128xf32, #tpu.memory_space<vmem>>, vector<1x128x128xf32>,
    return
  }
  func.func @transform_1(%arg0: i32, %arg1: i32) -> (i32, i32, i32) {
    %c0_i32 = arith.constant 0 : i32
    %c0_i32_0 = arith.constant 0 : i32
    %c0_i32_1 = arith.constant 0 : i32
    return %arg0, %c0_i32, %c0_i32_0 : i32, i32, i32
  }
  func.func @transform_2(%arg0: i32, %arg1: i32) -> (i32, i32) {
    %c0_i32 = arith.constant 0 : i32
    %c0_i32_0 = arith.constant 0 : i32
    %c0_i32_1 = arith.constant 0 : i32
    return %c0_i32, %c0_i32_0 : i32, i32
  }
  func.func @transform_3(%arg0: i32, %arg1: i32) -> (i32, i32) {
    %c0_i32 = arith.constant 0 : i32
    %c0_i32_0 = arith.constant 0 : i32
    %c0_i32_1 = arith.constant 0 : i32
    return %c0_i32, %c0_i32_0 : i32, i32
  }
  func.func @transform_4(%arg0: i32, %arg1: i32) -> (i32, i32) {
    %c0_i32 = arith.constant 0 : i32
    %c0_i32_0 = arith.constant 0 : i32
    %c0_i32_1 = arith.constant 0 : i32
    return %c0_i32, %c0_i32_0 : i32, i32
  }
  func.func @transform_5(%arg0: i32, %arg1: i32) -> (i32, i32) {
    %c0_i32 = arith.constant 0 : i32
    %c0_i32_0 = arith.constant 0 : i32
    %c0_i32_1 = arith.constant 0 : i32
    return %c0_i32, %c0_i32_0 : i32, i32
  }
  func.func @transform_6(%arg0: i32, %arg1: i32) -> (i32, i32, i32) {
    %c0_i32 = arith.constant 0 : i32
    %c0_i32_0 = arith.constant 0 : i32
    %c0_i32_1 = arith.constant 0 : i32
    %c0_i32_2 = arith.constant 0 : i32
    return %c0_i32, %c0_i32_0, %c0_i32_1 : i32, i32, i32
  }
  func.func @transform_7(%arg0: i32, %arg1: i32) -> (i32, i32, i32) {
    %c0_i32 = arith.constant 0 : i32
    %c0_i32_0 = arith.constant 0 : i32
    return %arg0, %arg1, %c0_i32 : i32, i32, i32
  }
}

module attributes {stable_mosaic.version = 11 : i64} {
  func.func @_aspp_band_kernel(%arg0: i32, %arg1: i32, %arg2: memref<2x40x40x128xbf16, #tpu.memory_space<any>>, %arg3: memref<1x1x128xf32, #tpu.memory_space<vmem>>, %arg4: memref<128x512xbf16, #tpu.memory_space<vmem>>, %arg5: memref<2048x128xbf16, #tpu.memory_space<vmem>>, %arg6: memref<128x128xbf16, #tpu.memory_space<vmem>>, %arg7: memref<640x128xbf16, #tpu.memory_space<vmem>>, %arg8: memref<6x1x128xf32, #tpu.memory_space<vmem>>, %arg9: memref<1x128x128xf32, #tpu.memory_space<vmem>>, %arg10: memref<32x40x128xbf16, #tpu.memory_space<vmem>>, %arg11: memref<128x512xf32, #tpu.memory_space<vmem>>, %arg12: memref<128x1024xbf16, #tpu.memory_space<vmem>>, %arg13: memref<128x640xbf16, #tpu.memory_space<vmem>>, %arg14: memref<!tpu.dma_semaphore, #tpu.memory_space<semaphore_mem>>) attributes {dimension_semantics = [#tpu.dimension_semantics<parallel>, #tpu.dimension_semantics<parallel>], iteration_bounds = array<i64: 2, 2>, scalar_prefetch = 0 : i64, scratch_operands = 5 : i64, tpu.core_type = #tpu.core_type<tc>, window_params = [{}, {transform_indices = @transform_1, window_bounds = array<i64: 1, 1, 128>}, {pipeline_mode = #tpu.pipeline_mode<synchronous>, transform_indices = @transform_2, window_bounds = array<i64: 128, 512>}, {pipeline_mode = #tpu.pipeline_mode<synchronous>, transform_indices = @transform_3, window_bounds = array<i64: 2048, 128>}, {pipeline_mode = #tpu.pipeline_mode<synchronous>, transform_indices = @transform_4, window_bounds = array<i64: 128, 128>}, {pipeline_mode = #tpu.pipeline_mode<synchronous>, transform_indices = @transform_5, window_bounds = array<i64: 640, 128>}, {pipeline_mode = #tpu.pipeline_mode<synchronous>, transform_indices = @transform_6, window_bounds = array<i64: 6, 1, 128>}, {transform_indices = @transform_7, window_bounds = array<i64: 1, 128, 128>}]} {
    %c8_i32 = arith.constant 8 : i32
    %0 = arith.muli %arg1, %c8_i32 : i32
    %1 = tpu.assume_multiple %0, 8 : i32
    %c0_i32 = arith.constant 0 : i32
    %c0_i32_0 = arith.constant 0 : i32
    %2 = tpu.memref_slice %arg2[%arg0, %1, %c0_i32, %c0_i32_0] : memref<2x40x40x128xbf16, #tpu.memory_space<any>> -> memref<1x32x40x128xbf16, #tpu.memory_space<any>>
    %3 = tpu.memref_squeeze %2 : memref<1x32x40x128xbf16, #tpu.memory_space<any>> -> memref<32x40x128xbf16, #tpu.memory_space<any>>
    tpu.enqueue_dma source(%3 : memref<32x40x128xbf16, #tpu.memory_space<any>>) target(%arg10 : memref<32x40x128xbf16, #tpu.memory_space<vmem>>) target_semaphore(%arg14 : memref<!tpu.dma_semaphore, #tpu.memory_space<semaphore_mem>>)
    %c0_i32_1 = arith.constant 0 : i32
    %c0_i32_2 = arith.constant 0 : i32
    %4 = tpu.memref_slice %arg2[%arg0, %1, %c0_i32_1, %c0_i32_2] : memref<2x40x40x128xbf16, #tpu.memory_space<any>> -> memref<1x32x40x128xbf16, #tpu.memory_space<any>>
    %5 = tpu.memref_squeeze %4 : memref<1x32x40x128xbf16, #tpu.memory_space<any>> -> memref<32x40x128xbf16, #tpu.memory_space<any>>
    tpu.wait_dma2 semaphore(%arg14 : memref<!tpu.dma_semaphore, #tpu.memory_space<semaphore_mem>>) src(%5 : memref<32x40x128xbf16, #tpu.memory_space<any>>) dst(%arg10 : memref<32x40x128xbf16, #tpu.memory_space<vmem>>)
    %c12 = arith.constant 12 : index
    %c12_3 = arith.constant 12 : index
    %c0 = arith.constant 0 : index
    %6 = vector.load %arg10[%c12, %c12_3, %c0] : memref<32x40x128xbf16, #tpu.memory_space<vmem>>, vector<8x16x128xbf16>
    %7 = vector.shape_cast %6 : vector<8x16x128xbf16> to vector<128x128xbf16>
    %c0_4 = arith.constant 0 : index
    %c0_5 = arith.constant 0 : index
    %8 = vector.load %arg4[%c0_4, %c0_5] : memref<128x512xbf16, #tpu.memory_space<vmem>>, vector<128x512xbf16>
    %cst = arith.constant dense<0.000000e+00> : vector<128x512xf32>
    %9 = tpu.matmul %7, %8, %cst {dimension_numbers = #tpu.dot_dimension_numbers<[1], [0], [0], [1], [0, 0, 1, 1], [], []>} : vector<128x128xbf16>, vector<128x512xbf16>, vector<128x512xf32> -> vector<128x512xf32>
    %c0_6 = arith.constant 0 : index
    %c0_7 = arith.constant 0 : index
    %10 = vector.load %arg11[%c0_6, %c0_7] : memref<128x512xf32, #tpu.memory_space<vmem>>, vector<128x512xf32>
    tpu.vector_store %arg11[%c0_6, %c0_7], %9 {strides = array<i32>} : memref<128x512xf32, #tpu.memory_space<vmem>>, vector<128x512xf32>,
    %c0_8 = arith.constant 0 : index
    %c0_9 = arith.constant 0 : index
    %11 = vector.load %arg11[%c0_8, %c0_9] : memref<128x512xf32, #tpu.memory_space<vmem>>, vector<128x128xf32>
    %c0_10 = arith.constant 0 : index
    %c0_11 = arith.constant 0 : index
    %c0_12 = arith.constant 0 : index
    %12 = vector.load %arg8[%c0_10, %c0_11, %c0_12] : memref<6x1x128xf32, #tpu.memory_space<vmem>>, vector<1x1x128xf32>
    %13 = vector.shape_cast %12 : vector<1x1x128xf32> to vector<1x128xf32>
    %14 = vector.broadcast %13 : vector<1x128xf32> to vector<128x128xf32>
    %15 = arith.addf %11, %14 : vector<128x128xf32>
    %cst_13 = arith.constant 0.000000e+00 : f32
    %16 = vector.broadcast %cst_13 : f32 to vector<128x128xf32>
    %17 = arith.maximumf %15, %16 : vector<128x128xf32>
    %18 = arith.truncf %17 : vector<128x128xf32> to vector<128x128xbf16>
    %c0_14 = arith.constant 0 : index
    %c0_15 = arith.constant 0 : index
    %19 = vector.load %arg13[%c0_14, %c0_15] : memref<128x640xbf16, #tpu.memory_space<vmem>>, vector<128x128xbf16>
    tpu.vector_store %arg13[%c0_14, %c0_15], %18 {strides = array<i32>} : memref<128x640xbf16, #tpu.memory_space<vmem>>, vector<128x128xbf16>,
    %c0_16 = arith.constant 0 : index
    %c128 = arith.constant 128 : index
    %20 = vector.load %arg11[%c0_16, %c128] : memref<128x512xf32, #tpu.memory_space<vmem>>, vector<128x128xf32>
    %c6 = arith.constant 6 : index
    %c6_17 = arith.constant 6 : index
    %c0_18 = arith.constant 0 : index
    %21 = vector.load %arg10[%c6, %c6_17, %c0_18] : memref<32x40x128xbf16, #tpu.memory_space<vmem>>, vector<8x16x128xbf16>
    %22 = vector.shape_cast %21 : vector<8x16x128xbf16> to vector<128x128xbf16>
    %c0_19 = arith.constant 0 : index
    %c0_20 = arith.constant 0 : index
    %23 = vector.load %arg12[%c0_19, %c0_20] : memref<128x1024xbf16, #tpu.memory_space<vmem>>, vector<128x128xbf16>
    tpu.vector_store %arg12[%c0_19, %c0_20], %22 {strides = array<i32>} : memref<128x1024xbf16, #tpu.memory_space<vmem>>, vector<128x128xbf16>,
    %c6_21 = arith.constant 6 : index
    %c12_22 = arith.constant 12 : index
    %c0_23 = arith.constant 0 : index
    %24 = vector.load %arg10[%c6_21, %c12_22, %c0_23] : memref<32x40x128xbf16, #tpu.memory_space<vmem>>, vector<8x16x128xbf16>
    %25 = vector.shape_cast %24 : vector<8x16x128xbf16> to vector<128x128xbf16>
    %c0_24 = arith.constant 0 : index
    %c128_25 = arith.constant 128 : index
    %26 = vector.load %arg12[%c0_24, %c128_25] : memref<128x1024xbf16, #tpu.memory_space<vmem>>, vector<128x128xbf16>
    tpu.vector_store %arg12[%c0_24, %c128_25], %25 {strides = array<i32>} : memref<128x1024xbf16, #tpu.memory_space<vmem>>, vector<128x128xbf16>,
    %c6_26 = arith.constant 6 : index
    %c18 = arith.constant 18 : index
    %c0_27 = arith.constant 0 : index
    %27 = vector.load %arg10[%c6_26, %c18, %c0_27] : memref<32x40x128xbf16, #tpu.memory_space<vmem>>, vector<8x16x128xbf16>
    %28 = vector.shape_cast %27 : vector<8x16x128xbf16> to vector<128x128xbf16>
    %c0_28 = arith.constant 0 : index
    %c256 = arith.constant 256 : index
    %29 = vector.load %arg12[%c0_28, %c256] : memref<128x1024xbf16, #tpu.memory_space<vmem>>, vector<128x128xbf16>
    tpu.vector_store %arg12[%c0_28, %c256], %28 {strides = array<i32>} : memref<128x1024xbf16, #tpu.memory_space<vmem>>, vector<128x128xbf16>,
    %c12_29 = arith.constant 12 : index
    %c6_30 = arith.constant 6 : index
    %c0_31 = arith.constant 0 : index
    %30 = vector.load %arg10[%c12_29, %c6_30, %c0_31] : memref<32x40x128xbf16, #tpu.memory_space<vmem>>, vector<8x16x128xbf16>
    %31 = vector.shape_cast %30 : vector<8x16x128xbf16> to vector<128x128xbf16>
    %c0_32 = arith.constant 0 : index
    %c384 = arith.constant 384 : index
    %32 = vector.load %arg12[%c0_32, %c384] : memref<128x1024xbf16, #tpu.memory_space<vmem>>, vector<128x128xbf16>
    tpu.vector_store %arg12[%c0_32, %c384], %31 {strides = array<i32>} : memref<128x1024xbf16, #tpu.memory_space<vmem>>, vector<128x128xbf16>,
    %c12_33 = arith.constant 12 : index
    %c18_34 = arith.constant 18 : index
    %c0_35 = arith.constant 0 : index
    %33 = vector.load %arg10[%c12_33, %c18_34, %c0_35] : memref<32x40x128xbf16, #tpu.memory_space<vmem>>, vector<8x16x128xbf16>
    %34 = vector.shape_cast %33 : vector<8x16x128xbf16> to vector<128x128xbf16>
    %c0_36 = arith.constant 0 : index
    %c512 = arith.constant 512 : index
    %35 = vector.load %arg12[%c0_36, %c512] : memref<128x1024xbf16, #tpu.memory_space<vmem>>, vector<128x128xbf16>
    tpu.vector_store %arg12[%c0_36, %c512], %34 {strides = array<i32>} : memref<128x1024xbf16, #tpu.memory_space<vmem>>, vector<128x128xbf16>,
    %c18_37 = arith.constant 18 : index
    %c6_38 = arith.constant 6 : index
    %c0_39 = arith.constant 0 : index
    %36 = vector.load %arg10[%c18_37, %c6_38, %c0_39] : memref<32x40x128xbf16, #tpu.memory_space<vmem>>, vector<8x16x128xbf16>
    %37 = vector.shape_cast %36 : vector<8x16x128xbf16> to vector<128x128xbf16>
    %c0_40 = arith.constant 0 : index
    %c640 = arith.constant 640 : index
    %38 = vector.load %arg12[%c0_40, %c640] : memref<128x1024xbf16, #tpu.memory_space<vmem>>, vector<128x128xbf16>
    tpu.vector_store %arg12[%c0_40, %c640], %37 {strides = array<i32>} : memref<128x1024xbf16, #tpu.memory_space<vmem>>, vector<128x128xbf16>,
    %c18_41 = arith.constant 18 : index
    %c12_42 = arith.constant 12 : index
    %c0_43 = arith.constant 0 : index
    %39 = vector.load %arg10[%c18_41, %c12_42, %c0_43] : memref<32x40x128xbf16, #tpu.memory_space<vmem>>, vector<8x16x128xbf16>
    %40 = vector.shape_cast %39 : vector<8x16x128xbf16> to vector<128x128xbf16>
    %c0_44 = arith.constant 0 : index
    %c768 = arith.constant 768 : index
    %41 = vector.load %arg12[%c0_44, %c768] : memref<128x1024xbf16, #tpu.memory_space<vmem>>, vector<128x128xbf16>
    tpu.vector_store %arg12[%c0_44, %c768], %40 {strides = array<i32>} : memref<128x1024xbf16, #tpu.memory_space<vmem>>, vector<128x128xbf16>,
    %c18_45 = arith.constant 18 : index
    %c18_46 = arith.constant 18 : index
    %c0_47 = arith.constant 0 : index
    %42 = vector.load %arg10[%c18_45, %c18_46, %c0_47] : memref<32x40x128xbf16, #tpu.memory_space<vmem>>, vector<8x16x128xbf16>
    %43 = vector.shape_cast %42 : vector<8x16x128xbf16> to vector<128x128xbf16>
    %c0_48 = arith.constant 0 : index
    %c896 = arith.constant 896 : index
    %44 = vector.load %arg12[%c0_48, %c896] : memref<128x1024xbf16, #tpu.memory_space<vmem>>, vector<128x128xbf16>
    tpu.vector_store %arg12[%c0_48, %c896], %43 {strides = array<i32>} : memref<128x1024xbf16, #tpu.memory_space<vmem>>, vector<128x128xbf16>,
    %c0_49 = arith.constant 0 : index
    %c0_50 = arith.constant 0 : index
    %45 = vector.load %arg12[%c0_49, %c0_50] : memref<128x1024xbf16, #tpu.memory_space<vmem>>, vector<128x1024xbf16>
    %c0_51 = arith.constant 0 : index
    %c0_52 = arith.constant 0 : index
    %46 = vector.load %arg5[%c0_51, %c0_52] : memref<2048x128xbf16, #tpu.memory_space<vmem>>, vector<1024x128xbf16>
    %cst_53 = arith.constant dense<0.000000e+00> : vector<128x128xf32>
    %47 = tpu.matmul %45, %46, %cst_53 {dimension_numbers = #tpu.dot_dimension_numbers<[1], [0], [0], [1], [0, 0, 1, 1], [], []>} : vector<128x1024xbf16>, vector<1024x128xbf16>, vector<128x128xf32> -> vector<128x128xf32>
    %48 = arith.addf %20, %47 : vector<128x128xf32>
    %c1 = arith.constant 1 : index
    %c0_54 = arith.constant 0 : index
    %c0_55 = arith.constant 0 : index
    %49 = vector.load %arg8[%c1, %c0_54, %c0_55] : memref<6x1x128xf32, #tpu.memory_space<vmem>>, vector<1x1x128xf32>
    %50 = vector.shape_cast %49 : vector<1x1x128xf32> to vector<1x128xf32>
    %51 = vector.broadcast %50 : vector<1x128xf32> to vector<128x128xf32>
    %52 = arith.addf %48, %51 : vector<128x128xf32>
    %cst_56 = arith.constant 0.000000e+00 : f32
    %53 = vector.broadcast %cst_56 : f32 to vector<128x128xf32>
    %54 = arith.maximumf %52, %53 : vector<128x128xf32>
    %55 = arith.truncf %54 : vector<128x128xf32> to vector<128x128xbf16>
    %c0_57 = arith.constant 0 : index
    %c128_58 = arith.constant 128 : index
    %56 = vector.load %arg13[%c0_57, %c128_58] : memref<128x640xbf16, #tpu.memory_space<vmem>>, vector<128x128xbf16>
    tpu.vector_store %arg13[%c0_57, %c128_58], %55 {strides = array<i32>} : memref<128x640xbf16, #tpu.memory_space<vmem>>, vector<128x128xbf16>,
    %c0_59 = arith.constant 0 : index
    %c256_60 = arith.constant 256 : index
    %57 = vector.load %arg11[%c0_59, %c256_60] : memref<128x512xf32, #tpu.memory_space<vmem>>, vector<128x128xf32>
    %c0_61 = arith.constant 0 : index
    %c0_62 = arith.constant 0 : index
    %c0_63 = arith.constant 0 : index
    %58 = vector.load %arg10[%c0_61, %c0_62, %c0_63] : memref<32x40x128xbf16, #tpu.memory_space<vmem>>, vector<8x16x128xbf16>
    %59 = vector.shape_cast %58 : vector<8x16x128xbf16> to vector<128x128xbf16>
    %c0_64 = arith.constant 0 : index
    %c0_65 = arith.constant 0 : index
    %60 = vector.load %arg12[%c0_64, %c0_65] : memref<128x1024xbf16, #tpu.memory_space<vmem>>, vector<128x128xbf16>
    tpu.vector_store %arg12[%c0_64, %c0_65], %59 {strides = array<i32>} : memref<128x1024xbf16, #tpu.memory_space<vmem>>, vector<128x128xbf16>,
    %c0_66 = arith.constant 0 : index
    %c12_67 = arith.constant 12 : index
    %c0_68 = arith.constant 0 : index
    %61 = vector.load %arg10[%c0_66, %c12_67, %c0_68] : memref<32x40x128xbf16, #tpu.memory_space<vmem>>, vector<8x16x128xbf16>
    %62 = vector.shape_cast %61 : vector<8x16x128xbf16> to vector<128x128xbf16>
    %c0_69 = arith.constant 0 : index
    %c128_70 = arith.constant 128 : index
    %63 = vector.load %arg12[%c0_69, %c128_70] : memref<128x1024xbf16, #tpu.memory_space<vmem>>, vector<128x128xbf16>
    tpu.vector_store %arg12[%c0_69, %c128_70], %62 {strides = array<i32>} : memref<128x1024xbf16, #tpu.memory_space<vmem>>, vector<128x128xbf16>,
    %c0_71 = arith.constant 0 : index
    %c24 = arith.constant 24 : index
    %c0_72 = arith.constant 0 : index
    %64 = vector.load %arg10[%c0_71, %c24, %c0_72] : memref<32x40x128xbf16, #tpu.memory_space<vmem>>, vector<8x16x128xbf16>
    %65 = vector.shape_cast %64 : vector<8x16x128xbf16> to vector<128x128xbf16>
    %c0_73 = arith.constant 0 : index
    %c256_74 = arith.constant 256 : index
    %66 = vector.load %arg12[%c0_73, %c256_74] : memref<128x1024xbf16, #tpu.memory_space<vmem>>, vector<128x128xbf16>
    tpu.vector_store %arg12[%c0_73, %c256_74], %65 {strides = array<i32>} : memref<128x1024xbf16, #tpu.memory_space<vmem>>, vector<128x128xbf16>,
    %c12_75 = arith.constant 12 : index
    %c0_76 = arith.constant 0 : index
    %c0_77 = arith.constant 0 : index
    %67 = vector.load %arg10[%c12_75, %c0_76, %c0_77] : memref<32x40x128xbf16, #tpu.memory_space<vmem>>, vector<8x16x128xbf16>
    %68 = vector.shape_cast %67 : vector<8x16x128xbf16> to vector<128x128xbf16>
    %c0_78 = arith.constant 0 : index
    %c384_79 = arith.constant 384 : index
    %69 = vector.load %arg12[%c0_78, %c384_79] : memref<128x1024xbf16, #tpu.memory_space<vmem>>, vector<128x128xbf16>
    tpu.vector_store %arg12[%c0_78, %c384_79], %68 {strides = array<i32>} : memref<128x1024xbf16, #tpu.memory_space<vmem>>, vector<128x128xbf16>,
    %c12_80 = arith.constant 12 : index
    %c24_81 = arith.constant 24 : index
    %c0_82 = arith.constant 0 : index
    %70 = vector.load %arg10[%c12_80, %c24_81, %c0_82] : memref<32x40x128xbf16, #tpu.memory_space<vmem>>, vector<8x16x128xbf16>
    %71 = vector.shape_cast %70 : vector<8x16x128xbf16> to vector<128x128xbf16>
    %c0_83 = arith.constant 0 : index
    %c512_84 = arith.constant 512 : index
    %72 = vector.load %arg12[%c0_83, %c512_84] : memref<128x1024xbf16, #tpu.memory_space<vmem>>, vector<128x128xbf16>
    tpu.vector_store %arg12[%c0_83, %c512_84], %71 {strides = array<i32>} : memref<128x1024xbf16, #tpu.memory_space<vmem>>, vector<128x128xbf16>,
    %c24_85 = arith.constant 24 : index
    %c0_86 = arith.constant 0 : index
    %c0_87 = arith.constant 0 : index
    %73 = vector.load %arg10[%c24_85, %c0_86, %c0_87] : memref<32x40x128xbf16, #tpu.memory_space<vmem>>, vector<8x16x128xbf16>
    %74 = vector.shape_cast %73 : vector<8x16x128xbf16> to vector<128x128xbf16>
    %c0_88 = arith.constant 0 : index
    %c640_89 = arith.constant 640 : index
    %75 = vector.load %arg12[%c0_88, %c640_89] : memref<128x1024xbf16, #tpu.memory_space<vmem>>, vector<128x128xbf16>
    tpu.vector_store %arg12[%c0_88, %c640_89], %74 {strides = array<i32>} : memref<128x1024xbf16, #tpu.memory_space<vmem>>, vector<128x128xbf16>,
    %c24_90 = arith.constant 24 : index
    %c12_91 = arith.constant 12 : index
    %c0_92 = arith.constant 0 : index
    %76 = vector.load %arg10[%c24_90, %c12_91, %c0_92] : memref<32x40x128xbf16, #tpu.memory_space<vmem>>, vector<8x16x128xbf16>
    %77 = vector.shape_cast %76 : vector<8x16x128xbf16> to vector<128x128xbf16>
    %c0_93 = arith.constant 0 : index
    %c768_94 = arith.constant 768 : index
    %78 = vector.load %arg12[%c0_93, %c768_94] : memref<128x1024xbf16, #tpu.memory_space<vmem>>, vector<128x128xbf16>
    tpu.vector_store %arg12[%c0_93, %c768_94], %77 {strides = array<i32>} : memref<128x1024xbf16, #tpu.memory_space<vmem>>, vector<128x128xbf16>,
    %c24_95 = arith.constant 24 : index
    %c24_96 = arith.constant 24 : index
    %c0_97 = arith.constant 0 : index
    %79 = vector.load %arg10[%c24_95, %c24_96, %c0_97] : memref<32x40x128xbf16, #tpu.memory_space<vmem>>, vector<8x16x128xbf16>
    %80 = vector.shape_cast %79 : vector<8x16x128xbf16> to vector<128x128xbf16>
    %c0_98 = arith.constant 0 : index
    %c896_99 = arith.constant 896 : index
    %81 = vector.load %arg12[%c0_98, %c896_99] : memref<128x1024xbf16, #tpu.memory_space<vmem>>, vector<128x128xbf16>
    tpu.vector_store %arg12[%c0_98, %c896_99], %80 {strides = array<i32>} : memref<128x1024xbf16, #tpu.memory_space<vmem>>, vector<128x128xbf16>,
    %c0_100 = arith.constant 0 : index
    %c0_101 = arith.constant 0 : index
    %82 = vector.load %arg12[%c0_100, %c0_101] : memref<128x1024xbf16, #tpu.memory_space<vmem>>, vector<128x1024xbf16>
    %c1024 = arith.constant 1024 : index
    %c0_102 = arith.constant 0 : index
    %83 = vector.load %arg5[%c1024, %c0_102] : memref<2048x128xbf16, #tpu.memory_space<vmem>>, vector<1024x128xbf16>
    %cst_103 = arith.constant dense<0.000000e+00> : vector<128x128xf32>
    %84 = tpu.matmul %82, %83, %cst_103 {dimension_numbers = #tpu.dot_dimension_numbers<[1], [0], [0], [1], [0, 0, 1, 1], [], []>} : vector<128x1024xbf16>, vector<1024x128xbf16>, vector<128x128xf32> -> vector<128x128xf32>
    %85 = arith.addf %57, %84 : vector<128x128xf32>
    %c2 = arith.constant 2 : index
    %c0_104 = arith.constant 0 : index
    %c0_105 = arith.constant 0 : index
    %86 = vector.load %arg8[%c2, %c0_104, %c0_105] : memref<6x1x128xf32, #tpu.memory_space<vmem>>, vector<1x1x128xf32>
    %87 = vector.shape_cast %86 : vector<1x1x128xf32> to vector<1x128xf32>
    %88 = vector.broadcast %87 : vector<1x128xf32> to vector<128x128xf32>
    %89 = arith.addf %85, %88 : vector<128x128xf32>
    %cst_106 = arith.constant 0.000000e+00 : f32
    %90 = vector.broadcast %cst_106 : f32 to vector<128x128xf32>
    %91 = arith.maximumf %89, %90 : vector<128x128xf32>
    %92 = arith.truncf %91 : vector<128x128xf32> to vector<128x128xbf16>
    %c0_107 = arith.constant 0 : index
    %c256_108 = arith.constant 256 : index
    %93 = vector.load %arg13[%c0_107, %c256_108] : memref<128x640xbf16, #tpu.memory_space<vmem>>, vector<128x128xbf16>
    tpu.vector_store %arg13[%c0_107, %c256_108], %92 {strides = array<i32>} : memref<128x640xbf16, #tpu.memory_space<vmem>>, vector<128x128xbf16>,
    %c0_109 = arith.constant 0 : index
    %c384_110 = arith.constant 384 : index
    %94 = vector.load %arg11[%c0_109, %c384_110] : memref<128x512xf32, #tpu.memory_space<vmem>>, vector<128x128xf32>
    %c3 = arith.constant 3 : index
    %c0_111 = arith.constant 0 : index
    %c0_112 = arith.constant 0 : index
    %95 = vector.load %arg8[%c3, %c0_111, %c0_112] : memref<6x1x128xf32, #tpu.memory_space<vmem>>, vector<1x1x128xf32>
    %96 = vector.shape_cast %95 : vector<1x1x128xf32> to vector<1x128xf32>
    %97 = vector.broadcast %96 : vector<1x128xf32> to vector<128x128xf32>
    %98 = arith.addf %94, %97 : vector<128x128xf32>
    %cst_113 = arith.constant 0.000000e+00 : f32
    %99 = vector.broadcast %cst_113 : f32 to vector<128x128xf32>
    %100 = arith.maximumf %98, %99 : vector<128x128xf32>
    %101 = arith.truncf %100 : vector<128x128xf32> to vector<128x128xbf16>
    %c0_114 = arith.constant 0 : index
    %c384_115 = arith.constant 384 : index
    %102 = vector.load %arg13[%c0_114, %c384_115] : memref<128x640xbf16, #tpu.memory_space<vmem>>, vector<128x128xbf16>
    tpu.vector_store %arg13[%c0_114, %c384_115], %101 {strides = array<i32>} : memref<128x640xbf16, #tpu.memory_space<vmem>>, vector<128x128xbf16>,
    %c0_116 = arith.constant 0 : index
    %c0_117 = arith.constant 0 : index
    %c0_118 = arith.constant 0 : index
    %103 = vector.load %arg3[%c0_116, %c0_117, %c0_118] : memref<1x1x128xf32, #tpu.memory_space<vmem>>, vector<1x1x128xf32>
    %104 = vector.shape_cast %103 : vector<1x1x128xf32> to vector<1x128xf32>
    %105 = arith.truncf %104 : vector<1x128xf32> to vector<1x128xbf16>
    %c0_119 = arith.constant 0 : index
    %c0_120 = arith.constant 0 : index
    %106 = vector.load %arg6[%c0_119, %c0_120] : memref<128x128xbf16, #tpu.memory_space<vmem>>, vector<128x128xbf16>
    %cst_121 = arith.constant dense<0.000000e+00> : vector<1x128xf32>
    %107 = tpu.matmul %105, %106, %cst_121 {dimension_numbers = #tpu.dot_dimension_numbers<[1], [0], [0], [1], [0, 0, 1, 1], [], []>} : vector<1x128xbf16>, vector<128x128xbf16>, vector<1x128xf32> -> vector<1x128xf32>
    %c4 = arith.constant 4 : index
    %c0_122 = arith.constant 0 : index
    %c0_123 = arith.constant 0 : index
    %108 = vector.load %arg8[%c4, %c0_122, %c0_123] : memref<6x1x128xf32, #tpu.memory_space<vmem>>, vector<1x1x128xf32>
    %109 = vector.shape_cast %108 : vector<1x1x128xf32> to vector<1x128xf32>
    %110 = arith.addf %107, %109 : vector<1x128xf32>
    %cst_124 = arith.constant 0.000000e+00 : f32
    %111 = vector.broadcast %cst_124 : f32 to vector<1x128xf32>
    %112 = arith.maximumf %110, %111 : vector<1x128xf32>
    %113 = arith.truncf %112 : vector<1x128xf32> to vector<1x128xbf16>
    %114 = vector.shape_cast %113 : vector<1x128xbf16> to vector<1x128xbf16>
    %115 = vector.broadcast %114 : vector<1x128xbf16> to vector<128x128xbf16>
    %c0_125 = arith.constant 0 : index
    %c512_126 = arith.constant 512 : index
    %116 = vector.load %arg13[%c0_125, %c512_126] : memref<128x640xbf16, #tpu.memory_space<vmem>>, vector<128x128xbf16>
    tpu.vector_store %arg13[%c0_125, %c512_126], %115 {strides = array<i32>} : memref<128x640xbf16, #tpu.memory_space<vmem>>, vector<128x128xbf16>,
    %c0_127 = arith.constant 0 : index
    %c0_128 = arith.constant 0 : index
    %117 = vector.load %arg13[%c0_127, %c0_128] : memref<128x640xbf16, #tpu.memory_space<vmem>>, vector<128x640xbf16>
    %c0_129 = arith.constant 0 : index
    %c0_130 = arith.constant 0 : index
    %118 = vector.load %arg7[%c0_129, %c0_130] : memref<640x128xbf16, #tpu.memory_space<vmem>>, vector<640x128xbf16>
    %cst_131 = arith.constant dense<0.000000e+00> : vector<128x128xf32>
    %119 = tpu.matmul %117, %118, %cst_131 {dimension_numbers = #tpu.dot_dimension_numbers<[1], [0], [0], [1], [0, 0, 1, 1], [], []>} : vector<128x640xbf16>, vector<640x128xbf16>, vector<128x128xf32> -> vector<128x128xf32>
    %c5 = arith.constant 5 : index
    %c0_132 = arith.constant 0 : index
    %c0_133 = arith.constant 0 : index
    %120 = vector.load %arg8[%c5, %c0_132, %c0_133] : memref<6x1x128xf32, #tpu.memory_space<vmem>>, vector<1x1x128xf32>
    %121 = vector.shape_cast %120 : vector<1x1x128xf32> to vector<1x128xf32>
    %122 = vector.broadcast %121 : vector<1x128xf32> to vector<128x128xf32>
    %123 = arith.addf %119, %122 : vector<128x128xf32>
    %cst_134 = arith.constant 0.000000e+00 : f32
    %124 = vector.broadcast %cst_134 : f32 to vector<128x128xf32>
    %125 = arith.maximumf %123, %124 : vector<128x128xf32>
    %c0_135 = arith.constant 0 : index
    %c0_136 = arith.constant 0 : index
    %c0_137 = arith.constant 0 : index
    %126 = vector.load %arg9[%c0_135, %c0_136, %c0_137] : memref<1x128x128xf32, #tpu.memory_space<vmem>>, vector<1x128x128xf32>
    %127 = vector.shape_cast %126 : vector<1x128x128xf32> to vector<128x128xf32>
    %128 = vector.shape_cast %125 : vector<128x128xf32> to vector<1x128x128xf32>
    tpu.vector_store %arg9[%c0_135, %c0_136, %c0_137], %128 {strides = array<i32>} : memref<1x128x128xf32, #tpu.memory_space<vmem>>, vector<1x128x128xf32>,
    return
  }
  func.func @transform_1(%arg0: i32, %arg1: i32) -> (i32, i32, i32) {
    %c0_i32 = arith.constant 0 : i32
    %c0_i32_0 = arith.constant 0 : i32
    %c0_i32_1 = arith.constant 0 : i32
    return %arg0, %c0_i32, %c0_i32_0 : i32, i32, i32
  }
  func.func @transform_2(%arg0: i32, %arg1: i32) -> (i32, i32) {
    %c0_i32 = arith.constant 0 : i32
    %c0_i32_0 = arith.constant 0 : i32
    %c0_i32_1 = arith.constant 0 : i32
    return %c0_i32, %c0_i32_0 : i32, i32
  }
  func.func @transform_3(%arg0: i32, %arg1: i32) -> (i32, i32) {
    %c0_i32 = arith.constant 0 : i32
    %c0_i32_0 = arith.constant 0 : i32
    %c0_i32_1 = arith.constant 0 : i32
    return %c0_i32, %c0_i32_0 : i32, i32
  }
  func.func @transform_4(%arg0: i32, %arg1: i32) -> (i32, i32) {
    %c0_i32 = arith.constant 0 : i32
    %c0_i32_0 = arith.constant 0 : i32
    %c0_i32_1 = arith.constant 0 : i32
    return %c0_i32, %c0_i32_0 : i32, i32
  }
  func.func @transform_5(%arg0: i32, %arg1: i32) -> (i32, i32) {
    %c0_i32 = arith.constant 0 : i32
    %c0_i32_0 = arith.constant 0 : i32
    %c0_i32_1 = arith.constant 0 : i32
    return %c0_i32, %c0_i32_0 : i32, i32
  }
  func.func @transform_6(%arg0: i32, %arg1: i32) -> (i32, i32, i32) {
    %c0_i32 = arith.constant 0 : i32
    %c0_i32_0 = arith.constant 0 : i32
    %c0_i32_1 = arith.constant 0 : i32
    %c0_i32_2 = arith.constant 0 : i32
    return %c0_i32, %c0_i32_0, %c0_i32_1 : i32, i32, i32
  }
  func.func @transform_7(%arg0: i32, %arg1: i32) -> (i32, i32, i32) {
    %c0_i32 = arith.constant 0 : i32
    %c0_i32_0 = arith.constant 0 : i32
    return %arg0, %arg1, %c0_i32 : i32, i32, i32
  }
}

</mosaic_0001>

<bundles_post_ra>
// kernel: tpu_custom_call.1
= control target key start
LH: loop header
LB: loop body
LE: loop exit
PB: predicated region body
PF: predicated region fallthrough
CT: control target
= control target key end

     0   :  { %s9480_s0 = inlined_call_operand.hbm [shape: bf16[2,40,40,128], index: 0, kind: input, shape index: {}]   ;;  %s9481_s1 = inlined_call_operand.vmem [shape: f32[2,1,128], index: 1, kind: input, shape index: {}]   ;;  %s9482_s2 = inlined_call_operand.hbm [shape: bf16[128,512], index: 2, kind: input, shape index: {}]   ;;  %s9483_s3 = inlined_call_operand.hbm [shape: bf16[2048,128], index: 3, kind: input, shape index: {}]   ;;  %s9484_s4 = inlined_call_operand.hbm [shape: bf16[128,128], index: 4, kind: input, shape index: {}]   ;;  %s9485_s5 = inlined_call_operand.hbm [shape: bf16[640,128], index: 5, kind: input, shape index: {}]   ;;  %s9486_s6 = inlined_call_operand.vmem [shape: f32[6,1,128], index: 6, kind: input, shape index: {}]   ;;  %s9487_s7 = inlined_call_operand.hbm [shape: f32[2,256,128], index: 7, kind: output, shape index: {}]  }
   0x1   :  { %9508 = sst [smem:[#allocation57_spill]] %s9483_s3 }
   0x2   :  { %12 = vsyncpa [#allocation8], 0 }
   0x3   :  { %13 = vsyncpa [#allocation11], 0 }
   0x4   :  { %14 = vsyncpa [#allocation14], 0 }
   0x5   :  { %15 = vsyncpa [#allocation9], 0 }
   0x6   :  { %17 = vsyncpa [#allocation9 + $0x1], 0  ;;  %s7927_s24 = smov 0   ;;  %s7929_s25 = smov 0  }
   0x7   :  { %s7931_s26 = smov 0   ;;  %s7933_s27 = smov 0  }
   0x8   :  { %s7935_s28 = smov 0   ;;  %s7937_s29 = smov 0  }
   0x9   :  { %s7939_s30 = smov 0   ;;  %s7941_s8 = smov 0  }
   0xa LB: > { %9509 = sst [smem:[#allocation25_spill]] %s7842_s24  ;;  %s6049_s9 = sadd.s32 4294967295, %s7870_s8   ;;  %s7870_s8 = sphi %s7941_s8, %s23_s8   ;;  %s7866_s30 = sphi %s7939_s30, %s9609_s30   ;;  %s7862_s29 = sphi %s7937_s29, %s9608_s29   ;;  %s7858_s28 = sphi %s7935_s28, %s9612_s28   ;;  %s7854_s27 = sphi %s7933_s27, %s9606_s27   ;;  %s7850_s26 = sphi %s7931_s26, %s9605_s26   ;;  %s7846_s25 = sphi %s7929_s25, %s9611_s25   ;;  %s7842_s24 = sphi %s7927_s24, %s9610_s24  }
   0xb   : > { %9510 = sst [smem:[#allocation26_spill]] %s7850_s26  ;;  %s6050_s10 = sadd.s32 4294967294, %s7870_s8  }
   0xc   : > { %9511 = sst [smem:[#allocation27_spill]] %s7862_s29  ;;  %s32_s11 = sadd.s32 1, %s7862_s29 }
   0xd   : > { %9512 = sst [smem:[#allocation28_spill]] %s7866_s30  ;;  %s35_s12 = sadd.s32 1, %s7866_s30 }
   0xe   : > { %9513 = sst [smem:[#allocation29_spill]] %s7870_s8  ;;  %p33_p0 = scmp.ge.s32.totalorder %s32_s11, 2 }
   0xf   : > { %s175_s13 = sadd.s32 1, %s7850_s26  ;;  %p185_p1 = scmp.ne.s32.totalorder %s7850_s26, %s7846_s25 }
  0x10   : > { %p186_p2 = scmp.eq.s32.totalorder %s6049_s9, 3  ;;  %s9614_s11 = smov (%p33_p0, %s32_s11), 0 }
  0x11   : > { %9514 = sst [smem:[#allocation30_spill]] %s9614_s11  ;;  %s9616_s12 = smov (!%p33_p0, %s35_s12), %s7866_s30 }
  0x12   : > { %s171_s14 = ssub.s32 %s7862_s29, %s9614_s11  ;;  %p7979_p3 = por %p186_p2, %p185_p1 }
  0x13   : > { %p37_p4 = scmp.ge.s32.totalorder %s9616_s12, 2  ;;  %p191_p5 = scmp.ne.s32.totalorder %s7846_s25, %s7842_s24 }
  0x14   : > { %s9515_s15 = scalar_select %p7979_p3, 1, 0 }
  0x15   : > { %p192_p6 = scmp.eq.s32.totalorder %s6050_s10, 3  ;;  %p6051_p7 = scmp.ge.s32.totalorder %s7870_s8, 1 }
  0x16   : > { %s9618_s12 = smov (%p37_p4, %s9616_s12), 0  ;;  %p199_p9 = scmp.lt.s32.totalorder %s7870_s8, 5 }
  0x17   : > { %9516 = sst [smem:[#allocation31_spill]] %s9618_s12  ;;  %p7988_p8 = por %p192_p6, %p191_p5 }
  0x18   : > { %s170_s17 = ssub.s32 %s7866_s30, %s9618_s12  ;;  %p7995_p10 = pnand %p6051_p7, %p199_p9 }
  0x19   : > { %s9517_s16 = scalar_select %p7988_p8, 1, 0 }
  0x1a   : > { %s172_s18 = sor.u32 %s171_s14, %s170_s17  ;;  %p7999_p12 = scmp.eq.s32.totalorder %s6049_s9, 0 }
  0x1b   : > { %9518 = sst [smem:[#allocation32_spill]] %s9517_s16  ;;  %p173_p11 = scmp.eq.s32.totalorder %s172_s18, 0 }
  0x1c   : > { %s9519_s19 = scalar_select %p7995_p10, 1, 0 }
  0x1d   : > { %s9520_s20 = scalar_select %p7999_p12, 1, 0 }
  0x1e   : > { %p7250_p13 = pneg %p7995_p10  ;;  %s7872_s23 = smov [#allocation10]  }
  0x1f   : > { %s8006_s21 = scalar_select %p173_p11, %s7850_s26, %s175_s13  }
  0x20   : > { %p8010_p0 = pnand %p7999_p12, %p7250_p13  ;;  %s224_s10 = sshll.u32 %s7872_s23, 4  ;;  %s225_s10 = int_to_ptr.vmem [resolvable:$true] %s224_s10 }
  0x21   : > { %9521 = sst [smem:[#allocation33_spill]] %s8006_s21  ;;  %s9523_s3 = sld [smem:[#allocation57_spill]] }
  0x22   : > { %p8022_p2 = pneg %p8010_p0 }
  0x27   : > { %s7626_s9 = scalar_lea.hbm %s9523_s3, 16384 }
  0x28   : > { %p7627_p1 = scmp.ne.s32.totalorder %s9523_s3, %s7626_s9  ;;  %p7633_p6 = scmp.lt.u32.totalorder %s7626_s9, %s9523_s3 }
  0x2a   : > { %p7629_p4 = pnand %p8022_p2, %p7627_p1 }
  0x2c   : > { %p7630_p5 = pneg %p7629_p4 }
  0x2e   : > { %p7635_p7 = pnand %p7633_p6, %p7630_p5 }
  0x30   : > { %7638 = shalt.err (!%p7635_p7)
}
  0x31   : > { %s7639_s14 = scalar_lea.vmem %s225_s10, 16384  ;;  %p7647_p8 = scmp.lt.s32.totalorder %s225_s10, %s225_s10 }
  0x32   : > { %p7640_p9 = scmp.ne.s32.totalorder %s225_s10, %s7639_s14  ;;  %p7648_p3 = scmp.lt.s32.totalorder %s7639_s14, %s7639_s14 }
  0x34   : > { %p7642_p11 = pnand %p7640_p9, %p8022_p2  ;;  %p7649_p12 = por %p7648_p3, %p7647_p8 }
  0x36   : > { %p7643_p13 = pneg %p7642_p11 }
  0x38   : > { %p7650_p10 = pnand %p7649_p12, %p7643_p13 }
  0x3a   : > { %7653 = shalt.err (!%p7650_p10)
}
  0x3b   : > { %s9499_s12 = smov 64   ;;  %s9501_s17 = smov 4  }
  0x3c   : > { %7256 = dma.hbm_to_vmem [thread:$0]  (!%p8010_p0), %s9523_s3, 16384, %s225_s10, [#allocation11], %s9499_s12, %s9499_s12, %s9501_s17  }
  0x3d   : > { %s7875_s18 = smov [#allocation7]   ;;  %s7654_s29 = scalar_lea.hbm %s9482_s2, 4096 }
  0x3e   : > { %s211_s23 = sshll.u32 %s7875_s18, 4  ;;  %p7655_p3 = scmp.ne.s32.totalorder %s9482_s2, %s7654_s29  ;;  %s212_s23 = int_to_ptr.vmem [resolvable:$true] %s211_s23 }
  0x3f   : > { %p7661_p12 = scmp.lt.u32.totalorder %s7654_s29, %s9482_s2 }
  0x40   : > { %p7657_p8 = pnand %p7655_p3, %p8022_p2 }
  0x42   : > { %p7658_p10 = pneg %p7657_p8 }
  0x44   : > { %p7663_p1 = pnand %p7661_p12, %p7658_p10 }
  0x46   : > { %7666 = shalt.err (!%p7663_p1)
}
  0x47   : > { %s7667_s10 = scalar_lea.vmem %s212_s23, 4096  ;;  %p7675_p7 = scmp.lt.s32.totalorder %s212_s23, %s212_s23 }
  0x48   : > { %p7668_p4 = scmp.ne.s32.totalorder %s212_s23, %s7667_s10  ;;  %p7676_p9 = scmp.lt.s32.totalorder %s7667_s10, %s7667_s10 }
  0x4a   : > { %p7670_p5 = pnand %p7668_p4, %p8022_p2  ;;  %p7677_p11 = por %p7676_p9, %p7675_p7 }
  0x4c   : > { %p7671_p6 = pneg %p7670_p5 }
  0x4e   : > { %p7678_p13 = pnand %p7677_p11, %p7671_p6 }
  0x50   : > { %7681 = shalt.err (!%p7678_p13)
}
  0x51   : > { %s7876_s26 = smov 256   ;;  %s7877_s30 = smov 16  }
  0x52   : > { %7253 = dma.hbm_to_vmem [thread:$0]  (!%p8010_p0), %s9482_s2, 4096, %s212_s23, [#allocation8], %s7876_s26, %s7876_s26, %s7877_s30  }
  0x53   : > { %s7878_s16 = smov [#allocation12]   ;;  %s7879_s11 = smov [#allocation13]  }
  0x54   : > { %s237_s21 = sshll.u32 %s7878_s16, 4  ;;  %s250_s9 = sshll.u32 %s7879_s11, 4  ;;  %s238_s21 = int_to_ptr.vmem [resolvable:$true] %s237_s21  ;;  %s251_s9 = int_to_ptr.vmem [resolvable:$true] %s250_s9 }
  0x55   : > { %s7682_s10 = scalar_lea.hbm %s9484_s4, 1024 }
  0x56   : > { %p7683_p3 = scmp.ne.s32.totalorder %s9484_s4, %s7682_s10  ;;  %p7689_p12 = scmp.lt.u32.totalorder %s7682_s10, %s9484_s4 }
  0x58   : > { %p7685_p8 = pnand %p7683_p3, %p8022_p2 }
  0x5a   : > { %p7686_p10 = pneg %p7685_p8 }
  0x5c   : > { %p7691_p1 = pnand %p7689_p12, %p7686_p10 }
  0x5e   : > { %7694 = shalt.err (!%p7691_p1)
}
  0x5f   : > { %s7695_s23 = scalar_lea.vmem %s238_s21, 1024  ;;  %p7703_p7 = scmp.lt.s32.totalorder %s238_s21, %s238_s21 }
  0x60   : > { %p7696_p4 = scmp.ne.s32.totalorder %s238_s21, %s7695_s23  ;;  %p7704_p9 = scmp.lt.s32.totalorder %s7695_s23, %s7695_s23 }
  0x62   : > { %p7698_p5 = pnand %p7696_p4, %p8022_p2  ;;  %p7705_p11 = por %p7704_p9, %p7703_p7 }
  0x64   : > { %p7699_p6 = pneg %p7698_p5 }
  0x66   : > { %p7706_p13 = pnand %p7705_p11, %p7699_p6 }
  0x68   : > { %7709 = shalt.err (!%p7706_p13)
}
  0x69   : > { %s9525_s12 = smov 4   ;;  %s9526_s17 = smov 64  }
  0x6a   : > { %7259 = dma.hbm_to_vmem [thread:$0]  (!%p8010_p0), %s9484_s4, 1024, %s238_s21, [#allocation11], %s9526_s17, %s9526_s17, %s9525_s12  }
  0x6b   : > { %s7710_s24 = scalar_lea.hbm %s9485_s5, 5120 }
  0x6c   : > { %p7711_p3 = scmp.ne.s32.totalorder %s9485_s5, %s7710_s24  ;;  %p7717_p12 = scmp.lt.u32.totalorder %s7710_s24, %s9485_s5 }
  0x6e   : > { %p7713_p8 = pnand %p7711_p3, %p8022_p2 }
  0x70   : > { %p7714_p10 = pneg %p7713_p8 }
  0x72   : > { %p7719_p1 = pnand %p7717_p12, %p7714_p10 }
  0x74   : > { %7722 = shalt.err (!%p7719_p1)
}
  0x75   : > { %s7723_s14 = scalar_lea.vmem %s251_s9, 5120  ;;  %p7731_p7 = scmp.lt.s32.totalorder %s251_s9, %s251_s9 }
  0x76   : > { %p7724_p4 = scmp.ne.s32.totalorder %s251_s9, %s7723_s14  ;;  %p7732_p9 = scmp.lt.s32.totalorder %s7723_s14, %s7723_s14 }
  0x78   : > { %p7726_p5 = pnand %p7724_p4, %p8022_p2  ;;  %p7733_p11 = por %p7732_p9, %p7731_p7 }
  0x7a   : > { %p7727_p6 = pneg %p7726_p5 }
  0x7c   : > { %p7734_p13 = pnand %p7733_p11, %p7727_p6 }
  0x7e   : > { %7737 = shalt.err (!%p7734_p13)
}
  0x7f   : > { %7262 = dma.hbm_to_vmem [thread:$0]  (!%p8010_p0), %s9485_s5, 5120, %s251_s9, [#allocation14], %s9526_s17, %s9526_s17, %s9525_s12  }
  0x80   : > { %p9527_p3 = scmp.ne.s32.totalorder %s9519_s19, 0 }
  0x82   : > { %275 = sbr.rel (%p9527_p3) target bundleno = 1007 (0x3ef), region = 44 }
  0x89   : > { %p9528_p2 = scmp.ne.s32.totalorder %s9520_s20, 0 }
  0x8b   : > { %7823 = dma.done.wait (%p9528_p2), [#allocation8], 4096  }
  0x8c   : > { %7825 = vsyncadd (%p9528_p2), [#allocation8], 4294963200 }
  0x8d   : > { %7827 = dma.done.wait (%p9528_p2), [#allocation11], 17408  }
  0x8e   : > { %7829 = vsyncadd (%p9528_p2), [#allocation11], 4294949888 }
  0x8f   : > { %7831 = dma.done.wait (%p9528_p2), [#allocation14], 5120  }
  0x90   : > { %7833 = vsyncadd (%p9528_p2), [#allocation14], 4294962176  ;;  %s312_s19 = sand.u32 1, %s7846_s25   ;;  %p315_p0 = scmp.lt.s32.totalorder %s7858_s28, 1 }
  0x91   : > { %s8119_s22 = sshll.u32 %s312_s19, 7  ;;  %s6064_s13 = smul.u32 40, %s7854_s27 }
  0x92   : > { %s322_s9 = smul.u32 200, %s7858_s28  ;;  %s7880_s29 = smov [#allocation2]  }
  0x93   : > { %s8124_s23 = scalar_select %p315_p0, %s7858_s28, 1 }
  0x94   : > { %s323_s12 = sadd.s32 %s6064_s13, %s322_s9  ;;  %s333_s16 = sshll.u32 %s7880_s29, 4  ;;  %s334_s16 = int_to_ptr.vmem [resolvable:$true] %s333_s16 }
  0x95   : > { %s317_s3 = scalar_lea.vmem %s9481_s1, %s8124_s23  ;;  %s6065_s8 = sshll.u32 %s323_s12, 6 }
  0x96   : > { %s325_s24 = scalar_lea.hbm %s9480_s0, %s6065_s8  ;;  %s7740_s21 = scalar_lea.hbm %s9480_s0, 25600 }
  0x97   : > { %s7738_s11 = scalar_lea.hbm %s325_s24, 10240  ;;  %p7741_p10 = scmp.lt.u32.totalorder %s325_s24, %s9480_s0 }
  0x98   : > { %p7739_p8 = scmp.ne.s32.totalorder %s325_s24, %s7738_s11  ;;  %p7742_p12 = scmp.lt.u32.totalorder %s7740_s21, %s7738_s11 }
  0x99   : > { %p7744_p4 = scmp.lt.u32.totalorder %s7738_s11, %s325_s24 }
  0x9a   : > { %p7743_p1 = por %p7742_p12, %p7741_p10 }
  0x9c   : > { %p7745_p5 = por %p7744_p4, %p7743_p1 }
  0x9e   : > { %p7746_p6 = pnand %p7745_p5, %p7739_p8 }
  0xa0   : > { %7749 = shalt.err (!%p7746_p6)  }
  0xa1   : > { %s7750_s9 = scalar_lea.vmem %s334_s16, 10240  ;;  %p7755_p9 = scmp.lt.s32.totalorder %s334_s16, %s334_s16 }
  0xa2   : > { %p7751_p7 = scmp.ne.s32.totalorder %s334_s16, %s7750_s9  ;;  %p7756_p11 = scmp.lt.s32.totalorder %s7750_s9, %s7750_s9 }
  0xa4   : > { %p7757_p13 = por %p7756_p11, %p7755_p9 }
  0xa6   : > { %p7758_p3 = pnand %p7757_p13, %p7751_p7 }
  0xa8   : > { %7761 = shalt.err (!%p7758_p3)  }
  0xa9   : > { %336 = dma.hbm_to_vmem [thread:$0]  %s325_s24, 10240, %s334_s16, [#allocation6] }
  0xaa   : > { %s8140_s12 = scalar_lea.vmem [#allocation15], %s8119_s22 }
  0xab   : > { %7834 = dma.done.wait [#allocation6], 10240 }
  0xac   : > { %7835 = vsyncadd [#allocation6], 4294957056  ;;  %v7881_v0 = vmov 0   ;;  %v7354_v1 = vld [vmem:[#allocation7 + $0x4] ss:$16 sps:$4 sm:$0xff]   ;;  %vm391_vm0 = vcmask 1041408  }
  0xad   : > { %706 = vmatprep.mubr.bf16.mxu0 %v7881_v0  ;;  %819 = vmatprep.mubr.bf16.mxu1 %v7881_v0  ;;  %v7356_v2 = vld [vmem:[#allocation7 + $0xc] ss:$16 sps:$4 sm:$0xff]   ;;  %v7358_v3 = vld [vmem:[#allocation7] ss:$16 sps:$4 sm:$0xff]   ;;  %v7359_v4 = vld [vmem:[#allocation7 + $0x8] ss:$16 sps:$4 sm:$0xff]  }
  0xae   : > { %674 = vmatprep.subr.bf16.mxu0 %v7354_v1  ;;  %787 = vmatprep.subr.bf16.mxu1 %v7356_v2  ;;  %v7360_v5 = vld [vmem:[#allocation7 + $0x24] ss:$16 sps:$4 sm:$0xff]   ;;  %v7362_v6 = vld [vmem:[#allocation7 + $0x2c] ss:$16 sps:$4 sm:$0xff]   ;;  %v7364_v7 = vld [vmem:[#allocation7 + $0x20] ss:$16 sps:$4 sm:$0xff]  }
  0xaf   : > { %675 = vmatpush1.bf16.msra.mxu0 %v7358_v3  ;;  %788 = vmatpush1.bf16.msra.mxu1 %v7359_v4  ;;  %v7365_v8 = vld [vmem:[#allocation7 + $0x28] ss:$16 sps:$4 sm:$0xff]   ;;  %v7366_v9 = vld [vmem:[#allocation7 + $0x44] ss:$16 sps:$4 sm:$0xff]   ;;  %v7368_v10 = vld [vmem:[#allocation7 + $0x4c] ss:$16 sps:$4 sm:$0xff]  }
  0xb0   : > { %676 = vmatprep.subr.bf16.mxu0 %v7360_v5  ;;  %789 = vmatprep.subr.bf16.mxu1 %v7362_v6  ;;  %v7370_v11 = vld [vmem:[#allocation7 + $0x40] ss:$16 sps:$4 sm:$0xff]   ;;  %v7371_v12 = vld [vmem:[#allocation7 + $0x48] ss:$16 sps:$4 sm:$0xff]   ;;  %v7372_v13 = vld [vmem:[#allocation7 + $0x64] ss:$16 sps:$4 sm:$0xff]  }
  0xb1   : > { %v7374_v14 = vld [vmem:[#allocation7 + $0x6c] ss:$16 sps:$4 sm:$0xff]   ;;  %v7376_v15 = vld [vmem:[#allocation7 + $0x60] ss:$16 sps:$4 sm:$0xff]   ;;  %v7377_v16 = vld [vmem:[#allocation7 + $0x68] ss:$16 sps:$4 sm:$0xff]  }
  0xb2   : > { %v7378_v17 = vld [vmem:[#allocation7 + $0x84] ss:$16 sps:$4 sm:$0xff]   ;;  %v7380_v18 = vld [vmem:[#allocation7 + $0x8c] ss:$16 sps:$4 sm:$0xff]   ;;  %v7382_v19 = vld [vmem:[#allocation7 + $0x80] ss:$16 sps:$4 sm:$0xff]  }
  0xb3   : > { %677 = vmatpush1.bf16.msra.mxu0 %v7364_v7  ;;  %790 = vmatpush1.bf16.msra.mxu1 %v7365_v8  ;;  %v7383_v20 = vld [vmem:[#allocation7 + $0x88] ss:$16 sps:$4 sm:$0xff]   ;;  %v7384_v21 = vld [vmem:[#allocation7 + $0xa4] ss:$16 sps:$4 sm:$0xff]   ;;  %v7386_v22 = vld [vmem:[#allocation7 + $0xac] ss:$16 sps:$4 sm:$0xff]  }
  0xb4   : > { %678 = vmatprep.subr.bf16.mxu0 %v7366_v9  ;;  %791 = vmatprep.subr.bf16.mxu1 %v7368_v10  ;;  %v7388_v23 = vld [vmem:[#allocation7 + $0xa0] ss:$16 sps:$4 sm:$0xff]   ;;  %v7389_v24 = vld [vmem:[#allocation7 + $0xa8] ss:$16 sps:$4 sm:$0xff]   ;;  %v7390_v25 = vld [vmem:[#allocation7 + $0xc4] ss:$16 sps:$4 sm:$0xff]  }
  0xb5   : > { %vm392_vm1 = vcmask 1045508   ;;  %v7392_v26 = vld [vmem:[#allocation7 + $0xcc] ss:$16 sps:$4 sm:$0xff]   ;;  %v343_v27 = vld [vmem:[#allocation2 + $0xf4] sm:$0xc]  ;;  %v7402_v46 = vld [vmem:[#allocation10 + $0x40] sm:$0xff]  }
  0xb6   : > { %v344_v28 = vld [vmem:[#allocation2 + $0xf8] sm:$0xf]  ;;  %v7394_v29 = vld [vmem:[#allocation7 + $0xc0] ss:$16 sps:$4 sm:$0xff]   ;;  %v345_v30 = vld [vmem:[#allocation2 + $0xfc] sm:$0x3] }
  0xb7   : > { %679 = vmatpush1.bf16.msra.mxu0 %v7370_v11  ;;  %792 = vmatpush1.bf16.msra.mxu1 %v7371_v12  ;;  %v396_v31 = vrot.slane %v344_v28, 6  ;;  %v7395_v32 = vld [vmem:[#allocation7 + $0xc8] ss:$16 sps:$4 sm:$0xff]   ;;  %vm8145_vm2 = vmor %vm391_vm0, %vm392_vm1  ;;  %v6066_v34 = vrot.slane %v343_v27, 10  ;;  %v399_v36 = vrot.slane %v345_v30, 6  ;;  %v7403_v49 = vld [vmem:[#allocation10] sm:$0xff]  }
  0xb8   : > { %680 = vmatprep.subr.bf16.mxu0 %v7372_v13  ;;  %793 = vmatprep.subr.bf16.mxu1 %v7374_v14  ;;  %v7396_v37 = vld [vmem:[#allocation7 + $0xe4] ss:$16 sps:$4 sm:$0xff]   ;;  %v7398_v38 = vld [vmem:[#allocation7 + $0xec] ss:$16 sps:$4 sm:$0xff]   ;;  %v7400_v40 = vld [vmem:[#allocation7 + $0xe0] ss:$16 sps:$4 sm:$0xff]  }
  0xb9   : > { %v398_v35 = vrot.slane %v396_v31, 4  ;;  %v347_v39 = vld [vmem:[#allocation2 + $0x10c] sm:$0xf]  ;;  %v7401_v41 = vld [vmem:[#allocation7 + $0xe8] ss:$16 sps:$4 sm:$0xff]   ;;  %v397_v42 = vsel %vm8145_vm2, %v6066_v34, %v396_v31  ;;  %v7409_v55 = vld [vmem:[#allocation10 + $0xc0] sm:$0xff]  }
  0xba   : > { %v346_v44 = vld [vmem:[#allocation2 + $0x108] sm:$0xc]  ;;  %v403_v45 = vrot.slane %v347_v39, 6  ;;  %v348_v47 = vld [vmem:[#allocation2 + $0x110] sm:$0x3]  ;;  %v7411_v62 = vld [vmem:[#allocation10 + $0x80] sm:$0xff]  }
  0xbb   : > { %681 = vmatpush1.bf16.msra.mxu0 %v7376_v15  ;;  %794 = vmatpush1.bf16.msra.mxu1 %v7377_v16  ;;  %v400_v43 = vsel %vm8145_vm2, %v398_v35, %v399_v36  ;;  %v6067_v50 = vrot.slane %v346_v44, 10  ;;  %v406_v52 = vrot.slane %v348_v47, 6  ;;  %v7404_v53 = vld [vmem:[#allocation10 + $0x48] sm:$0xff]   ;;  %v350_v54 = vld [vmem:[#allocation2 + $0x120] sm:$0xf]  ;;  %v7406_v63 = vld [vmem:[#allocation10 + $0x50] sm:$0xff]  }
  0xbc   : > { %682 = vmatprep.subr.bf16.mxu0 %v7378_v17  ;;  %795 = vmatprep.subr.bf16.mxu1 %v7380_v18  ;;  %v6074_v48 = vcombine.low %v397_v42, %v400_v43  ;;  %v405_v51 = vrot.slane %v403_v45, 4  ;;  %v349_v56 = vld [vmem:[#allocation2 + $0x11c] sm:$0xc]  ;;  %v351_v57 = vld [vmem:[#allocation2 + $0x124] sm:$0x3]  ;;  %v410_v58 = vrot.slane %v350_v54, 6 }
  0xbd   : > { %v404_v59 = vsel %vm8145_vm2, %v6067_v50, %v403_v45  ;;  %v7405_v61 = vld [vmem:[#allocation10 + $0x8] sm:$0xff]   ;;  %v6068_v1 = vrot.slane %v349_v56, 10  ;;  %v413_v2 = vrot.slane %v351_v57, 6  ;;  %v7407_v5 = vld [vmem:[#allocation10 + $0x10] sm:$0xff]   ;;  %v7408_v10 = vld [vmem:[#allocation10 + $0x58] sm:$0xff]   ;;  %vm1100_vm3 = vcmask 1040384  }
  0xbe   : > { %v407_v60 = vsel %vm8145_vm2, %v405_v51, %v406_v52  ;;  %v412_v4 = vrot.slane %v410_v58, 4  ;;  %v7413_v6 = vld [vmem:[#allocation10 + $0xc8] sm:$0xff]   ;;  %v353_v7 = vld [vmem:[#allocation2 + $0x134] sm:$0xf]  ;;  %v352_v9 = vld [vmem:[#allocation2 + $0x130] sm:$0xc] }
  0xbf   : > { %683 = vmatpush1.bf16.msra.mxu0 %v7382_v19  ;;  %796 = vmatpush1.bf16.msra.mxu1 %v7383_v20  ;;  %v6075_v3 = vcombine.low %v404_v59, %v407_v60  ;;  %v7415_v8 = vld [vmem:[#allocation10 + $0x88] sm:$0xff]   ;;  %v354_v11 = vld [vmem:[#allocation2 + $0x138] sm:$0x3]  ;;  %v417_v12 = vrot.slane %v353_v7, 6  ;;  %v411_v14 = vsel %vm8145_vm2, %v6068_v1, %v410_v58  ;;  %v7417_v16 = vld [vmem:[#allocation10 + $0xd0] sm:$0xff]   ;;  %v6069_v17 = vrot.slane %v352_v9, 10 }
  0xc0   : > { %684 = vmatprep.subr.bf16.mxu0 %v7384_v21  ;;  %797 = vmatprep.subr.bf16.mxu1 %v7386_v22  ;;  %v7410_v13 = vld [vmem:[#allocation10 + $0x18] sm:$0xff]   ;;  %v414_v15 = vsel %vm8145_vm2, %v412_v4, %v413_v2  ;;  %v356_v18 = vld [vmem:[#allocation2 + $0x148] sm:$0xf]  ;;  %v7412_v19 = vld [vmem:[#allocation10 + $0x60] sm:$0xff]   ;;  %v420_v21 = vrot.slane %v354_v11, 6  ;;  %vm1101_vm4 = vcmask 1044484  }
  0xc1   : > { %v6076_v20 = vcombine.low %v411_v14, %v414_v15  ;;  %v7419_v22 = vld [vmem:[#allocation10 + $0x90] sm:$0xff]   ;;  %v7421_v27 = vld [vmem:[#allocation10 + $0x98] sm:$0xff]   ;;  %v357_v28 = vld [vmem:[#allocation2 + $0x14c] sm:$0x3]  ;;  %v424_v30 = vrot.slane %v356_v18, 6  ;;  %vm1391_vm5 = vcmask 1042432  }
  0xc2   : > { %v7418_v31 = vld [vmem:[#allocation10 + $0x28] sm:$0xff]   ;;  %v7423_v35 = vld [vmem:[#allocation10 + $0xe0] sm:$0xff]   ;;  %v358_v43 = vld [vmem:[#allocation2 + $0x158] sm:$0xc]  ;;  %vm1392_vm6 = vcmask 1046532   ;;  %vm7883_vm9 = vmmov 0  }
  0xc3   : > { %685 = vmatpush1.bf16.msra.mxu0 %v7388_v23  ;;  %798 = vmatpush1.bf16.msra.mxu1 %v7389_v24  ;;  %v419_v23 = vrot.slane %v417_v12, 4  ;;  %v7420_v24 = vld [vmem:[#allocation10 + $0xd8] sm:$0xff]   ;;  %v7425_v39 = vld [vmem:[#allocation10 + $0xa0] sm:$0xff]   ;;  %v7426_v42 = vld [vmem:[#allocation10 + $0xe8] sm:$0xff]   ;;  %v6071_v56 = vrot.slane %v358_v43, 10  ;;  %s6509_s21 = sshll.u32 %s7854_s27, 4 }
  0xc4   : > { %686 = vmatprep.subr.bf16.mxu0 %v7390_v25  ;;  %799 = vmatprep.subr.bf16.mxu1 %v7392_v26  ;;  %v355_v25 = vld [vmem:[#allocation2 + $0x144] sm:$0xc]  ;;  %v359_v44 = vld [vmem:[#allocation2 + $0x15c] sm:$0xf]  ;;  %v360_v45 = vld [vmem:[#allocation2 + $0x160] sm:$0x3] }
  0xc5   : > { %v7414_v26 = vld [vmem:[#allocation10 + $0x20] sm:$0xff]   ;;  %v421_v34 = vsel %vm8145_vm2, %v419_v23, %v420_v21  ;;  %v6070_v36 = vrot.slane %v355_v25, 10  ;;  %v7427_v47 = vld [vmem:[#allocation10 + $0xa8] sm:$0xff]   ;;  %v431_v50 = vrot.slane %v359_v44, 6  ;;  %v7429_v51 = vld [vmem:[#allocation10 + $0xf0] sm:$0xff]   ;;  %v434_v58 = vrot.slane %v360_v45, 6 }
  0xc6   : > { %v8179_v54 = vld [vmem:[#allocation2 + $0x184] sm:$0xf]  ;;  %v7431_v57 = vld [vmem:[#allocation10 + $0xb0] sm:$0xff]   ;;  %v7432_v59 = vld [vmem:[#allocation10 + $0xf8] sm:$0xff]   ;;  %s6510_s10 = sshll.u32 %s7858_s28, 5  ;;  %s5924_s9 = sshll.u32 %s8140_s12, 4  ;;  %s9416_s9 = int_to_ptr.vmem [resolvable:$true] %s5924_s9 }
  0xc7   : > { %687 = vmatpush1.bf16.msra.mxu0 %v7394_v29  ;;  %800 = vmatpush1.bf16.msra.mxu1 %v7395_v32  ;;  %v7416_v29 = vld [vmem:[#allocation10 + $0x68] sm:$0xff]   ;;  %v418_v32 = vsel %vm8145_vm2, %v6069_v17, %v417_v12  ;;  %v425_v52 = vsel %vm8145_vm2, %v6070_v36, %v424_v30  ;;  %v363_v1 = vld [vmem:[#allocation2 + $0x174] sm:$0x3]  ;;  %v8182_v2 = vld [vmem:[#allocation2 + $0x180] sm:$0xc]  ;;  %v445_v4 = vrot.slane %v8179_v54, 6  ;;  %s5921_s13 = sadd.s32 %s6510_s10, %s6509_s21 }
  0xc8   : > { %688 = vmatprep.subr.bf16.mxu0 %v7396_v37  ;;  %801 = vmatprep.subr.bf16.mxu1 %v7398_v38  ;;  %v7422_v37 = vld [vmem:[#allocation10 + $0x70] sm:$0xff]   ;;  %v427_v38 = vrot.slane %v357_v28, 6  ;;  %v8187_v7 = vld [vmem:[#allocation2 + $0x7c] sm:$0xc]  ;;  %v8191_v9 = vld [vmem:[#allocation2 + $0x84] sm:$0x3] }
  0xc9   : > { %v441_v12 = vrot.slane %v363_v1, 6  ;;  %v6073_v15 = vrot.slane %v8182_v2, 10  ;;  %v8201_v17 = vld [vmem:[#allocation2 + $0xf0] sm:$0x8]  ;;  %v8203_v18 = vld [vmem:[#allocation2 + $0xf4] sm:$0xf]  ;;  %vm8276_vm7 = vmor %vm1100_vm3, %vm1101_vm4 }
  0xca   : > { %v8212_v23 = vld [vmem:[#allocation2 + $0xf8] sm:$0x7]  ;;  %v8216_v25 = vld [vmem:[#allocation2 + $0x84] sm:$0xf]  ;;  %v1540_v28 = vrot.slane %v8203_v18, 7  ;;  %vm8347_vm8 = vmor %vm1391_vm5, %vm1392_vm6  ;;  %s6511_s27 = sshll.u32 %s5921_s13, 7 }
  0xcb   : > { %689 = vmatpush1.bf16.msra.mxu0 %v7400_v40  ;;  %802 = vmatpush1.bf16.msra.mxu1 %v7401_v41  ;;  %v6077_v40 = vcombine.low %v418_v32, %v421_v34  ;;  %v426_v41 = vrot.slane %v424_v30, 4  ;;  %v8222_v30 = vld [vmem:[#allocation2 + $0x80] sm:$0x7]  ;;  %v1396_v34 = vrot.slane %v8216_v25, 5  ;;  %v1543_v36 = vrot.slane %v8212_v23, 7  ;;  %s9422_s17 = scalar_lea.hbm %s9487_s7, %s6511_s27  ;;  %s9428_s20 = scalar_lea.sflag [#allocation9], %s312_s19 }
  0xcc   : > { %6515 = vmatprep.subr.bf16.mxu0 %v7402_v46  ;;  %6579 = vmatprep.subr.bf16.mxu1 %v7409_v55  ;;  %v7424_v46 = vld [vmem:[#allocation10 + $0x30] sm:$0xff]   ;;  %v7430_v55 = vld [vmem:[#allocation10 + $0x38] sm:$0xff]   ;;  %v8225_v32 = vld [vmem:[#allocation2 + $0x80] sm:$0xe]  ;;  %v1108_v45 = vrot.slane %v8222_v30, 7  ;;  %s7762_s8 = scalar_lea.vmem %s9416_s9, 2048 }
  0xcd   : > { %v8272_v1 = vld [vmem:[#allocation2 + $0x94] sm:$0x7]  ;;  %v8312_v18 = vld [vmem:[#allocation2 + $0xa8] sm:$0xf]  ;;  %p7763_p2 = scmp.ne.s32.totalorder %s9416_s9, %s7762_s8  ;;  %p9599_p0 = scmp.ne.s32.totalorder %s9515_s15, 0 }
  0xce   : > { %707 = vmatmul.mubr.bf16.vlgmr.msra.gmra.mrb[0].mxu0 %v6074_v48  ;;  %820 = vmatmul.mubr.bf16.vlgmr.msra.gmra.mrb[0].mxu1 %v6074_v48  ;;  %v8171_v48 = vld [vmem:[#allocation2 + $0x170] sm:$0xf]  ;;  %s7884_s26 = smov [#allocation15]  }
  0xcf   : > { %6516 = vmatpush3.bf16.msra.mxu0 %v7403_v49  ;;  %716 = vmatprep.mubr.bf16.mxu0 %v7881_v0  ;;  %v7428_v49 = vld [vmem:[#allocation10 + $0x78] sm:$0xff]   ;;  %p7764_p8 = pnand %p7763_p2, %p9599_p0  ;;  %s7766_s30 = sshll.u32 %s7884_s26, 4  ;;  %s7767_s30 = int_to_ptr.vmem [resolvable:$false] %s7766_s30 }
  0xd0   : > { %829 = vmatprep.mubr.bf16.mxu1 %v7881_v0  ;;  %6517 = vmatprep.subr.bf16.mxu0 %v7404_v53  ;;  %v428_v53 = vsel %vm8145_vm2, %v426_v41, %v427_v38  ;;  %v8233_v38 = vld [vmem:[#allocation2 + $0x94] sm:$0xf]  ;;  %v8236_v41 = vld [vmem:[#allocation2 + $0x90] sm:$0xc]  ;;  %s7768_s23 = scalar_lea.vmem %s7767_s30, 4096  ;;  %p7769_p12 = scmp.lt.s32.totalorder %s9416_s9, %s7767_s30 }
  0xd1   : > { %6580 = vmatpush3.bf16.msra.mxu1 %v7411_v62  ;;  %v6078_v60 = vcombine.low %v425_v52, %v428_v53  ;;  %v438_v62 = vrot.slane %v8171_v48, 6  ;;  %v8250_v48 = vld [vmem:[#allocation2 + $0x108] sm:$0xf]  ;;  %v1256_v52 = vrot.slane %v8233_v38, 6  ;;  %v7441_v53 = vld [vmem:[#allocation10 + $0x1c0] sm:$0xff]   ;;  %p7765_p10 = pneg %p7764_p8  ;;  %p7770_p1 = scmp.lt.s32.totalorder %s7768_s23, %s7762_s8 }
  0xd2   : > { %6581 = vmatprep.subr.bf16.mxu1 %v7413_v6  ;;  %v7434_v6 = vld [vmem:[#allocation10 + $0x140] sm:$0xff]  }
  0xd3   : > { %6518 = vmatpush3.bf16.msra.mxu0 %v7405_v61  ;;  %v433_v61 = vrot.slane %v431_v50, 4  ;;  %v440_v11 = vrot.slane %v438_v62, 4  ;;  %p7771_p4 = por %p7770_p1, %p7769_p12 }
  0xd4   : > { %6519 = vmatprep.subr.bf16.mxu0 %v7406_v63  ;;  %v361_v63 = vld [vmem:[#allocation2 + $0x16c] sm:$0xc] }
  0xd5   : > { %6582 = vmatpush3.bf16.msra.mxu1 %v7415_v8  ;;  %v8189_v8 = vld [vmem:[#allocation2 + $0x80] sm:$0xf]  ;;  %v435_v14 = vsel %vm8145_vm2, %v433_v61, %v434_v58  ;;  %v442_v44 = vsel %vm8145_vm2, %v440_v11, %v441_v12  ;;  %v8264_v58 = vld [vmem:[#allocation2 + $0x90] sm:$0xf]  ;;  %v1547_v61 = vrot.slane %v8250_v48, 7  ;;  %v446_v11 = vsel %vm8145_vm2, %v6073_v15, %v445_v4  ;;  %p7772_p5 = pnand %p7771_p4, %p7765_p10 }
  0xd6   : > { %717 = vmatmul.mubr.bf16.gmra.mrb[4].mxu0 %v6075_v3  ;;  %830 = vmatmul.mubr.bf16.gmra.mrb[4].mxu1 %v6075_v3  ;;  %v8184_v3 = vld [vmem:[#allocation2 + $0x188] sm:$0x3]  ;;  %v1249_v21 = vrot.slane %v8189_v8, 6  ;;  %v8310_v15 = vld [vmem:[#allocation2 + $0xa4] sm:$0xc] }
  0xd7   : > { %726 = vmatprep.mubr.bf16.mxu0 %v7881_v0  ;;  %839 = vmatprep.mubr.bf16.mxu1 %v7881_v0 }
  0xd8   : > { %6520 = vmatpush3.bf16.msra.mxu0 %v7407_v5  ;;  %6583 = vmatprep.subr.bf16.mxu1 %v7417_v16  ;;  %v7433_v5 = vld [vmem:[#allocation10 + $0xb8] sm:$0xff]   ;;  %v448_v16 = vrot.slane %v8184_v3, 6  ;;  %v8314_v3 = vld [vmem:[#allocation2 + $0xac] sm:$0x3] }
  0xd9   : > { %6521 = vmatprep.subr.bf16.mxu0 %v7408_v10  ;;  %6584 = vmatpush3.bf16.msra.mxu1 %v7419_v22  ;;  %v6072_v10 = vrot.slane %v361_v63, 10  ;;  %v1252_v22 = vrot.slane %v8191_v9, 6  ;;  %v8270_v63 = vld [vmem:[#allocation2 + $0x8c] sm:$0x8]  ;;  %v1549_v9 = vrot.slane %v1547_v61, 4 }
  0xda   : > { %6585 = vmatprep.subr.bf16.mxu1 %v7420_v24  ;;  %v8214_v24 = vld [vmem:[#allocation2 + $0x7c] sm:$0xf] }
  0xdb   : > { %v439_v43 = vsel %vm8145_vm2, %v6072_v10, %v438_v62  ;;  %v8268_v62 = vld [vmem:[#allocation2 + $0x98] sm:$0xf]  ;;  %v1112_v10 = vrot.slane %v8264_v58, 7  ;;  %v7445_v58 = vld [vmem:[#allocation10 + $0x1c8] sm:$0xff]  }
  0xdc   : > { %6522 = vmatpush3.bf16.msra.mxu0 %v7410_v13  ;;  %v432_v13 = vsel %vm8145_vm2, %v6071_v56, %v431_v50  ;;  %v8256_v50 = vrot.slane %v1396_v34, 4 }
  0xdd   : > { %6523 = vmatprep.subr.bf16.mxu0 %v7412_v19  ;;  %6586 = vmatpush3.bf16.msra.mxu1 %v7421_v27  ;;  %v8207_v19 = vrot.slane %v445_v4, 4  ;;  %v6163_v27 = vrot.slane %v8201_v17, 11  ;;  %v1403_v17 = vrot.slane %v8268_v62, 5  ;;  %v9537_v62 = vrot.slane %v8310_v15, 10 }
  0xde   : > { %727 = vmatmul.mubr.bf16.gmra.mrb[8].mxu0 %v6076_v20  ;;  %840 = vmatmul.mubr.bf16.gmra.mrb[8].mxu1 %v6076_v20  ;;  %v6131_v20 = vrot.slane %v8187_v7, 10 }
  0xdf   : > { %736 = vmatprep.mubr.bf16.mxu0 %v7881_v0  ;;  %849 = vmatprep.mubr.bf16.mxu1 %v7881_v0  ;;  %v449_v54 = vsel %vm8145_vm2, %v8207_v19, %v448_v16  ;;  %v1541_v7 = vsel %vm8276_vm7, %v6163_v27, %v1540_v28  ;;  %v6116_v16 = vrot.slane %v8270_v63, 11  ;;  %v8325_v19 = vld [vmem:[#allocation2 + $0x118] sm:$0x8]  ;;  %v8355_v27 = vld [vmem:[#allocation2 + $0xac] sm:$0xf] }
  0xe0   : > { %6524 = vmatpush3.bf16.msra.mxu0 %v7414_v26  ;;  %6587 = vmatprep.subr.bf16.mxu1 %v7423_v35  ;;  %v6079_v26 = vcombine.low %v432_v13, %v435_v14  ;;  %v1251_v35 = vrot.slane %v1249_v21, 4  ;;  %v8290_v13 = vld [vmem:[#allocation2 + $0x94] sm:$0xe]  ;;  %v8292_v14 = vld [vmem:[#allocation2 + $0x9c] sm:$0x1]  ;;  %v1250_v2 = vsel %vm8145_vm2, %v6131_v20, %v1249_v21  ;;  %v8331_v21 = vrot.slane %v1112_v10, 4 }
  0xe1   : > { %6525 = vmatprep.subr.bf16.mxu0 %v7416_v29  ;;  %6588 = vmatpush3.bf16.msra.mxu1 %v7425_v39  ;;  %v8220_v29 = vld [vmem:[#allocation2 + $0x78] sm:$0x8]  ;;  %v1542_v39 = vrot.slane %v1540_v28, 4  ;;  %v8327_v20 = vld [vmem:[#allocation2 + $0x11c] sm:$0xf]  ;;  %v1263_v28 = vrot.slane %v8312_v18, 6 }
  0xe2   : > { %6589 = vmatprep.subr.bf16.mxu1 %v7426_v42  ;;  %v8238_v42 = vld [vmem:[#allocation2 + $0x98] sm:$0x3]  ;;  %v1253_v4 = vsel %vm8145_vm2, %v1251_v35, %v1252_v22  ;;  %v8357_v35 = vld [vmem:[#allocation2 + $0xa0] sm:$0x8]  ;;  %v9535_v63 = vrot.slane %v8290_v13, 9 }
  0xe3   : > { %v1259_v56 = vrot.slane %v8238_v42, 6  ;;  %v1544_v8 = vsel %vm8276_vm7, %v1542_v39, %v1543_v36  ;;  %v8343_v36 = vld [vmem:[#allocation2 + $0x120] sm:$0x7]  ;;  %v6081_v39 = vcombine.low %v446_v11, %v449_v54  ;;  %v6139_v23 = vcombine.low %v1250_v2, %v1253_v4  ;;  %v8424_v42 = vld [vmem:[#allocation2 + $0x12c] sm:$0x8] }
  0xe4   : > { %6526 = vmatpush3.bf16.msra.mxu0 %v7418_v31  ;;  %v1105_v31 = vrot.slane %v8214_v24, 7  ;;  %v6171_v22 = vcombine.low %v1541_v7, %v1544_v8  ;;  %v8373_v2 = vrot.slane %v1263_v28, 4  ;;  %v1557_v4 = vrot.slane %v8343_v36, 7  ;;  %v8378_v7 = vld [vmem:[#allocation2 + $0xbc] sm:$0xf] }
  0xe5   : > { %6527 = vmatprep.subr.bf16.mxu0 %v7422_v37  ;;  %6590 = vmatpush3.bf16.msra.mxu1 %v7427_v47  ;;  %v8231_v37 = vld [vmem:[#allocation2 + $0x88] sm:$0x1]  ;;  %v8248_v47 = vld [vmem:[#allocation2 + $0x104] sm:$0x8]  ;;  %v8396_v8 = vld [vmem:[#allocation2 + $0xb0] sm:$0x1]  ;;  %v1264_v13 = vsel %vm8145_vm2, %v9537_v62, %v1263_v28 }
  0xe6   : > { %737 = vmatmul.mubr.bf16.gmra.mrb[12].mxu0 %v6077_v40  ;;  %850 = vmatmul.mubr.bf16.gmra.mrb[12].mxu1 %v6077_v40  ;;  %v6115_v40 = vrot.slane %v8220_v29, 11  ;;  %v1410_v29 = vrot.slane %v8355_v27, 5  ;;  %v8508_v28 = vld [vmem:[#allocation2 + $0xc4] sm:$0x1]  ;;  %v8518_v36 = vld [vmem:[#allocation2 + $0xd4] sm:$0x3] }
  0xe7   : > { %746 = vmatprep.mubr.bf16.mxu0 %v7881_v0  ;;  %859 = vmatprep.mubr.bf16.mxu1 %v7881_v0 }
  0xe8   : > { %6528 = vmatpush3.bf16.msra.mxu0 %v7424_v46  ;;  %6591 = vmatprep.subr.bf16.mxu1 %v7429_v51  ;;  %v6147_v46 = vrot.slane %v8225_v32, 9  ;;  %v1399_v51 = vrot.slane %v8231_v37, 5  ;;  %v1106_v11 = vsel %vm8276_vm7, %v6115_v40, %v1105_v31  ;;  %v8409_v37 = vld [vmem:[#allocation2 + $0xb8] sm:$0xc] }
  0xe9   : > { %6529 = vmatprep.subr.bf16.mxu0 %v7428_v49  ;;  %6592 = vmatpush3.bf16.msra.mxu1 %v7431_v57  ;;  %v1107_v49 = vrot.slane %v1105_v31, 4  ;;  %v8262_v57 = vld [vmem:[#allocation2 + $0x10c] sm:$0x7] }
  0xea   : > { %6593 = vmatprep.subr.bf16.mxu1 %v7432_v59  ;;  %v6080_v59 = vcombine.low %v439_v43, %v442_v44  ;;  %v1550_v12 = vrot.slane %v8262_v57, 7  ;;  %v8369_v44 = vld [vmem:[#allocation2 + $0xa8] sm:$0x7]  ;;  %v1397_v30 = vsel %vm8347_vm8, %v6147_v46, %v1396_v34  ;;  %v1400_v31 = vsel %vm8347_vm8, %v8256_v50, %v1399_v51  ;;  %v8411_v46 = vld [vmem:[#allocation2 + $0xc0] sm:$0x3] }
  0xeb   : > { %v1109_v54 = vsel %vm8276_vm7, %v1107_v49, %v1108_v45  ;;  %v6117_v45 = vrot.slane %v8357_v35, 11  ;;  %v8394_v49 = vld [vmem:[#allocation2 + $0xa8] sm:$0xe]  ;;  %v1122_v34 = vrot.slane %v8369_v44, 7  ;;  %v1270_v50 = vrot.slane %v8378_v7, 6 }
  0xec   : > { %6530 = vmatpush3.bf16.msra.mxu0 %v7430_v55  ;;  %v6132_v55 = vrot.slane %v8236_v41, 10  ;;  %v6123_v51 = vcombine.low %v1106_v11, %v1109_v54  ;;  %v1551_v41 = vsel %vm8276_vm7, %v1549_v9, %v1550_v12  ;;  %v1413_v57 = vrot.slane %v8396_v8, 5  ;;  %v7436_v12 = vld [vmem:[#allocation10 + $0x148] sm:$0xff]  }
  0xed   : > { %6594 = vmatpush3.bf16.msra.mxu1 %v7433_v5  ;;  %6643 = vmatprep.subr.bf16.mxu0 %v7434_v6  ;;  %v1258_v6 = vrot.slane %v1256_v52, 4  ;;  %v6134_v9 = vrot.slane %v8409_v37, 10  ;;  %v8448_v11 = vrot.slane %v1270_v50, 4  ;;  %v9542_v7 = vrot.slane %v8424_v42, 11 }
  0xee   : > { %747 = vmatmul.mubr.bf16.gmra.mrb[16].mxu0 %v6078_v60  ;;  %860 = vmatmul.mubr.bf16.gmra.mrb[16].mxu1 %v6078_v60  ;;  %v6164_v60 = vrot.slane %v8248_v47, 11  ;;  %v1257_v25 = vsel %vm8145_vm2, %v6132_v55, %v1256_v52  ;;  %v8426_v52 = vld [vmem:[#allocation2 + $0x130] sm:$0xf]  ;;  %v8428_v55 = vld [vmem:[#allocation2 + $0x134] sm:$0x7] }
  0xef   : > { %756 = vmatprep.mubr.bf16.mxu0 %v7881_v0  ;;  %869 = vmatprep.mubr.bf16.mxu1 %v7881_v0  ;;  %v1260_v32 = vsel %vm8145_vm2, %v1258_v6, %v1259_v56  ;;  %v7435_v56 = vld [vmem:[#allocation10 + $0x100] sm:$0xff]   ;;  %v1561_v47 = vrot.slane %v8426_v52, 7  ;;  %v1271_v27 = vsel %vm8145_vm2, %v6134_v9, %v1270_v50  ;;  %v9543_v37 = vrot.slane %v8428_v55, 7  ;;  %v8614_v55 = vld [vmem:[#allocation2 + $0xe8] sm:$0x3] }
  0xf0   : > { %6707 = vmatprep.subr.bf16.mxu1 %v7441_v53  ;;  %v1554_v53 = vrot.slane %v8327_v20, 7  ;;  %v1548_v38 = vsel %vm8276_vm7, %v6164_v60, %v1547_v61  ;;  %v8437_v60 = vrot.slane %v1410_v29, 4  ;;  %v6155_v61 = vcombine.low %v1397_v30, %v1400_v31  ;;  %v7443_v31 = vld [vmem:[#allocation10 + $0x180] sm:$0xff]   ;;  %v8470_v30 = vld [vmem:[#allocation2 + $0xbc] sm:$0x7] }
  0xf1   : > { %v6140_v6 = vcombine.low %v1257_v25, %v1260_v32  ;;  %v6172_v25 = vcombine.low %v1548_v38, %v1551_v41  ;;  %v8459_v32 = vsel %vm8276_vm7, %v6116_v16, %v1112_v10  ;;  %v8472_v38 = vld [vmem:[#allocation2 + $0xbc] sm:$0xe]  ;;  %v1404_v10 = vsel %vm8347_vm8, %v9535_v63, %v1403_v17  ;;  %v7446_v9 = vld [vmem:[#allocation10 + $0x120] sm:$0xff]  }
  0xf2   : > { %v1556_v40 = vrot.slane %v1554_v53, 4  ;;  %v1414_v35 = vsel %vm8347_vm8, %v8437_v60, %v1413_v57 }
  0xf4   : > { %v1558_v15 = vsel %vm8276_vm7, %v1556_v40, %v1557_v4  ;;  %v8521_v4 = vld [vmem:[#allocation2 + $0x140] sm:$0x8] }
  0xf6   : > { %757 = vmatmul.mubr.bf16.gmra.mrb[20].mxu0 %v6079_v26  ;;  %870 = vmatmul.mubr.bf16.gmra.mrb[20].mxu1 %v6079_v26  ;;  %v8338_v26 = vrot.slane %v1403_v17, 4  ;;  %v7438_v17 = vld [vmem:[#allocation10 + $0x150] sm:$0xff]  }
  0xf7   : > { %766 = vmatprep.mubr.bf16.mxu0 %v7881_v0  ;;  %879 = vmatprep.mubr.bf16.mxu1 %v7881_v0 }
  0xfe   : > { %767 = vmatmul.mubr.bf16.gmra.mrb[24].mxu0 %v6080_v59  ;;  %880 = vmatmul.mubr.bf16.gmra.mrb[24].mxu1 %v6080_v59  ;;  %v8353_v59 = vld [vmem:[#allocation2 + $0xa4] sm:$0xf] }
  0xff   : > { %776 = vmatprep.mubr.bf16.mxu0 %v7881_v0  ;;  %889 = vmatprep.mubr.bf16.mxu1 %v7881_v0  ;;  %v1115_v0 = vrot.slane %v8272_v1, 7  ;;  %v1119_v24 = vrot.slane %v8353_v59, 7  ;;  %v9536_v1 = vrot.slane %v8292_v14, 5  ;;  %v9538_v14 = vrot.slane %v8314_v3, 6  ;;  %v8512_v3 = vld [vmem:[#allocation2 + $0xd0] sm:$0xf] }
 0x100   : > { %v8576_v59 = vld [vmem:[#allocation2 + $0xd4] sm:$0xf] }
 0x101   : > { %v8432_v48 = vrot.slane %v1119_v24, 4  ;;  %v8466_v54 = vsel %vm8276_vm7, %v8331_v21, %v1115_v0  ;;  %v1407_v16 = vsel %vm8347_vm8, %v8338_v26, %v9536_v1  ;;  %v7437_v21 = vld [vmem:[#allocation10 + $0x108] sm:$0xff]   ;;  %v1267_v26 = vsel %vm8145_vm2, %v8373_v2, %v9538_v14 }
 0x102   : > { %v6124_v20 = vcombine.low %v8459_v32, %v8466_v54  ;;  %v1277_v2 = vrot.slane %v8512_v3, 6  ;;  %v6141_v32 = vcombine.low %v1264_v13, %v1267_v26  ;;  %v8539_v14 = vld [vmem:[#allocation2 + $0xc8] sm:$0x8]  ;;  %v1120_v26 = vsel %vm8276_vm7, %v6117_v45, %v1119_v24  ;;  %v7453_v45 = vld [vmem:[#allocation10 + $0x198] sm:$0xff]  }
 0x103   : > { %v6119_v13 = vrot.slane %v8539_v14, 11  ;;  %v1123_v54 = vsel %vm8276_vm7, %v8432_v48, %v1122_v34  ;;  %v1562_v34 = vsel %vm8276_vm7, %v9542_v7, %v1561_v47  ;;  %v8606_v48 = vld [vmem:[#allocation2 + $0xd8] sm:$0x1]  ;;  %v1424_v42 = vrot.slane %v8576_v59, 5 }
 0x104   : > { %v6125_v60 = vcombine.low %v1120_v26, %v1123_v54  ;;  %v8621_v54 = vld [vmem:[#allocation2 + $0x158] sm:$0xf] }
 0x106   : > { %777 = vmatmul.mubr.bf16.gmra.mrb[28].mxu0 %v6081_v39  ;;  %890 = vmatmul.mubr.bf16.gmra.mrb[28].mxu1 %v6081_v39  ;;  %v8444_v39 = vld [vmem:[#allocation2 + $0xc0] sm:$0xf] }
 0x107   : > { %2819 = vmatprep.mubr.bf16.mxu0 %v6139_v23  ;;  %2916 = vmatprep.mubr.bf16.mxu1 %v6171_v22  ;;  %v8442_v23 = vld [vmem:[#allocation2 + $0xb8] sm:$0xf]  ;;  %v8468_v22 = vld [vmem:[#allocation2 + $0xb4] sm:$0x8]  ;;  %v9505_v41 = vrot.slane %v8444_v39, 5 }
 0x108   : > { %v1126_v0 = vrot.slane %v8442_v23, 7  ;;  %v6118_v40 = vrot.slane %v8468_v22, 11  ;;  %v8640_v23 = vld [vmem:[#allocation2 + $0x15c] sm:$0x7]  ;;  %v1575_v22 = vrot.slane %v8621_v54, 7 }
 0x109   : > { %v8534_v1 = vrot.slane %v9505_v41, 4  ;;  %v8547_v41 = vld [vmem:[#allocation2 + $0xcc] sm:$0xf]  ;;  %v1578_v7 = vrot.slane %v8640_v23, 7  ;;  %v1510_v23 = vld [vmem:[#allocation2 + $0x170] sm:$0x7] }
 0x10a   : > { %v1133_v44 = vrot.slane %v8547_v41, 7  ;;  %v1127_v26 = vsel %vm8276_vm7, %v6118_v40, %v1126_v0 }
 0x10e   : > { %2820 = vmatmul.mubr.bf16.vlgmr.msra.gmra.mrb[32].mxu0 %v6123_v51  ;;  %2917 = vmatmul.mubr.bf16.vlgmr.msra.gmra.mrb[32].mxu1 %v6155_v61  ;;  %v9539_v51 = vrot.slane %v8325_v19, 11  ;;  %v7447_v61 = vld [vmem:[#allocation10 + $0x188] sm:$0xff]   ;;  %v6156_v19 = vcombine.low %v1404_v10, %v1407_v16  ;;  %v7439_v10 = vld [vmem:[#allocation10 + $0x110] sm:$0xff]  }
 0x10f   : > { %6644 = vmatpush3.bf16.msra.mxu0 %v7435_v56  ;;  %2827 = vmatprep.mubr.bf16.mxu0 %v6140_v6  ;;  %v8510_v56 = vld [vmem:[#allocation2 + $0xcc] sm:$0xc]  ;;  %v8526_v6 = vrot.slane %v1126_v0, 4  ;;  %v8536_v16 = vld [vmem:[#allocation2 + $0x148] sm:$0x7]  ;;  %v7455_v0 = vld [vmem:[#allocation10 + $0x1e0] sm:$0xff]  }
 0x110   : > { %v1555_v18 = vsel %vm8276_vm7, %v9539_v51, %v1554_v53  ;;  %2924 = vmatprep.mubr.bf16.mxu1 %v6172_v25  ;;  %6645 = vmatprep.subr.bf16.mxu0 %v7436_v12  ;;  %v1563_v53 = vrot.slane %v1561_v47, 4  ;;  %v8530_v12 = vld [vmem:[#allocation2 + $0x144] sm:$0xf]  ;;  %v8549_v25 = vld [vmem:[#allocation2 + $0xd0] sm:$0x7] }
 0x111   : > { %6708 = vmatpush3.bf16.msra.mxu1 %v7443_v31  ;;  %v6173_v63 = vcombine.low %v1555_v18, %v1558_v15  ;;  %v1568_v62 = vrot.slane %v8530_v12, 7  ;;  %v7440_v31 = vld [vmem:[#allocation10 + $0x158] sm:$0xff]   ;;  %v7449_v18 = vld [vmem:[#allocation10 + $0x1d0] sm:$0xff]   ;;  %v1279_v15 = vrot.slane %v1277_v2, 4  ;;  %v1136_v24 = vrot.slane %v8549_v25, 7 }
 0x112   : > { %6709 = vmatprep.subr.bf16.mxu1 %v7445_v58  ;;  %v7451_v58 = vld [vmem:[#allocation10 + $0x190] sm:$0xff]   ;;  %v1565_v50 = vsel %vm8276_vm7, %v1563_v53, %v9543_v37  ;;  %v8612_v47 = vld [vmem:[#allocation2 + $0xe0] sm:$0xc]  ;;  %v7460_v25 = vld [vmem:[#allocation10 + $0x178] sm:$0xff]  }
 0x113   : > { %6646 = vmatpush3.bf16.msra.mxu0 %v7437_v21  ;;  %v8553_v21 = vrot.slane %v1568_v62, 4  ;;  %v8557_v51 = vld [vmem:[#allocation2 + $0xd0] sm:$0xe]  ;;  %v6174_v53 = vcombine.low %v1562_v34, %v1565_v50  ;;  %v6136_v3 = vrot.slane %v8612_v47, 10  ;;  %v7458_v50 = vld [vmem:[#allocation10 + $0x1e8] sm:$0xff]  }
 0x114   : > { %6647 = vmatprep.subr.bf16.mxu0 %v7438_v17  ;;  %v7452_v17 = vld [vmem:[#allocation10 + $0x1d8] sm:$0xff]   ;;  %v6151_v52 = vrot.slane %v8557_v51, 9  ;;  %v7454_v37 = vld [vmem:[#allocation10 + $0x170] sm:$0xff]  }
 0x115   : > { %6710 = vmatpush3.bf16.msra.mxu1 %v7447_v61  ;;  %v9540_v61 = vrot.slane %v8394_v49, 9  ;;  %v9541_v49 = vrot.slane %v8411_v46, 6  ;;  %v8608_v46 = vld [vmem:[#allocation2 + $0xe4] sm:$0xf] }
 0x116   : > { %2828 = vmatmul.mubr.bf16.gmra.mrb[36].mxu0 %v6124_v20  ;;  %2925 = vmatmul.mubr.bf16.gmra.mrb[36].mxu1 %v6156_v19  ;;  %v7442_v19 = vld [vmem:[#allocation10 + $0x118] sm:$0xff]   ;;  %v1425_v41 = vsel %vm8347_vm8, %v6151_v52, %v1424_v42 }
 0x117   : > { %v1411_v20 = vsel %vm8347_vm8, %v9540_v61, %v1410_v29  ;;  %2835 = vmatprep.mubr.bf16.mxu0 %v6141_v32  ;;  %2932 = vmatprep.mubr.bf16.mxu1 %v6173_v63  ;;  %v7444_v29 = vld [vmem:[#allocation10 + $0x160] sm:$0xff]   ;;  %v1274_v8 = vsel %vm8145_vm2, %v8448_v11, %v9541_v49  ;;  %v1135_v32 = vrot.slane %v1133_v44, 4  ;;  %v1284_v63 = vrot.slane %v8608_v46, 6 }
 0x118   : > { %6648 = vmatpush3.bf16.msra.mxu0 %v7439_v10  ;;  %6711 = vmatprep.subr.bf16.mxu1 %v7449_v18  ;;  %v6157_v57 = vcombine.low %v1411_v20, %v1414_v35  ;;  %v6142_v11 = vcombine.low %v1271_v27, %v1274_v8  ;;  %v8619_v10 = vld [vmem:[#allocation2 + $0x154] sm:$0x8]  ;;  %v9544_v18 = vrot.slane %v8470_v30, 7  ;;  %v9546_v61 = vrot.slane %v8472_v38, 9  ;;  %v8643_v35 = vld [vmem:[#allocation2 + $0xdc] sm:$0x8] }
 0x119   : > { %6649 = vmatprep.subr.bf16.mxu0 %v7440_v31  ;;  %6712 = vmatpush3.bf16.msra.mxu1 %v7451_v58  ;;  %v7448_v31 = vld [vmem:[#allocation10 + $0x168] sm:$0xff]   ;;  %v9547_v30 = vrot.slane %v8508_v28, 5  ;;  %v1427_v27 = vrot.slane %v8606_v48, 5  ;;  %v8661_v28 = vld [vmem:[#allocation2 + $0xe0] sm:$0xf]  ;;  %v1577_v8 = vrot.slane %v1575_v22, 4  ;;  %v1285_v52 = vsel %vm8145_vm2, %v6136_v3, %v1284_v63 }
 0x11a   : > { %6713 = vmatprep.subr.bf16.mxu1 %v7452_v17  ;;  %v1130_v58 = vsel %vm8276_vm7, %v8526_v6, %v9544_v18  ;;  %v9545_v17 = vrot.slane %v8444_v39, 5  ;;  %v9548_v39 = vrot.slane %v8510_v56, 10  ;;  %v9549_v6 = vrot.slane %v8518_v36, 6  ;;  %v8663_v49 = vld [vmem:[#allocation2 + $0xe4] sm:$0x7]  ;;  %v7456_v18 = vld [vmem:[#allocation10 + $0x130] sm:$0xff]  }
 0x11b   : > { %v1421_v40 = vsel %vm8347_vm8, %v8534_v1, %v9547_v30  ;;  %v7457_v1 = vld [vmem:[#allocation10 + $0x1a0] sm:$0xff]   ;;  %v1426_v56 = vrot.slane %v1424_v42, 4  ;;  %v1287_v36 = vrot.slane %v8614_v55, 6  ;;  %v6120_v34 = vrot.slane %v8643_v35, 11  ;;  %v8726_v30 = vld [vmem:[#allocation2 + $0xf0] sm:$0x8] }
 0x11c   : > { %v1418_v20 = vsel %vm8347_vm8, %v9546_v61, %v9545_v17  ;;  %6650 = vmatpush3.bf16.msra.mxu0 %v7442_v19  ;;  %v1278_v38 = vsel %vm8145_vm2, %v9548_v39, %v1277_v2  ;;  %v1281_v19 = vsel %vm8145_vm2, %v1279_v15, %v9549_v6  ;;  %v6168_v2 = vrot.slane %v8619_v10, 11  ;;  %v8670_v15 = vld [vmem:[#allocation2 + $0xe8] sm:$0xf]  ;;  %v1219_v61 = vld [vmem:[#allocation2 + $0xfc] sm:$0x3] }
 0x11d   : > { %6651 = vmatprep.subr.bf16.mxu0 %v7444_v29  ;;  %6714 = vmatpush3.bf16.msra.mxu1 %v7453_v45  ;;  %v7450_v29 = vld [vmem:[#allocation10 + $0x128] sm:$0xff]   ;;  %v1286_v45 = vrot.slane %v1284_v63, 4  ;;  %v9550_v48 = vrot.slane %v8521_v4, 11  ;;  %v1140_v55 = vrot.slane %v8661_v28, 7  ;;  %v1431_v12 = vrot.slane %v8670_v15, 5 }
 0x11e   : > { %2836 = vmatmul.mubr.bf16.gmra.mrb[40].mxu0 %v6125_v60  ;;  %2933 = vmatmul.mubr.bf16.gmra.mrb[40].mxu1 %v6157_v57  ;;  %v9551_v57 = vrot.slane %v8536_v16, 7  ;;  %v7459_v4 = vld [vmem:[#allocation10 + $0x1a8] sm:$0xff]   ;;  %v6158_v10 = vcombine.low %v1418_v20, %v1421_v40  ;;  %v1134_v17 = vsel %vm8276_vm7, %v6119_v13, %v1133_v44  ;;  %v1428_v44 = vsel %vm8347_vm8, %v1426_v56, %v1427_v27  ;;  %v8739_v6 = vld [vmem:[#allocation2 + $0xf8] sm:$0x7] }
 0x11f   : > { %2843 = vmatprep.mubr.bf16.mxu0 %v6142_v11  ;;  %2940 = vmatprep.mubr.bf16.mxu1 %v6174_v53  ;;  %v1569_v60 = vsel %vm8276_vm7, %v9550_v48, %v1568_v62  ;;  %v1143_v11 = vrot.slane %v8663_v49, 7  ;;  %v8691_v53 = vld [vmem:[#allocation2 + $0xe4] sm:$0xe]  ;;  %v6126_v62 = vcombine.low %v1127_v26, %v1130_v58  ;;  %v8694_v16 = vld [vmem:[#allocation2 + $0xec] sm:$0x1]  ;;  %v1142_v59 = vrot.slane %v1140_v55, 4 }
 0x120   : > { %v1572_v47 = vsel %vm8276_vm7, %v8553_v21, %v9551_v57  ;;  %6652 = vmatpush3.bf16.msra.mxu0 %v7446_v9  ;;  %6715 = vmatprep.subr.bf16.mxu1 %v7455_v0  ;;  %v6143_v21 = vcombine.low %v1278_v38, %v1281_v19  ;;  %v8706_v26 = vld [vmem:[#allocation2 + $0xf4] sm:$0xc]  ;;  %v6152_v14 = vrot.slane %v8691_v53, 9  ;;  %v1218_v58 = vld [vmem:[#allocation2 + $0xf8] sm:$0xf]  ;;  %v1288_v42 = vsel %vm8145_vm2, %v1286_v45, %v1287_v36 }
 0x121   : > { %6653 = vmatprep.subr.bf16.mxu0 %v7448_v31  ;;  %6716 = vmatpush3.bf16.msra.mxu1 %v7457_v1  ;;  %v6175_v9 = vcombine.low %v1569_v60, %v1572_v47  ;;  %v1137_v31 = vsel %vm8276_vm7, %v1135_v32, %v1136_v24  ;;  %v1291_v51 = vrot.slane %v1218_v58, 6  ;;  %v1508_v24 = vld [vmem:[#allocation2 + $0x168] sm:$0x8]  ;;  %v1509_v32 = vld [vmem:[#allocation2 + $0x16c] sm:$0xf]  ;;  %v1434_v20 = vrot.slane %v8694_v16, 5 }
 0x122   : > { %6717 = vmatprep.subr.bf16.mxu1 %v7458_v50  ;;  %v6127_v13 = vcombine.low %v1134_v17, %v1137_v31  ;;  %v1582_v0 = vrot.slane %v1509_v32, 7  ;;  %v1576_v40 = vsel %vm8276_vm7, %v6168_v2, %v1575_v22  ;;  %v1579_v46 = vsel %vm8276_vm7, %v1577_v8, %v1578_v7  ;;  %v8737_v38 = vld [vmem:[#allocation2 + $0xf4] sm:$0xf]  ;;  %v8741_v56 = vld [vmem:[#allocation2 + $0xf8] sm:$0xe]  ;;  %v7466_v32 = vld [vmem:[#allocation10 + $0x240] sm:$0xff]  }
 0x123   : > { %v1433_v63 = vrot.slane %v1431_v12, 4  ;;  %v6137_v39 = vrot.slane %v8706_v26, 10  ;;  %v6159_v19 = vcombine.low %v1425_v41, %v1428_v44  ;;  %v1293_v27 = vrot.slane %v1291_v51, 4  ;;  %v7461_v22 = vld [vmem:[#allocation10 + $0x1f0] sm:$0xff]   ;;  %v1362_v45 = vld [vmem:[#allocation2 + $0xfc] sm:$0xf] }
 0x124   : > { %6654 = vmatpush3.bf16.msra.mxu0 %v7450_v29  ;;  %v1294_v1 = vrot.slane %v1219_v61, 6  ;;  %v6169_v54 = vrot.slane %v1508_v24, 11  ;;  %v1584_v3 = vrot.slane %v1582_v0, 4  ;;  %v1585_v36 = vrot.slane %v1510_v23, 7  ;;  %v7462_v50 = vld [vmem:[#allocation10 + $0x138] sm:$0xff]  }
 0x125   : > { %6655 = vmatprep.subr.bf16.mxu0 %v7454_v37  ;;  %6718 = vmatpush3.bf16.msra.mxu1 %v7459_v4  ;;  %v6121_v2 = vrot.slane %v8726_v30, 11  ;;  %v1147_v29 = vrot.slane %v8737_v38, 7  ;;  %v6144_v8 = vcombine.low %v1285_v52, %v1288_v42  ;;  %v6176_v7 = vcombine.low %v1576_v40, %v1579_v46  ;;  %v1363_v48 = vld [vmem:[#allocation2 + $0x100] sm:$0x1]  ;;  %v7464_v17 = vld [vmem:[#allocation10 + $0x1f8] sm:$0xff]  }
 0x126   : > { %2844 = vmatmul.mubr.bf16.gmra.mrb[44].mxu0 %v6126_v62  ;;  %2941 = vmatmul.mubr.bf16.gmra.mrb[44].mxu1 %v6158_v10  ;;  %v1150_v37 = vrot.slane %v8739_v6, 7  ;;  %v6153_v60 = vrot.slane %v8741_v56, 9  ;;  %v1438_v57 = vrot.slane %v1362_v45, 5  ;;  %v1141_v47 = vsel %vm8276_vm7, %v6120_v34, %v1140_v55  ;;  %v7463_v10 = vld [vmem:[#allocation10 + $0x1b0] sm:$0xff]   ;;  %v1220_v55 = vld [vmem:[#allocation2 + $0x108] sm:$0xc] }
 0x127   : > { %2851 = vmatprep.mubr.bf16.mxu0 %v6143_v21  ;;  %2948 = vmatprep.mubr.bf16.mxu1 %v6175_v9  ;;  %v1144_v53 = vsel %vm8276_vm7, %v1142_v59, %v1143_v11  ;;  %v1432_v4 = vsel %vm8347_vm8, %v6152_v14, %v1431_v12  ;;  %v1149_v62 = vrot.slane %v1147_v29, 4  ;;  %v1435_v35 = vsel %vm8347_vm8, %v1433_v63, %v1434_v20  ;;  %v1221_v11 = vld [vmem:[#allocation2 + $0x10c] sm:$0xf]  ;;  %v1222_v12 = vld [vmem:[#allocation2 + $0x110] sm:$0x3] }
 0x128   : > { %6656 = vmatpush3.bf16.msra.mxu0 %v7456_v18  ;;  %6719 = vmatprep.subr.bf16.mxu1 %v7461_v22  ;;  %v1292_v28 = vsel %vm8145_vm2, %v6137_v39, %v1291_v51  ;;  %v1295_v49 = vsel %vm8145_vm2, %v1293_v27, %v1294_v1  ;;  %v1583_v34 = vsel %vm8276_vm7, %v6169_v54, %v1582_v0  ;;  %v1440_v16 = vrot.slane %v1438_v57, 4  ;;  %v1511_v9 = vld [vmem:[#allocation2 + $0x17c] sm:$0x8]  ;;  %v1512_v58 = vld [vmem:[#allocation2 + $0x180] sm:$0xf] }
 0x129   : > { %6657 = vmatprep.subr.bf16.mxu0 %v7460_v25  ;;  %v1586_v15 = vsel %vm8276_vm7, %v1584_v3, %v1585_v36  ;;  %6720 = vmatpush3.bf16.msra.mxu1 %v7463_v10  ;;  %v1441_v18 = vrot.slane %v1363_v48, 5  ;;  %v1298_v21 = vrot.slane %v1221_v11, 6  ;;  %v6128_v31 = vcombine.low %v1141_v47, %v1144_v53  ;;  %v1513_v61 = vld [vmem:[#allocation2 + $0x184] sm:$0x7]  ;;  %v7465_v25 = vld [vmem:[#allocation10 + $0x1b8] sm:$0xff]  }
 0x12a   : > { %v6160_v26 = vcombine.low %v1432_v4, %v1435_v35  ;;  %v6145_v41 = vcombine.low %v1292_v28, %v1295_v49  ;;  %v6138_v14 = vrot.slane %v1220_v55, 10  ;;  %v1301_v59 = vrot.slane %v1222_v12, 6  ;;  %v1073_v24 = vld [vmem:[#allocation2 + $0x104] sm:$0x8]  ;;  %6721 = vmatprep.subr.bf16.mxu1 %v7464_v17  ;;  %v1074_v23 = vld [vmem:[#allocation2 + $0x108] sm:$0xf] }
 0x12b   : > { %v1300_v44 = vrot.slane %v1298_v21, 4  ;;  %v1589_v51 = vrot.slane %v1512_v58, 7  ;;  %v1148_v52 = vsel %vm8276_vm7, %v6121_v2, %v1147_v29  ;;  %v6170_v42 = vrot.slane %v1511_v9, 11  ;;  %v1075_v0 = vld [vmem:[#allocation2 + $0x10c] sm:$0x7] }
 0x12c   : > { %6658 = vmatpush3.bf16.msra.mxu0 %v7462_v50  ;;  %v1592_v20 = vrot.slane %v1513_v61, 7  ;;  %v1151_v30 = vsel %vm8276_vm7, %v1149_v62, %v1150_v37  ;;  %v1439_v40 = vsel %vm8347_vm8, %v6153_v60, %v1438_v57  ;;  %v1154_v63 = vrot.slane %v1074_v23, 7  ;;  %v1364_v39 = vld [vmem:[#allocation2 + $0x10c] sm:$0xe]  ;;  %v1365_v38 = vld [vmem:[#allocation2 + $0x110] sm:$0xf] }
 0x12d   : > { %6722 = vmatpush3.bf16.msra.mxu1 %v7465_v25  ;;  %v1591_v46 = vrot.slane %v1589_v51, 4  ;;  %6771 = vmatprep.subr.bf16.mxu0 %v7466_v32  ;;  %v1442_v6 = vsel %vm8347_vm8, %v1440_v16, %v1441_v18  ;;  %v1157_v27 = vrot.slane %v1075_v0, 7  ;;  %v1366_v1 = vld [vmem:[#allocation2 + $0x114] sm:$0x1]  ;;  %v1445_v54 = vrot.slane %v1365_v38, 5 }
 0x12e   : > { %2852 = vmatmul.mubr.bf16.gmra.mrb[48].mxu0 %v6127_v13  ;;  %2949 = vmatmul.mubr.bf16.gmra.mrb[48].mxu1 %v6159_v19  ;;  %v6177_v13 = vcombine.low %v1583_v34, %v1586_v15  ;;  %v6122_v19 = vrot.slane %v1073_v24, 11  ;;  %v1299_v56 = vsel %vm8145_vm2, %v6138_v14, %v1298_v21  ;;  %v1302_v22 = vsel %vm8145_vm2, %v1300_v44, %v1301_v59  ;;  %v1779_v60 = vld [vmem:[#allocation2 + $0x168] sm:$0x8]  ;;  %v1780_v57 = vld [vmem:[#allocation2 + $0x16c] sm:$0xf] }
 0x12f   : > { %2859 = vmatprep.mubr.bf16.mxu0 %v6144_v8  ;;  %2956 = vmatprep.mubr.bf16.mxu1 %v6176_v7  ;;  %v1156_v3 = vrot.slane %v1154_v63, 4  ;;  %v6154_v36 = vrot.slane %v1364_v39, 9  ;;  %v1590_v2 = vsel %vm8276_vm7, %v6170_v42, %v1589_v51  ;;  %v1593_v29 = vsel %vm8276_vm7, %v1591_v46, %v1592_v20  ;;  %v1781_v47 = vld [vmem:[#allocation2 + $0x170] sm:$0x7]  ;;  %v2068_v35 = vld [vmem:[#allocation2 + $0x174] sm:$0xf] }
 0x130   : > { %v1447_v45 = vrot.slane %v1445_v54, 4  ;;  %v1448_v8 = vrot.slane %v1366_v1, 5  ;;  %v6129_v7 = vcombine.low %v1148_v52, %v1151_v30  ;;  %v6161_v37 = vcombine.low %v1439_v40, %v1442_v6  ;;  %v2067_v10 = vld [vmem:[#allocation2 + $0x170] sm:$0xe]  ;;  %v2069_v34 = vld [vmem:[#allocation2 + $0x178] sm:$0x1] }
 0x131   : > { %v6146_v50 = vcombine.low %v1299_v56, %v1302_v22  ;;  %v6178_v48 = vcombine.low %v1590_v2, %v1593_v29  ;;  %v6195_v53 = vrot.slane %v1779_v60, 11  ;;  %v1829_v4 = vrot.slane %v1780_v57, 7  ;;  %v1634_v11 = vld [vmem:[#allocation2 + $0xf8] sm:$0xe]  ;;  %v1635_v9 = vld [vmem:[#allocation2 + $0xfc] sm:$0xf] }
 0x132   : > { %v1832_v62 = vrot.slane %v1781_v47, 7  ;;  %v1155_v28 = vsel %vm8276_vm7, %v6122_v19, %v1154_v63  ;;  %v1158_v49 = vsel %vm8276_vm7, %v1156_v3, %v1157_v27  ;;  %v6227_v15 = vrot.slane %v2067_v10, 9  ;;  %v1636_v17 = vld [vmem:[#allocation2 + $0x100] sm:$0x1]  ;;  %v1923_v58 = vld [vmem:[#allocation2 + $0x16c] sm:$0xc] }
 0x133   : > { %v2117_v55 = vrot.slane %v2068_v35, 5  ;;  %v1446_v12 = vsel %vm8347_vm8, %v6154_v36, %v1445_v54  ;;  %v1449_v16 = vsel %vm8347_vm8, %v1447_v45, %v1448_v8  ;;  %v1831_v18 = vrot.slane %v1829_v4, 4  ;;  %v1924_v59 = vld [vmem:[#allocation2 + $0x170] sm:$0xf]  ;;  %v1925_v51 = vld [vmem:[#allocation2 + $0x174] sm:$0x3] }
 0x134   : > { %v2120_v21 = vrot.slane %v2069_v34, 5  ;;  %v1684_v14 = vrot.slane %v1635_v9, 5  ;;  %v6130_v61 = vcombine.low %v1155_v28, %v1158_v49  ;;  %v1687_v44 = vrot.slane %v1636_v17, 5  ;;  %v1782_v40 = vld [vmem:[#allocation2 + $0x17c] sm:$0x8] }
 0x135   : > { %v1833_v25 = vsel %vm8276_vm7, %v1831_v18, %v1832_v62  ;;  %v6162_v24 = vcombine.low %v1446_v12, %v1449_v16  ;;  %v6211_v42 = vrot.slane %v1923_v58, 10  ;;  %v1973_v0 = vrot.slane %v1924_v59, 6  ;;  %v1783_v46 = vld [vmem:[#allocation2 + $0x180] sm:$0xf]  ;;  %v1784_v63 = vld [vmem:[#allocation2 + $0x184] sm:$0x7] }
 0x136   : > { %2860 = vmatmul.mubr.bf16.gmra.mrb[52].mxu0 %v6128_v31  ;;  %2957 = vmatmul.mubr.bf16.gmra.mrb[52].mxu1 %v6160_v26  ;;  %v1830_v31 = vsel %vm8276_vm7, %v6195_v53, %v1829_v4  ;;  %v2118_v26 = vsel %vm8347_vm8, %v6227_v15, %v2117_v55  ;;  %v1686_v52 = vrot.slane %v1684_v14, 4  ;;  %v1976_v30 = vrot.slane %v1925_v51, 6  ;;  %v2070_v19 = vld [vmem:[#allocation2 + $0x184] sm:$0xe]  ;;  %v2071_v27 = vld [vmem:[#allocation2 + $0x188] sm:$0xf] }
 0x137   : > { %2867 = vmatprep.mubr.bf16.mxu0 %v6145_v41  ;;  %2964 = vmatprep.mubr.bf16.mxu1 %v6177_v13  ;;  %v2119_v41 = vrot.slane %v2117_v55, 4  ;;  %v6179_v13 = vrot.slane %v1634_v11, 9  ;;  %v6203_v20 = vcombine.low %v1830_v31, %v1833_v25  ;;  %v1975_v38 = vrot.slane %v1973_v0, 4  ;;  %v2072_v56 = vld [vmem:[#allocation2 + $0x18c] sm:$0x1]  ;;  %v7467_v53 = vld [vmem:[#allocation10 + $0x200] sm:$0xff]  }
 0x138   : > { %v6196_v6 = vrot.slane %v1782_v40, 11  ;;  %v1836_v1 = vrot.slane %v1783_v46, 7  ;;  %v1839_v54 = vrot.slane %v1784_v63, 7  ;;  %v6228_v22 = vrot.slane %v2070_v19, 9  ;;  %v1637_v8 = vld [vmem:[#allocation2 + $0x10c] sm:$0xe] }
 0x139   : > { %v2121_v32 = vsel %vm8347_vm8, %v2119_v41, %v2120_v21  ;;  %v1685_v39 = vsel %vm8347_vm8, %v6179_v13, %v1684_v14  ;;  %v2124_v3 = vrot.slane %v2071_v27, 5  ;;  %v1688_v36 = vsel %vm8347_vm8, %v1686_v52, %v1687_v44  ;;  %v1639_v57 = vld [vmem:[#allocation2 + $0x114] sm:$0x1]  ;;  %v1926_v47 = vld [vmem:[#allocation2 + $0x180] sm:$0xc]  ;;  %v7468_v12 = vld [vmem:[#allocation10 + $0x248] sm:$0xff]  }
 0x13a   : > { %v6235_v23 = vcombine.low %v2118_v26, %v2121_v32  ;;  %v1974_v2 = vsel %vm8145_vm2, %v6211_v42, %v1973_v0  ;;  %v1977_v29 = vsel %vm8145_vm2, %v1975_v38, %v1976_v30  ;;  %v2127_v45 = vrot.slane %v2072_v56, 5  ;;  %v1927_v28 = vld [vmem:[#allocation2 + $0x184] sm:$0xf]  ;;  %v1928_v55 = vld [vmem:[#allocation2 + $0x188] sm:$0x3]  ;;  %v7470_v42 = vld [vmem:[#allocation10 + $0x250] sm:$0xff]  }
 0x13b   : > { %v2125_v60 = vsel %vm8347_vm8, %v6228_v22, %v2124_v3  ;;  %v2126_v4 = vrot.slane %v2124_v3, 4  ;;  %v6180_v62 = vrot.slane %v1637_v8, 9  ;;  %v1694_v35 = vrot.slane %v1639_v57, 5  ;;  %v1785_v41 = vld [vmem:[#allocation2 + $0x190] sm:$0x8]  ;;  %v7475_v59 = vld [vmem:[#allocation10 + $0x280] sm:$0xff]  }
 0x13c   : > { %v6187_v49 = vcombine.low %v1685_v39, %v1688_v36  ;;  %v6219_v34 = vcombine.low %v1974_v2, %v1977_v29  ;;  %v1980_v11 = vrot.slane %v1927_v28, 6  ;;  %v6212_v9 = vrot.slane %v1926_v47, 10  ;;  %v1786_v25 = vld [vmem:[#allocation2 + $0x194] sm:$0xf]  ;;  %v1787_v13 = vld [vmem:[#allocation2 + $0x198] sm:$0x7] }
 0x13d   : > { %v2128_v18 = vsel %vm8347_vm8, %v2126_v4, %v2127_v45  ;;  %v1983_v26 = vrot.slane %v1928_v55, 6  ;;  %v6197_v44 = vrot.slane %v1785_v41, 11  ;;  %v1843_v51 = vrot.slane %v1786_v25, 7  ;;  %v2073_v32 = vld [vmem:[#allocation2 + $0x198] sm:$0xe]  ;;  %v7477_v36 = vld [vmem:[#allocation10 + $0x2c8] sm:$0xff]  }
 0x13e   : > { %2868 = vmatmul.mubr.bf16.gmra.mrb[56].mxu0 %v6129_v7  ;;  %2965 = vmatmul.mubr.bf16.gmra.mrb[56].mxu1 %v6161_v37  ;;  %v1638_v7 = vld [vmem:[#allocation2 + $0x110] sm:$0xf]  ;;  %v7473_v37 = vld [vmem:[#allocation10 + $0x2c0] sm:$0xff]   ;;  %v6236_v17 = vcombine.low %v2125_v60, %v2128_v18  ;;  %v1982_v31 = vrot.slane %v1980_v11, 4  ;;  %v2074_v52 = vld [vmem:[#allocation2 + $0x19c] sm:$0xf] }
 0x13f   : > { %2875 = vmatprep.mubr.bf16.mxu0 %v6146_v50  ;;  %2972 = vmatprep.mubr.bf16.mxu1 %v6178_v48  ;;  %v1837_v50 = vsel %vm8276_vm7, %v6196_v6, %v1836_v1  ;;  %v1838_v48 = vrot.slane %v1836_v1, 4  ;;  %v1691_v10 = vrot.slane %v1638_v7, 5  ;;  %v2075_v0 = vld [vmem:[#allocation2 + $0x1a0] sm:$0x1]  ;;  %v6229_v30 = vrot.slane %v2073_v32, 9  ;;  %v7472_v47 = vld [vmem:[#allocation10 + $0x258] sm:$0xff]  }
 0x140   : > { %6835 = vmatprep.subr.bf16.mxu1 %v7473_v37  ;;  %v2131_v40 = vrot.slane %v2074_v52, 5  ;;  %v1640_v46 = vld [vmem:[#allocation2 + $0x120] sm:$0xe]  ;;  %v1844_v39 = vsel %vm8276_vm7, %v6197_v44, %v1843_v51  ;;  %v1845_v38 = vrot.slane %v1843_v51, 4  ;;  %v2134_v6 = vrot.slane %v2075_v0, 5  ;;  %v7474_v18 = vld [vmem:[#allocation10 + $0x218] sm:$0xff]  }
 0x141   : > { %v1840_v15 = vsel %vm8276_vm7, %v1838_v48, %v1839_v54  ;;  %v1693_v21 = vrot.slane %v1691_v10, 4  ;;  %v1692_v14 = vsel %vm8347_vm8, %v6180_v62, %v1691_v10  ;;  %v1641_v19 = vld [vmem:[#allocation2 + $0x124] sm:$0xf]  ;;  %v1642_v27 = vld [vmem:[#allocation2 + $0x128] sm:$0x1]  ;;  %v6181_v56 = vrot.slane %v1640_v46, 9 }
 0x142   : > { %v6204_v16 = vcombine.low %v1837_v50, %v1840_v15  ;;  %v2132_v1 = vsel %vm8347_vm8, %v6229_v30, %v2131_v40  ;;  %v2133_v54 = vrot.slane %v2131_v40, 4  ;;  %v1698_v22 = vrot.slane %v1641_v19, 5  ;;  %v1929_v3 = vld [vmem:[#allocation2 + $0x194] sm:$0xc]  ;;  %v1930_v8 = vld [vmem:[#allocation2 + $0x198] sm:$0xf] }
 0x143   : > { %v1695_v58 = vsel %vm8347_vm8, %v1693_v21, %v1694_v35  ;;  %v1701_v45 = vrot.slane %v1642_v27, 5  ;;  %v1931_v7 = vld [vmem:[#allocation2 + $0x19c] sm:$0x3]  ;;  %v6213_v37 = vrot.slane %v1929_v3, 10  ;;  %v7471_v50 = vld [vmem:[#allocation10 + $0x210] sm:$0xff]   ;;  %v1987_v4 = vrot.slane %v1930_v8, 6 }
 0x144   : > { %v6188_v63 = vcombine.low %v1692_v14, %v1695_v58  ;;  %v2135_v60 = vsel %vm8347_vm8, %v2133_v54, %v2134_v6  ;;  %v1700_v57 = vrot.slane %v1698_v22, 4  ;;  %v1990_v62 = vrot.slane %v1931_v7, 6  ;;  %v1788_v28 = vld [vmem:[#allocation2 + $0x1a4] sm:$0x8]  ;;  %v1644_v25 = vld [vmem:[#allocation2 + $0x138] sm:$0xf] }
 0x145   : > { %v1699_v10 = vsel %vm8347_vm8, %v6181_v56, %v1698_v22  ;;  %v1988_v15 = vsel %vm8145_vm2, %v6213_v37, %v1987_v4  ;;  %v1989_v55 = vrot.slane %v1987_v4, 4  ;;  %v1645_v32 = vld [vmem:[#allocation2 + $0x13c] sm:$0x1]  ;;  %v1932_v52 = vld [vmem:[#allocation2 + $0x1a8] sm:$0xc]  ;;  %v1705_v0 = vrot.slane %v1644_v25, 5 }
 0x146   : > { %2876 = vmatmul.mubr.bf16.gmra.mrb[60].mxu0 %v6130_v61  ;;  %2973 = vmatmul.mubr.bf16.gmra.mrb[60].mxu1 %v6162_v24  ;;  %v7469_v61 = vld [vmem:[#allocation10 + $0x208] sm:$0xff]   ;;  %v1846_v24 = vrot.slane %v1787_v13, 7  ;;  %v1702_v35 = vsel %vm8347_vm8, %v1700_v57, %v1701_v45  ;;  %v1708_v30 = vrot.slane %v1645_v32, 5  ;;  %v7478_v46 = vld [vmem:[#allocation10 + $0x220] sm:$0xff]   ;;  %v7481_v56 = vld [vmem:[#allocation10 + $0x2d0] sm:$0xff]  }
 0x147   : > { %3013 = vmatprep.mubr.bf16.mxu0 %v6203_v20  ;;  %3110 = vmatprep.mubr.bf16.mxu1 %v6235_v23  ;;  %v1981_v20 = vsel %vm8145_vm2, %v6212_v9, %v1980_v11  ;;  %v1984_v23 = vsel %vm8145_vm2, %v1982_v31, %v1983_v26  ;;  %v6198_v11 = vrot.slane %v1788_v28, 11  ;;  %v6189_v41 = vcombine.low %v1699_v10, %v1702_v35  ;;  %v7479_v13 = vld [vmem:[#allocation10 + $0x288] sm:$0xff]   ;;  %v1791_v7 = vld [vmem:[#allocation2 + $0x1b8] sm:$0x8]  ;;  %v1792_v37 = vld [vmem:[#allocation2 + $0x1bc] sm:$0xf] }
 0x148   : > { %v6220_v2 = vcombine.low %v1981_v20, %v1984_v23  ;;  %v1847_v29 = vsel %vm8276_vm7, %v1845_v38, %v1846_v24  ;;  %v1991_v14 = vsel %vm8145_vm2, %v1989_v55, %v1990_v62  ;;  %v1933_v40 = vld [vmem:[#allocation2 + $0x1ac] sm:$0xf]  ;;  %v6214_v38 = vrot.slane %v1932_v52, 10  ;;  %v2080_v10 = vld [vmem:[#allocation2 + $0x1c4] sm:$0xf] }
 0x149   : > { %v6205_v48 = vcombine.low %v1844_v39, %v1847_v29  ;;  %v6221_v44 = vcombine.low %v1988_v15, %v1991_v14  ;;  %v1934_v39 = vld [vmem:[#allocation2 + $0x1b0] sm:$0x3]  ;;  %v1994_v6 = vrot.slane %v1933_v40, 6  ;;  %v7480_v19 = vld [vmem:[#allocation10 + $0x268] sm:$0xff]   ;;  %v1707_v54 = vrot.slane %v1705_v0, 4  ;;  %v7487_v40 = vld [vmem:[#allocation10 + $0x2e0] sm:$0xff]  }
 0x14a   : > { %v2081_v35 = vld [vmem:[#allocation2 + $0x1c8] sm:$0x1]  ;;  %v2145_v55 = vrot.slane %v2080_v10, 5 }
 0x14b   : > { %v1996_v3 = vrot.slane %v1994_v6, 4  ;;  %v1709_v29 = vsel %vm8347_vm8, %v1707_v54, %v1708_v30  ;;  %v1995_v45 = vsel %vm8145_vm2, %v6214_v38, %v1994_v6  ;;  %v1795_v38 = vld [vmem:[#allocation2 + $0x1d0] sm:$0xf] }
 0x14c   : > { %v1864_v54 = vrot.slane %v1795_v38, 7  ;;  %v1653_v38 = vld [vmem:[#allocation2 + $0x174] sm:$0xf] }
 0x14e   : > { %3014 = vmatmul.mubr.bf16.vlgmr.msra.gmra.mrb[64].mxu0 %v6187_v49  ;;  %3111 = vmatmul.mubr.bf16.vlgmr.msra.gmra.mrb[64].mxu1 %v6219_v34  ;;  %v1789_v49 = vld [vmem:[#allocation2 + $0x1a8] sm:$0xf]  ;;  %v1790_v34 = vld [vmem:[#allocation2 + $0x1ac] sm:$0x7] }
 0x14f   : > { %6772 = vmatpush3.bf16.msra.mxu0 %v7467_v53  ;;  %3021 = vmatprep.mubr.bf16.mxu0 %v6204_v16  ;;  %v6237_v53 = vcombine.low %v2132_v1, %v2135_v60  ;;  %v2077_v16 = vld [vmem:[#allocation2 + $0x1b0] sm:$0xf]  ;;  %v1850_v21 = vrot.slane %v1789_v49, 7  ;;  %v1853_v9 = vrot.slane %v1790_v34, 7  ;;  %v1857_v60 = vrot.slane %v1792_v37, 7 }
 0x150   : > { %3118 = vmatprep.mubr.bf16.mxu1 %v6236_v17  ;;  %6773 = vmatprep.subr.bf16.mxu0 %v7468_v12  ;;  %v2076_v12 = vld [vmem:[#allocation2 + $0x1ac] sm:$0xe]  ;;  %v2078_v17 = vld [vmem:[#allocation2 + $0x1b4] sm:$0x1]  ;;  %v2138_v26 = vrot.slane %v2077_v16, 5  ;;  %v7484_v16 = vld [vmem:[#allocation10 + $0x2d8] sm:$0xff]  }
 0x151   : > { %6836 = vmatpush3.bf16.msra.mxu1 %v7475_v59  ;;  %v6230_v31 = vrot.slane %v2076_v12, 9  ;;  %v2141_v58 = vrot.slane %v2078_v17, 5  ;;  %v1851_v59 = vsel %vm8276_vm7, %v6198_v11, %v1850_v21  ;;  %v1852_v51 = vrot.slane %v1850_v21, 4  ;;  %v7483_v49 = vld [vmem:[#allocation10 + $0x290] sm:$0xff]   ;;  %v1646_v12 = vld [vmem:[#allocation2 + $0x148] sm:$0xe] }
 0x152   : > { %6837 = vmatprep.subr.bf16.mxu1 %v7477_v36  ;;  %v2140_v20 = vrot.slane %v2138_v26, 4  ;;  %v1997_v36 = vrot.slane %v1934_v39, 6  ;;  %v1859_v15 = vrot.slane %v1857_v60, 4  ;;  %v2148_v11 = vrot.slane %v2081_v35, 5  ;;  %v1648_v21 = vld [vmem:[#allocation2 + $0x150] sm:$0x1] }
 0x153   : > { %6774 = vmatpush3.bf16.msra.mxu0 %v7469_v61  ;;  %v1643_v61 = vld [vmem:[#allocation2 + $0x134] sm:$0xe]  ;;  %v2139_v24 = vsel %vm8347_vm8, %v6230_v31, %v2138_v26  ;;  %v7485_v17 = vld [vmem:[#allocation10 + $0x298] sm:$0xff]   ;;  %v1794_v39 = vld [vmem:[#allocation2 + $0x1cc] sm:$0x8] }
 0x154   : > { %6775 = vmatprep.subr.bf16.mxu0 %v7470_v42  ;;  %v7476_v42 = vld [vmem:[#allocation10 + $0x260] sm:$0xff]   ;;  %v6182_v23 = vrot.slane %v1643_v61, 9  ;;  %v2142_v1 = vsel %vm8347_vm8, %v2140_v20, %v2141_v58  ;;  %v1998_v8 = vsel %vm8145_vm2, %v1996_v3, %v1997_v36  ;;  %v1935_v58 = vld [vmem:[#allocation2 + $0x1bc] sm:$0xc]  ;;  %v2083_v3 = vld [vmem:[#allocation2 + $0x1d8] sm:$0xf] }
 0x155   : > { %6838 = vmatpush3.bf16.msra.mxu1 %v7479_v13  ;;  %v6238_v22 = vcombine.low %v2139_v24, %v2142_v1  ;;  %v6222_v62 = vcombine.low %v1995_v45, %v1998_v8  ;;  %v1936_v61 = vld [vmem:[#allocation2 + $0x1c0] sm:$0xf]  ;;  %v1715_v13 = vrot.slane %v1648_v21, 5  ;;  %v7486_v24 = vld [vmem:[#allocation10 + $0x270] sm:$0xff]   ;;  %v6200_v1 = vrot.slane %v1794_v39, 11 }
 0x156   : > { %3022 = vmatmul.mubr.bf16.gmra.mrb[68].mxu0 %v6188_v63  ;;  %3119 = vmatmul.mubr.bf16.gmra.mrb[68].mxu1 %v6220_v2  ;;  %v1854_v63 = vsel %vm8276_vm7, %v1852_v51, %v1853_v9  ;;  %v1706_v2 = vsel %vm8347_vm8, %v6182_v23, %v1705_v0  ;;  %v6183_v9 = vrot.slane %v1646_v12, 9  ;;  %v2001_v51 = vrot.slane %v1936_v61, 6  ;;  %v2084_v36 = vld [vmem:[#allocation2 + $0x1dc] sm:$0x1]  ;;  %v1649_v37 = vld [vmem:[#allocation2 + $0x15c] sm:$0xe] }
 0x157   : > { %3029 = vmatprep.mubr.bf16.mxu0 %v6205_v48  ;;  %3126 = vmatprep.mubr.bf16.mxu1 %v6237_v53  ;;  %v6206_v27 = vcombine.low %v1851_v59, %v1854_v63  ;;  %v6199_v48 = vrot.slane %v1791_v7, 11  ;;  %v7482_v53 = vld [vmem:[#allocation10 + $0x228] sm:$0xff]   ;;  %v6190_v4 = vcombine.low %v1706_v2, %v1709_v29  ;;  %v6215_v59 = vrot.slane %v1935_v58, 10  ;;  %v1938_v35 = vld [vmem:[#allocation2 + $0x1d0] sm:$0xc] }
 0x158   : > { %6776 = vmatpush3.bf16.msra.mxu0 %v7471_v50  ;;  %v1793_v50 = vld [vmem:[#allocation2 + $0x1c0] sm:$0x7]  ;;  %6839 = vmatprep.subr.bf16.mxu1 %v7481_v56  ;;  %v2003_v30 = vrot.slane %v2001_v51, 4  ;;  %v2082_v56 = vld [vmem:[#allocation2 + $0x1d4] sm:$0xe]  ;;  %v1865_v29 = vsel %vm8276_vm7, %v6200_v1, %v1864_v54  ;;  %v1866_v45 = vrot.slane %v1864_v54, 4 }
 0x159   : > { %6777 = vmatprep.subr.bf16.mxu0 %v7472_v47  ;;  %v1860_v57 = vrot.slane %v1793_v50, 7  ;;  %v2079_v47 = vld [vmem:[#allocation2 + $0x1c0] sm:$0xe]  ;;  %v1858_v34 = vsel %vm8276_vm7, %v6199_v48, %v1857_v60  ;;  %6840 = vmatpush3.bf16.msra.mxu1 %v7483_v49  ;;  %v2002_v0 = vsel %vm8145_vm2, %v6215_v59, %v2001_v51  ;;  %v6232_v2 = vrot.slane %v2082_v56, 9  ;;  %v7488_v50 = vld [vmem:[#allocation10 + $0x230] sm:$0xff]   ;;  %v7490_v12 = vld [vmem:[#allocation10 + $0x2e8] sm:$0xff]  }
 0x15a   : > { %v6231_v28 = vrot.slane %v2079_v47, 9  ;;  %6841 = vmatprep.subr.bf16.mxu1 %v7484_v16  ;;  %v2152_v8 = vrot.slane %v2083_v3, 5  ;;  %v2155_v7 = vrot.slane %v2084_v36, 5  ;;  %v1650_v48 = vld [vmem:[#allocation2 + $0x160] sm:$0xf]  ;;  %v1726_v54 = vrot.slane %v1653_v38, 5 }
 0x15b   : > { %v1861_v31 = vsel %vm8276_vm7, %v1859_v15, %v1860_v57  ;;  %v1651_v60 = vld [vmem:[#allocation2 + $0x164] sm:$0x1]  ;;  %v6184_v57 = vrot.slane %v1649_v37, 9  ;;  %v1719_v10 = vrot.slane %v1650_v48, 5  ;;  %v1940_v15 = vld [vmem:[#allocation2 + $0x1d8] sm:$0x3] }
 0x15c   : > { %6778 = vmatpush3.bf16.msra.mxu0 %v7474_v18  ;;  %v1647_v18 = vld [vmem:[#allocation2 + $0x14c] sm:$0xf]  ;;  %v2146_v26 = vsel %vm8347_vm8, %v6231_v28, %v2145_v55  ;;  %v6207_v25 = vcombine.low %v1858_v34, %v1861_v31  ;;  %v7489_v47 = vld [vmem:[#allocation10 + $0x2a0] sm:$0xff]   ;;  %v1939_v28 = vld [vmem:[#allocation2 + $0x1d4] sm:$0xf]  ;;  %v1722_v34 = vrot.slane %v1651_v60, 5 }
 0x15d   : > { %6779 = vmatprep.subr.bf16.mxu0 %v7476_v42  ;;  %v1712_v14 = vrot.slane %v1647_v18, 5  ;;  %6842 = vmatpush3.bf16.msra.mxu1 %v7485_v17  ;;  %v1720_v18 = vsel %vm8347_vm8, %v6184_v57, %v1719_v10  ;;  %v1721_v21 = vrot.slane %v1719_v10, 4  ;;  %v1799_v59 = vld [vmem:[#allocation2 + $0x1e8] sm:$0x7]  ;;  %v1941_v56 = vld [vmem:[#allocation2 + $0x1e4] sm:$0xc] }
 0x15e   : > { %3030 = vmatmul.mubr.bf16.gmra.mrb[72].mxu0 %v6189_v41  ;;  %3127 = vmatmul.mubr.bf16.gmra.mrb[72].mxu1 %v6221_v44  ;;  %v2147_v41 = vrot.slane %v2145_v55, 4  ;;  %v1937_v44 = vld [vmem:[#allocation2 + $0x1c4] sm:$0x3]  ;;  %v6216_v55 = vrot.slane %v1938_v35, 10  ;;  %v7494_v48 = vld [vmem:[#allocation10 + $0x238] sm:$0xff]   ;;  %v7495_v35 = vld [vmem:[#allocation10 + $0x2b0] sm:$0xff]  }
 0x15f   : > { %3037 = vmatprep.mubr.bf16.mxu0 %v6206_v27  ;;  %3134 = vmatprep.mubr.bf16.mxu1 %v6238_v22  ;;  %v1714_v52 = vrot.slane %v1712_v14, 4  ;;  %v2004_v42 = vrot.slane %v1937_v44, 6  ;;  %v1713_v23 = vsel %vm8347_vm8, %v6183_v9, %v1712_v14  ;;  %v1796_v27 = vld [vmem:[#allocation2 + $0x1d4] sm:$0x7]  ;;  %v2011_v9 = vrot.slane %v1940_v15, 6 }
 0x160   : > { %6780 = vmatpush3.bf16.msra.mxu0 %v7478_v46  ;;  %v2149_v32 = vsel %vm8347_vm8, %v2147_v41, %v2148_v11  ;;  %6843 = vmatprep.subr.bf16.mxu1 %v7487_v40  ;;  %v1867_v22 = vrot.slane %v1796_v27, 7  ;;  %v2008_v11 = vrot.slane %v1939_v28, 6  ;;  %v7491_v41 = vld [vmem:[#allocation10 + $0x2a8] sm:$0xff]   ;;  %v1723_v14 = vsel %vm8347_vm8, %v1721_v21, %v1722_v34  ;;  %v1798_v44 = vld [vmem:[#allocation2 + $0x1e4] sm:$0xf]  ;;  %v7496_v21 = vld [vmem:[#allocation10 + $0x2f8] sm:$0xff]  }
 0x161   : > { %6781 = vmatprep.subr.bf16.mxu0 %v7480_v19  ;;  %v6239_v20 = vcombine.low %v2146_v26, %v2149_v32  ;;  %v1716_v46 = vsel %vm8347_vm8, %v1714_v52, %v1715_v13  ;;  %v2005_v63 = vsel %vm8145_vm2, %v2003_v30, %v2004_v42  ;;  %6844 = vmatpush3.bf16.msra.mxu1 %v7489_v47  ;;  %v1797_v13 = vld [vmem:[#allocation2 + $0x1e0] sm:$0x8]  ;;  %v1871_v32 = vrot.slane %v1798_v44, 7  ;;  %v2085_v42 = vld [vmem:[#allocation2 + $0x1e8] sm:$0xe] }
 0x162   : > { %v6191_v6 = vcombine.low %v1713_v23, %v1716_v46  ;;  %v6223_v19 = vcombine.low %v2002_v0, %v2005_v63  ;;  %v2009_v31 = vsel %vm8145_vm2, %v6216_v55, %v2008_v11  ;;  %v2010_v26 = vrot.slane %v2008_v11, 4  ;;  %6845 = vmatprep.subr.bf16.mxu1 %v7490_v12  ;;  %v2087_v23 = vld [vmem:[#allocation2 + $0x1f0] sm:$0x1]  ;;  %v1652_v40 = vld [vmem:[#allocation2 + $0x170] sm:$0xe] }
 0x163   : > { %v6192_v58 = vcombine.low %v1720_v18, %v1723_v14  ;;  %v6201_v51 = vrot.slane %v1797_v13, 11  ;;  %v1874_v52 = vrot.slane %v1799_v59, 7  ;;  %v6233_v0 = vrot.slane %v2085_v42, 9  ;;  %v1801_v34 = vld [vmem:[#allocation2 + $0x1f8] sm:$0xf] }
 0x164   : > { %6782 = vmatpush3.bf16.msra.mxu0 %v7482_v53  ;;  %v1868_v53 = vsel %vm8276_vm7, %v1866_v45, %v1867_v22  ;;  %v2012_v61 = vsel %vm8145_vm2, %v2010_v26, %v2011_v9  ;;  %v1873_v63 = vrot.slane %v1871_v32, 4  ;;  %v2162_v39 = vrot.slane %v2087_v23, 5  ;;  %v7493_v22 = vld [vmem:[#allocation10 + $0x2f0] sm:$0xff]   ;;  %v1802_v15 = vld [vmem:[#allocation2 + $0x1fc] sm:$0x7] }
 0x165   : > { %6783 = vmatprep.subr.bf16.mxu0 %v7486_v24  ;;  %v6208_v49 = vcombine.low %v1865_v29, %v1868_v53  ;;  %6846 = vmatpush3.bf16.msra.mxu1 %v7491_v41  ;;  %v7492_v24 = vld [vmem:[#allocation10 + $0x278] sm:$0xff]   ;;  %v1872_v46 = vsel %vm8276_vm7, %v6201_v51, %v1871_v32  ;;  %v6185_v1 = vrot.slane %v1652_v40, 9  ;;  %v1943_v29 = vld [vmem:[#allocation2 + $0x1ec] sm:$0x3]  ;;  %v6217_v45 = vrot.slane %v1941_v56, 10 }
 0x166   : > { %3038 = vmatmul.mubr.bf16.gmra.mrb[76].mxu0 %v6190_v4  ;;  %3135 = vmatmul.mubr.bf16.gmra.mrb[76].mxu1 %v6222_v62  ;;  %v2153_v4 = vsel %vm8347_vm8, %v6232_v2, %v2152_v8  ;;  %v2154_v62 = vrot.slane %v2152_v8, 4  ;;  %v1875_v3 = vsel %vm8276_vm7, %v1873_v63, %v1874_v52  ;;  %v1942_v2 = vld [vmem:[#allocation2 + $0x1e8] sm:$0xf]  ;;  %v2018_v47 = vrot.slane %v1943_v29, 6  ;;  %v2088_v18 = vld [vmem:[#allocation2 + $0x1fc] sm:$0xe] }
 0x167   : > { %3045 = vmatprep.mubr.bf16.mxu0 %v6207_v25  ;;  %3142 = vmatprep.mubr.bf16.mxu1 %v6239_v20  ;;  %v6224_v25 = vcombine.low %v2009_v31, %v2012_v61  ;;  %v2086_v20 = vld [vmem:[#allocation2 + $0x1ec] sm:$0xf]  ;;  %v6209_v8 = vcombine.low %v1872_v46, %v1875_v3  ;;  %v1727_v37 = vsel %vm8347_vm8, %v6185_v1, %v1726_v54  ;;  %v2015_v57 = vrot.slane %v1942_v2, 6  ;;  %v2089_v9 = vld [vmem:[#allocation2 + $0x200] sm:$0xf]  ;;  %v7497_v26 = vld [vmem:[#allocation10 + $0x2b8] sm:$0xff]  }
 0x168   : > { %6784 = vmatpush3.bf16.msra.mxu0 %v7488_v50  ;;  %v2156_v16 = vsel %vm8347_vm8, %v2154_v62, %v2155_v7  ;;  %v2159_v30 = vrot.slane %v2086_v20, 5  ;;  %v1728_v50 = vrot.slane %v1726_v54, 4  ;;  %6847 = vmatprep.subr.bf16.mxu1 %v7493_v22  ;;  %v1878_v12 = vrot.slane %v1801_v34, 7  ;;  %v1656_v13 = vld [vmem:[#allocation2 + $0x188] sm:$0xf]  ;;  %v7498_v1 = vld [vmem:[#allocation2 + $0xf0] sm:$0xff]  }
 0x169   : > { %v6240_v17 = vcombine.low %v2153_v4, %v2156_v16  ;;  %6785 = vmatprep.subr.bf16.mxu0 %v7492_v24  ;;  %v2016_v62 = vsel %vm8145_vm2, %v6217_v45, %v2015_v57  ;;  %v2017_v10 = vrot.slane %v2015_v57, 4  ;;  %6848 = vmatpush3.bf16.msra.mxu1 %v7495_v35  ;;  %v1881_v16 = vrot.slane %v1802_v15, 7  ;;  %v1657_v44 = vld [vmem:[#allocation2 + $0x18c] sm:$0x1]  ;;  %v1944_v42 = vld [vmem:[#allocation2 + $0x1f8] sm:$0xc] }
 0x16a   : > { %v2161_v27 = vrot.slane %v2159_v30, 4  ;;  %v6234_v31 = vrot.slane %v2088_v18, 9  ;;  %v1880_v14 = vrot.slane %v1878_v12, 4  ;;  %6849 = vmatprep.subr.bf16.mxu1 %v7496_v21  ;;  %v1733_v52 = vrot.slane %v1656_v13, 5  ;;  %v1945_v20 = vld [vmem:[#allocation2 + $0x1fc] sm:$0xf] }
 0x16b   : > { %v2019_v28 = vsel %vm8145_vm2, %v2017_v10, %v2018_v47  ;;  %v6218_v40 = vrot.slane %v1944_v42, 10  ;;  %v2022_v46 = vrot.slane %v1945_v20, 6  ;;  %v7501_v54 = vld [vmem:[#allocation10 + $0x340] sm:$0xff]   ;;  %v3336_v29 = vld [vmem:[#allocation2 + $0x8] sm:$0xf]  ;;  %v7504_v21 = vld [vmem:[#allocation2 + $0x14] sm:$0xff]  }
 0x16c   : > { %v2163_v7 = vsel %vm8347_vm8, %v2161_v27, %v2162_v39  ;;  %6786 = vmatpush3.bf16.msra.mxu0 %v7494_v48  ;;  %v6225_v55 = vcombine.low %v2016_v62, %v2019_v28  ;;  %v1882_v51 = vsel %vm8276_vm7, %v1880_v14, %v1881_v16  ;;  %v1735_v5 = vrot.slane %v1733_v52, 4  ;;  %v3335_v2 = vld [vmem:[#allocation2 + $0x4] sm:$0xc]  ;;  %v3337_v45 = vld [vmem:[#allocation2 + $0xc] sm:$0x3]  ;;  %v7508_v13 = vld [vmem:[#allocation2 + $0x118] sm:$0xff]  }
 0x16d   : > { %6850 = vmatpush3.bf16.msra.mxu1 %v7497_v26  ;;  %v2024_v27 = vrot.slane %v2022_v46, 4  ;;  %6899 = vmatprep.subr.bf16.mxu0 %v7501_v54  ;;  %v7499_v48 = vld [vmem:[#allocation2] sm:$0xff]   ;;  %v7507_v16 = vld [vmem:[#allocation10 + $0x308] sm:$0xff]   ;;  %v7516_v54 = vld [vmem:[#allocation10 + $0x358] sm:$0xff]  }
 0x16e   : > { %3046 = vmatmul.mubr.bf16.gmra.mrb[80].mxu0 %v6191_v6  ;;  %3143 = vmatmul.mubr.bf16.gmra.mrb[80].mxu1 %v6223_v19  ;;  %v1654_v6 = vld [vmem:[#allocation2 + $0x178] sm:$0x1]  ;;  %v2160_v19 = vsel %vm8347_vm8, %v6233_v0, %v2159_v30  ;;  %v1736_v0 = vrot.slane %v1657_v44, 5  ;;  %v1946_v30 = vld [vmem:[#allocation2 + $0x200] sm:$0x3]  ;;  %v7503_v34 = vld [vmem:[#allocation2 + $0x104] sm:$0xff]  }
 0x16f   : > { %3053 = vmatprep.mubr.bf16.mxu0 %v6208_v49  ;;  %3150 = vmatprep.mubr.bf16.mxu1 %v6240_v17  ;;  %v1729_v36 = vrot.slane %v1654_v6, 5  ;;  %v6241_v60 = vcombine.low %v2160_v19, %v2163_v7  ;;  %v1800_v49 = vld [vmem:[#allocation2 + $0x1f4] sm:$0x8]  ;;  %v2090_v17 = vld [vmem:[#allocation2 + $0x204] sm:$0x1]  ;;  %v2025_v38 = vrot.slane %v1946_v30, 6  ;;  %v2023_v19 = vsel %vm8145_vm2, %v6218_v40, %v2022_v46 }
 0x170   : > { %v6202_v11 = vrot.slane %v1800_v49, 11  ;;  %v2169_v61 = vrot.slane %v2090_v17, 5  ;;  %v1737_v56 = vsel %vm8347_vm8, %v1735_v5, %v1736_v0  ;;  %v3385_v7 = vrot.slane %v3336_v29, 6  ;;  %v7502_v57 = vld [vmem:[#allocation10 + $0x300] sm:$0xff]   ;;  %v3342_v17 = vld [vmem:[#allocation2 + $0x30] sm:$0xf] }
 0x171   : > { %v1730_v53 = vsel %vm8347_vm8, %v1728_v50, %v1729_v36  ;;  %v2026_v3 = vsel %vm8145_vm2, %v2024_v27, %v2025_v38  ;;  %v3340_v62 = vld [vmem:[#allocation2 + $0x20] sm:$0x3]  ;;  %v3399_v14 = vrot.slane %v3342_v17, 6  ;;  %v3345_v42 = vld [vmem:[#allocation2 + $0x44] sm:$0xf]  ;;  %v7509_v0 = vld [vmem:[#allocation2 + $0x28] sm:$0xff]  }
 0x172   : > { %v6193_v4 = vcombine.low %v1727_v37, %v1730_v53  ;;  %v1879_v41 = vsel %vm8276_vm7, %v6202_v11, %v1878_v12  ;;  %v6226_v36 = vcombine.low %v2023_v19, %v2026_v3  ;;  %v3388_v37 = vrot.slane %v3337_v45, 6  ;;  %v3338_v53 = vld [vmem:[#allocation2 + $0x18] sm:$0xc]  ;;  %v7506_v11 = vld [vmem:[#allocation10 + $0x348] sm:$0xff]   ;;  %v7505_v26 = vld [vmem:[#allocation2 + $0x20] sm:$0xff]  }
 0x173   : > { %v6210_v23 = vcombine.low %v1879_v41, %v1882_v51  ;;  %v3387_v50 = vrot.slane %v3385_v7, 4  ;;  %v6318_v35 = vrot.slane %v3338_v53, 10  ;;  %v3395_v49 = vrot.slane %v3340_v62, 6  ;;  %v3346_v20 = vld [vmem:[#allocation2 + $0x48] sm:$0x3]  ;;  %v7510_v46 = vld [vmem:[#allocation2 + $0x34] sm:$0xff]  }
 0x174   : > { %v3406_v30 = vrot.slane %v3345_v42, 6  ;;  %v3409_v40 = vrot.slane %v3346_v20, 6  ;;  %v7513_v19 = vld [vmem:[#allocation2 + $0x12c] sm:$0xff]   ;;  %v7518_v29 = vld [vmem:[#allocation10 + $0x318] sm:$0xff]  }
 0x175   : > { %v3389_v47 = vsel %vm8145_vm2, %v3387_v50, %v3388_v37  ;;  %v3348_v37 = vld [vmem:[#allocation2 + $0x58] sm:$0xf]  ;;  %v7515_v53 = vld [vmem:[#allocation2 + $0x48] sm:$0xff]  }
 0x176   : > { %3054 = vmatmul.mubr.bf16.gmra.mrb[84].mxu0 %v6192_v58  ;;  %3151 = vmatmul.mubr.bf16.gmra.mrb[84].mxu1 %v6224_v25  ;;  %v2166_v58 = vrot.slane %v2089_v9, 5  ;;  %v1655_v25 = vld [vmem:[#allocation2 + $0x184] sm:$0xe]  ;;  %v3341_v9 = vld [vmem:[#allocation2 + $0x2c] sm:$0xc]  ;;  %v3408_v5 = vrot.slane %v3406_v30, 4 }
 0x177   : > { %3061 = vmatprep.mubr.bf16.mxu0 %v6209_v8  ;;  %3158 = vmatprep.mubr.bf16.mxu1 %v6241_v60  ;;  %v6186_v59 = vrot.slane %v1655_v25, 9  ;;  %v6317_v8 = vrot.slane %v3335_v2, 10  ;;  %v7500_v60 = vld [vmem:[#allocation2 + $0xc] sm:$0xff]   ;;  %v6319_v41 = vrot.slane %v3341_v9, 10  ;;  %v3401_v25 = vrot.slane %v3399_v14, 4  ;;  %v7517_v2 = vld [vmem:[#allocation10 + $0x3c0] sm:$0xff]  }
 0x178   : > { %v2167_v24 = vsel %vm8347_vm8, %v6234_v31, %v2166_v58  ;;  %v2168_v32 = vrot.slane %v2166_v58, 4  ;;  %v3343_v31 = vld [vmem:[#allocation2 + $0x34] sm:$0x3]  ;;  %6963 = vmatprep.subr.bf16.mxu1 %v7517_v2  ;;  %v7525_v9 = vld [vmem:[#allocation10 + $0x320] sm:$0xff]  }
 0x179   : > { %v1734_v39 = vsel %vm8347_vm8, %v6186_v59, %v1733_v52  ;;  %v3386_v43 = vsel %vm8145_vm2, %v6317_v8, %v3385_v7  ;;  %v3402_v58 = vrot.slane %v3343_v31, 6  ;;  %v7511_v59 = vld [vmem:[#allocation10 + $0x350] sm:$0xff]   ;;  %v3344_v52 = vld [vmem:[#allocation2 + $0x40] sm:$0xc] }
 0x17a   : > { %v2170_v63 = vsel %vm8347_vm8, %v2168_v32, %v2169_v61  ;;  %v6194_v22 = vcombine.low %v1734_v39, %v1737_v56  ;;  %v6325_v10 = vcombine.low %v3386_v43, %v3389_v47  ;;  %v3400_v61 = vsel %vm8145_vm2, %v6319_v41, %v3399_v14  ;;  %v8938_v32 = vld [vmem:[%s9486_s6] ss:$0 sm:$0xff]  ;;  %v3347_v7 = vld [vmem:[#allocation2 + $0x54] sm:$0xc]  ;;  %v3349_v43 = vld [vmem:[#allocation2 + $0x5c] sm:$0x3] }
 0x17b   : > { %v6242_v6 = vcombine.low %v2167_v24, %v2170_v63  ;;  %v3403_v44 = vsel %vm8145_vm2, %v3401_v25, %v3402_v58  ;;  %v7512_v24 = vld [vmem:[#allocation10 + $0x310] sm:$0xff]   ;;  %v7519_v8 = vld [vmem:[#allocation10 + $0x380] sm:$0xff]   ;;  %v6321_v50 = vrot.slane %v3347_v7, 10  ;;  %v3416_v47 = vrot.slane %v3349_v43, 6  ;;  %v3350_v14 = vld [vmem:[#allocation2 + $0x68] sm:$0xc] }
 0x17c   : > { %v6327_v51 = vcombine.low %v3400_v61, %v3403_v44  ;;  %v7521_v41 = vld [vmem:[#allocation2 + $0x50] sm:$0xff]   ;;  %v3351_v58 = vld [vmem:[#allocation2 + $0x6c] sm:$0xf]  ;;  %v6322_v44 = vrot.slane %v3350_v14, 10  ;;  %v8979_v2 = vld [vmem:[%s9486_s6 + $0x3] ss:$0 sm:$0xff] }
 0x17d   : > { %v3352_v61 = vld [vmem:[#allocation2 + $0x70] sm:$0x3]  ;;  %v7534_v7 = vld [vmem:[#allocation10 + $0x3d8] sm:$0xff]  }
 0x17e   : > { %3062 = vmatmul.mubr.bf16.gmra.mrb[88].mxu0 %v6193_v4  ;;  %3159 = vmatmul.mubr.bf16.gmra.mrb[88].mxu1 %v6225_v55  ;;  %v3339_v4 = vld [vmem:[#allocation2 + $0x1c] sm:$0xf]  ;;  %v7539_v14 = vld [vmem:[#allocation10 + $0x370] sm:$0xff]  }
 0x17f   : > { %3069 = vmatprep.mubr.bf16.mxu0 %v6210_v23  ;;  %3166 = vmatprep.mubr.bf16.mxu1 %v6242_v6  ;;  %v3392_v28 = vrot.slane %v3339_v4, 6  ;;  %v6320_v23 = vrot.slane %v3344_v52, 10  ;;  %v7527_v52 = vld [vmem:[#allocation2 + $0x154] sm:$0xff]  }
 0x181   : > { %v3393_v15 = vsel %vm8145_vm2, %v6318_v35, %v3392_v28  ;;  %v3394_v55 = vrot.slane %v3392_v28, 4  ;;  %v3407_v39 = vsel %vm8145_vm2, %v6320_v23, %v3406_v30  ;;  %v7520_v35 = vld [vmem:[#allocation2 + $0x140] sm:$0xff]  }
 0x183   : > { %v3396_v12 = vsel %vm8145_vm2, %v3394_v55, %v3395_v49 }
 0x184   : > { %v6326_v18 = vcombine.low %v3393_v15, %v3396_v12 }
 0x186   : > { %3070 = vmatmul.mubr.bf16.gmra.mrb[92].mxu0 %v6194_v22  ;;  %3167 = vmatmul.mubr.bf16.gmra.mrb[92].mxu1 %v6226_v36 }
 0x187   : > { %4689 = vmatprep.mubr.bf16.mxu1 %v7498_v1  ;;  %4592 = vmatprep.mubr.bf16.mxu0 %v6325_v10  ;;  %v3410_v1 = vsel %vm8145_vm2, %v3408_v5, %v3409_v40  ;;  %v7530_v5 = vld [vmem:[#allocation10 + $0x368] sm:$0xff]  }
 0x188   : > { %v6328_v36 = vcombine.low %v3407_v39, %v3410_v1  ;;  %v7532_v1 = vld [vmem:[#allocation10 + $0x328] sm:$0xff]  }
 0x18e   : > { %4593 = vmatmul.mubr.bf16.vlgmr.msra.gmra.mrb[96].mxu0 %v7499_v48  ;;  %4690 = vmatmul.mubr.bf16.vlgmr.msra.gmra.mrb[96].mxu1 %v7500_v60  ;;  %v3413_v48 = vrot.slane %v3348_v37, 6 }
 0x18f   : > { %6900 = vmatpush3.bf16.msra.mxu0 %v7502_v57  ;;  %4697 = vmatprep.mubr.bf16.mxu1 %v7503_v34  ;;  %v7514_v57 = vld [vmem:[#allocation2 + $0x3c] sm:$0xff]  }
 0x190   : > { %6901 = vmatprep.subr.bf16.mxu0 %v7506_v11  ;;  %4600 = vmatprep.mubr.bf16.mxu0 %v6326_v18  ;;  %v3414_v62 = vsel %vm8145_vm2, %v6321_v50, %v3413_v48  ;;  %v3415_v10 = vrot.slane %v3413_v48, 4  ;;  %v7523_v34 = vld [vmem:[#allocation10 + $0x360] sm:$0xff]   ;;  %v7524_v11 = vld [vmem:[#allocation10 + $0x3c8] sm:$0xff]   ;;  %v3353_v50 = vld [vmem:[#allocation2 + $0x7c] sm:$0xc] }
 0x191   : > { %6964 = vmatpush3.bf16.msra.mxu1 %v7519_v8  ;;  %v3354_v48 = vld [vmem:[#allocation2 + $0x80] sm:$0xf] }
 0x192   : > { %v3417_v55 = vsel %vm8145_vm2, %v3415_v10, %v3416_v47  ;;  %6965 = vmatprep.subr.bf16.mxu1 %v7524_v11  ;;  %v6323_v10 = vrot.slane %v3353_v50, 10 }
 0x193   : > { %6902 = vmatpush3.bf16.msra.mxu0 %v7507_v16 }
 0x194   : > { %6903 = vmatprep.subr.bf16.mxu0 %v7511_v59  ;;  %v3420_v59 = vrot.slane %v3351_v58, 6 }
 0x196   : > { %4601 = vmatmul.mubr.bf16.gmra.mrb[100].mxu0 %v7504_v21  ;;  %4698 = vmatmul.mubr.bf16.gmra.mrb[100].mxu1 %v7505_v26  ;;  %v6329_v21 = vcombine.low %v3414_v62, %v3417_v55  ;;  %v7526_v26 = vld [vmem:[#allocation10 + $0x388] sm:$0xff]   ;;  %v3421_v23 = vsel %vm8145_vm2, %v6322_v44, %v3420_v59  ;;  %v3355_v62 = vld [vmem:[#allocation2 + $0x84] sm:$0x3]  ;;  %v7536_v55 = vld [vmem:[#allocation10 + $0x398] sm:$0xff]  }
 0x197   : > { %4705 = vmatprep.mubr.bf16.mxu1 %v7508_v13  ;;  %4608 = vmatprep.mubr.bf16.mxu0 %v6327_v51  ;;  %v7522_v13 = vld [vmem:[#allocation2 + $0x5c] sm:$0xff]   ;;  %v3423_v51 = vrot.slane %v3352_v61, 6 }
 0x198   : > { %6904 = vmatpush3.bf16.msra.mxu0 %v7512_v24  ;;  %6966 = vmatpush3.bf16.msra.mxu1 %v7526_v26  ;;  %v7537_v61 = vld [vmem:[#allocation2 + $0x78] sm:$0xff]  }
 0x199   : > { %6905 = vmatprep.subr.bf16.mxu0 %v7516_v54  ;;  %v7528_v54 = vld [vmem:[#allocation2 + $0x64] sm:$0xff]  }
 0x19c   : > { %6906 = vmatpush3.bf16.msra.mxu0 %v7518_v29 }
 0x19d   : > { %6907 = vmatprep.subr.bf16.mxu0 %v7523_v34  ;;  %v3427_v34 = vrot.slane %v3354_v48, 6  ;;  %v7544_v48 = vld [vmem:[#allocation2 + $0x17c] sm:$0xff]  }
 0x19e   : > { %4609 = vmatmul.mubr.bf16.gmra.mrb[104].mxu0 %v7509_v0  ;;  %4706 = vmatmul.mubr.bf16.gmra.mrb[104].mxu1 %v7510_v46  ;;  %v3422_v0 = vrot.slane %v3420_v59, 4 }
 0x19f   : > { %4616 = vmatprep.mubr.bf16.mxu0 %v6328_v36  ;;  %4713 = vmatprep.mubr.bf16.mxu1 %v7513_v19 }
 0x1a0   : > { %6908 = vmatpush3.bf16.msra.mxu0 %v7525_v9  ;;  %v3424_v39 = vsel %vm8145_vm2, %v3422_v0, %v3423_v51  ;;  %v3428_v9 = vsel %vm8145_vm2, %v6323_v10, %v3427_v34 }
 0x1a1   : > { %v708_v63 = vpop.f32.mrb[0].mxu0  ;;  %v8962_v17 = vpop.f32.mrb[0].mxu1  ;;  %v6330_v19 = vcombine.low %v3421_v23, %v3424_v39  ;;  %6909 = vmatprep.subr.bf16.mxu0 %v7530_v5 }
 0x1a2   : > { %v987_v38 = vadd.f32 %v8938_v32, %v708_v63  ;;  %v8943_v6 = vpop.f32.mrb[1].mxu0  ;;  %9552 = vst [vmem:[#allocation34_spill] sm:$0xff] %v8962_v17  ;;  %v823_v36 = vpop.f32.mrb[1].mxu1  ;;  %v7590_v17 = vld [vmem:[#allocation13 + $0x50] sm:$0xff]  }
 0x1a3   : > { %v712_v27 = vpop.f32.mrb[2].mxu0  ;;  %v8984_v8 = vpop.f32.mrb[2].mxu1 }
 0x1a4   : > { %v1003_v56 = vmax.f32 %v987_v38, 0.0  ;;  %v988_v22 = vadd.f32 %v8938_v32, %v712_v27  ;;  %v8948_v3 = vpop.f32.mrb[3].mxu0  ;;  %v7531_v38 = vld [vmem:[#allocation10 + $0x3d0] sm:$0xff]   ;;  %6910 = vmatpush3.bf16.msra.mxu0 %v7532_v1  ;;  %9553 = vst [vmem:[#allocation35_spill] sm:$0xff] %v8984_v8  ;;  %v827_v43 = vpop.f32.mrb[3].mxu1 }
 0x1a5   : > { %6967 = vmatprep.subr.bf16.mxu1 %v7531_v38  ;;  %6911 = vmatprep.subr.bf16.mxu0 %v7539_v14  ;;  %v7543_v38 = vld [vmem:[#allocation10 + $0x3e8] sm:$0xff]   ;;  %v7549_v14 = vld [vmem:[#allocation10 + $0x338] sm:$0xff]  }
 0x1a6   : > { %v1004_v45 = vmax.f32 %v988_v22, 0.0  ;;  %4617 = vmatmul.mubr.bf16.gmra.mrb[108].mxu0 %v7514_v57  ;;  %4714 = vmatmul.mubr.bf16.gmra.mrb[108].mxu1 %v7515_v53  ;;  %v7533_v22 = vld [vmem:[#allocation10 + $0x390] sm:$0xff]  }
 0x1a7   : > { %4624 = vmatprep.mubr.bf16.mxu0 %v6329_v21  ;;  %4721 = vmatprep.mubr.bf16.mxu1 %v7520_v35  ;;  %v7535_v35 = vld [vmem:[#allocation2 + $0x168] sm:$0xff]  }
 0x1a8   : > { %v8950_v60 = vpack.c.bf16 %v1004_v45, %v1003_v56  ;;  %v7529_v56 = vld [vmem:[#allocation2 + $0x70] sm:$0xff]   ;;  %v5044_v45 = vadd.f32 %v8979_v2, %v823_v36  ;;  %6968 = vmatpush3.bf16.msra.mxu1 %v7533_v22 }
 0x1a9   : > { %v718_v4 = vpop.f32.mrb[4].mxu0  ;;  %6969 = vmatprep.subr.bf16.mxu1 %v7534_v7  ;;  %v9001_v51 = vpop.f32.mrb[4].mxu1  ;;  %v3356_v36 = vld [vmem:[#allocation2 + $0x90] sm:$0xc] }
 0x1aa   : > { %v989_v28 = vadd.f32 %v8938_v32, %v718_v4  ;;  %v8955_v49 = vpop.f32.mrb[5].mxu0  ;;  %v5060_v57 = vmax.f32 %v5044_v45, 0.0  ;;  %v5045_v4 = vadd.f32 %v8979_v2, %v827_v43  ;;  %9554 = vst [vmem:[#allocation36_spill] sm:$0xff] %v9001_v51  ;;  %v3357_v45 = vld [vmem:[#allocation2 + $0x94] sm:$0xf]  ;;  %v6324_v43 = vrot.slane %v3356_v36, 10 }
 0x1ab   : > { %v722_v15 = vpop.f32.mrb[6].mxu0  ;;  %v3434_v50 = vrot.slane %v3357_v45, 6 }
 0x1ac   : > { %v1005_v12 = vmax.f32 %v989_v28, 0.0  ;;  %v990_v16 = vadd.f32 %v8938_v32, %v722_v15  ;;  %v8960_v18 = vpop.f32.mrb[7].mxu0  ;;  %v3430_v15 = vrot.slane %v3355_v62, 6  ;;  %v5061_v11 = vmax.f32 %v5045_v4, 0.0  ;;  %6970 = vmatpush3.bf16.msra.mxu1 %v7536_v55 }
 0x1ad   : > { %v3435_v62 = vsel %vm8145_vm2, %v6324_v43, %v3434_v50  ;;  %v3436_v10 = vrot.slane %v3434_v50, 4  ;;  %v7556_v50 = vld [vmem:[#allocation2 + $0x1ec] sm:$0xff]  }
 0x1ae   : > { %v1006_v31 = vmax.f32 %v990_v16, 0.0  ;;  %4625 = vmatmul.mubr.bf16.gmra.mrb[112].mxu0 %v7521_v41  ;;  %4722 = vmatmul.mubr.bf16.gmra.mrb[112].mxu1 %v7522_v13  ;;  %v8995_v26 = vpack.c.bf16 %v5061_v11, %v5060_v57  ;;  %v7538_v13 = vld [vmem:[#allocation2 + $0x84] sm:$0xff]   ;;  %v7547_v11 = vld [vmem:[#allocation2 + $0x98] sm:$0xff]  }
 0x1af   : > { %4729 = vmatprep.mubr.bf16.mxu1 %v7527_v52  ;;  %4632 = vmatprep.mubr.bf16.mxu0 %v6330_v19  ;;  %v833_v52 = vpop.f32.mrb[5].mxu1 }
 0x1b0   : > { %v8964_v25 = vpack.c.bf16 %v1006_v31, %v1005_v12  ;;  %v3429_v31 = vrot.slane %v3427_v34, 4  ;;  %v5046_v23 = vadd.f32 %v8979_v2, %v833_v52  ;;  %v7546_v34 = vld [vmem:[#allocation2 + $0x8c] sm:$0xff]  }
 0x1b1   : > { %v728_v24 = vpop.f32.mrb[8].mxu0  ;;  %v7551_v52 = vld [vmem:[#allocation10 + $0x3b0] sm:$0xff]  }
 0x1b2   : > { %v991_v42 = vadd.f32 %v8938_v32, %v728_v24  ;;  %v8967_v20 = vpop.f32.mrb[9].mxu0  ;;  %v3431_v58 = vsel %vm8145_vm2, %v3429_v31, %v3430_v15  ;;  %v7540_v24 = vld [vmem:[#allocation10 + $0x330] sm:$0xff]   ;;  %v5062_v19 = vmax.f32 %v5046_v23, 0.0 }
 0x1b3   : > { %v732_v30 = vpop.f32.mrb[10].mxu0  ;;  %v6331_v59 = vcombine.low %v3428_v9, %v3431_v58  ;;  %6912 = vmatpush3.bf16.msra.mxu0 %v7540_v24  ;;  %v7548_v9 = vld [vmem:[#allocation10 + $0x378] sm:$0xff]  }
 0x1b4   : > { %v1007_v40 = vmax.f32 %v991_v42, 0.0  ;;  %v992_v46 = vadd.f32 %v8938_v32, %v732_v30  ;;  %v8972_v63 = vpop.f32.mrb[11].mxu0  ;;  %v7541_v42 = vld [vmem:[#allocation10 + $0x3e0] sm:$0xff]   ;;  %v9004_v30 = vpop.f32.mrb[6].mxu1  ;;  %6913 = vmatprep.subr.bf16.mxu0 %v7548_v9 }
 0x1b5   : > { %9555 = vst [vmem:[#allocation37_spill] sm:$0xff] %v9004_v30  ;;  %6971 = vmatprep.subr.bf16.mxu1 %v7541_v42  ;;  %v837_v5 = vpop.f32.mrb[7].mxu1  ;;  %v3790_v30 = vld [vmem:[#allocation2 + $0x274] sm:$0xf] }
 0x1b6   : > { %v1008_v27 = vmax.f32 %v992_v46, 0.0  ;;  %4633 = vmatmul.mubr.bf16.gmra.mrb[116].mxu0 %v7528_v54  ;;  %4730 = vmatmul.mubr.bf16.gmra.mrb[116].mxu1 %v7529_v56  ;;  %v7542_v46 = vld [vmem:[#allocation10 + $0x3a0] sm:$0xff]   ;;  %v9019_v15 = vpop.f32.mrb[8].mxu1 }
 0x1b7   : > { %4737 = vmatprep.mubr.bf16.mxu1 %v7535_v35  ;;  %4640 = vmatprep.mubr.bf16.mxu0 %v6331_v59  ;;  %v7545_v35 = vld [vmem:[#allocation10 + $0x3a8] sm:$0xff]   ;;  %9557 = vst [vmem:[#allocation39_spill] sm:$0xff] %v9019_v15  ;;  %v7550_v59 = vld [vmem:[#allocation10 + $0x3f0] sm:$0xff]  }
 0x1b8   : > { %v8981_v29 = vpack.c.bf16 %v1008_v27, %v1007_v40  ;;  %v5047_v27 = vadd.f32 %v8979_v2, %v837_v5  ;;  %6972 = vmatpush3.bf16.msra.mxu1 %v7542_v46  ;;  %6914 = vmatpush3.bf16.msra.mxu0 %v7549_v14  ;;  %v7552_v46 = vld [vmem:[#allocation10 + $0x3f8] sm:$0xff]  }
 0x1b9   : > { %v738_v37 = vpop.f32.mrb[12].mxu0  ;;  %6973 = vmatprep.subr.bf16.mxu1 %v7543_v38  ;;  %v7553_v38 = vld [vmem:[#allocation2 + $0x1e0] sm:$0xff]  }
 0x1ba   : > { %v993_v47 = vadd.f32 %v8938_v32, %v738_v37  ;;  %v8987_v53 = vpop.f32.mrb[13].mxu0  ;;  %v5063_v7 = vmax.f32 %v5047_v27, 0.0  ;;  %v3358_v37 = vld [vmem:[#allocation2 + $0x98] sm:$0x3] }
 0x1bb   : > { %v742_v28 = vpop.f32.mrb[14].mxu0 }
 0x1bc   : > { %v994_v12 = vadd.f32 %v8938_v32, %v742_v28  ;;  %v8991_v16 = vpop.f32.mrb[15].mxu0  ;;  %v1009_v21 = vmax.f32 %v993_v47, 0.0  ;;  %v3437_v47 = vrot.slane %v3358_v37, 6  ;;  %v9013_v4 = vpack.c.bf16 %v5063_v7, %v5062_v19  ;;  %6974 = vmatpush3.bf16.msra.mxu1 %v7545_v35  ;;  %v7555_v37 = vld [vmem:[#allocation2 + $0xfc] sm:$0xff]  }
 0x1bd   : > { %6975 = vmatprep.subr.bf16.mxu1 %v7550_v59  ;;  %v9506_v19 = vmov 0.0  }
 0x1be   : > { %v1010_v41 = vmax.f32 %v994_v12, 0.0  ;;  %4641 = vmatmul.mubr.bf16.gmra.mrb[120].mxu0 %v7537_v61  ;;  %4738 = vmatmul.mubr.bf16.gmra.mrb[120].mxu1 %v7538_v13  ;;  %9556 = vst [vmem:[#allocation38_spill] sm:$0xff] %v9013_v4  ;;  %v3438_v55 = vsel %vm8145_vm2, %v3436_v10, %v3437_v47  ;;  %v843_v12 = vpop.f32.mrb[9].mxu1  ;;  %v3789_v4 = vld [vmem:[#allocation2 + $0x270] sm:$0xc] }
 0x1bf   : > { %4745 = vmatprep.mubr.bf16.mxu1 %v7544_v48  ;;  %v5048_v31 = vadd.f32 %v8979_v2, %v843_v12  ;;  %v9025_v61 = vpop.f32.mrb[10].mxu1  ;;  %7180 = vmatprep.subr.bf16.mxu0 %v9506_v19  ;;  %v3770_v12 = vld [vmem:[#allocation2 + $0x1ec] sm:$0x3] }
 0x1c0   : > { %v8999_v44 = vpack.c.bf16 %v1010_v41, %v1009_v21  ;;  %v6332_v21 = vcombine.low %v3435_v62, %v3438_v55  ;;  %9558 = vst [vmem:[#allocation40_spill] sm:$0xff] %v9025_v61  ;;  %v847_v23 = vpop.f32.mrb[11].mxu1  ;;  %6976 = vmatpush3.bf16.msra.mxu1 %v7551_v52  ;;  %v7557_v62 = vld [vmem:[#allocation12] sm:$0xff]  }
 0x1c1   : > { %v748_v0 = vpop.f32.mrb[16].mxu0  ;;  %v5064_v13 = vmax.f32 %v5048_v31, 0.0  ;;  %v9030_v5 = vpop.f32.mrb[12].mxu1  ;;  %6977 = vmatprep.subr.bf16.mxu1 %v7552_v46  ;;  %v3768_v55 = vld [vmem:[#allocation2 + $0x1e4] sm:$0xc] }
 0x1c2   : > { %v995_v40 = vadd.f32 %v8938_v32, %v748_v0  ;;  %v9007_v39 = vpop.f32.mrb[17].mxu0  ;;  %4648 = vmatprep.mubr.bf16.mxu0 %v6332_v21  ;;  %v5049_v0 = vadd.f32 %v8979_v2, %v847_v23  ;;  %9559 = vst [vmem:[#allocation41_spill] sm:$0xff] %v9030_v5  ;;  %v853_v36 = vpop.f32.mrb[13].mxu1  ;;  %v6365_v9 = vrot.slane %v3768_v55, 10 }
 0x1c3   : > { %v752_v1 = vpop.f32.mrb[18].mxu0  ;;  %v5050_v7 = vadd.f32 %v8979_v2, %v853_v36  ;;  %v9037_v43 = vpop.f32.mrb[14].mxu1 }
 0x1c4   : > { %v1011_v54 = vmax.f32 %v995_v40, 0.0  ;;  %v996_v56 = vadd.f32 %v8938_v32, %v752_v1  ;;  %v9011_v22 = vpop.f32.mrb[19].mxu0  ;;  %9560 = vst [vmem:[#allocation42_spill] sm:$0xff] %v9037_v43  ;;  %v857_v10 = vpop.f32.mrb[15].mxu1 }
 0x1c5   : > { %v5066_v47 = vmax.f32 %v5050_v7, 0.0  ;;  %v9045_v14 = vpop.f32.mrb[16].mxu1  ;;  %v7560_v7 = vld [vmem:[#allocation2 + $0x200] sm:$0xff]  }
 0x1c6   : > { %v1012_v57 = vmax.f32 %v996_v56, 0.0  ;;  %4746 = vmatmul.mubr.bf16.gmra.mrb[124].mxu1 %v7547_v11  ;;  %4649 = vmatmul.mubr.bf16.gmra.mrb[124].mxu0 %v7546_v34  ;;  %v5065_v56 = vmax.f32 %v5049_v0, 0.0  ;;  %v5051_v34 = vadd.f32 %v8979_v2, %v857_v10  ;;  %v3769_v11 = vld [vmem:[#allocation2 + $0x1e8] sm:$0xf]  ;;  %9562 = vst [vmem:[#allocation44_spill] sm:$0xff] %v9045_v14  ;;  %v863_v52 = vpop.f32.mrb[17].mxu1 }
 0x1c7   : > { %4786 = vmatprep.mubr.bf16.mxu0 %v7553_v38  ;;  %4883 = vmatprep.mubr.bf16.mxu1 %v7556_v50  ;;  %v3818_v31 = vrot.slane %v3769_v11, 6  ;;  %v5052_v46 = vadd.f32 %v8979_v2, %v863_v52  ;;  %v3772_v52 = vld [vmem:[#allocation2 + $0x1fc] sm:$0xf] }
 0x1c8   : > { %v9017_v28 = vpack.c.bf16 %v1012_v57, %v1011_v54  ;;  %v7554_v54 = vld [vmem:[#allocation10 + $0x3b8] sm:$0xff]   ;;  %v9039_v48 = vpack.c.bf16 %v5065_v56, %v5064_v13  ;;  %v5067_v59 = vmax.f32 %v5051_v34, 0.0  ;;  %v7559_v56 = vld [vmem:[#allocation2 + $0x110] sm:$0xff]   ;;  %v7561_v34 = vld [vmem:[#allocation12 + $0x8] sm:$0xff]  }
 0x1c9   : > { %v758_v41 = vpop.f32.mrb[20].mxu0  ;;  %6978 = vmatpush3.bf16.msra.mxu1 %v7554_v54  ;;  %v7558_v13 = vld [vmem:[#allocation2 + $0x1f4] sm:$0xff]   ;;  %v3819_v0 = vsel %vm8145_vm2, %v6365_v9, %v3818_v31  ;;  %v5068_v50 = vmax.f32 %v5052_v46, 0.0 }
 0x1ca   : > { %v997_v58 = vadd.f32 %v8938_v32, %v758_v41  ;;  %v9027_v42 = vpop.f32.mrb[21].mxu0  ;;  %9561 = vst [vmem:[#allocation43_spill] sm:$0xff] %v9039_v48  ;;  %v3821_v41 = vrot.slane %v3770_v12, 6  ;;  %v9058_v36 = vpack.c.bf16 %v5067_v59, %v5066_v47 }
 0x1cb   : > { %v762_v40 = vpop.f32.mrb[22].mxu0 }
 0x1cc   : > { %v1013_v24 = vmax.f32 %v997_v58, 0.0  ;;  %v998_v27 = vadd.f32 %v8938_v32, %v762_v40  ;;  %v9034_v1 = vpop.f32.mrb[23].mxu0  ;;  %v3820_v40 = vrot.slane %v3818_v31, 4  ;;  %9564 = vst [vmem:[#allocation46_spill] sm:$0xff] %v9058_v36 }
 0x1ce   : > { %v1014_v45 = vmax.f32 %v998_v27, 0.0  ;;  %4787 = vmatmul.mubr.bf16.vlgmr.msra.gmra.mrb[128].mxu0 %v7555_v37  ;;  %v9054_v27 = vpop.f32.mrb[18].mxu1  ;;  %v3822_v37 = vsel %vm8145_vm2, %v3820_v40, %v3821_v41 }
 0x1cf   : > { %7181 = vmatpush3.bf16.msra.mxu0 %v7557_v62  ;;  %9563 = vst [vmem:[#allocation45_spill] sm:$0xff] %v9054_v27  ;;  %4794 = vmatprep.mubr.bf16.mxu0 %v7558_v13  ;;  %v6373_v55 = vcombine.low %v3819_v0, %v3822_v37  ;;  %v3771_v13 = vld [vmem:[#allocation2 + $0x1f8] sm:$0xc] }
 0x1d0   : > { %v9041_v57 = vpack.c.bf16 %v1014_v45, %v1013_v24  ;;  %7182 = vmatprep.subr.bf16.mxu0 %v9506_v19  ;;  %v867_v45 = vpop.f32.mrb[19].mxu1  ;;  %v6366_v40 = vrot.slane %v3771_v13, 10  ;;  %v7563_v13 = vld [vmem:[#allocation2 + $0x124] sm:$0xff]  }
 0x1d1   : > { %v768_v35 = vpop.f32.mrb[24].mxu0  ;;  %v5053_v10 = vadd.f32 %v8979_v2, %v867_v45  ;;  %4884 = vmatmul.mubr.bf16.vlgmr.msra.gmra.mrb[128].mxu1 %v6373_v55 }
 0x1d2   : > { %v999_v21 = vadd.f32 %v8938_v32, %v768_v35  ;;  %v9047_v58 = vpop.f32.mrb[25].mxu0  ;;  %v9063_v35 = vpop.f32.mrb[20].mxu1  ;;  %4891 = vmatprep.mubr.bf16.mxu1 %v7560_v7 }
 0x1d3   : > { %v772_v23 = vpop.f32.mrb[26].mxu0  ;;  %9565 = vst [vmem:[#allocation47_spill] sm:$0xff] %v9063_v35  ;;  %v873_v11 = vpop.f32.mrb[21].mxu1  ;;  %v5069_v9 = vmax.f32 %v5053_v10, 0.0  ;;  %7183 = vmatpush3.bf16.msra.mxu0 %v7561_v34 }
 0x1d4   : > { %v1015_v24 = vmax.f32 %v999_v21, 0.0  ;;  %v1000_v38 = vadd.f32 %v8938_v32, %v772_v23  ;;  %v9056_v54 = vpop.f32.mrb[27].mxu0  ;;  %v5054_v47 = vadd.f32 %v8979_v2, %v873_v11  ;;  %v9068_v31 = vpop.f32.mrb[22].mxu1  ;;  %v3773_v23 = vld [vmem:[#allocation2 + $0x200] sm:$0x3]  ;;  %7184 = vmatprep.subr.bf16.mxu0 %v9506_v19 }
 0x1d5   : > { %9566 = vst [vmem:[#allocation48_spill] sm:$0xff] %v9068_v31  ;;  %v877_v59 = vpop.f32.mrb[23].mxu1  ;;  %v9071_v0 = vpack.c.bf16 %v5069_v9, %v5068_v50 }
 0x1d6   : > { %v1016_v62 = vmax.f32 %v1000_v38, 0.0  ;;  %4795 = vmatmul.mubr.bf16.gmra.mrb[132].mxu0 %v7559_v56  ;;  %v5070_v46 = vmax.f32 %v5054_v47, 0.0  ;;  %v3825_v38 = vrot.slane %v3772_v52, 6  ;;  %v9074_v45 = vpop.f32.mrb[24].mxu1  ;;  %v7562_v47 = vld [vmem:[#allocation2 + $0x208] sm:$0xff]  }
 0x1d7   : > { %9567 = vst [vmem:[#allocation49_spill] sm:$0xff] %v9071_v0  ;;  %9568 = vst [vmem:[#allocation50_spill] sm:$0xff] %v9074_v45  ;;  %v883_v56 = vpop.f32.mrb[25].mxu1  ;;  %4802 = vmatprep.mubr.bf16.mxu0 %v7562_v47 }
 0x1d8   : > { %v9065_v21 = vpack.c.bf16 %v1016_v62, %v1015_v24  ;;  %v5055_v24 = vadd.f32 %v8979_v2, %v877_v59  ;;  %v3828_v62 = vrot.slane %v3773_v23, 6  ;;  %v3826_v50 = vsel %vm8145_vm2, %v6366_v40, %v3825_v38  ;;  %v7564_v23 = vld [vmem:[#allocation2 + $0x214] sm:$0xff]  }
 0x1d9   : > { %v778_v12 = vpop.f32.mrb[28].mxu0  ;;  %v3827_v11 = vrot.slane %v3825_v38, 4  ;;  %v5056_v7 = vadd.f32 %v8979_v2, %v883_v56 }
 0x1da   : > { %v1001_v41 = vadd.f32 %v8938_v32, %v778_v12  ;;  %v9076_v37 = vpop.f32.mrb[29].mxu0  ;;  %v5071_v55 = vmax.f32 %v5055_v24, 0.0  ;;  %v9082_v12 = vpop.f32.mrb[26].mxu1 }
 0x1db   : > { %v782_v34 = vpop.f32.mrb[30].mxu0  ;;  %9569 = vst [vmem:[#allocation51_spill] sm:$0xff] %v9082_v12  ;;  %v887_v52 = vpop.f32.mrb[27].mxu1  ;;  %v3829_v24 = vsel %vm8145_vm2, %v3827_v11, %v3828_v62  ;;  %v5072_v19 = vmax.f32 %v5056_v7, 0.0  ;;  %v3775_v11 = vld [vmem:[#allocation2 + $0x210] sm:$0xf] }
 0x1dc   : > { %v1017_v10 = vmax.f32 %v1001_v41, 0.0  ;;  %v9084_v9 = vpop.f32.mrb[31].mxu0  ;;  %v1002_v59 = vadd.f32 %v8938_v32, %v782_v34  ;;  %v9087_v41 = vpack.c.bf16 %v5071_v55, %v5070_v46  ;;  %v5057_v40 = vadd.f32 %v8979_v2, %v887_v52  ;;  %v9092_v38 = vpop.f32.mrb[28].mxu1  ;;  %v7565_v34 = vld [vmem:[#allocation12 + $0x10] sm:$0xff]   ;;  %v3774_v46 = vld [vmem:[#allocation2 + $0x20c] sm:$0xc] }
 0x1dd   : > { %9571 = vst [vmem:[#allocation53_spill] sm:$0xff] %v9092_v38  ;;  %v6374_v56 = vcombine.low %v3826_v50, %v3829_v24  ;;  %v893_v45 = vpop.f32.mrb[29].mxu1  ;;  %v3776_v7 = vld [vmem:[#allocation2 + $0x214] sm:$0x3]  ;;  %v6367_v52 = vrot.slane %v3774_v46, 10  ;;  %7185 = vmatpush3.bf16.msra.mxu0 %v7565_v34 }
 0x1de   : > { %9570 = vst [vmem:[#allocation52_spill] sm:$0xff] %v9087_v41  ;;  %v1018_v12 = vmax.f32 %v1002_v59, 0.0  ;;  %v5073_v31 = vmax.f32 %v5057_v40, 0.0  ;;  %v5058_v35 = vadd.f32 %v8979_v2, %v893_v45  ;;  %v9095_v32 = vpop.f32.mrb[30].mxu1  ;;  %4803 = vmatmul.mubr.bf16.gmra.mrb[136].mxu0 %v7563_v13  ;;  %v3832_v59 = vrot.slane %v3775_v11, 6 }
 0x1df   : > { %9572 = vst [vmem:[#allocation54_spill] sm:$0xff] %v9095_v32  ;;  %4892 = vmatmul.mubr.bf16.gmra.mrb[132].mxu1 %v6374_v56  ;;  %v897_v62 = vpop.f32.mrb[31].mxu1  ;;  %v3835_v32 = vrot.slane %v3776_v7, 6  ;;  %v9574_v13 = vmov 0.0  }
 0x1e0   : > { %v9097_v41 = vpack.c.bf16 %v1018_v12, %v1017_v10  ;;  %v9099_v47 = vpack.c.bf16 %v5073_v31, %v5072_v19  ;;  %v5074_v50 = vmax.f32 %v5058_v35, 0.0  ;;  %4899 = vmatprep.mubr.bf16.mxu1 %v7564_v23  ;;  %v5059_v45 = vadd.f32 %v8979_v2, %v897_v62  ;;  %v7566_v12 = vld [vmem:[#allocation2 + $0x21c] sm:$0xff]   ;;  %7186 = vmatprep.subr.bf16.mxu0 %v9574_v13 }
 0x1e1   : > { %v6531_v55 = vpop.f32.mrb[32].mxu0  ;;  %v6595_v24 = vpop.f32.mrb[32].mxu1  ;;  %v3833_v19 = vsel %vm8145_vm2, %v6367_v52, %v3832_v59  ;;  %v3834_v31 = vrot.slane %v3832_v59, 4  ;;  %4810 = vmatprep.mubr.bf16.mxu0 %v7566_v12  ;;  %v7567_v62 = vld [vmem:[#allocation2 + $0x138] sm:$0xff]   ;;  %v3777_v59 = vld [vmem:[#allocation2 + $0x220] sm:$0xc] }
 0x1e2   : > { %9573 = vst [vmem:[#allocation55_spill] sm:$0xff] %v9099_v47  ;;  %v6532_v40 = vpop.f32.mrb[33].mxu0  ;;  %v6596_v56 = vpop.f32.mrb[33].mxu1  ;;  %v5075_v0 = vmax.f32 %v5059_v45, 0.0  ;;  %v7568_v45 = vld [vmem:[#allocation2 + $0x228] sm:$0xff]   ;;  %v7569_v52 = vld [vmem:[#allocation12 + $0x18] sm:$0xff]  }
 0x1e3   : > { %v6533_v38 = vadd.f32 %v6532_v40, %v6531_v55  ;;  %v6534_v10 = vpop.f32.mrb[34].mxu0  ;;  %v6597_v35 = vadd.f32 %v6596_v56, %v6595_v24  ;;  %v6598_v23 = vpop.f32.mrb[34].mxu1  ;;  %v3836_v55 = vsel %vm8145_vm2, %v3834_v31, %v3835_v32  ;;  %v6368_v12 = vrot.slane %v3777_v59, 10  ;;  %7187 = vmatpush3.bf16.msra.mxu0 %v7569_v52  ;;  %v7573_v52 = vld [vmem:[#allocation12 + $0x20] sm:$0xff]  }
 0x1e4   : > { %v6535_v34 = vpop.f32.mrb[35].mxu0  ;;  %v6599_v2 = vpop.f32.mrb[35].mxu1  ;;  %v9105_v11 = vpack.c.bf16 %v5075_v0, %v5074_v50  ;;  %v6375_v27 = vcombine.low %v3833_v19, %v3836_v55  ;;  %7188 = vmatprep.subr.bf16.mxu0 %v9574_v13 }
 0x1e5   : > { %v6536_v46 = vadd.f32 %v6535_v34, %v6534_v10  ;;  %v9109_v7 = vadd.f32 %v6597_v35, %v6533_v38  ;;  %v6600_v40 = vadd.f32 %v6599_v2, %v6598_v23  ;;  %v3778_v10 = vld [vmem:[#allocation2 + $0x224] sm:$0xf]  ;;  %v3779_v34 = vld [vmem:[#allocation2 + $0x228] sm:$0x3]  ;;  %v7570_v2 = vld [vmem:[#allocation2 + $0x230] sm:$0xff]  }
 0x1e6   : > { %9575 = vst [vmem:[#allocation56_spill] sm:$0xff] %v9105_v11  ;;  %4811 = vmatmul.mubr.bf16.gmra.mrb[140].mxu0 %v7567_v62  ;;  %v3839_v0 = vrot.slane %v3778_v10, 6  ;;  %v3842_v50 = vrot.slane %v3779_v34, 6  ;;  %v7571_v11 = vld [vmem:[#allocation2 + $0x14c] sm:$0xff]  }
 0x1e7   : > { %v9111_v56 = vadd.f32 %v6600_v40, %v6536_v46  ;;  %4900 = vmatmul.mubr.bf16.gmra.mrb[136].mxu1 %v6375_v27  ;;  %4818 = vmatprep.mubr.bf16.mxu0 %v7570_v2  ;;  %v7574_v2 = vld [vmem:[#allocation2 + $0x244] sm:$0xff]  }
 0x1e8   : > { %4907 = vmatprep.mubr.bf16.mxu1 %v7568_v45  ;;  %v3840_v46 = vsel %vm8145_vm2, %v6368_v12, %v3839_v0  ;;  %v3841_v55 = vrot.slane %v3839_v0, 4  ;;  %v3780_v12 = vld [vmem:[#allocation2 + $0x234] sm:$0xc]  ;;  %v3781_v0 = vld [vmem:[#allocation2 + $0x238] sm:$0xf]  ;;  %7189 = vmatpush3.bf16.msra.mxu0 %v7573_v52 }
 0x1e9   : > { %v6537_v47 = vpop.f32.mrb[36].mxu0  ;;  %v6601_v24 = vpop.f32.mrb[36].mxu1  ;;  %7190 = vmatprep.subr.bf16.mxu0 %v9574_v13 }
 0x1ea   : > { %v6538_v14 = vpop.f32.mrb[37].mxu0  ;;  %v6602_v38 = vpop.f32.mrb[37].mxu1  ;;  %v3843_v45 = vsel %vm8145_vm2, %v3841_v55, %v3842_v50 }
 0x1eb   : > { %v6539_v32 = vadd.f32 %v6538_v14, %v6537_v47  ;;  %v6540_v31 = vpop.f32.mrb[38].mxu0  ;;  %v6603_v35 = vadd.f32 %v6602_v38, %v6601_v24  ;;  %v6604_v19 = vpop.f32.mrb[38].mxu1  ;;  %v7572_v47 = vld [vmem:[#allocation2 + $0x23c] sm:$0xff]   ;;  %v6376_v10 = vcombine.low %v3840_v46, %v3843_v45 }
 0x1ec   : > { %v6541_v23 = vpop.f32.mrb[39].mxu0  ;;  %v6605_v59 = vpop.f32.mrb[39].mxu1  ;;  %v3782_v38 = vld [vmem:[#allocation2 + $0x23c] sm:$0x3] }
 0x1ed   : > { %v6542_v40 = vadd.f32 %v6541_v23, %v6540_v31  ;;  %v9116_v27 = vadd.f32 %v6603_v35, %v6539_v32  ;;  %v6606_v14 = vadd.f32 %v6605_v59, %v6604_v19  ;;  %v6369_v31 = vrot.slane %v3780_v12, 10 }
 0x1ee   : > { %v3846_v23 = vrot.slane %v3781_v0, 6  ;;  %v3849_v32 = vrot.slane %v3782_v38, 6  ;;  %4819 = vmatmul.mubr.bf16.gmra.mrb[144].mxu0 %v7571_v11  ;;  %v7577_v11 = vld [vmem:[#allocation12 + $0x28] sm:$0xff]  }
 0x1ef   : > { %v9120_v34 = vadd.f32 %v6606_v14, %v6542_v40  ;;  %4908 = vmatmul.mubr.bf16.gmra.mrb[140].mxu1 %v6376_v10  ;;  %4826 = vmatprep.mubr.bf16.mxu0 %v7574_v2  ;;  %v7576_v10 = vld [vmem:[#allocation2 + $0x250] sm:$0xff]   ;;  %v3783_v0 = vld [vmem:[#allocation2 + $0x248] sm:$0xc]  ;;  %v3784_v38 = vld [vmem:[#allocation2 + $0x24c] sm:$0xf] }
 0x1f0   : > { %v3847_v50 = vsel %vm8145_vm2, %v6369_v31, %v3846_v23  ;;  %v3848_v46 = vrot.slane %v3846_v23, 4  ;;  %4915 = vmatprep.mubr.bf16.mxu1 %v7572_v47  ;;  %v3853_v47 = vrot.slane %v3784_v38, 6  ;;  %7191 = vmatpush3.bf16.msra.mxu0 %v7577_v11  ;;  %v7581_v38 = vld [vmem:[#allocation12 + $0x30] sm:$0xff]  }
 0x1f1   : > { %v6543_v62 = vpop.f32.mrb[40].mxu0  ;;  %v6607_v24 = vpop.f32.mrb[40].mxu1  ;;  %7192 = vmatprep.subr.bf16.mxu0 %v9574_v13 }
 0x1f2   : > { %v6544_v35 = vpop.f32.mrb[41].mxu0  ;;  %v6608_v19 = vpop.f32.mrb[41].mxu1 }
 0x1f3   : > { %v6545_v59 = vadd.f32 %v6544_v35, %v6543_v62  ;;  %v6609_v36 = vadd.f32 %v6608_v19, %v6607_v24  ;;  %v6546_v43 = vpop.f32.mrb[42].mxu0  ;;  %v6610_v5 = vpop.f32.mrb[42].mxu1  ;;  %v3850_v62 = vsel %vm8145_vm2, %v3848_v46, %v3849_v32  ;;  %v7575_v24 = vld [vmem:[#allocation2 + $0x160] sm:$0xff]   ;;  %v3785_v35 = vld [vmem:[#allocation2 + $0x250] sm:$0x3]  ;;  %v6370_v19 = vrot.slane %v3783_v0, 10 }
 0x1f4   : > { %v6547_v55 = vpop.f32.mrb[43].mxu0  ;;  %v6611_v40 = vpop.f32.mrb[43].mxu1  ;;  %v6377_v23 = vcombine.low %v3847_v50, %v3850_v62  ;;  %v7578_v32 = vld [vmem:[#allocation2 + $0x258] sm:$0xff]   ;;  %v3855_v46 = vrot.slane %v3853_v47, 4  ;;  %7193 = vmatpush3.bf16.msra.mxu0 %v7581_v38 }
 0x1f5   : > { %v9125_v14 = vadd.f32 %v6609_v36, %v6545_v59  ;;  %v6548_v45 = vadd.f32 %v6547_v55, %v6546_v43  ;;  %v6612_v52 = vadd.f32 %v6611_v40, %v6610_v5  ;;  %v3856_v5 = vrot.slane %v3785_v35, 6  ;;  %7194 = vmatprep.subr.bf16.mxu0 %v9574_v13 }
 0x1f6   : > { %4827 = vmatmul.mubr.bf16.gmra.mrb[148].mxu0 %v7575_v24  ;;  %v3854_v11 = vsel %vm8145_vm2, %v6370_v19, %v3853_v47  ;;  %v7580_v24 = vld [vmem:[#allocation2 + $0x264] sm:$0xff]  }
 0x1f7   : > { %v9129_v12 = vadd.f32 %v6612_v52, %v6548_v45  ;;  %4916 = vmatmul.mubr.bf16.gmra.mrb[144].mxu1 %v6377_v23  ;;  %v3857_v0 = vsel %vm8145_vm2, %v3855_v46, %v3856_v5  ;;  %4834 = vmatprep.mubr.bf16.mxu0 %v7578_v32 }
 0x1f8   : > { %4923 = vmatprep.mubr.bf16.mxu1 %v7576_v10 }
 0x1f9   : > { %v6549_v31 = vpop.f32.mrb[44].mxu0  ;;  %v6613_v36 = vpop.f32.mrb[44].mxu1 }
 0x1fa   : > { %v6550_v59 = vpop.f32.mrb[45].mxu0  ;;  %v6614_v2 = vpop.f32.mrb[45].mxu1 }
 0x1fb   : > { %v6551_v43 = vadd.f32 %v6550_v59, %v6549_v31  ;;  %v6552_v55 = vpop.f32.mrb[46].mxu0  ;;  %v6615_v40 = vadd.f32 %v6614_v2, %v6613_v36  ;;  %v6616_v45 = vpop.f32.mrb[46].mxu1  ;;  %v3786_v31 = vld [vmem:[#allocation2 + $0x25c] sm:$0xc]  ;;  %v7579_v36 = vld [vmem:[#allocation2 + $0x174] sm:$0xff]  }
 0x1fc   : > { %v6553_v52 = vpop.f32.mrb[47].mxu0  ;;  %v6617_v61 = vpop.f32.mrb[47].mxu1  ;;  %v3787_v59 = vld [vmem:[#allocation2 + $0x260] sm:$0xf]  ;;  %v3788_v2 = vld [vmem:[#allocation2 + $0x264] sm:$0x3] }
 0x1fd   : > { %v6554_v48 = vadd.f32 %v6553_v52, %v6552_v55  ;;  %v9132_v50 = vadd.f32 %v6615_v40, %v6551_v43  ;;  %v6618_v62 = vadd.f32 %v6617_v61, %v6616_v45  ;;  %v6371_v23 = vrot.slane %v3786_v31, 10  ;;  %v7582_v55 = vld [vmem:[#allocation2 + $0x26c] sm:$0xff]  }
 0x1fe   : > { %v3860_v43 = vrot.slane %v3787_v59, 6  ;;  %v6378_v40 = vcombine.low %v3854_v11, %v3857_v0  ;;  %v3863_v32 = vrot.slane %v3788_v2, 6  ;;  %4835 = vmatmul.mubr.bf16.gmra.mrb[152].mxu0 %v7579_v36  ;;  %v7585_v0 = vld [vmem:[#allocation12 + $0x38] sm:$0xff]   ;;  %v7586_v36 = vld [vmem:[#allocation13 + $0x40] sm:$0xff]  }
 0x1ff   : > { %v9138_v35 = vadd.f32 %v6618_v62, %v6554_v48  ;;  %4842 = vmatprep.mubr.bf16.mxu0 %v7582_v55  ;;  %7195 = vmatpush3.bf16.msra.mxu0 %v7585_v0 }
 0x200   : > { %v3862_v5 = vrot.slane %v3860_v43, 4  ;;  %4924 = vmatmul.mubr.bf16.gmra.mrb[148].mxu1 %v6378_v40  ;;  %v3861_v11 = vsel %vm8145_vm2, %v6371_v23, %v3860_v43  ;;  %v7584_v40 = vld [vmem:[#allocation2 + $0x278] sm:$0xff]   ;;  %7036 = vmatprep.subr.bf16.mxu1 %v7586_v36 }
 0x201   : > { %v6555_v61 = vpop.f32.mrb[48].mxu0  ;;  %v6619_v10 = vpop.f32.mrb[48].mxu1  ;;  %4931 = vmatprep.mubr.bf16.mxu1 %v7580_v24 }
 0x202   : > { %v6556_v19 = vpop.f32.mrb[49].mxu0  ;;  %v6620_v47 = vpop.f32.mrb[49].mxu1  ;;  %v3864_v2 = vsel %vm8145_vm2, %v3862_v5, %v3863_v32 }
 0x203   : > { %v6557_v46 = vadd.f32 %v6556_v19, %v6555_v61  ;;  %v6621_v48 = vadd.f32 %v6620_v47, %v6619_v10  ;;  %v6558_v45 = vpop.f32.mrb[50].mxu0  ;;  %v6622_v52 = vpop.f32.mrb[50].mxu1  ;;  %v3791_v10 = vld [vmem:[#allocation2 + $0x278] sm:$0x3]  ;;  %v6372_v19 = vrot.slane %v3789_v4, 10  ;;  %v3867_v47 = vrot.slane %v3790_v30, 6 }
 0x204   : > { %v6559_v62 = vpop.f32.mrb[51].mxu0  ;;  %v6623_v15 = vpop.f32.mrb[51].mxu1  ;;  %v7588_v30 = vld [vmem:[#allocation13 + $0x48] sm:$0xff]  }
 0x205   : > { %v9141_v31 = vadd.f32 %v6621_v48, %v6557_v46  ;;  %v6560_v38 = vadd.f32 %v6559_v62, %v6558_v45  ;;  %v6624_v59 = vadd.f32 %v6623_v15, %v6622_v52  ;;  %v7583_v46 = vld [vmem:[#allocation2 + $0x188] sm:$0xff]   ;;  %v3870_v15 = vrot.slane %v3791_v10, 6  ;;  %v7587_v45 = vld [vmem:[#allocation13] sm:$0xff]  }
 0x206   : > { %v3869_v48 = vrot.slane %v3867_v47, 4  ;;  %v6379_v52 = vcombine.low %v3861_v11, %v3864_v2  ;;  %7037 = vmatpush3.bf16.msra.mxu1 %v7587_v45  ;;  %v7589_v4 = vld [vmem:[#allocation13 + $0x8] sm:$0xff]   ;;  %4843 = vmatmul.mubr.bf16.gmra.mrb[156].mxu0 %v7583_v46  ;;  %v5092_v11 = vld [vmem:[%s317_s3] sm:$0x1]  ;;  %v3868_v2 = vsel %vm8145_vm2, %v6372_v19, %v3867_v47  ;;  %v7592_v46 = vld [vmem:[#allocation13 + $0x58] sm:$0xff]  }
 0x207   : > { %v9147_v61 = vadd.f32 %v6624_v59, %v6560_v38  ;;  %7038 = vmatprep.subr.bf16.mxu1 %v7588_v30  ;;  %7196 = vmatprep.mubr.msk.bf16.mxu0 %vm7883_vm9, %v9574_v13  ;;  %v7595_v30 = vld [vmem:[#allocation13 + $0x20] sm:$0xff]  }
 0x208   : > { %4932 = vmatmul.mubr.bf16.gmra.mrb[152].mxu1 %v6379_v52  ;;  %v3871_v36 = vsel %vm8145_vm2, %v3869_v48, %v3870_v15  ;;  %v7594_v48 = vld [vmem:[#allocation13 + $0x60] sm:$0xff]  }
 0x209   : > { %v6561_v23 = vpop.f32.mrb[52].mxu0  ;;  %v6625_v43 = vpop.f32.mrb[52].mxu1  ;;  %4939 = vmatprep.mubr.bf16.mxu1 %v7584_v40 }
 0x20a   : > { %v6562_v24 = vpop.f32.mrb[53].mxu0  ;;  %v6626_v62 = vpop.f32.mrb[53].mxu1  ;;  %7039 = vmatpush3.bf16.msra.mxu1 %v7589_v4 }
 0x20b   : > { %v6563_v5 = vadd.f32 %v6562_v24, %v6561_v23  ;;  %v6627_v32 = vadd.f32 %v6626_v62, %v6625_v43  ;;  %v6564_v55 = vpop.f32.mrb[54].mxu0  ;;  %v6628_v38 = vpop.f32.mrb[54].mxu1  ;;  %v7591_v43 = vld [vmem:[#allocation13 + $0x10] sm:$0xff]   ;;  %7040 = vmatprep.subr.bf16.mxu1 %v7590_v17  ;;  %v6380_v24 = vcombine.low %v3868_v2, %v3871_v36  ;;  %v5093_v62 = vpack.c.bf16 %v5092_v11, %v5092_v11  ;;  %v7597_v36 = vld [vmem:[#allocation13 + $0x28] sm:$0xff]  }
 0x20c   : > { %v6565_v59 = vpop.f32.mrb[55].mxu0  ;;  %v6629_v0 = vpop.f32.mrb[55].mxu1 }
 0x20d   : > { %v9149_v10 = vadd.f32 %v6627_v32, %v6563_v5  ;;  %v6566_v51 = vadd.f32 %v6565_v59, %v6564_v55  ;;  %v6630_v8 = vadd.f32 %v6629_v0, %v6628_v38  ;;  %v7596_v0 = vld [vmem:[#allocation13 + $0x68] sm:$0xff]  }
 0x20e   : > { %7041 = vmatpush3.bf16.msra.mxu1 %v7591_v43  ;;  %7197 = vmatmul.mubr.bf16.vlgmr.msra.gmra.mrb[160].mxu0 %v5093_v62  ;;  %v7598_v62 = vld [vmem:[#allocation13 + $0x70] sm:$0xff]  }
 0x20f   : > { %v9160_v23 = vadd.f32 %v6630_v8, %v6566_v51  ;;  %v7593_v51 = vld [vmem:[#allocation13 + $0x18] sm:$0xff]   ;;  %7042 = vmatprep.subr.bf16.mxu1 %v7592_v46  ;;  %5714 = vmatprep.mubr.bf16.mxu0 %v8995_v26  ;;  %v7602_v26 = vld [vmem:[#allocation13 + $0xc0] sm:$0xff]  }
 0x210   : > { %4940 = vmatmul.mubr.bf16.gmra.mrb[156].mxu1 %v6380_v24  ;;  %7100 = vmatprep.subr.bf16.mxu0 %v7602_v26 }
 0x211   : > { %v6567_v45 = vpop.f32.mrb[56].mxu0  ;;  %v6631_v52 = vpop.f32.mrb[56].mxu1 }
 0x212   : > { %v6568_v40 = vpop.f32.mrb[57].mxu0  ;;  %v6632_v5 = vpop.f32.mrb[57].mxu1  ;;  %7043 = vmatpush3.bf16.msra.mxu1 %v7593_v51  ;;  %v7600_v51 = vld [vmem:[#allocation13 + $0x78] sm:$0xff]  }
 0x213   : > { %v6569_v32 = vadd.f32 %v6568_v40, %v6567_v45  ;;  %v6633_v19 = vadd.f32 %v6632_v5, %v6631_v52  ;;  %v6570_v47 = vpop.f32.mrb[58].mxu0  ;;  %v6634_v33 = vpop.f32.mrb[58].mxu1  ;;  %7044 = vmatprep.subr.bf16.mxu1 %v7594_v48  ;;  %v7605_v48 = vld [vmem:[#allocation13 + $0x88] sm:$0xff]  }
 0x214   : > { %v6571_v15 = vpop.f32.mrb[59].mxu0  ;;  %v6635_v8 = vpop.f32.mrb[59].mxu1 }
 0x215   : > { %v9163_v13 = vadd.f32 %v6633_v19, %v6569_v32  ;;  %v6572_v55 = vadd.f32 %v6571_v15, %v6570_v47  ;;  %v6636_v38 = vadd.f32 %v6635_v8, %v6634_v33  ;;  %v7599_v47 = vld [vmem:[#allocation13 + $0x30] sm:$0xff]   ;;  %v7603_v33 = vld [vmem:[#allocation13 + $0x80] sm:$0xff]   ;;  %v7604_v15 = vld [vmem:[#allocation13 + $0xc8] sm:$0xff]  }
 0x216   : > { %7045 = vmatpush3.bf16.msra.mxu1 %v7595_v30  ;;  %7101 = vmatpush3.bf16.msra.mxu0 %v7603_v33  ;;  %v7608_v33 = vld [vmem:[#allocation13 + $0xd8] sm:$0xff]  }
 0x217   : > { %v9166_v17 = vadd.f32 %v6636_v38, %v6572_v55  ;;  %7046 = vmatprep.subr.bf16.mxu1 %v7596_v0  ;;  %7102 = vmatprep.subr.bf16.mxu0 %v7604_v15  ;;  %v7609_v15 = vld [vmem:[#allocation13 + $0x98] sm:$0xff]  }
 0x219   : > { %v6573_v4 = vpop.f32.mrb[60].mxu0  ;;  %v6637_v59 = vpop.f32.mrb[60].mxu1 }
 0x21a   : > { %v6574_v11 = vpop.f32.mrb[61].mxu0  ;;  %v6638_v2 = vpop.f32.mrb[61].mxu1  ;;  %7047 = vmatpush3.bf16.msra.mxu1 %v7597_v36  ;;  %7103 = vmatpush3.bf16.msra.mxu0 %v7605_v48 }
 0x21b   : > { %v6575_v43 = vadd.f32 %v6574_v11, %v6573_v4  ;;  %v6639_v45 = vadd.f32 %v6638_v2, %v6637_v59  ;;  %v6576_v52 = vpop.f32.mrb[62].mxu0  ;;  %v6640_v40 = vpop.f32.mrb[62].mxu1  ;;  %7048 = vmatprep.subr.bf16.mxu1 %v7598_v62  ;;  %v7601_v59 = vld [vmem:[#allocation13 + $0x38] sm:$0xff]   ;;  %v9176_v62 = vld [vmem:[%s9486_s6 + $0x1] ss:$0 sm:$0xff] }
 0x21c   : > { %v6577_v46 = vpop.f32.mrb[63].mxu0  ;;  %v6641_v24 = vpop.f32.mrb[63].mxu1 }
 0x21d   : > { %v9168_v5 = vadd.f32 %v6639_v45, %v6575_v43  ;;  %v6578_v32 = vadd.f32 %v6577_v46, %v6576_v52  ;;  %v6642_v19 = vadd.f32 %v6641_v24, %v6640_v40  ;;  %v7606_v24 = vld [vmem:[#allocation13 + $0xd0] sm:$0xff]  }
 0x21e   : > { %7049 = vmatpush3.bf16.msra.mxu1 %v7599_v47  ;;  %7104 = vmatprep.subr.bf16.mxu0 %v7606_v24 }
 0x21f   : > { %v9170_v8 = vadd.f32 %v6642_v19, %v6578_v32  ;;  %7050 = vmatprep.subr.bf16.mxu1 %v7600_v51  ;;  %v7607_v19 = vld [vmem:[#allocation13 + $0x90] sm:$0xff]  }
 0x220   : > { %7105 = vmatpush3.bf16.msra.mxu0 %v7607_v19 }
 0x221   : > { %v6659_v55 = vpop.f32.mrb[64].mxu0  ;;  %v6723_v38 = vpop.f32.mrb[64].mxu1  ;;  %7106 = vmatprep.subr.bf16.mxu0 %v7608_v33 }
 0x222   : > { %v6660_v30 = vpop.f32.mrb[65].mxu0  ;;  %v6724_v4 = vpop.f32.mrb[65].mxu1  ;;  %7051 = vmatpush3.bf16.msra.mxu1 %v7601_v59 }
 0x223   : > { %v6661_v11 = vadd.f32 %v6660_v30, %v6659_v55  ;;  %v6662_v2 = vpop.f32.mrb[66].mxu0  ;;  %v6725_v0 = vadd.f32 %v6724_v4, %v6723_v38  ;;  %v6726_v43 = vpop.f32.mrb[66].mxu1 }
 0x224   : > { %v6663_v45 = vpop.f32.mrb[67].mxu0  ;;  %v6727_v52 = vpop.f32.mrb[67].mxu1  ;;  %7107 = vmatpush3.bf16.msra.mxu0 %v7609_v15 }
 0x225   : > { %v3016_v40 = vadd.f32 %v6661_v11, %v9109_v7  ;;  %v6664_v46 = vadd.f32 %v6663_v45, %v6662_v2  ;;  %v6728_v36 = vadd.f32 %v6727_v52, %v6726_v43 }
 0x227   : > { %v3019_v26 = vadd.f32 %v6664_v46, %v9111_v56  ;;  %v3113_v32 = vadd.f32 %v6725_v0, %v3016_v40 }
 0x229   : > { %v3175_v47 = vadd.f32 %v3113_v32, %v8943_v6  ;;  %v3116_v7 = vadd.f32 %v6728_v36, %v3019_v26  ;;  %v6665_v48 = vpop.f32.mrb[68].mxu0  ;;  %v6729_v55 = vpop.f32.mrb[68].mxu1  ;;  %v7610_v26 = vld [vmem:[#allocation13 + $0xe0] sm:$0xff]  }
 0x22a   : > { %v6666_v51 = vpop.f32.mrb[69].mxu0  ;;  %v6730_v38 = vpop.f32.mrb[69].mxu1  ;;  %v7611_v32 = vld [vmem:[#allocation13 + $0xa0] sm:$0xff]   ;;  %7108 = vmatprep.subr.bf16.mxu0 %v7610_v26 }
 0x22b   : > { %v3176_v30 = vadd.f32 %v3116_v7, %v8948_v3  ;;  %v6667_v4 = vadd.f32 %v6666_v51, %v6665_v48  ;;  %v6668_v11 = vpop.f32.mrb[70].mxu0  ;;  %v6731_v56 = vadd.f32 %v6730_v38, %v6729_v55  ;;  %v6732_v2 = vpop.f32.mrb[70].mxu1  ;;  %v3199_v0 = vadd.f32 %v9176_v62, %v3175_v47  ;;  %7109 = vmatpush3.bf16.msra.mxu0 %v7611_v32 }
 0x22c   : > { %v6669_v43 = vpop.f32.mrb[71].mxu0  ;;  %v6733_v45 = vpop.f32.mrb[71].mxu1 }
 0x22d   : > { %v3024_v59 = vadd.f32 %v6667_v4, %v9116_v27  ;;  %v6670_v6 = vadd.f32 %v6669_v43, %v6668_v11  ;;  %v6734_v52 = vadd.f32 %v6733_v45, %v6732_v2  ;;  %v3200_v40 = vadd.f32 %v9176_v62, %v3176_v30  ;;  %v7612_v11 = vld [vmem:[#allocation13 + $0xe8] sm:$0xff]  }
 0x22e   : > { %v3215_v46 = vmax.f32 %v3199_v0, 0.0  ;;  %v7613_v2 = vld [vmem:[#allocation13 + $0xa8] sm:$0xff]   ;;  %7110 = vmatprep.subr.bf16.mxu0 %v7612_v11 }
 0x22f   : > { %v3027_v36 = vadd.f32 %v6670_v6, %v9120_v34  ;;  %v3121_v24 = vadd.f32 %v6731_v56, %v3024_v59  ;;  %v3216_v3 = vmax.f32 %v3200_v40, 0.0  ;;  %7111 = vmatpush3.bf16.msra.mxu0 %v7613_v2  ;;  %v7616_v2 = vld [vmem:[#allocation13 + $0x100] sm:$0xff]  }
 0x230   : > { %7200 = vmatprep.subr.bf16.mxu1 %v7616_v2 }
 0x231   : > { %v3177_v19 = vadd.f32 %v3121_v24, %v8955_v49  ;;  %v3124_v33 = vadd.f32 %v6734_v52, %v3027_v36  ;;  %v6671_v47 = vpop.f32.mrb[72].mxu0  ;;  %v6735_v7 = vpop.f32.mrb[72].mxu1  ;;  %v3231_v48 = vpack.c.bf16 %v3216_v3, %v3215_v46  ;;  %v7614_v46 = vld [vmem:[#allocation13 + $0xf0] sm:$0xff]  }
 0x232   : > { %v6672_v27 = vpop.f32.mrb[73].mxu0  ;;  %v6736_v55 = vpop.f32.mrb[73].mxu1  ;;  %v7615_v36 = vld [vmem:[#allocation13 + $0xb0] sm:$0xff]   ;;  %7112 = vmatprep.subr.bf16.mxu0 %v7614_v46 }
 0x233   : > { %v3178_v51 = vadd.f32 %v3124_v33, %v8960_v18  ;;  %v6673_v15 = vadd.f32 %v6672_v27, %v6671_v47  ;;  %v6674_v38 = vpop.f32.mrb[74].mxu0  ;;  %5617 = vmatprep.mubr.bf16.mxu1 %v3231_v48  ;;  %v6737_v34 = vadd.f32 %v6736_v55, %v6735_v7  ;;  %v6738_v30 = vpop.f32.mrb[74].mxu1  ;;  %v3201_v4 = vadd.f32 %v9176_v62, %v3177_v19  ;;  %v7617_v55 = vld [vmem:[#allocation13 + $0xf8] sm:$0xff]  }
 0x234   : > { %v6675_v56 = vpop.f32.mrb[75].mxu0  ;;  %5618 = vmatmul.mubr.bf16.vlgmr.msra.gmra.mrb[160].mxu1 %v8950_v60  ;;  %v6739_v49 = vpop.f32.mrb[75].mxu1  ;;  %7113 = vmatpush3.bf16.msra.mxu0 %v7615_v36 }
 0x235   : > { %v3032_v0 = vadd.f32 %v6673_v15, %v9125_v14  ;;  %v6676_v43 = vadd.f32 %v6675_v56, %v6674_v38  ;;  %v6740_v45 = vadd.f32 %v6739_v49, %v6738_v30  ;;  %v3202_v59 = vadd.f32 %v9176_v62, %v3178_v51  ;;  %v7618_v15 = vld [vmem:[#allocation13 + $0xb8] sm:$0xff]   ;;  %7114 = vmatprep.subr.bf16.mxu0 %v7617_v55 }
 0x236   : > { %v3217_v52 = vmax.f32 %v3201_v4, 0.0  ;;  %7201 = vmatpush3.bf16.msra.mxu1 %v7616_v2 }
 0x237   : > { %v3035_v18 = vadd.f32 %v6676_v43, %v9129_v12  ;;  %v3129_v6 = vadd.f32 %v6737_v34, %v3032_v0  ;;  %v3218_v40 = vmax.f32 %v3202_v59, 0.0 }
 0x238   : > { %7115 = vmatpush3.bf16.msra.mxu0 %v7618_v15 }
 0x239   : > { %v3179_v24 = vadd.f32 %v3129_v6, %v8967_v20  ;;  %v3132_v60 = vadd.f32 %v6740_v45, %v3035_v18  ;;  %v6677_v3 = vpop.f32.mrb[76].mxu0  ;;  %v6741_v26 = vpop.f32.mrb[76].mxu1  ;;  %v3232_v32 = vpack.c.bf16 %v3218_v40, %v3217_v52 }
 0x23a   : > { %v6678_v14 = vpop.f32.mrb[77].mxu0  ;;  %v6742_v19 = vpop.f32.mrb[77].mxu1 }
 0x23b   : > { %v3180_v33 = vadd.f32 %v3132_v60, %v8972_v63  ;;  %v6679_v47 = vadd.f32 %v6678_v14, %v6677_v3  ;;  %v6680_v7 = vpop.f32.mrb[78].mxu0  ;;  %5625 = vmatprep.mubr.bf16.mxu1 %v3232_v32  ;;  %v6743_v12 = vadd.f32 %v6742_v19, %v6741_v26  ;;  %v6744_v48 = vpop.f32.mrb[78].mxu1  ;;  %v3203_v27 = vadd.f32 %v9176_v62, %v3179_v24 }
 0x23c   : > { %v6681_v51 = vpop.f32.mrb[79].mxu0  ;;  %5626 = vmatmul.mubr.bf16.gmra.mrb[164].mxu1 %v8964_v25  ;;  %v6745_v20 = vpop.f32.mrb[79].mxu1 }
 0x23d   : > { %v3040_v38 = vadd.f32 %v6679_v47, %v9132_v50  ;;  %v6682_v34 = vadd.f32 %v6681_v51, %v6680_v7  ;;  %v6746_v30 = vadd.f32 %v6745_v20, %v6744_v48  ;;  %v3204_v4 = vadd.f32 %v9176_v62, %v3180_v33  ;;  %v7619_v47 = vld [vmem:[#allocation13 + $0x108] sm:$0xff]  }
 0x23e   : > { %v3219_v56 = vmax.f32 %v3203_v27, 0.0  ;;  %7202 = vmatprep.subr.bf16.mxu1 %v7619_v47 }
 0x23f   : > { %v3043_v63 = vadd.f32 %v6682_v34, %v9138_v35  ;;  %v3137_v11 = vadd.f32 %v6743_v12, %v3040_v38  ;;  %v3220_v49 = vmax.f32 %v3204_v4, 0.0  ;;  %7203 = vmatpush3.bf16.msra.mxu1 %v7619_v47 }
 0x241   : > { %v3181_v0 = vadd.f32 %v3137_v11, %v8987_v53  ;;  %v3140_v43 = vadd.f32 %v6746_v30, %v3043_v63  ;;  %v6683_v25 = vpop.f32.mrb[80].mxu0  ;;  %v6747_v45 = vpop.f32.mrb[80].mxu1  ;;  %v3233_v59 = vpack.c.bf16 %v3220_v49, %v3219_v56 }
 0x242   : > { %v6684_v50 = vpop.f32.mrb[81].mxu0  ;;  %v6748_v18 = vpop.f32.mrb[81].mxu1 }
 0x243   : > { %v3182_v6 = vadd.f32 %v3140_v43, %v8991_v16  ;;  %v6685_v52 = vadd.f32 %v6684_v50, %v6683_v25  ;;  %v6686_v40 = vpop.f32.mrb[82].mxu0  ;;  %5633 = vmatprep.mubr.bf16.mxu1 %v3233_v59  ;;  %v6749_v35 = vadd.f32 %v6748_v18, %v6747_v45  ;;  %v6750_v46 = vpop.f32.mrb[82].mxu1  ;;  %v3205_v36 = vadd.f32 %v9176_v62, %v3181_v0  ;;  %v7620_v43 = vld [vmem:[#allocation13 + $0x110] sm:$0xff]  }
 0x244   : > { %v6687_v24 = vpop.f32.mrb[83].mxu0  ;;  %5634 = vmatmul.mubr.bf16.gmra.mrb[168].mxu1 %v8981_v29  ;;  %v6751_v53 = vpop.f32.mrb[83].mxu1  ;;  %7204 = vmatprep.subr.bf16.mxu1 %v7620_v43 }
 0x245   : > { %v3048_v60 = vadd.f32 %v6685_v52, %v9141_v31  ;;  %v6688_v3 = vadd.f32 %v6687_v24, %v6686_v40  ;;  %v6752_v26 = vadd.f32 %v6751_v53, %v6750_v46  ;;  %v3206_v32 = vadd.f32 %v9176_v62, %v3182_v6  ;;  %7205 = vmatpush3.bf16.msra.mxu1 %v7620_v43 }
 0x246   : > { %v3221_v19 = vmax.f32 %v3205_v36, 0.0 }
 0x247   : > { %v3051_v14 = vadd.f32 %v6688_v3, %v9147_v61  ;;  %v3145_v16 = vadd.f32 %v6749_v35, %v3048_v60  ;;  %v3222_v33 = vmax.f32 %v3206_v32, 0.0 }
 0x249   : > { %v3183_v7 = vadd.f32 %v3145_v16, %v9007_v39  ;;  %v3148_v12 = vadd.f32 %v6752_v26, %v3051_v14  ;;  %v6689_v48 = vpop.f32.mrb[84].mxu0  ;;  %v6753_v27 = vpop.f32.mrb[84].mxu1  ;;  %v3234_v55 = vpack.c.bf16 %v3222_v33, %v3221_v19 }
 0x24a   : > { %v6690_v29 = vpop.f32.mrb[85].mxu0  ;;  %v6754_v51 = vpop.f32.mrb[85].mxu1 }
 0x24b   : > { %v3184_v31 = vadd.f32 %v3148_v12, %v9011_v22  ;;  %v6691_v20 = vadd.f32 %v6690_v29, %v6689_v48  ;;  %v6692_v15 = vpop.f32.mrb[86].mxu0  ;;  %5641 = vmatprep.mubr.bf16.mxu1 %v3234_v55  ;;  %v6755_v61 = vadd.f32 %v6754_v51, %v6753_v27  ;;  %v6756_v38 = vpop.f32.mrb[86].mxu1  ;;  %v3207_v34 = vadd.f32 %v9176_v62, %v3183_v7  ;;  %v7622_v12 = vld [vmem:[#allocation13 + $0x120] sm:$0xff]  }
 0x24c   : > { %v6693_v30 = vpop.f32.mrb[87].mxu0  ;;  %5642 = vmatmul.mubr.bf16.gmra.mrb[172].mxu1 %v8999_v44  ;;  %v6757_v39 = vpop.f32.mrb[87].mxu1 }
 0x24d   : > { %v3056_v4 = vadd.f32 %v6691_v20, %v9149_v10  ;;  %v6694_v63 = vadd.f32 %v6693_v30, %v6692_v15  ;;  %v6758_v11 = vadd.f32 %v6757_v39, %v6756_v38  ;;  %v3208_v56 = vadd.f32 %v9176_v62, %v3184_v31 }
 0x24e   : > { %v3223_v2 = vmax.f32 %v3207_v34, 0.0 }
 0x24f   : > { %v3059_v49 = vadd.f32 %v6694_v63, %v9160_v23  ;;  %v3153_v22 = vadd.f32 %v6755_v61, %v3056_v4  ;;  %v3224_v0 = vmax.f32 %v3208_v56, 0.0  ;;  %v7623_v56 = vld [vmem:[#allocation13 + $0x128] sm:$0xff]  }
 0x251   : > { %v3185_v25 = vadd.f32 %v3153_v22, %v9027_v42  ;;  %v3156_v45 = vadd.f32 %v6758_v11, %v3059_v49  ;;  %v3235_v59 = vpack.c.bf16 %v3224_v0, %v3223_v2  ;;  %v6695_v50 = vpop.f32.mrb[88].mxu0  ;;  %v6759_v40 = vpop.f32.mrb[88].mxu1 }
 0x252   : > { %v6696_v18 = vpop.f32.mrb[89].mxu0  ;;  %v6760_v36 = vpop.f32.mrb[89].mxu1 }
 0x253   : > { %v3186_v44 = vadd.f32 %v3156_v45, %v9034_v1  ;;  %5649 = vmatprep.mubr.bf16.mxu1 %v3235_v59  ;;  %v3209_v10 = vadd.f32 %v9176_v62, %v3185_v25  ;;  %v6697_v23 = vadd.f32 %v6696_v18, %v6695_v50  ;;  %v6698_v6 = vpop.f32.mrb[90].mxu0  ;;  %v7621_v1 = vld [vmem:[#allocation13 + $0x118] sm:$0xff]   ;;  %v6761_v60 = vadd.f32 %v6760_v36, %v6759_v40  ;;  %v6762_v3 = vpop.f32.mrb[90].mxu1  ;;  %v7624_v40 = vld [vmem:[#allocation13 + $0x130] sm:$0xff]  }
 0x254   : > { %5650 = vmatmul.mubr.bf16.gmra.mrb[176].mxu1 %v9017_v28  ;;  %v6699_v35 = vpop.f32.mrb[91].mxu0  ;;  %v6763_v32 = vpop.f32.mrb[91].mxu1  ;;  %7206 = vmatprep.subr.bf16.mxu1 %v7621_v1 }
 0x255   : > { %v3210_v52 = vadd.f32 %v9176_v62, %v3186_v44  ;;  %v3064_v42 = vadd.f32 %v6697_v23, %v9163_v13  ;;  %v6700_v46 = vadd.f32 %v6699_v35, %v6698_v6  ;;  %v3225_v24 = vmax.f32 %v3209_v10, 0.0  ;;  %7207 = vmatpush3.bf16.msra.mxu1 %v7621_v1 }
 0x256   : > { %v6764_v16 = vadd.f32 %v6763_v32, %v6762_v3  ;;  %7208 = vmatprep.subr.bf16.mxu1 %v7622_v12 }
 0x257   : > { %v3226_v53 = vmax.f32 %v3210_v52, 0.0  ;;  %v3067_v26 = vadd.f32 %v6700_v46, %v9166_v17  ;;  %v3161_v28 = vadd.f32 %v6761_v60, %v3064_v42  ;;  %v7625_v60 = vld [vmem:[#allocation13 + $0x138] sm:$0xff]  }
 0x259   : > { %v3236_v14 = vpack.c.bf16 %v3226_v53, %v3225_v24  ;;  %v3187_v19 = vadd.f32 %v3161_v28, %v9047_v58  ;;  %v3164_v33 = vadd.f32 %v6764_v16, %v3067_v26  ;;  %v6701_v7 = vpop.f32.mrb[92].mxu0  ;;  %v6765_v17 = vpop.f32.mrb[92].mxu1  ;;  %7209 = vmatpush3.bf16.msra.mxu1 %v7622_v12 }
 0x25a   : > { %v6702_v48 = vpop.f32.mrb[93].mxu0  ;;  %v6766_v51 = vpop.f32.mrb[93].mxu1  ;;  %7210 = vmatprep.subr.bf16.mxu1 %v7623_v56 }
 0x25b   : > { %5657 = vmatprep.mubr.bf16.mxu1 %v3236_v14  ;;  %v3188_v13 = vadd.f32 %v3164_v33, %v9056_v54  ;;  %v3211_v47 = vadd.f32 %v9176_v62, %v3187_v19  ;;  %v6703_v55 = vadd.f32 %v6702_v48, %v6701_v7  ;;  %v6704_v29 = vpop.f32.mrb[94].mxu0  ;;  %v6767_v20 = vadd.f32 %v6766_v51, %v6765_v17  ;;  %v6768_v58 = vpop.f32.mrb[94].mxu1 }
 0x25c   : > { %5658 = vmatmul.mubr.bf16.gmra.mrb[180].mxu1 %v9041_v57  ;;  %v6705_v31 = vpop.f32.mrb[95].mxu0  ;;  %v6769_v38 = vpop.f32.mrb[95].mxu1 }
 0x25d   : > { %v3212_v27 = vadd.f32 %v9176_v62, %v3188_v13  ;;  %v3227_v15 = vmax.f32 %v3211_v47, 0.0  ;;  %v3072_v57 = vadd.f32 %v6703_v55, %v9168_v5  ;;  %v6706_v54 = vadd.f32 %v6705_v31, %v6704_v29  ;;  %7211 = vmatpush3.bf16.msra.mxu1 %v7623_v56 }
 0x25e   : > { %v6770_v34 = vadd.f32 %v6769_v38, %v6768_v58  ;;  %7212 = vmatprep.subr.bf16.mxu1 %v7624_v40 }
 0x25f   : > { %v3228_v61 = vmax.f32 %v3212_v27, 0.0  ;;  %v3075_v39 = vadd.f32 %v6706_v54, %v9170_v8  ;;  %v3169_v4 = vadd.f32 %v6767_v20, %v3072_v57 }
 0x261   : > { %v3237_v30 = vpack.c.bf16 %v3228_v61, %v3227_v15  ;;  %v3189_v63 = vadd.f32 %v3169_v4, %v9076_v37  ;;  %v3172_v11 = vadd.f32 %v6770_v34, %v3075_v39  ;;  %v6787_v49 = vpop.f32.mrb[96].mxu0  ;;  %v6851_v22 = vpop.f32.mrb[96].mxu1  ;;  %7213 = vmatpush3.bf16.msra.mxu1 %v7624_v40 }
 0x262   : > { %v6788_v0 = vpop.f32.mrb[97].mxu0  ;;  %v6852_v5 = vpop.f32.mrb[97].mxu1  ;;  %7214 = vmatprep.subr.bf16.mxu1 %v7625_v60 }
 0x263   : > { %5665 = vmatprep.mubr.bf16.mxu1 %v3237_v30  ;;  %v3190_v2 = vadd.f32 %v3172_v11, %v9084_v9  ;;  %v3213_v43 = vadd.f32 %v9176_v62, %v3189_v63  ;;  %v6789_v25 = vadd.f32 %v6788_v0, %v6787_v49  ;;  %v6853_v45 = vadd.f32 %v6852_v5, %v6851_v22  ;;  %v6790_v8 = vpop.f32.mrb[98].mxu0  ;;  %v6854_v59 = vpop.f32.mrb[98].mxu1 }
 0x264   : > { %5666 = vmatmul.mubr.bf16.gmra.mrb[184].mxu1 %v9065_v21  ;;  %v6791_v44 = vpop.f32.mrb[99].mxu0  ;;  %v6855_v37 = vpop.f32.mrb[99].mxu1 }
 0x265   : > { %v3214_v50 = vadd.f32 %v9176_v62, %v3190_v2  ;;  %v9232_v21 = vadd.f32 %v6853_v45, %v6789_v25  ;;  %v6792_v10 = vadd.f32 %v6791_v44, %v6790_v8  ;;  %v6856_v18 = vadd.f32 %v6855_v37, %v6854_v59  ;;  %7215 = vmatpush3.bf16.msra.mxu1 %v7625_v60 }
 0x266   : > { %v3229_v23 = vmax.f32 %v3213_v43, 0.0 }
 0x267   : > { %v3230_v9 = vmax.f32 %v3214_v50, 0.0  ;;  %v9234_v6 = vadd.f32 %v6856_v18, %v6792_v10 }
 0x269   : > { %v3238_v52 = vpack.c.bf16 %v3230_v9, %v3229_v23  ;;  %v6793_v35 = vpop.f32.mrb[100].mxu0  ;;  %v6857_v42 = vpop.f32.mrb[100].mxu1 }
 0x26a   : > { %v6794_v46 = vpop.f32.mrb[101].mxu0  ;;  %v6858_v36 = vpop.f32.mrb[101].mxu1 }
 0x26b   : > { %5673 = vmatprep.mubr.bf16.mxu1 %v3238_v52  ;;  %v6795_v24 = vadd.f32 %v6794_v46, %v6793_v35  ;;  %v6859_v53 = vadd.f32 %v6858_v36, %v6857_v42  ;;  %v6796_v1 = vpop.f32.mrb[102].mxu0  ;;  %v6860_v62 = vpop.f32.mrb[102].mxu1 }
 0x26c   : > { %5674 = vmatmul.mubr.bf16.gmra.mrb[188].mxu1 %v9097_v41  ;;  %v6797_v3 = vpop.f32.mrb[103].mxu0  ;;  %v6861_v26 = vpop.f32.mrb[103].mxu1 }
 0x26d   : > { %v9237_v32 = vadd.f32 %v6859_v53, %v6795_v24  ;;  %v6798_v14 = vadd.f32 %v6797_v3, %v6796_v1  ;;  %v6862_v28 = vadd.f32 %v6861_v26, %v6860_v62 }
 0x26f   : > { %v9239_v16 = vadd.f32 %v6862_v28, %v6798_v14 }
 0x271   : > { %v6799_v19 = vpop.f32.mrb[104].mxu0  ;;  %v6863_v33 = vpop.f32.mrb[104].mxu1 }
 0x272   : > { %v6800_v13 = vpop.f32.mrb[105].mxu0  ;;  %v6864_v47 = vpop.f32.mrb[105].mxu1 }
 0x273   : > { %v6801_v7 = vadd.f32 %v6800_v13, %v6799_v19  ;;  %v6865_v12 = vadd.f32 %v6864_v47, %v6863_v33  ;;  %v6802_v48 = vpop.f32.mrb[106].mxu0  ;;  %v6866_v41 = vpop.f32.mrb[106].mxu1 }
 0x274   : > { %v6803_v17 = vpop.f32.mrb[107].mxu0  ;;  %v6867_v27 = vpop.f32.mrb[107].mxu1 }
 0x275   : > { %v9241_v55 = vadd.f32 %v6865_v12, %v6801_v7  ;;  %v6804_v29 = vadd.f32 %v6803_v17, %v6802_v48  ;;  %v6868_v51 = vadd.f32 %v6867_v27, %v6866_v41 }
 0x277   : > { %v9243_v31 = vadd.f32 %v6868_v51, %v6804_v29 }
 0x279   : > { %v6805_v20 = vpop.f32.mrb[108].mxu0  ;;  %v6869_v58 = vpop.f32.mrb[108].mxu1 }
 0x27a   : > { %v6806_v15 = vpop.f32.mrb[109].mxu0  ;;  %v6870_v61 = vpop.f32.mrb[109].mxu1 }
 0x27b   : > { %v6807_v57 = vadd.f32 %v6806_v15, %v6805_v20  ;;  %v6871_v54 = vadd.f32 %v6870_v61, %v6869_v58  ;;  %v6808_v38 = vpop.f32.mrb[110].mxu0  ;;  %v6872_v34 = vpop.f32.mrb[110].mxu1 }
 0x27c   : > { %v6809_v30 = vpop.f32.mrb[111].mxu0  ;;  %v6873_v39 = vpop.f32.mrb[111].mxu1 }
 0x27d   : > { %v9245_v4 = vadd.f32 %v6871_v54, %v6807_v57  ;;  %v6810_v63 = vadd.f32 %v6809_v30, %v6808_v38  ;;  %v6874_v11 = vadd.f32 %v6873_v39, %v6872_v34 }
 0x27f   : > { %v9247_v56 = vadd.f32 %v6874_v11, %v6810_v63 }
 0x281   : > { %v6811_v49 = vpop.f32.mrb[112].mxu0  ;;  %v6875_v22 = vpop.f32.mrb[112].mxu1 }
 0x282   : > { %v6812_v2 = vpop.f32.mrb[113].mxu0  ;;  %v6876_v0 = vpop.f32.mrb[113].mxu1 }
 0x283   : > { %v6813_v5 = vadd.f32 %v6812_v2, %v6811_v49  ;;  %v6877_v43 = vadd.f32 %v6876_v0, %v6875_v22  ;;  %v6814_v25 = vpop.f32.mrb[114].mxu0  ;;  %v6878_v45 = vpop.f32.mrb[114].mxu1 }
 0x284   : > { %v6815_v8 = vpop.f32.mrb[115].mxu0  ;;  %v6879_v59 = vpop.f32.mrb[115].mxu1 }
 0x285   : > { %v9249_v44 = vadd.f32 %v6877_v43, %v6813_v5  ;;  %v6816_v37 = vadd.f32 %v6815_v8, %v6814_v25  ;;  %v6880_v50 = vadd.f32 %v6879_v59, %v6878_v45 }
 0x287   : > { %v9251_v10 = vadd.f32 %v6880_v50, %v6816_v37 }
 0x289   : > { %v6817_v18 = vpop.f32.mrb[116].mxu0  ;;  %v6881_v23 = vpop.f32.mrb[116].mxu1 }
 0x28a   : > { %v6818_v9 = vpop.f32.mrb[117].mxu0  ;;  %v6882_v52 = vpop.f32.mrb[117].mxu1 }
 0x28b   : > { %v6819_v40 = vadd.f32 %v6818_v9, %v6817_v18  ;;  %v6883_v35 = vadd.f32 %v6882_v52, %v6881_v23  ;;  %v6820_v42 = vpop.f32.mrb[118].mxu0  ;;  %v6884_v46 = vpop.f32.mrb[118].mxu1 }
 0x28c   : > { %v6821_v36 = vpop.f32.mrb[119].mxu0  ;;  %v6885_v24 = vpop.f32.mrb[119].mxu1 }
 0x28d   : > { %v9253_v53 = vadd.f32 %v6883_v35, %v6819_v40  ;;  %v6822_v1 = vadd.f32 %v6821_v36, %v6820_v42  ;;  %v6886_v62 = vadd.f32 %v6885_v24, %v6884_v46 }
 0x28f   : > { %v9255_v60 = vadd.f32 %v6886_v62, %v6822_v1 }
 0x291   : > { %v6823_v3 = vpop.f32.mrb[120].mxu0  ;;  %v6887_v26 = vpop.f32.mrb[120].mxu1 }
 0x292   : > { %v6824_v14 = vpop.f32.mrb[121].mxu0  ;;  %v6888_v28 = vpop.f32.mrb[121].mxu1 }
 0x293   : > { %v6825_v19 = vadd.f32 %v6824_v14, %v6823_v3  ;;  %v6889_v33 = vadd.f32 %v6888_v28, %v6887_v26  ;;  %v6826_v13 = vpop.f32.mrb[122].mxu0  ;;  %v6890_v47 = vpop.f32.mrb[122].mxu1  ;;  %v9577_v14 = vld [vmem:[#allocation35_spill] sm:$0xff] }
 0x294   : > { %v6827_v7 = vpop.f32.mrb[123].mxu0  ;;  %v6891_v12 = vpop.f32.mrb[123].mxu1 }
 0x295   : > { %v9257_v48 = vadd.f32 %v6889_v33, %v6825_v19  ;;  %v6828_v41 = vadd.f32 %v6827_v7, %v6826_v13  ;;  %v6892_v17 = vadd.f32 %v6891_v12, %v6890_v47 }
 0x297   : > { %v9259_v27 = vadd.f32 %v6892_v17, %v6828_v41 }
 0x299   : > { %v6893_v29 = vpop.f32.mrb[124].mxu1  ;;  %v6829_v51 = vpop.f32.mrb[124].mxu0 }
 0x29a   : > { %v6894_v20 = vpop.f32.mrb[125].mxu1  ;;  %v6830_v58 = vpop.f32.mrb[125].mxu0 }
 0x29b   : > { %v6895_v15 = vadd.f32 %v6894_v20, %v6893_v29  ;;  %v6896_v61 = vpop.f32.mrb[126].mxu1  ;;  %v6831_v57 = vadd.f32 %v6830_v58, %v6829_v51  ;;  %v6832_v54 = vpop.f32.mrb[126].mxu0 }
 0x29c   : > { %v6897_v38 = vpop.f32.mrb[127].mxu1  ;;  %v6833_v34 = vpop.f32.mrb[127].mxu0 }
 0x29d   : > { %v6898_v30 = vadd.f32 %v6897_v38, %v6896_v61  ;;  %v9261_v39 = vadd.f32 %v6895_v15, %v6831_v57  ;;  %v6834_v63 = vadd.f32 %v6833_v34, %v6832_v54  ;;  %v9578_v54 = vld [vmem:[#allocation36_spill] sm:$0xff] }
 0x29f   : > { %v9263_v11 = vadd.f32 %v6898_v30, %v6834_v63 }
 0x2a1   : > { %v6915_v49 = vpop.f32.mrb[128].mxu0 }
 0x2a2   : > { %v6916_v22 = vpop.f32.mrb[129].mxu0 }
 0x2a3   : > { %v6917_v2 = vadd.f32 %v6916_v22, %v6915_v49  ;;  %v6918_v0 = vpop.f32.mrb[130].mxu0  ;;  %v9579_v49 = vld [vmem:[#allocation37_spill] sm:$0xff] }
 0x2a4   : > { %v6919_v5 = vpop.f32.mrb[131].mxu0  ;;  %v6979_v8 = vpop.f32.mrb[128].mxu1 }
 0x2a5   : > { %v4789_v43 = vadd.f32 %v6917_v2, %v9232_v21  ;;  %v6920_v25 = vadd.f32 %v6919_v5, %v6918_v0  ;;  %v6980_v37 = vpop.f32.mrb[129].mxu1  ;;  %v9271_v21 = vld [vmem:[%s9486_s6 + $0x2] ss:$0 sm:$0xff] }
 0x2a6   : > { %v6981_v18 = vadd.f32 %v6980_v37, %v6979_v8  ;;  %v6982_v23 = vpop.f32.mrb[130].mxu1 }
 0x2a7   : > { %v4792_v45 = vadd.f32 %v6920_v25, %v9234_v6  ;;  %v6983_v40 = vpop.f32.mrb[131].mxu1  ;;  %v9576_v6 = vld [vmem:[#allocation34_spill] sm:$0xff] }
 0x2a8   : > { %v4886_v42 = vadd.f32 %v6981_v18, %v4789_v43  ;;  %v6984_v46 = vadd.f32 %v6983_v40, %v6982_v23  ;;  %v9580_v25 = vld [vmem:[#allocation38_spill] sm:$0xff] }
 0x2a9   : > { %v6921_v59 = vpop.f32.mrb[132].mxu0 }
 0x2aa   : > { %v6922_v50 = vpop.f32.mrb[133].mxu0  ;;  %v4948_v1 = vadd.f32 %v4886_v42, %v9576_v6  ;;  %v4889_v62 = vadd.f32 %v6984_v46, %v4792_v45  ;;  %v9581_v46 = vld [vmem:[#allocation39_spill] sm:$0xff] }
 0x2ab   : > { %v6923_v9 = vadd.f32 %v6922_v50, %v6921_v59  ;;  %v6924_v52 = vpop.f32.mrb[134].mxu0 }
 0x2ac   : > { %v6925_v35 = vpop.f32.mrb[135].mxu0  ;;  %v4972_v26 = vadd.f32 %v9271_v21, %v4948_v1  ;;  %v4949_v28 = vadd.f32 %v4889_v62, %v9577_v14  ;;  %v9582_v62 = vld [vmem:[#allocation40_spill] sm:$0xff] }
 0x2ad   : > { %v4797_v36 = vadd.f32 %v6923_v9, %v9237_v32  ;;  %v6926_v24 = vadd.f32 %v6925_v35, %v6924_v52 }
 0x2ae   : > { %v4973_v32 = vadd.f32 %v9271_v21, %v4949_v28  ;;  %v4988_v29 = vmax.f32 %v4972_v26, 0.0 }
 0x2af   : > { %v4800_v3 = vadd.f32 %v6926_v24, %v9239_v16 }
 0x2b0   : > { %v4989_v58 = vmax.f32 %v4973_v32, 0.0 }
 0x2b1   : > { %v6927_v33 = vpop.f32.mrb[136].mxu0 }
 0x2b2   : > { %v6985_v19 = vpop.f32.mrb[132].mxu1  ;;  %v6928_v47 = vpop.f32.mrb[137].mxu0  ;;  %v5004_v30 = vpack.c.bf16 %v4989_v58, %v4988_v29 }
 0x2b3   : > { %v6986_v13 = vpop.f32.mrb[133].mxu1  ;;  %v6929_v41 = vadd.f32 %v6928_v47, %v6927_v33  ;;  %v6930_v17 = vpop.f32.mrb[138].mxu0  ;;  %v9583_v33 = vld [vmem:[#allocation43_spill] sm:$0xff] }
 0x2b4   : > { %v6987_v7 = vadd.f32 %v6986_v13, %v6985_v19  ;;  %v6988_v12 = vpop.f32.mrb[134].mxu1  ;;  %v6931_v20 = vpop.f32.mrb[139].mxu0  ;;  %5715 = vmatmul.mubr.bf16.vlgmr.msra.gmra.mrb[164].mxu0 %v5004_v30 }
 0x2b5   : > { %v6989_v51 = vpop.f32.mrb[135].mxu1  ;;  %v4805_v61 = vadd.f32 %v6929_v41, %v9241_v55  ;;  %v6932_v57 = vadd.f32 %v6931_v20, %v6930_v17  ;;  %5722 = vmatprep.mubr.bf16.mxu0 %v9580_v25 }
 0x2b6   : > { %v4894_v15 = vadd.f32 %v6987_v7, %v4797_v36  ;;  %v6990_v16 = vadd.f32 %v6989_v51, %v6988_v12 }
 0x2b7   : > { %v4808_v63 = vadd.f32 %v6932_v57, %v9243_v31 }
 0x2b8   : > { %v4950_v38 = vadd.f32 %v4894_v15, %v9578_v54  ;;  %v4897_v34 = vadd.f32 %v6990_v16, %v4800_v3  ;;  %v9584_v16 = vld [vmem:[#allocation41_spill] sm:$0xff] }
 0x2b9   : > { %v6933_v0 = vpop.f32.mrb[140].mxu0 }
 0x2ba   : > { %v4951_v22 = vadd.f32 %v4897_v34, %v9579_v49  ;;  %v6991_v2 = vpop.f32.mrb[136].mxu1  ;;  %v4974_v5 = vadd.f32 %v9271_v21, %v4950_v38  ;;  %v6934_v45 = vpop.f32.mrb[141].mxu0  ;;  %v9585_v34 = vld [vmem:[#allocation42_spill] sm:$0xff] }
 0x2bb   : > { %v6992_v43 = vpop.f32.mrb[137].mxu1  ;;  %v6935_v59 = vadd.f32 %v6934_v45, %v6933_v0  ;;  %v6936_v37 = vpop.f32.mrb[142].mxu0  ;;  %v9586_v0 = vld [vmem:[#allocation46_spill] sm:$0xff] }
 0x2bc   : > { %v6993_v8 = vadd.f32 %v6992_v43, %v6991_v2  ;;  %v6994_v55 = vpop.f32.mrb[138].mxu1  ;;  %v4975_v50 = vadd.f32 %v9271_v21, %v4951_v22  ;;  %v4990_v23 = vmax.f32 %v4974_v5, 0.0  ;;  %v6937_v31 = vpop.f32.mrb[143].mxu0 }
 0x2bd   : > { %v6995_v18 = vpop.f32.mrb[139].mxu1  ;;  %v4813_v40 = vadd.f32 %v6935_v59, %v9245_v4  ;;  %v6938_v42 = vadd.f32 %v6937_v31, %v6936_v37 }
 0x2be   : > { %v4902_v9 = vadd.f32 %v6993_v8, %v4805_v61  ;;  %v6996_v52 = vadd.f32 %v6995_v18, %v6994_v55  ;;  %v4991_v35 = vmax.f32 %v4975_v50, 0.0 }
 0x2bf   : > { %v4816_v1 = vadd.f32 %v6938_v42, %v9247_v56 }
 0x2c0   : > { %v4952_v36 = vadd.f32 %v4902_v9, %v9581_v46  ;;  %v4905_v24 = vadd.f32 %v6996_v52, %v4808_v63  ;;  %v5005_v6 = vpack.c.bf16 %v4991_v35, %v4990_v23  ;;  %v9587_v9 = vld [vmem:[#allocation44_spill] sm:$0xff]  ;;  %v9588_v46 = vld [vmem:[#allocation45_spill] sm:$0xff] }
 0x2c1   : > { %v6939_v14 = vpop.f32.mrb[144].mxu0 }
 0x2c2   : > { %v4953_v3 = vadd.f32 %v4905_v24, %v9582_v62  ;;  %v6997_v26 = vpop.f32.mrb[140].mxu1  ;;  %5723 = vmatmul.mubr.bf16.gmra.mrb[168].mxu0 %v5005_v6  ;;  %v4976_v28 = vadd.f32 %v9271_v21, %v4952_v36  ;;  %v6940_v13 = vpop.f32.mrb[145].mxu0 }
 0x2c3   : > { %v6998_v19 = vpop.f32.mrb[141].mxu1  ;;  %5730 = vmatprep.mubr.bf16.mxu0 %v9583_v33  ;;  %v6941_v32 = vadd.f32 %v6940_v13, %v6939_v14  ;;  %v6942_v7 = vpop.f32.mrb[146].mxu0 }
 0x2c4   : > { %v6999_v4 = vadd.f32 %v6998_v19, %v6997_v26  ;;  %v7000_v47 = vpop.f32.mrb[142].mxu1  ;;  %v4977_v12 = vadd.f32 %v9271_v21, %v4953_v3  ;;  %v4992_v17 = vmax.f32 %v4976_v28, 0.0  ;;  %v6943_v56 = vpop.f32.mrb[147].mxu0  ;;  %v9589_v3 = vld [vmem:[#allocation49_spill] sm:$0xff] }
 0x2c5   : > { %v7001_v41 = vpop.f32.mrb[143].mxu1  ;;  %v4821_v20 = vadd.f32 %v6941_v32, %v9249_v44  ;;  %v6944_v15 = vadd.f32 %v6943_v56, %v6942_v7 }
 0x2c6   : > { %v4910_v29 = vadd.f32 %v6999_v4, %v4813_v40  ;;  %v7002_v51 = vadd.f32 %v7001_v41, %v7000_v47  ;;  %v4993_v58 = vmax.f32 %v4977_v12, 0.0 }
 0x2c7   : > { %v4824_v38 = vadd.f32 %v6944_v15, %v9251_v10 }
 0x2c8   : > { %v4954_v61 = vadd.f32 %v4910_v29, %v9584_v16  ;;  %v4913_v57 = vadd.f32 %v7002_v51, %v4816_v1  ;;  %v5006_v54 = vpack.c.bf16 %v4993_v58, %v4992_v17  ;;  %v9590_v17 = vld [vmem:[#allocation47_spill] sm:$0xff]  ;;  %v9591_v58 = vld [vmem:[#allocation48_spill] sm:$0xff] }
 0x2c9   : > { %v6945_v49 = vpop.f32.mrb[148].mxu0 }
 0x2ca   : > { %v4955_v30 = vadd.f32 %v4913_v57, %v9585_v34  ;;  %v7003_v63 = vpop.f32.mrb[144].mxu1  ;;  %5731 = vmatmul.mubr.bf16.gmra.mrb[172].mxu0 %v5006_v54  ;;  %v4978_v22 = vadd.f32 %v9271_v21, %v4954_v61  ;;  %v6946_v5 = vpop.f32.mrb[149].mxu0 }
 0x2cb   : > { %v7004_v2 = vpop.f32.mrb[145].mxu1  ;;  %5738 = vmatprep.mubr.bf16.mxu0 %v9586_v0  ;;  %v6947_v25 = vadd.f32 %v6946_v5, %v6945_v49  ;;  %v6948_v45 = vpop.f32.mrb[150].mxu0 }
 0x2cc   : > { %v7005_v44 = vadd.f32 %v7004_v2, %v7003_v63  ;;  %v7006_v43 = vpop.f32.mrb[146].mxu1  ;;  %v4979_v8 = vadd.f32 %v9271_v21, %v4955_v30  ;;  %v4994_v59 = vmax.f32 %v4978_v22, 0.0  ;;  %v6949_v10 = vpop.f32.mrb[151].mxu0 }
 0x2cd   : > { %v7007_v55 = vpop.f32.mrb[147].mxu1  ;;  %v4829_v18 = vadd.f32 %v6947_v25, %v9253_v53  ;;  %v6950_v31 = vadd.f32 %v6949_v10, %v6948_v45 }
 0x2ce   : > { %v4918_v37 = vadd.f32 %v7005_v44, %v4821_v20  ;;  %v7008_v50 = vadd.f32 %v7007_v55, %v7006_v43  ;;  %v4995_v23 = vmax.f32 %v4979_v8, 0.0  ;;  %v5205_v8 = vlaneseq  ;;  %v9593_v55 = vld [vmem:[#allocation50_spill] sm:$0xff] }
 0x2cf   : > { %v4832_v42 = vadd.f32 %v6950_v31, %v9255_v60 }
 0x2d0   : > { %v4956_v52 = vadd.f32 %v4918_v37, %v9587_v9  ;;  %v4921_v40 = vadd.f32 %v7008_v50, %v4824_v38  ;;  %v5007_v35 = vpack.c.bf16 %v4995_v23, %v4994_v59  ;;  %v9592_v38 = vld [vmem:[#allocation52_spill] sm:$0xff]  ;;  %v6457_v50 = vld [vmem:[%s9486_s6 + $0x4] sm:$0x1]  ;;  %v9594_v23 = vld [vmem:[#allocation51_spill] sm:$0xff] }
 0x2d1   : > { %v6951_v6 = vpop.f32.mrb[152].mxu0 }
 0x2d2   : > { %v4957_v36 = vadd.f32 %v4921_v40, %v9588_v46  ;;  %5739 = vmatmul.mubr.bf16.gmra.mrb[176].mxu0 %v5007_v35  ;;  %v4980_v1 = vadd.f32 %v9271_v21, %v4956_v52  ;;  %v6952_v26 = vpop.f32.mrb[153].mxu0  ;;  %v9595_v35 = vld [vmem:[#allocation55_spill] sm:$0xff]  ;;  %v5206_v46 = vshrl.u32 %v5205_v8, 7 }
 0x2d3   : > { %v7009_v24 = vpop.f32.mrb[148].mxu1  ;;  %5746 = vmatprep.mubr.bf16.mxu0 %v9589_v3  ;;  %v6953_v28 = vadd.f32 %v6952_v26, %v6951_v6  ;;  %v6954_v19 = vpop.f32.mrb[154].mxu0 }
 0x2d4   : > { %v7010_v62 = vpop.f32.mrb[149].mxu1  ;;  %v4981_v33 = vadd.f32 %v9271_v21, %v4957_v36  ;;  %v4996_v4 = vmax.f32 %v4980_v1, 0.0  ;;  %v6955_v60 = vpop.f32.mrb[155].mxu0 }
 0x2d5   : > { %v7011_v53 = vadd.f32 %v7010_v62, %v7009_v24  ;;  %v7012_v14 = vpop.f32.mrb[150].mxu1  ;;  %v4837_v7 = vadd.f32 %v6953_v28, %v9257_v48  ;;  %v6956_v41 = vadd.f32 %v6955_v60, %v6954_v19 }
 0x2d6   : > { %v7013_v13 = vpop.f32.mrb[151].mxu1  ;;  %v4997_v12 = vmax.f32 %v4981_v33, 0.0 }
 0x2d7   : > { %v4926_v47 = vadd.f32 %v7011_v53, %v4829_v18  ;;  %v7014_v32 = vadd.f32 %v7013_v13, %v7012_v14  ;;  %v4840_v20 = vadd.f32 %v6956_v41, %v9259_v27  ;;  %v5207_v13 = vsub.s32 0, %v5206_v46 }
 0x2d8   : > { %v5008_v51 = vpack.c.bf16 %v4997_v12, %v4996_v4  ;;  %v9596_v4 = vld [vmem:[#allocation53_spill] sm:$0xff]  ;;  %v9597_v12 = vld [vmem:[#allocation54_spill] sm:$0xff] }
 0x2d9   : > { %v4958_v56 = vadd.f32 %v4926_v47, %v9590_v17  ;;  %v4929_v29 = vadd.f32 %v7014_v32, %v4832_v42  ;;  %v6957_v61 = vpop.f32.mrb[156].mxu0 }
 0x2da   : > { %5747 = vmatmul.mubr.bf16.gmra.mrb[180].mxu0 %v5008_v51  ;;  %v6958_v34 = vpop.f32.mrb[157].mxu0 }
 0x2db   : > { %v4959_v15 = vadd.f32 %v4929_v29, %v9591_v58  ;;  %v7015_v16 = vpop.f32.mrb[152].mxu1  ;;  %v4982_v57 = vadd.f32 %v9271_v21, %v4958_v56  ;;  %5754 = vmatprep.mubr.bf16.mxu0 %v9592_v38  ;;  %v6959_v63 = vadd.f32 %v6958_v34, %v6957_v61  ;;  %v6960_v49 = vpop.f32.mrb[158].mxu0  ;;  %v9598_v29 = vld [vmem:[#allocation56_spill] sm:$0xff] }
 0x2dc   : > { %v7016_v54 = vpop.f32.mrb[153].mxu1  ;;  %v6961_v27 = vpop.f32.mrb[159].mxu0 }
 0x2dd   : > { %v7017_v48 = vadd.f32 %v7016_v54, %v7015_v16  ;;  %v7018_v30 = vpop.f32.mrb[154].mxu1  ;;  %v4983_v22 = vadd.f32 %v9271_v21, %v4959_v15  ;;  %v4998_v0 = vmax.f32 %v4982_v57, 0.0  ;;  %v4845_v43 = vadd.f32 %v6959_v63, %v9261_v39 }
 0x2de   : > { %v7019_v2 = vpop.f32.mrb[155].mxu1  ;;  %v6962_v45 = vadd.f32 %v6961_v27, %v6960_v49 }
 0x2df   : > { %v4934_v5 = vadd.f32 %v7017_v48, %v4837_v7  ;;  %v7020_v44 = vadd.f32 %v7019_v2, %v7018_v30  ;;  %v4999_v25 = vmax.f32 %v4983_v22, 0.0 }
 0x2e0   : > { %v4848_v18 = vadd.f32 %v6962_v45, %v9263_v11 }
 0x2e1   : > { %v4960_v59 = vadd.f32 %v4934_v5, %v9593_v55  ;;  %v4937_v10 = vadd.f32 %v7020_v44, %v4840_v20  ;;  %v5009_v37 = vpack.c.bf16 %v4999_v25, %v4998_v0  ;;  %v5194_v52 = vpop.f32.mrb[160].mxu0 }
 0x2e2   : > { %v5195_v42 = vadd.f32 %v6457_v50, %v5194_v52  ;;  %v7198_v36 = vpop.f32.mrb[161].mxu0 }
 0x2e3   : > { %v4961_v31 = vadd.f32 %v4937_v10, %v9594_v23  ;;  %v7021_v9 = vpop.f32.mrb[156].mxu1  ;;  %5755 = vmatmul.mubr.bf16.gmra.mrb[184].mxu0 %v5009_v37  ;;  %v4984_v39 = vadd.f32 %v9271_v21, %v4960_v59  ;;  %v5197_v1 = vpop.f32.mrb[162].mxu0 }
 0x2e4   : > { %v7022_v40 = vpop.f32.mrb[157].mxu1  ;;  %5762 = vmatprep.mubr.bf16.mxu0 %v9595_v35  ;;  %v5200_v11 = vmax.f32 %v5195_v42, 0.0  ;;  %v7199_v26 = vpop.f32.mrb[163].mxu0 }
 0x2e5   : > { %v7023_v24 = vadd.f32 %v7022_v40, %v7021_v9  ;;  %v7024_v6 = vpop.f32.mrb[158].mxu1  ;;  %v4985_v62 = vadd.f32 %v9271_v21, %v4961_v31  ;;  %v5000_v28 = vmax.f32 %v4984_v39, 0.0 }
 0x2e6   : > { %v7025_v3 = vpop.f32.mrb[159].mxu1  ;;  %v5201_v33 = vpack.c.bf16 %v5200_v11, %v5200_v11 }
 0x2e7   : > { %v4942_v53 = vadd.f32 %v7023_v24, %v4845_v43  ;;  %v7026_v14 = vadd.f32 %v7025_v3, %v7024_v6  ;;  %v5001_v19 = vmax.f32 %v4985_v62, 0.0 }
 0x2e8   : > { %v5203_v7 = vpack.i.b16 %v5201_v33, %v5201_v33  ;;  %v9347_v33 = vld [vmem:[%s9486_s6 + $0x5] ss:$0 sm:$0xff] }
 0x2e9   : > { %v4962_v60 = vadd.f32 %v4942_v53, %v9596_v4  ;;  %v4945_v47 = vadd.f32 %v7026_v14, %v4848_v18  ;;  %v5010_v32 = vpack.c.bf16 %v5001_v19, %v5000_v28 }
 0x2ea   : > { %v5208_v56 = vrot.slane %v5203_v7, %v5207_v13 }
 0x2eb   : > { %v4963_v41 = vadd.f32 %v4945_v47, %v9597_v12  ;;  %5763 = vmatmul.mubr.bf16.gmra.mrb[188].mxu0 %v5010_v32  ;;  %v4986_v17 = vadd.f32 %v9271_v21, %v4962_v60 }
 0x2ec   : > { %5770 = vmatprep.mubr.bf16.mxu0 %v9598_v29  ;;  %7216 = vmatprep.mubr.bf16.mxu1 %v5208_v56 }
 0x2ed   : > { %v4987_v51 = vadd.f32 %v9271_v21, %v4963_v41  ;;  %v5002_v20 = vmax.f32 %v4986_v17, 0.0  ;;  %7217 = vmatmul.mubr.bf16.vlgmr.msra.gmra.mrb[192].mxu1 %v5208_v56 }
 0x2ee   : > { %7220 = vmatprep.mubr.bf16.mxu1 %v5208_v56 }
 0x2ef   : > { %v5003_v58 = vmax.f32 %v4987_v51, 0.0 }
 0x2f1   : > { %v5011_v15 = vpack.c.bf16 %v5003_v58, %v5002_v20 }
 0x2f3   : > { %5771 = vmatmul.mubr.bf16.gmra.mrb[192].mxu0 %v5011_v15 }
 0x2f5   : > { %7221 = vmatmul.mubr.bf16.gmra.mrb[196].mxu1 %v5208_v56 }
 0x2f6   : > { %7224 = vmatprep.mubr.bf16.mxu1 %v5208_v56 }
 0x2fd   : > { %7225 = vmatmul.mubr.bf16.gmra.mrb[200].mxu1 %v5208_v56 }
 0x2fe   : > { %7228 = vmatprep.mubr.bf16.mxu1 %v5208_v56 }
 0x305   : > { %7229 = vmatmul.mubr.bf16.gmra.mrb[204].mxu1 %v5208_v56 }
 0x307   : > { %v7052_v16 = vpop.f32.mrb[160].mxu1 }
 0x308   : > { %v7053_v61 = vpop.f32.mrb[161].mxu1 }
 0x309   : > { %v7054_v57 = vadd.f32 %v7053_v61, %v7052_v16  ;;  %v7055_v54 = vpop.f32.mrb[162].mxu1 }
 0x30a   : > { %v7056_v38 = vpop.f32.mrb[163].mxu1 }
 0x30b   : > { %v7057_v34 = vadd.f32 %v7056_v38, %v7055_v54  ;;  %v5620_v60 = vadd.f32 %v7054_v57, %v9347_v33 }
 0x30d   : > { %v5623_v12 = vadd.f32 %v7057_v34, %v9347_v33 }
 0x30f   : > { %v7058_v48 = vpop.f32.mrb[164].mxu1 }
 0x310   : > { %v7059_v21 = vpop.f32.mrb[165].mxu1 }
 0x311   : > { %v7060_v30 = vadd.f32 %v7059_v21, %v7058_v48  ;;  %v7061_v63 = vpop.f32.mrb[166].mxu1 }
 0x312   : > { %v7062_v49 = vpop.f32.mrb[167].mxu1 }
 0x313   : > { %v7063_v22 = vadd.f32 %v7062_v49, %v7061_v63  ;;  %v5628_v20 = vadd.f32 %v7060_v30, %v9347_v33 }
 0x315   : > { %v5631_v61 = vadd.f32 %v7063_v22, %v9347_v33 }
 0x317   : > { %v7064_v2 = vpop.f32.mrb[168].mxu1 }
 0x318   : > { %v7065_v0 = vpop.f32.mrb[169].mxu1 }
 0x319   : > { %v7066_v27 = vadd.f32 %v7065_v0, %v7064_v2  ;;  %v7067_v5 = vpop.f32.mrb[170].mxu1 }
 0x31a   : > { %v7068_v44 = vpop.f32.mrb[171].mxu1 }
 0x31b   : > { %v7069_v43 = vadd.f32 %v7068_v44, %v7067_v5  ;;  %v5636_v34 = vadd.f32 %v7066_v27, %v9347_v33 }
 0x31d   : > { %v5639_v0 = vadd.f32 %v7069_v43, %v9347_v33 }
 0x31f   : > { %v7070_v25 = vpop.f32.mrb[172].mxu1 }
 0x320   : > { %v7071_v45 = vpop.f32.mrb[173].mxu1 }
 0x321   : > { %v7072_v8 = vadd.f32 %v7071_v45, %v7070_v25  ;;  %v7073_v55 = vpop.f32.mrb[174].mxu1 }
 0x322   : > { %v7074_v59 = vpop.f32.mrb[175].mxu1 }
 0x323   : > { %v7075_v10 = vadd.f32 %v7074_v59, %v7073_v55  ;;  %v5644_v22 = vadd.f32 %v7072_v8, %v9347_v33 }
 0x327   : > { %v7076_v37 = vpop.f32.mrb[176].mxu1 }
 0x328   : > { %v7077_v50 = vpop.f32.mrb[177].mxu1 }
 0x329   : > { %v9328_v18 = vadd.f32 %v7077_v50, %v7076_v37  ;;  %v7079_v23 = vpop.f32.mrb[178].mxu1  ;;  %v5647_v50 = vadd.f32 %v7075_v10, %v9347_v33 }
 0x32a   : > { %v7080_v31 = vpop.f32.mrb[179].mxu1 }
 0x32b   : > { %v9330_v9 = vadd.f32 %v7080_v31, %v7079_v23 }
 0x32d   : > { %v5655_v8 = vadd.f32 %v9330_v9, %v9347_v33 }
 0x32f   : > { %v7082_v52 = vpop.f32.mrb[180].mxu1 }
 0x330   : > { %v7083_v39 = vpop.f32.mrb[181].mxu1 }
 0x331   : > { %v9332_v40 = vadd.f32 %v7083_v39, %v7082_v52  ;;  %v7085_v35 = vpop.f32.mrb[182].mxu1  ;;  %v5652_v39 = vadd.f32 %v9328_v18, %v9347_v33 }
 0x332   : > { %v7086_v42 = vpop.f32.mrb[183].mxu1 }
 0x333   : > { %v9334_v46 = vadd.f32 %v7086_v42, %v7085_v35 }
 0x335   : > { %v5663_v18 = vadd.f32 %v9334_v46, %v9347_v33 }
 0x337   : > { %v7088_v36 = vpop.f32.mrb[184].mxu1 }
 0x338   : > { %v7089_v24 = vpop.f32.mrb[185].mxu1 }
 0x339   : > { %v9336_v6 = vadd.f32 %v7089_v24, %v7088_v36  ;;  %v7091_v1 = vpop.f32.mrb[186].mxu1 }
 0x33a   : > { %v7092_v62 = vpop.f32.mrb[187].mxu1 }
 0x33b   : > { %v9338_v3 = vadd.f32 %v7092_v62, %v7091_v1 }
 0x33f   : > { %v7094_v11 = vpop.f32.mrb[188].mxu1 }
 0x340   : > { %v7095_v26 = vpop.f32.mrb[189].mxu1 }
 0x341   : > { %v9340_v53 = vadd.f32 %v7095_v26, %v7094_v11  ;;  %v7097_v14 = vpop.f32.mrb[190].mxu1  ;;  %v5660_v26 = vadd.f32 %v9332_v40, %v9347_v33  ;;  %v5671_v40 = vadd.f32 %v9338_v3, %v9347_v33 }
 0x342   : > { %v7098_v28 = vpop.f32.mrb[191].mxu1 }
 0x343   : > { %v9342_v19 = vadd.f32 %v7098_v28, %v7097_v14 }
 0x387   : > { %v7116_v13 = vpop.f32.mrb[164].mxu0 }
 0x388   : > { %v7117_v4 = vpop.f32.mrb[165].mxu0 }
 0x389   : > { %v7118_v47 = vadd.f32 %v7117_v4, %v7116_v13  ;;  %v7119_v32 = vpop.f32.mrb[166].mxu0 }
 0x38a   : > { %v7120_v7 = vpop.f32.mrb[167].mxu0 }
 0x38b   : > { %v7121_v41 = vadd.f32 %v7120_v7, %v7119_v32  ;;  %v9351_v17 = vadd.f32 %v7118_v47, %v5620_v60  ;;  %v5668_v7 = vadd.f32 %v9336_v6, %v9347_v33 }
 0x38d   : > { %v9353_v56 = vadd.f32 %v7121_v41, %v5623_v12 }
 0x395   : > { %v7122_v29 = vpop.f32.mrb[168].mxu0 }
 0x396   : > { %v7123_v51 = vpop.f32.mrb[169].mxu0 }
 0x397   : > { %v7124_v58 = vadd.f32 %v7123_v51, %v7122_v29  ;;  %v7125_v15 = vpop.f32.mrb[170].mxu0 }
 0x398   : > { %v7126_v16 = vpop.f32.mrb[171].mxu0 }
 0x399   : > { %v7127_v57 = vadd.f32 %v7126_v16, %v7125_v15  ;;  %v5725_v54 = vadd.f32 %v7124_v58, %v5628_v20 }
 0x39b   : > { %v5728_v38 = vadd.f32 %v7127_v57, %v5631_v61 }
 0x39d   : > { %v7128_v48 = vpop.f32.mrb[172].mxu0 }
 0x39e   : > { %v7129_v21 = vpop.f32.mrb[173].mxu0 }
 0x39f   : > { %v7130_v63 = vadd.f32 %v7129_v21, %v7128_v48  ;;  %v7131_v49 = vpop.f32.mrb[174].mxu0 }
 0x3a0   : > { %v7132_v2 = vpop.f32.mrb[175].mxu0 }
 0x3a1   : > { %v7133_v5 = vadd.f32 %v7132_v2, %v7131_v49  ;;  %v9359_v44 = vadd.f32 %v7130_v63, %v5636_v34 }
 0x3a3   : > { %v9361_v30 = vadd.f32 %v7133_v5, %v5639_v0 }
 0x3a5   : > { %v7134_v25 = vpop.f32.mrb[176].mxu0 }
 0x3a6   : > { %v7135_v45 = vpop.f32.mrb[177].mxu0 }
 0x3a7   : > { %v7136_v55 = vadd.f32 %v7135_v45, %v7134_v25  ;;  %v7137_v59 = vpop.f32.mrb[178].mxu0 }
 0x3a8   : > { %v7138_v37 = vpop.f32.mrb[179].mxu0 }
 0x3a9   : > { %v7139_v27 = vadd.f32 %v7138_v37, %v7137_v59  ;;  %v5741_v23 = vadd.f32 %v7136_v55, %v5644_v22 }
 0x3ab   : > { %v9365_v31 = vadd.f32 %v7139_v27, %v5647_v50 }
 0x3ad   : > { %v7140_v52 = vpop.f32.mrb[180].mxu0 }
 0x3ae   : > { %v7141_v43 = vpop.f32.mrb[181].mxu0 }
 0x3af   : > { %v7142_v35 = vadd.f32 %v7141_v43, %v7140_v52  ;;  %v7143_v42 = vpop.f32.mrb[182].mxu0 }
 0x3b0   : > { %v7144_v36 = vpop.f32.mrb[183].mxu0 }
 0x3b1   : > { %v7145_v24 = vadd.f32 %v7144_v36, %v7143_v42  ;;  %v9371_v1 = vadd.f32 %v7142_v35, %v5652_v39 }
 0x3b3   : > { %v9373_v62 = vadd.f32 %v7145_v24, %v5655_v8 }
 0x3b6   : > { %v7146_v10 = vpop.f32.mrb[184].mxu0 }
 0x3b7   : > { %v7147_v11 = vpop.f32.mrb[185].mxu0 }
 0x3b8   : > { %v7148_v14 = vadd.f32 %v7147_v11, %v7146_v10  ;;  %v7149_v28 = vpop.f32.mrb[186].mxu0 }
 0x3b9   : > { %v7150_v13 = vpop.f32.mrb[187].mxu0 }
 0x3ba   : > { %v7151_v4 = vadd.f32 %v7150_v13, %v7149_v28  ;;  %v5757_v60 = vadd.f32 %v7148_v14, %v5660_v26 }
 0x3bc   : > { %v5760_v47 = vadd.f32 %v7151_v4, %v5663_v18 }
 0x3be   : > { %v7152_v9 = vpop.f32.mrb[188].mxu0 }
 0x3bf   : > { %v7153_v32 = vpop.f32.mrb[189].mxu0 }
 0x3c0   : > { %v7154_v12 = vadd.f32 %v7153_v32, %v7152_v9  ;;  %v7155_v41 = vpop.f32.mrb[190].mxu0  ;;  %v7218_v20 = vpop.f32.mrb[192].mxu1 }
 0x3c1   : > { %v7156_v29 = vpop.f32.mrb[191].mxu0  ;;  %v5822_v46 = vadd.f32 %v7218_v20, %v5725_v54  ;;  %v5813_v15 = vpop.f32.mrb[193].mxu1  ;;  %v5676_v54 = vadd.f32 %v9340_v53, %v9347_v33 }
 0x3c2   : > { %v7157_v51 = vadd.f32 %v7156_v29, %v7155_v41  ;;  %v9383_v58 = vadd.f32 %v7154_v12, %v5668_v7  ;;  %v5814_v16 = vadd.f32 %v5813_v15, %v9351_v17  ;;  %v7219_v61 = vpop.f32.mrb[194].mxu1 }
 0x3c3   : > { %v5878_v6 = vmax.f32 %v5822_v46, 0.0  ;;  %v5825_v48 = vadd.f32 %v7219_v61, %v5728_v38  ;;  %v5816_v21 = vpop.f32.mrb[195].mxu1  ;;  %v5679_v38 = vadd.f32 %v9342_v19, %v9347_v33 }
 0x3c4   : > { %v9386_v57 = vadd.f32 %v7157_v51, %v5671_v40  ;;  %v5876_v3 = vmax.f32 %v5814_v16, 0.0  ;;  %v5817_v63 = vadd.f32 %v5816_v21, %v9353_v56 }
 0x3c5   : > { %5894 = vst [vmem:[%s8140_s12 + $0x10] sm:$0xff] %v5878_v6  ;;  %v5879_v2 = vmax.f32 %v5825_v48, 0.0 }
 0x3c6   : > { %v7158_v34 = vpop.f32.mrb[192].mxu0  ;;  %5892 = vst [vmem:[%s8140_s12] sm:$0xff] %v5876_v3  ;;  %v5877_v5 = vmax.f32 %v5817_v63, 0.0 }
 0x3c7   : > { %v7159_v49 = vpop.f32.mrb[193].mxu0  ;;  %5895 = vst [vmem:[%s8140_s12 + $0x18] sm:$0xff] %v5879_v2 }
 0x3c8   : > { %v7160_v0 = vadd.f32 %v7159_v49, %v7158_v34  ;;  %v7161_v17 = vpop.f32.mrb[194].mxu0  ;;  %5893 = vst [vmem:[%s8140_s12 + $0x8] sm:$0xff] %v5877_v5  ;;  %v7222_v56 = vpop.f32.mrb[196].mxu1 }
 0x3c9   : > { %v7162_v25 = vpop.f32.mrb[195].mxu0  ;;  %v5838_v55 = vadd.f32 %v7222_v56, %v5741_v23  ;;  %v5829_v59 = vpop.f32.mrb[197].mxu1 }
 0x3ca   : > { %v7163_v45 = vadd.f32 %v7162_v25, %v7161_v17  ;;  %v5773_v22 = vadd.f32 %v7160_v0, %v5676_v54  ;;  %v5830_v53 = vadd.f32 %v5829_v59, %v9359_v44  ;;  %v7223_v37 = vpop.f32.mrb[198].mxu1 }
 0x3cb   : > { %v5882_v27 = vmax.f32 %v5838_v55, 0.0  ;;  %v5841_v52 = vadd.f32 %v7223_v37, %v9365_v31  ;;  %v5832_v43 = vpop.f32.mrb[199].mxu1 }
 0x3cc   : > { %v5776_v50 = vadd.f32 %v7163_v45, %v5679_v38  ;;  %v5880_v39 = vmax.f32 %v5830_v53, 0.0  ;;  %v5833_v19 = vadd.f32 %v5832_v43, %v9361_v30 }
 0x3cd   : > { %5898 = vst [vmem:[%s8140_s12 + $0x30] sm:$0xff] %v5882_v27  ;;  %v5883_v33 = vmax.f32 %v5841_v52, 0.0 }
 0x3ce   : > { %5896 = vst [vmem:[%s8140_s12 + $0x20] sm:$0xff] %v5880_v39  ;;  %v5881_v35 = vmax.f32 %v5833_v19, 0.0 }
 0x3cf   : > { %5899 = vst [vmem:[%s8140_s12 + $0x38] sm:$0xff] %v5883_v33 }
 0x3d0   : > { %5897 = vst [vmem:[%s8140_s12 + $0x28] sm:$0xff] %v5881_v35  ;;  %v7226_v44 = vpop.f32.mrb[200].mxu1 }
 0x3d1   : > { %v5854_v23 = vadd.f32 %v7226_v44, %v5757_v60  ;;  %v5845_v42 = vpop.f32.mrb[201].mxu1 }
 0x3d2   : > { %v5846_v31 = vadd.f32 %v5845_v42, %v9371_v1  ;;  %v7227_v36 = vpop.f32.mrb[202].mxu1 }
 0x3d3   : > { %v5886_v8 = vmax.f32 %v5854_v23, 0.0  ;;  %v5857_v30 = vadd.f32 %v7227_v36, %v5760_v47  ;;  %v5848_v24 = vpop.f32.mrb[203].mxu1 }
 0x3d4   : > { %v5884_v10 = vmax.f32 %v5846_v31, 0.0  ;;  %v5849_v11 = vadd.f32 %v5848_v24, %v9373_v62 }
 0x3d5   : > { %5902 = vst [vmem:[%s8140_s12 + $0x50] sm:$0xff] %v5886_v8  ;;  %v5887_v26 = vmax.f32 %v5857_v30, 0.0 }
 0x3d6   : > { %5900 = vst [vmem:[%s8140_s12 + $0x40] sm:$0xff] %v5884_v10  ;;  %v5885_v14 = vmax.f32 %v5849_v11, 0.0 }
 0x3d7   : > { %5903 = vst [vmem:[%s8140_s12 + $0x58] sm:$0xff] %v5887_v26 }
 0x3d8   : > { %5901 = vst [vmem:[%s8140_s12 + $0x48] sm:$0xff] %v5885_v14  ;;  %v7230_v28 = vpop.f32.mrb[204].mxu1 }
 0x3d9   : > { %v5870_v1 = vadd.f32 %v7230_v28, %v5773_v22  ;;  %v5861_v13 = vpop.f32.mrb[205].mxu1 }
 0x3da   : > { %v5862_v18 = vadd.f32 %v5861_v13, %v9383_v58  ;;  %v7231_v4 = vpop.f32.mrb[206].mxu1 }
 0x3db   : > { %v5890_v62 = vmax.f32 %v5870_v1, 0.0  ;;  %v5873_v60 = vadd.f32 %v7231_v4, %v5776_v50  ;;  %v5864_v47 = vpop.f32.mrb[207].mxu1 }
 0x3dc   : > { %v5888_v9 = vmax.f32 %v5862_v18, 0.0  ;;  %v5865_v32 = vadd.f32 %v5864_v47, %v9386_v57 }
 0x3dd   : > { %5906 = vst [vmem:[%s8140_s12 + $0x70] sm:$0xff] %v5890_v62  ;;  %v5891_v7 = vmax.f32 %v5873_v60, 0.0 }
 0x3de   : > { %5904 = vst [vmem:[%s8140_s12 + $0x60] sm:$0xff] %v5888_v9  ;;  %v5889_v12 = vmax.f32 %v5865_v32, 0.0 }
 0x3df   : > { %5907 = vst [vmem:[%s8140_s12 + $0x78] sm:$0xff] %v5891_v7 }
 0x3e0   : > { %5905 = vst [vmem:[%s8140_s12 + $0x68] sm:$0xff] %v5889_v12 }
 0x3e1   : > { %7775 = shalt.err (!%p7772_p5)
}
 0x3e2   : > { %s7776_s19 = scalar_lea.hbm %s9422_s17, 2048  ;;  %s7780_s24 = scalar_lea.hbm %s9487_s7, 8192 }
 0x3e3   : > { %p7777_p6 = scmp.ne.s32.totalorder %s9422_s17, %s7776_s19  ;;  %p7781_p11 = scmp.lt.u32.totalorder %s9422_s17, %s9487_s7 }
 0x3e4   : > { %p7782_p13 = scmp.lt.u32.totalorder %s7780_s24, %s7776_s19  ;;  %p7784_p2 = scmp.lt.u32.totalorder %s7776_s19, %s9422_s17 }
 0x3e5   : > { %p7778_p7 = pnand %p7777_p6, %p9599_p0 }
 0x3e6   : > { %p7783_p3 = por %p7782_p13, %p7781_p11 }
 0x3e7   : > { %p7779_p9 = pneg %p7778_p7 }
 0x3e8   : > { %p7785_p8 = por %p7784_p2, %p7783_p3 }
 0x3ea   : > { %p7786_p10 = pnand %p7785_p8, %p7779_p9 }
 0x3ec   : > { %7789 = shalt.err (!%p7786_p10)
}
 0x3ed   : > { %s7885_s11 = smov 128   ;;  %s7886_s18 = smov 8  }
 0x3ee   : > { %7248 = dma.vmem_to_hbm [thread:$0]  (%p9599_p0), %s9416_s9, 2048, %s9422_s17, %s9428_s20, %s7885_s11, %s7885_s11, %s7886_s18  }
 0x3ef PF: > { %s9600_s14 = sld [smem:[#allocation29_spill]]  ;;  %s9601_s21 = sld [smem:[#allocation25_spill]] }
 0x3f0   : > { %s9602_s10 = sld [smem:[#allocation32_spill]] }
 0x3f5   : > { %p7275_p12 = scmp.ge.s32.totalorder %s9600_s14, 2  ;;  %s5939_s13 = sand.u32 1, %s9601_s21  }
 0x3f6   : > { %p9603_p1 = scmp.ne.s32.totalorder %s9602_s10, 0  ;;  %s5940_s27 = scalar_lea.sflag [#allocation9], %s5939_s13 }
 0x3f8   : > { %p7264_p4 = pnand %p7275_p12, %p9603_p1 }
 0x3fa   : > { %7837 = dma.done.wait (!%p7264_p4), %s5940_s27, 2048  }
 0x3fb   : > { %7839 = vsyncadd (!%p7264_p4), %s5940_s27, 4294965248  ;;  %s23_s8 = sadd.s32 1, %s9600_s14   ;;  %s9604_s28 = sld [smem:[#allocation26_spill]] }
 0x3fc   : > { %p20_p5 = scmp.ge.s32.totalorder %s23_s8, 6   ;;  %s9605_s26 = sld [smem:[#allocation33_spill]] }
 0x3fd   : > { %s9606_s27 = sld [smem:[#allocation27_spill]]  ;;  %s9607_s15 = sld [smem:[#allocation28_spill]] }
 0x3fe   : > { %s9608_s29 = sld [smem:[#allocation30_spill]]  ;;  %s9609_s30 = sld [smem:[#allocation31_spill]] }
 0x3ff   : > { %s9610_s24 = smov %s7846_s25  ;;  %22 = sbr.rel (!%p20_p5) target bundleno = 10 (0xa), region = 110 }
 0x401   : > { %s9611_s25 = smov %s9604_s28 }
 0x403   : > { %s9612_s28 = smov %s9607_s15 }
 0x406   :  { %5945 = vsyncpa [#allocation8], 1 }
 0x407   :  { %5947 = vsyncpa [#allocation8 + $0x1], 1 }
 0x408   :  { %5948 = vsyncpa [#allocation11], 1 }
 0x409   :  { %5949 = vsyncpa [#allocation14], 1 }
 0x40a   :  { %5950 = vsyncpa [#allocation9], 1 }
 0x40b   :  { %5952 = vsyncpa [#allocation9 + $0x1], 1 }
 0x40c   :  { %5953 = vsyncmov [#allocation6] }
 0x40f   :  { %s5954_s9 = vpop.sfrf %5953 }
 0x410   :  { %p6514_p0 = scmp.ne.s32.totalorder %s5954_s9, 0 }
 0x412   :  { %5958 = shalt.err (%p6514_p0)  }

// kernel: tpu_custom_call.1
= control target key start
LH: loop header
LB: loop body
LE: loop exit
PB: predicated region body
PF: predicated region fallthrough
CT: control target
= control target key end

     0   :  { %s9480_s0 = inlined_call_operand.hbm [shape: bf16[2,40,40,128], index: 0, kind: input, shape index: {}]   ;;  %s9481_s1 = inlined_call_operand.vmem [shape: f32[2,1,128], index: 1, kind: input, shape index: {}]   ;;  %s9482_s2 = inlined_call_operand.hbm [shape: bf16[128,512], index: 2, kind: input, shape index: {}]   ;;  %s9483_s3 = inlined_call_operand.hbm [shape: bf16[2048,128], index: 3, kind: input, shape index: {}]   ;;  %s9484_s4 = inlined_call_operand.hbm [shape: bf16[128,128], index: 4, kind: input, shape index: {}]   ;;  %s9485_s5 = inlined_call_operand.hbm [shape: bf16[640,128], index: 5, kind: input, shape index: {}]   ;;  %s9486_s6 = inlined_call_operand.vmem [shape: f32[6,1,128], index: 6, kind: input, shape index: {}]   ;;  %s9487_s7 = inlined_call_operand.hbm [shape: f32[2,256,128], index: 7, kind: output, shape index: {}]  }
   0x1   :  { %9508 = sst [smem:[#allocation57_spill]] %s9483_s3 }
   0x2   :  { %12 = vsyncpa [#allocation8], 0 }
   0x3   :  { %13 = vsyncpa [#allocation11], 0 }
   0x4   :  { %14 = vsyncpa [#allocation14], 0 }
   0x5   :  { %15 = vsyncpa [#allocation9], 0 }
   0x6   :  { %17 = vsyncpa [#allocation9 + $0x1], 0  ;;  %s7927_s24 = smov 0   ;;  %s7929_s25 = smov 0  }
   0x7   :  { %s7931_s26 = smov 0   ;;  %s7933_s27 = smov 0  }
   0x8   :  { %s7935_s28 = smov 0   ;;  %s7937_s29 = smov 0  }
   0x9   :  { %s7939_s30 = smov 0   ;;  %s7941_s8 = smov 0  }
   0xa LB: > { %9509 = sst [smem:[#allocation25_spill]] %s7842_s24  ;;  %s6049_s9 = sadd.s32 4294967295, %s7870_s8   ;;  %s7870_s8 = sphi %s7941_s8, %s23_s8   ;;  %s7866_s30 = sphi %s7939_s30, %s9609_s30   ;;  %s7862_s29 = sphi %s7937_s29, %s9608_s29   ;;  %s7858_s28 = sphi %s7935_s28, %s9612_s28   ;;  %s7854_s27 = sphi %s7933_s27, %s9606_s27   ;;  %s7850_s26 = sphi %s7931_s26, %s9605_s26   ;;  %s7846_s25 = sphi %s7929_s25, %s9611_s25   ;;  %s7842_s24 = sphi %s7927_s24, %s9610_s24  }
   0xb   : > { %9510 = sst [smem:[#allocation26_spill]] %s7850_s26  ;;  %s6050_s10 = sadd.s32 4294967294, %s7870_s8  }
   0xc   : > { %9511 = sst [smem:[#allocation27_spill]] %s7862_s29  ;;  %s32_s11 = sadd.s32 1, %s7862_s29 }
   0xd   : > { %9512 = sst [smem:[#allocation28_spill]] %s7866_s30  ;;  %s35_s12 = sadd.s32 1, %s7866_s30 }
   0xe   : > { %9513 = sst [smem:[#allocation29_spill]] %s7870_s8  ;;  %p33_p0 = scmp.ge.s32.totalorder %s32_s11, 2 }
   0xf   : > { %s175_s13 = sadd.s32 1, %s7850_s26  ;;  %p185_p1 = scmp.ne.s32.totalorder %s7850_s26, %s7846_s25 }
  0x10   : > { %p186_p2 = scmp.eq.s32.totalorder %s6049_s9, 3  ;;  %s9614_s11 = smov (%p33_p0, %s32_s11), 0 }
  0x11   : > { %9514 = sst [smem:[#allocation30_spill]] %s9614_s11  ;;  %s9616_s12 = smov (!%p33_p0, %s35_s12), %s7866_s30 }
  0x12   : > { %s171_s14 = ssub.s32 %s7862_s29, %s9614_s11  ;;  %p7979_p3 = por %p186_p2, %p185_p1 }
  0x13   : > { %p37_p4 = scmp.ge.s32.totalorder %s9616_s12, 2  ;;  %p191_p5 = scmp.ne.s32.totalorder %s7846_s25, %s7842_s24 }
  0x14   : > { %s9515_s15 = scalar_select %p7979_p3, 1, 0 }
  0x15   : > { %p192_p6 = scmp.eq.s32.totalorder %s6050_s10, 3  ;;  %p6051_p7 = scmp.ge.s32.totalorder %s7870_s8, 1 }
  0x16   : > { %s9618_s12 = smov (%p37_p4, %s9616_s12), 0  ;;  %p199_p9 = scmp.lt.s32.totalorder %s7870_s8, 5 }
  0x17   : > { %9516 = sst [smem:[#allocation31_spill]] %s9618_s12  ;;  %p7988_p8 = por %p192_p6, %p191_p5 }
  0x18   : > { %s170_s17 = ssub.s32 %s7866_s30, %s9618_s12  ;;  %p7995_p10 = pnand %p6051_p7, %p199_p9 }
  0x19   : > { %s9517_s16 = scalar_select %p7988_p8, 1, 0 }
  0x1a   : > { %s172_s18 = sor.u32 %s171_s14, %s170_s17  ;;  %p7999_p12 = scmp.eq.s32.totalorder %s6049_s9, 0 }
  0x1b   : > { %9518 = sst [smem:[#allocation32_spill]] %s9517_s16  ;;  %p173_p11 = scmp.eq.s32.totalorder %s172_s18, 0 }
  0x1c   : > { %s9519_s19 = scalar_select %p7995_p10, 1, 0 }
  0x1d   : > { %s9520_s20 = scalar_select %p7999_p12, 1, 0 }
  0x1e   : > { %p7250_p13 = pneg %p7995_p10  ;;  %s7872_s23 = smov [#allocation10]  }
  0x1f   : > { %s8006_s21 = scalar_select %p173_p11, %s7850_s26, %s175_s13  }
  0x20   : > { %p8010_p0 = pnand %p7999_p12, %p7250_p13  ;;  %s224_s10 = sshll.u32 %s7872_s23, 4  ;;  %s225_s10 = int_to_ptr.vmem [resolvable:$true] %s224_s10 }
  0x21   : > { %9521 = sst [smem:[#allocation33_spill]] %s8006_s21  ;;  %s9523_s3 = sld [smem:[#allocation57_spill]] }
  0x22   : > { %p8022_p2 = pneg %p8010_p0 }
  0x27   : > { %s7626_s9 = scalar_lea.hbm %s9523_s3, 16384 }
  0x28   : > { %p7627_p1 = scmp.ne.s32.totalorder %s9523_s3, %s7626_s9  ;;  %p7633_p6 = scmp.lt.u32.totalorder %s7626_s9, %s9523_s3 }
  0x2a   : > { %p7629_p4 = pnand %p8022_p2, %p7627_p1 }
  0x2c   : > { %p7630_p5 = pneg %p7629_p4 }
  0x2e   : > { %p7635_p7 = pnand %p7633_p6, %p7630_p5 }
  0x30   : > { %7638 = shalt.err (!%p7635_p7)
}
  0x31   : > { %s7639_s14 = scalar_lea.vmem %s225_s10, 16384  ;;  %p7647_p8 = scmp.lt.s32.totalorder %s225_s10, %s225_s10 }
  0x32   : > { %p7640_p9 = scmp.ne.s32.totalorder %s225_s10, %s7639_s14  ;;  %p7648_p3 = scmp.lt.s32.totalorder %s7639_s14, %s7639_s14 }
  0x34   : > { %p7642_p11 = pnand %p7640_p9, %p8022_p2  ;;  %p7649_p12 = por %p7648_p3, %p7647_p8 }
  0x36   : > { %p7643_p13 = pneg %p7642_p11 }
  0x38   : > { %p7650_p10 = pnand %p7649_p12, %p7643_p13 }
  0x3a   : > { %7653 = shalt.err (!%p7650_p10)
}
  0x3b   : > { %s9499_s12 = smov 64   ;;  %s9501_s17 = smov 4  }
  0x3c   : > { %7256 = dma.hbm_to_vmem [thread:$0]  (!%p8010_p0), %s9523_s3, 16384, %s225_s10, [#allocation11], %s9499_s12, %s9499_s12, %s9501_s17  }
  0x3d   : > { %s7875_s18 = smov [#allocation7]   ;;  %s7654_s29 = scalar_lea.hbm %s9482_s2, 4096 }
  0x3e   : > { %s211_s23 = sshll.u32 %s7875_s18, 4  ;;  %p7655_p3 = scmp.ne.s32.totalorder %s9482_s2, %s7654_s29  ;;  %s212_s23 = int_to_ptr.vmem [resolvable:$true] %s211_s23 }
  0x3f   : > { %p7661_p12 = scmp.lt.u32.totalorder %s7654_s29, %s9482_s2 }
  0x40   : > { %p7657_p8 = pnand %p7655_p3, %p8022_p2 }
  0x42   : > { %p7658_p10 = pneg %p7657_p8 }
  0x44   : > { %p7663_p1 = pnand %p7661_p12, %p7658_p10 }
  0x46   : > { %7666 = shalt.err (!%p7663_p1)
}
  0x47   : > { %s7667_s10 = scalar_lea.vmem %s212_s23, 4096  ;;  %p7675_p7 = scmp.lt.s32.totalorder %s212_s23, %s212_s23 }
  0x48   : > { %p7668_p4 = scmp.ne.s32.totalorder %s212_s23, %s7667_s10  ;;  %p7676_p9 = scmp.lt.s32.totalorder %s7667_s10, %s7667_s10 }
  0x4a   : > { %p7670_p5 = pnand %p7668_p4, %p8022_p2  ;;  %p7677_p11 = por %p7676_p9, %p7675_p7 }
  0x4c   : > { %p7671_p6 = pneg %p7670_p5 }
  0x4e   : > { %p7678_p13 = pnand %p7677_p11, %p7671_p6 }
  0x50   : > { %7681 = shalt.err (!%p7678_p13)
}
  0x51   : > { %s7876_s26 = smov 256   ;;  %s7877_s30 = smov 16  }
  0x52   : > { %7253 = dma.hbm_to_vmem [thread:$0]  (!%p8010_p0), %s9482_s2, 4096, %s212_s23, [#allocation8], %s7876_s26, %s7876_s26, %s7877_s30  }
  0x53   : > { %s7878_s16 = smov [#allocation12]   ;;  %s7879_s11 = smov [#allocation13]  }
  0x54   : > { %s237_s21 = sshll.u32 %s7878_s16, 4  ;;  %s250_s9 = sshll.u32 %s7879_s11, 4  ;;  %s238_s21 = int_to_ptr.vmem [resolvable:$true] %s237_s21  ;;  %s251_s9 = int_to_ptr.vmem [resolvable:$true] %s250_s9 }
  0x55   : > { %s7682_s10 = scalar_lea.hbm %s9484_s4, 1024 }
  0x56   : > { %p7683_p3 = scmp.ne.s32.totalorder %s9484_s4, %s7682_s10  ;;  %p7689_p12 = scmp.lt.u32.totalorder %s7682_s10, %s9484_s4 }
  0x58   : > { %p7685_p8 = pnand %p7683_p3, %p8022_p2 }
  0x5a   : > { %p7686_p10 = pneg %p7685_p8 }
  0x5c   : > { %p7691_p1 = pnand %p7689_p12, %p7686_p10 }
  0x5e   : > { %7694 = shalt.err (!%p7691_p1)
}
  0x5f   : > { %s7695_s23 = scalar_lea.vmem %s238_s21, 1024  ;;  %p7703_p7 = scmp.lt.s32.totalorder %s238_s21, %s238_s21 }
  0x60   : > { %p7696_p4 = scmp.ne.s32.totalorder %s238_s21, %s7695_s23  ;;  %p7704_p9 = scmp.lt.s32.totalorder %s7695_s23, %s7695_s23 }
  0x62   : > { %p7698_p5 = pnand %p7696_p4, %p8022_p2  ;;  %p7705_p11 = por %p7704_p9, %p7703_p7 }
  0x64   : > { %p7699_p6 = pneg %p7698_p5 }
  0x66   : > { %p7706_p13 = pnand %p7705_p11, %p7699_p6 }
  0x68   : > { %7709 = shalt.err (!%p7706_p13)
}
  0x69   : > { %s9525_s12 = smov 4   ;;  %s9526_s17 = smov 64  }
  0x6a   : > { %7259 = dma.hbm_to_vmem [thread:$0]  (!%p8010_p0), %s9484_s4, 1024, %s238_s21, [#allocation11], %s9526_s17, %s9526_s17, %s9525_s12  }
  0x6b   : > { %s7710_s24 = scalar_lea.hbm %s9485_s5, 5120 }
  0x6c   : > { %p7711_p3 = scmp.ne.s32.totalorder %s9485_s5, %s7710_s24  ;;  %p7717_p12 = scmp.lt.u32.totalorder %s7710_s24, %s9485_s5 }
  0x6e   : > { %p7713_p8 = pnand %p7711_p3, %p8022_p2 }
  0x70   : > { %p7714_p10 = pneg %p7713_p8 }
  0x72   : > { %p7719_p1 = pnand %p7717_p12, %p7714_p10 }
  0x74   : > { %7722 = shalt.err (!%p7719_p1)
}
  0x75   : > { %s7723_s14 = scalar_lea.vmem %s251_s9, 5120  ;;  %p7731_p7 = scmp.lt.s32.totalorder %s251_s9, %s251_s9 }
  0x76   : > { %p7724_p4 = scmp.ne.s32.totalorder %s251_s9, %s7723_s14  ;;  %p7732_p9 = scmp.lt.s32.totalorder %s7723_s14, %s7723_s14 }
  0x78   : > { %p7726_p5 = pnand %p7724_p4, %p8022_p2  ;;  %p7733_p11 = por %p7732_p9, %p7731_p7 }
  0x7a   : > { %p7727_p6 = pneg %p7726_p5 }
  0x7c   : > { %p7734_p13 = pnand %p7733_p11, %p7727_p6 }
  0x7e   : > { %7737 = shalt.err (!%p7734_p13)
}
  0x7f   : > { %7262 = dma.hbm_to_vmem [thread:$0]  (!%p8010_p0), %s9485_s5, 5120, %s251_s9, [#allocation14], %s9526_s17, %s9526_s17, %s9525_s12  }
  0x80   : > { %p9527_p3 = scmp.ne.s32.totalorder %s9519_s19, 0 }
  0x82   : > { %275 = sbr.rel (%p9527_p3) target bundleno = 1007 (0x3ef), region = 44 }
  0x89   : > { %p9528_p2 = scmp.ne.s32.totalorder %s9520_s20, 0 }
  0x8b   : > { %7823 = dma.done.wait (%p9528_p2), [#allocation8], 4096  }
  0x8c   : > { %7825 = vsyncadd (%p9528_p2), [#allocation8], 4294963200 }
  0x8d   : > { %7827 = dma.done.wait (%p9528_p2), [#allocation11], 17408  }
  0x8e   : > { %7829 = vsyncadd (%p9528_p2), [#allocation11], 4294949888 }
  0x8f   : > { %7831 = dma.done.wait (%p9528_p2), [#allocation14], 5120  }
  0x90   : > { %7833 = vsyncadd (%p9528_p2), [#allocation14], 4294962176  ;;  %s312_s19 = sand.u32 1, %s7846_s25   ;;  %p315_p0 = scmp.lt.s32.totalorder %s7858_s28, 1 }
  0x91   : > { %s8119_s22 = sshll.u32 %s312_s19, 7  ;;  %s6064_s13 = smul.u32 40, %s7854_s27 }
  0x92   : > { %s322_s9 = smul.u32 200, %s7858_s28  ;;  %s7880_s29 = smov [#allocation2]  }
  0x93   : > { %s8124_s23 = scalar_select %p315_p0, %s7858_s28, 1 }
  0x94   : > { %s323_s12 = sadd.s32 %s6064_s13, %s322_s9  ;;  %s333_s16 = sshll.u32 %s7880_s29, 4  ;;  %s334_s16 = int_to_ptr.vmem [resolvable:$true] %s333_s16 }
  0x95   : > { %s317_s3 = scalar_lea.vmem %s9481_s1, %s8124_s23  ;;  %s6065_s8 = sshll.u32 %s323_s12, 6 }
  0x96   : > { %s325_s24 = scalar_lea.hbm %s9480_s0, %s6065_s8  ;;  %s7740_s21 = scalar_lea.hbm %s9480_s0, 25600 }
  0x97   : > { %s7738_s11 = scalar_lea.hbm %s325_s24, 10240  ;;  %p7741_p10 = scmp.lt.u32.totalorder %s325_s24, %s9480_s0 }
  0x98   : > { %p7739_p8 = scmp.ne.s32.totalorder %s325_s24, %s7738_s11  ;;  %p7742_p12 = scmp.lt.u32.totalorder %s7740_s21, %s7738_s11 }
  0x99   : > { %p7744_p4 = scmp.lt.u32.totalorder %s7738_s11, %s325_s24 }
  0x9a   : > { %p7743_p1 = por %p7742_p12, %p7741_p10 }
  0x9c   : > { %p7745_p5 = por %p7744_p4, %p7743_p1 }
  0x9e   : > { %p7746_p6 = pnand %p7745_p5, %p7739_p8 }
  0xa0   : > { %7749 = shalt.err (!%p7746_p6)  }
  0xa1   : > { %s7750_s9 = scalar_lea.vmem %s334_s16, 10240  ;;  %p7755_p9 = scmp.lt.s32.totalorder %s334_s16, %s334_s16 }
  0xa2   : > { %p7751_p7 = scmp.ne.s32.totalorder %s334_s16, %s7750_s9  ;;  %p7756_p11 = scmp.lt.s32.totalorder %s7750_s9, %s7750_s9 }
  0xa4   : > { %p7757_p13 = por %p7756_p11, %p7755_p9 }
  0xa6   : > { %p7758_p3 = pnand %p7757_p13, %p7751_p7 }
  0xa8   : > { %7761 = shalt.err (!%p7758_p3)  }
  0xa9   : > { %336 = dma.hbm_to_vmem [thread:$0]  %s325_s24, 10240, %s334_s16, [#allocation6] }
  0xaa   : > { %s8140_s12 = scalar_lea.vmem [#allocation15], %s8119_s22 }
  0xab   : > { %7834 = dma.done.wait [#allocation6], 10240 }
  0xac   : > { %7835 = vsyncadd [#allocation6], 4294957056  ;;  %v7881_v0 = vmov 0   ;;  %v7354_v1 = vld [vmem:[#allocation7 + $0x4] ss:$16 sps:$4 sm:$0xff]   ;;  %vm391_vm0 = vcmask 1041408  }
  0xad   : > { %706 = vmatprep.mubr.bf16.mxu0 %v7881_v0  ;;  %819 = vmatprep.mubr.bf16.mxu1 %v7881_v0  ;;  %v7356_v2 = vld [vmem:[#allocation7 + $0xc] ss:$16 sps:$4 sm:$0xff]   ;;  %v7358_v3 = vld [vmem:[#allocation7] ss:$16 sps:$4 sm:$0xff]   ;;  %v7359_v4 = vld [vmem:[#allocation7 + $0x8] ss:$16 sps:$4 sm:$0xff]  }
  0xae   : > { %674 = vmatprep.subr.bf16.mxu0 %v7354_v1  ;;  %787 = vmatprep.subr.bf16.mxu1 %v7356_v2  ;;  %v7360_v5 = vld [vmem:[#allocation7 + $0x24] ss:$16 sps:$4 sm:$0xff]   ;;  %v7362_v6 = vld [vmem:[#allocation7 + $0x2c] ss:$16 sps:$4 sm:$0xff]   ;;  %v7364_v7 = vld [vmem:[#allocation7 + $0x20] ss:$16 sps:$4 sm:$0xff]  }
  0xaf   : > { %675 = vmatpush1.bf16.msra.mxu0 %v7358_v3  ;;  %788 = vmatpush1.bf16.msra.mxu1 %v7359_v4  ;;  %v7365_v8 = vld [vmem:[#allocation7 + $0x28] ss:$16 sps:$4 sm:$0xff]   ;;  %v7366_v9 = vld [vmem:[#allocation7 + $0x44] ss:$16 sps:$4 sm:$0xff]   ;;  %v7368_v10 = vld [vmem:[#allocation7 + $0x4c] ss:$16 sps:$4 sm:$0xff]  }
  0xb0   : > { %676 = vmatprep.subr.bf16.mxu0 %v7360_v5  ;;  %789 = vmatprep.subr.bf16.mxu1 %v7362_v6  ;;  %v7370_v11 = vld [vmem:[#allocation7 + $0x40] ss:$16 sps:$4 sm:$0xff]   ;;  %v7371_v12 = vld [vmem:[#allocation7 + $0x48] ss:$16 sps:$4 sm:$0xff]   ;;  %v7372_v13 = vld [vmem:[#allocation7 + $0x64] ss:$16 sps:$4 sm:$0xff]  }
  0xb1   : > { %v7374_v14 = vld [vmem:[#allocation7 + $0x6c] ss:$16 sps:$4 sm:$0xff]   ;;  %v7376_v15 = vld [vmem:[#allocation7 + $0x60] ss:$16 sps:$4 sm:$0xff]   ;;  %v7377_v16 = vld [vmem:[#allocation7 + $0x68] ss:$16 sps:$4 sm:$0xff]  }
  0xb2   : > { %v7378_v17 = vld [vmem:[#allocation7 + $0x84] ss:$16 sps:$4 sm:$0xff]   ;;  %v7380_v18 = vld [vmem:[#allocation7 + $0x8c] ss:$16 sps:$4 sm:$0xff]   ;;  %v7382_v19 = vld [vmem:[#allocation7 + $0x80] ss:$16 sps:$4 sm:$0xff]  }
  0xb3   : > { %677 = vmatpush1.bf16.msra.mxu0 %v7364_v7  ;;  %790 = vmatpush1.bf16.msra.mxu1 %v7365_v8  ;;  %v7383_v20 = vld [vmem:[#allocation7 + $0x88] ss:$16 sps:$4 sm:$0xff]   ;;  %v7384_v21 = vld [vmem:[#allocation7 + $0xa4] ss:$16 sps:$4 sm:$0xff]   ;;  %v7386_v22 = vld [vmem:[#allocation7 + $0xac] ss:$16 sps:$4 sm:$0xff]  }
  0xb4   : > { %678 = vmatprep.subr.bf16.mxu0 %v7366_v9  ;;  %791 = vmatprep.subr.bf16.mxu1 %v7368_v10  ;;  %v7388_v23 = vld [vmem:[#allocation7 + $0xa0] ss:$16 sps:$4 sm:$0xff]   ;;  %v7389_v24 = vld [vmem:[#allocation7 + $0xa8] ss:$16 sps:$4 sm:$0xff]   ;;  %v7390_v25 = vld [vmem:[#allocation7 + $0xc4] ss:$16 sps:$4 sm:$0xff]  }
  0xb5   : > { %vm392_vm1 = vcmask 1045508   ;;  %v7392_v26 = vld [vmem:[#allocation7 + $0xcc] ss:$16 sps:$4 sm:$0xff]   ;;  %v343_v27 = vld [vmem:[#allocation2 + $0xf4] sm:$0xc]  ;;  %v7402_v46 = vld [vmem:[#allocation10 + $0x40] sm:$0xff]  }
  0xb6   : > { %v344_v28 = vld [vmem:[#allocation2 + $0xf8] sm:$0xf]  ;;  %v7394_v29 = vld [vmem:[#allocation7 + $0xc0] ss:$16 sps:$4 sm:$0xff]   ;;  %v345_v30 = vld [vmem:[#allocation2 + $0xfc] sm:$0x3] }
  0xb7   : > { %679 = vmatpush1.bf16.msra.mxu0 %v7370_v11  ;;  %792 = vmatpush1.bf16.msra.mxu1 %v7371_v12  ;;  %v396_v31 = vrot.slane %v344_v28, 6  ;;  %v7395_v32 = vld [vmem:[#allocation7 + $0xc8] ss:$16 sps:$4 sm:$0xff]   ;;  %vm8145_vm2 = vmor %vm391_vm0, %vm392_vm1  ;;  %v6066_v34 = vrot.slane %v343_v27, 10  ;;  %v399_v36 = vrot.slane %v345_v30, 6  ;;  %v7403_v49 = vld [vmem:[#allocation10] sm:$0xff]  }
  0xb8   : > { %680 = vmatprep.subr.bf16.mxu0 %v7372_v13  ;;  %793 = vmatprep.subr.bf16.mxu1 %v7374_v14  ;;  %v7396_v37 = vld [vmem:[#allocation7 + $0xe4] ss:$16 sps:$4 sm:$0xff]   ;;  %v7398_v38 = vld [vmem:[#allocation7 + $0xec] ss:$16 sps:$4 sm:$0xff]   ;;  %v7400_v40 = vld [vmem:[#allocation7 + $0xe0] ss:$16 sps:$4 sm:$0xff]  }
  0xb9   : > { %v398_v35 = vrot.slane %v396_v31, 4  ;;  %v347_v39 = vld [vmem:[#allocation2 + $0x10c] sm:$0xf]  ;;  %v7401_v41 = vld [vmem:[#allocation7 + $0xe8] ss:$16 sps:$4 sm:$0xff]   ;;  %v397_v42 = vsel %vm8145_vm2, %v6066_v34, %v396_v31  ;;  %v7409_v55 = vld [vmem:[#allocation10 + $0xc0] sm:$0xff]  }
  0xba   : > { %v346_v44 = vld [vmem:[#allocation2 + $0x108] sm:$0xc]  ;;  %v403_v45 = vrot.slane %v347_v39, 6  ;;  %v348_v47 = vld [vmem:[#allocation2 + $0x110] sm:$0x3]  ;;  %v7411_v62 = vld [vmem:[#allocation10 + $0x80] sm:$0xff]  }
  0xbb   : > { %681 = vmatpush1.bf16.msra.mxu0 %v7376_v15  ;;  %794 = vmatpush1.bf16.msra.mxu1 %v7377_v16  ;;  %v400_v43 = vsel %vm8145_vm2, %v398_v35, %v399_v36  ;;  %v6067_v50 = vrot.slane %v346_v44, 10  ;;  %v406_v52 = vrot.slane %v348_v47, 6  ;;  %v7404_v53 = vld [vmem:[#allocation10 + $0x48] sm:$0xff]   ;;  %v350_v54 = vld [vmem:[#allocation2 + $0x120] sm:$0xf]  ;;  %v7406_v63 = vld [vmem:[#allocation10 + $0x50] sm:$0xff]  }
  0xbc   : > { %682 = vmatprep.subr.bf16.mxu0 %v7378_v17  ;;  %795 = vmatprep.subr.bf16.mxu1 %v7380_v18  ;;  %v6074_v48 = vcombine.low %v397_v42, %v400_v43  ;;  %v405_v51 = vrot.slane %v403_v45, 4  ;;  %v349_v56 = vld [vmem:[#allocation2 + $0x11c] sm:$0xc]  ;;  %v351_v57 = vld [vmem:[#allocation2 + $0x124] sm:$0x3]  ;;  %v410_v58 = vrot.slane %v350_v54, 6 }
  0xbd   : > { %v404_v59 = vsel %vm8145_vm2, %v6067_v50, %v403_v45  ;;  %v7405_v61 = vld [vmem:[#allocation10 + $0x8] sm:$0xff]   ;;  %v6068_v1 = vrot.slane %v349_v56, 10  ;;  %v413_v2 = vrot.slane %v351_v57, 6  ;;  %v7407_v5 = vld [vmem:[#allocation10 + $0x10] sm:$0xff]   ;;  %v7408_v10 = vld [vmem:[#allocation10 + $0x58] sm:$0xff]   ;;  %vm1100_vm3 = vcmask 1040384  }
  0xbe   : > { %v407_v60 = vsel %vm8145_vm2, %v405_v51, %v406_v52  ;;  %v412_v4 = vrot.slane %v410_v58, 4  ;;  %v7413_v6 = vld [vmem:[#allocation10 + $0xc8] sm:$0xff]   ;;  %v353_v7 = vld [vmem:[#allocation2 + $0x134] sm:$0xf]  ;;  %v352_v9 = vld [vmem:[#allocation2 + $0x130] sm:$0xc] }
  0xbf   : > { %683 = vmatpush1.bf16.msra.mxu0 %v7382_v19  ;;  %796 = vmatpush1.bf16.msra.mxu1 %v7383_v20  ;;  %v6075_v3 = vcombine.low %v404_v59, %v407_v60  ;;  %v7415_v8 = vld [vmem:[#allocation10 + $0x88] sm:$0xff]   ;;  %v354_v11 = vld [vmem:[#allocation2 + $0x138] sm:$0x3]  ;;  %v417_v12 = vrot.slane %v353_v7, 6  ;;  %v411_v14 = vsel %vm8145_vm2, %v6068_v1, %v410_v58  ;;  %v7417_v16 = vld [vmem:[#allocation10 + $0xd0] sm:$0xff]   ;;  %v6069_v17 = vrot.slane %v352_v9, 10 }
  0xc0   : > { %684 = vmatprep.subr.bf16.mxu0 %v7384_v21  ;;  %797 = vmatprep.subr.bf16.mxu1 %v7386_v22  ;;  %v7410_v13 = vld [vmem:[#allocation10 + $0x18] sm:$0xff]   ;;  %v414_v15 = vsel %vm8145_vm2, %v412_v4, %v413_v2  ;;  %v356_v18 = vld [vmem:[#allocation2 + $0x148] sm:$0xf]  ;;  %v7412_v19 = vld [vmem:[#allocation10 + $0x60] sm:$0xff]   ;;  %v420_v21 = vrot.slane %v354_v11, 6  ;;  %vm1101_vm4 = vcmask 1044484  }
  0xc1   : > { %v6076_v20 = vcombine.low %v411_v14, %v414_v15  ;;  %v7419_v22 = vld [vmem:[#allocation10 + $0x90] sm:$0xff]   ;;  %v7421_v27 = vld [vmem:[#allocation10 + $0x98] sm:$0xff]   ;;  %v357_v28 = vld [vmem:[#allocation2 + $0x14c] sm:$0x3]  ;;  %v424_v30 = vrot.slane %v356_v18, 6  ;;  %vm1391_vm5 = vcmask 1042432  }
  0xc2   : > { %v7418_v31 = vld [vmem:[#allocation10 + $0x28] sm:$0xff]   ;;  %v7423_v35 = vld [vmem:[#allocation10 + $0xe0] sm:$0xff]   ;;  %v358_v43 = vld [vmem:[#allocation2 + $0x158] sm:$0xc]  ;;  %vm1392_vm6 = vcmask 1046532   ;;  %vm7883_vm9 = vmmov 0  }
  0xc3   : > { %685 = vmatpush1.bf16.msra.mxu0 %v7388_v23  ;;  %798 = vmatpush1.bf16.msra.mxu1 %v7389_v24  ;;  %v419_v23 = vrot.slane %v417_v12, 4  ;;  %v7420_v24 = vld [vmem:[#allocation10 + $0xd8] sm:$0xff]   ;;  %v7425_v39 = vld [vmem:[#allocation10 + $0xa0] sm:$0xff]   ;;  %v7426_v42 = vld [vmem:[#allocation10 + $0xe8] sm:$0xff]   ;;  %v6071_v56 = vrot.slane %v358_v43, 10  ;;  %s6509_s21 = sshll.u32 %s7854_s27, 4 }
  0xc4   : > { %686 = vmatprep.subr.bf16.mxu0 %v7390_v25  ;;  %799 = vmatprep.subr.bf16.mxu1 %v7392_v26  ;;  %v355_v25 = vld [vmem:[#allocation2 + $0x144] sm:$0xc]  ;;  %v359_v44 = vld [vmem:[#allocation2 + $0x15c] sm:$0xf]  ;;  %v360_v45 = vld [vmem:[#allocation2 + $0x160] sm:$0x3] }
  0xc5   : > { %v7414_v26 = vld [vmem:[#allocation10 + $0x20] sm:$0xff]   ;;  %v421_v34 = vsel %vm8145_vm2, %v419_v23, %v420_v21  ;;  %v6070_v36 = vrot.slane %v355_v25, 10  ;;  %v7427_v47 = vld [vmem:[#allocation10 + $0xa8] sm:$0xff]   ;;  %v431_v50 = vrot.slane %v359_v44, 6  ;;  %v7429_v51 = vld [vmem:[#allocation10 + $0xf0] sm:$0xff]   ;;  %v434_v58 = vrot.slane %v360_v45, 6 }
  0xc6   : > { %v8179_v54 = vld [vmem:[#allocation2 + $0x184] sm:$0xf]  ;;  %v7431_v57 = vld [vmem:[#allocation10 + $0xb0] sm:$0xff]   ;;  %v7432_v59 = vld [vmem:[#allocation10 + $0xf8] sm:$0xff]   ;;  %s6510_s10 = sshll.u32 %s7858_s28, 5  ;;  %s5924_s9 = sshll.u32 %s8140_s12, 4  ;;  %s9416_s9 = int_to_ptr.vmem [resolvable:$true] %s5924_s9 }
  0xc7   : > { %687 = vmatpush1.bf16.msra.mxu0 %v7394_v29  ;;  %800 = vmatpush1.bf16.msra.mxu1 %v7395_v32  ;;  %v7416_v29 = vld [vmem:[#allocation10 + $0x68] sm:$0xff]   ;;  %v418_v32 = vsel %vm8145_vm2, %v6069_v17, %v417_v12  ;;  %v425_v52 = vsel %vm8145_vm2, %v6070_v36, %v424_v30  ;;  %v363_v1 = vld [vmem:[#allocation2 + $0x174] sm:$0x3]  ;;  %v8182_v2 = vld [vmem:[#allocation2 + $0x180] sm:$0xc]  ;;  %v445_v4 = vrot.slane %v8179_v54, 6  ;;  %s5921_s13 = sadd.s32 %s6510_s10, %s6509_s21 }
  0xc8   : > { %688 = vmatprep.subr.bf16.mxu0 %v7396_v37  ;;  %801 = vmatprep.subr.bf16.mxu1 %v7398_v38  ;;  %v7422_v37 = vld [vmem:[#allocation10 + $0x70] sm:$0xff]   ;;  %v427_v38 = vrot.slane %v357_v28, 6  ;;  %v8187_v7 = vld [vmem:[#allocation2 + $0x7c] sm:$0xc]  ;;  %v8191_v9 = vld [vmem:[#allocation2 + $0x84] sm:$0x3] }
  0xc9   : > { %v441_v12 = vrot.slane %v363_v1, 6  ;;  %v6073_v15 = vrot.slane %v8182_v2, 10  ;;  %v8201_v17 = vld [vmem:[#allocation2 + $0xf0] sm:$0x8]  ;;  %v8203_v18 = vld [vmem:[#allocation2 + $0xf4] sm:$0xf]  ;;  %vm8276_vm7 = vmor %vm1100_vm3, %vm1101_vm4 }
  0xca   : > { %v8212_v23 = vld [vmem:[#allocation2 + $0xf8] sm:$0x7]  ;;  %v8216_v25 = vld [vmem:[#allocation2 + $0x84] sm:$0xf]  ;;  %v1540_v28 = vrot.slane %v8203_v18, 7  ;;  %vm8347_vm8 = vmor %vm1391_vm5, %vm1392_vm6  ;;  %s6511_s27 = sshll.u32 %s5921_s13, 7 }
  0xcb   : > { %689 = vmatpush1.bf16.msra.mxu0 %v7400_v40  ;;  %802 = vmatpush1.bf16.msra.mxu1 %v7401_v41  ;;  %v6077_v40 = vcombine.low %v418_v32, %v421_v34  ;;  %v426_v41 = vrot.slane %v424_v30, 4  ;;  %v8222_v30 = vld [vmem:[#allocation2 + $0x80] sm:$0x7]  ;;  %v1396_v34 = vrot.slane %v8216_v25, 5  ;;  %v1543_v36 = vrot.slane %v8212_v23, 7  ;;  %s9422_s17 = scalar_lea.hbm %s9487_s7, %s6511_s27  ;;  %s9428_s20 = scalar_lea.sflag [#allocation9], %s312_s19 }
  0xcc   : > { %6515 = vmatprep.subr.bf16.mxu0 %v7402_v46  ;;  %6579 = vmatprep.subr.bf16.mxu1 %v7409_v55  ;;  %v7424_v46 = vld [vmem:[#allocation10 + $0x30] sm:$0xff]   ;;  %v7430_v55 = vld [vmem:[#allocation10 + $0x38] sm:$0xff]   ;;  %v8225_v32 = vld [vmem:[#allocation2 + $0x80] sm:$0xe]  ;;  %v1108_v45 = vrot.slane %v8222_v30, 7  ;;  %s7762_s8 = scalar_lea.vmem %s9416_s9, 2048 }
  0xcd   : > { %v8272_v1 = vld [vmem:[#allocation2 + $0x94] sm:$0x7]  ;;  %v8312_v18 = vld [vmem:[#allocation2 + $0xa8] sm:$0xf]  ;;  %p7763_p2 = scmp.ne.s32.totalorder %s9416_s9, %s7762_s8  ;;  %p9599_p0 = scmp.ne.s32.totalorder %s9515_s15, 0 }
  0xce   : > { %707 = vmatmul.mubr.bf16.vlgmr.msra.gmra.mrb[0].mxu0 %v6074_v48  ;;  %820 = vmatmul.mubr.bf16.vlgmr.msra.gmra.mrb[0].mxu1 %v6074_v48  ;;  %v8171_v48 = vld [vmem:[#allocation2 + $0x170] sm:$0xf]  ;;  %s7884_s26 = smov [#allocation15]  }
  0xcf   : > { %6516 = vmatpush3.bf16.msra.mxu0 %v7403_v49  ;;  %716 = vmatprep.mubr.bf16.mxu0 %v7881_v0  ;;  %v7428_v49 = vld [vmem:[#allocation10 + $0x78] sm:$0xff]   ;;  %p7764_p8 = pnand %p7763_p2, %p9599_p0  ;;  %s7766_s30 = sshll.u32 %s7884_s26, 4  ;;  %s7767_s30 = int_to_ptr.vmem [resolvable:$false] %s7766_s30 }
  0xd0   : > { %829 = vmatprep.mubr.bf16.mxu1 %v7881_v0  ;;  %6517 = vmatprep.subr.bf16.mxu0 %v7404_v53  ;;  %v428_v53 = vsel %vm8145_vm2, %v426_v41, %v427_v38  ;;  %v8233_v38 = vld [vmem:[#allocation2 + $0x94] sm:$0xf]  ;;  %v8236_v41 = vld [vmem:[#allocation2 + $0x90] sm:$0xc]  ;;  %s7768_s23 = scalar_lea.vmem %s7767_s30, 4096  ;;  %p7769_p12 = scmp.lt.s32.totalorder %s9416_s9, %s7767_s30 }
  0xd1   : > { %6580 = vmatpush3.bf16.msra.mxu1 %v7411_v62  ;;  %v6078_v60 = vcombine.low %v425_v52, %v428_v53  ;;  %v438_v62 = vrot.slane %v8171_v48, 6  ;;  %v8250_v48 = vld [vmem:[#allocation2 + $0x108] sm:$0xf]  ;;  %v1256_v52 = vrot.slane %v8233_v38, 6  ;;  %v7441_v53 = vld [vmem:[#allocation10 + $0x1c0] sm:$0xff]   ;;  %p7765_p10 = pneg %p7764_p8  ;;  %p7770_p1 = scmp.lt.s32.totalorder %s7768_s23, %s7762_s8 }
  0xd2   : > { %6581 = vmatprep.subr.bf16.mxu1 %v7413_v6  ;;  %v7434_v6 = vld [vmem:[#allocation10 + $0x140] sm:$0xff]  }
  0xd3   : > { %6518 = vmatpush3.bf16.msra.mxu0 %v7405_v61  ;;  %v433_v61 = vrot.slane %v431_v50, 4  ;;  %v440_v11 = vrot.slane %v438_v62, 4  ;;  %p7771_p4 = por %p7770_p1, %p7769_p12 }
  0xd4   : > { %6519 = vmatprep.subr.bf16.mxu0 %v7406_v63  ;;  %v361_v63 = vld [vmem:[#allocation2 + $0x16c] sm:$0xc] }
  0xd5   : > { %6582 = vmatpush3.bf16.msra.mxu1 %v7415_v8  ;;  %v8189_v8 = vld [vmem:[#allocation2 + $0x80] sm:$0xf]  ;;  %v435_v14 = vsel %vm8145_vm2, %v433_v61, %v434_v58  ;;  %v442_v44 = vsel %vm8145_vm2, %v440_v11, %v441_v12  ;;  %v8264_v58 = vld [vmem:[#allocation2 + $0x90] sm:$0xf]  ;;  %v1547_v61 = vrot.slane %v8250_v48, 7  ;;  %v446_v11 = vsel %vm8145_vm2, %v6073_v15, %v445_v4  ;;  %p7772_p5 = pnand %p7771_p4, %p7765_p10 }
  0xd6   : > { %717 = vmatmul.mubr.bf16.gmra.mrb[4].mxu0 %v6075_v3  ;;  %830 = vmatmul.mubr.bf16.gmra.mrb[4].mxu1 %v6075_v3  ;;  %v8184_v3 = vld [vmem:[#allocation2 + $0x188] sm:$0x3]  ;;  %v1249_v21 = vrot.slane %v8189_v8, 6  ;;  %v8310_v15 = vld [vmem:[#allocation2 + $0xa4] sm:$0xc] }
  0xd7   : > { %726 = vmatprep.mubr.bf16.mxu0 %v7881_v0  ;;  %839 = vmatprep.mubr.bf16.mxu1 %v7881_v0 }
  0xd8   : > { %6520 = vmatpush3.bf16.msra.mxu0 %v7407_v5  ;;  %6583 = vmatprep.subr.bf16.mxu1 %v7417_v16  ;;  %v7433_v5 = vld [vmem:[#allocation10 + $0xb8] sm:$0xff]   ;;  %v448_v16 = vrot.slane %v8184_v3, 6  ;;  %v8314_v3 = vld [vmem:[#allocation2 + $0xac] sm:$0x3] }
  0xd9   : > { %6521 = vmatprep.subr.bf16.mxu0 %v7408_v10  ;;  %6584 = vmatpush3.bf16.msra.mxu1 %v7419_v22  ;;  %v6072_v10 = vrot.slane %v361_v63, 10  ;;  %v1252_v22 = vrot.slane %v8191_v9, 6  ;;  %v8270_v63 = vld [vmem:[#allocation2 + $0x8c] sm:$0x8]  ;;  %v1549_v9 = vrot.slane %v1547_v61, 4 }
  0xda   : > { %6585 = vmatprep.subr.bf16.mxu1 %v7420_v24  ;;  %v8214_v24 = vld [vmem:[#allocation2 + $0x7c] sm:$0xf] }
  0xdb   : > { %v439_v43 = vsel %vm8145_vm2, %v6072_v10, %v438_v62  ;;  %v8268_v62 = vld [vmem:[#allocation2 + $0x98] sm:$0xf]  ;;  %v1112_v10 = vrot.slane %v8264_v58, 7  ;;  %v7445_v58 = vld [vmem:[#allocation10 + $0x1c8] sm:$0xff]  }
  0xdc   : > { %6522 = vmatpush3.bf16.msra.mxu0 %v7410_v13  ;;  %v432_v13 = vsel %vm8145_vm2, %v6071_v56, %v431_v50  ;;  %v8256_v50 = vrot.slane %v1396_v34, 4 }
  0xdd   : > { %6523 = vmatprep.subr.bf16.mxu0 %v7412_v19  ;;  %6586 = vmatpush3.bf16.msra.mxu1 %v7421_v27  ;;  %v8207_v19 = vrot.slane %v445_v4, 4  ;;  %v6163_v27 = vrot.slane %v8201_v17, 11  ;;  %v1403_v17 = vrot.slane %v8268_v62, 5  ;;  %v9537_v62 = vrot.slane %v8310_v15, 10 }
  0xde   : > { %727 = vmatmul.mubr.bf16.gmra.mrb[8].mxu0 %v6076_v20  ;;  %840 = vmatmul.mubr.bf16.gmra.mrb[8].mxu1 %v6076_v20  ;;  %v6131_v20 = vrot.slane %v8187_v7, 10 }
  0xdf   : > { %736 = vmatprep.mubr.bf16.mxu0 %v7881_v0  ;;  %849 = vmatprep.mubr.bf16.mxu1 %v7881_v0  ;;  %v449_v54 = vsel %vm8145_vm2, %v8207_v19, %v448_v16  ;;  %v1541_v7 = vsel %vm8276_vm7, %v6163_v27, %v1540_v28  ;;  %v6116_v16 = vrot.slane %v8270_v63, 11  ;;  %v8325_v19 = vld [vmem:[#allocation2 + $0x118] sm:$0x8]  ;;  %v8355_v27 = vld [vmem:[#allocation2 + $0xac] sm:$0xf] }
  0xe0   : > { %6524 = vmatpush3.bf16.msra.mxu0 %v7414_v26  ;;  %6587 = vmatprep.subr.bf16.mxu1 %v7423_v35  ;;  %v6079_v26 = vcombine.low %v432_v13, %v435_v14  ;;  %v1251_v35 = vrot.slane %v1249_v21, 4  ;;  %v8290_v13 = vld [vmem:[#allocation2 + $0x94] sm:$0xe]  ;;  %v8292_v14 = vld [vmem:[#allocation2 + $0x9c] sm:$0x1]  ;;  %v1250_v2 = vsel %vm8145_vm2, %v6131_v20, %v1249_v21  ;;  %v8331_v21 = vrot.slane %v1112_v10, 4 }
  0xe1   : > { %6525 = vmatprep.subr.bf16.mxu0 %v7416_v29  ;;  %6588 = vmatpush3.bf16.msra.mxu1 %v7425_v39  ;;  %v8220_v29 = vld [vmem:[#allocation2 + $0x78] sm:$0x8]  ;;  %v1542_v39 = vrot.slane %v1540_v28, 4  ;;  %v8327_v20 = vld [vmem:[#allocation2 + $0x11c] sm:$0xf]  ;;  %v1263_v28 = vrot.slane %v8312_v18, 6 }
  0xe2   : > { %6589 = vmatprep.subr.bf16.mxu1 %v7426_v42  ;;  %v8238_v42 = vld [vmem:[#allocation2 + $0x98] sm:$0x3]  ;;  %v1253_v4 = vsel %vm8145_vm2, %v1251_v35, %v1252_v22  ;;  %v8357_v35 = vld [vmem:[#allocation2 + $0xa0] sm:$0x8]  ;;  %v9535_v63 = vrot.slane %v8290_v13, 9 }
  0xe3   : > { %v1259_v56 = vrot.slane %v8238_v42, 6  ;;  %v1544_v8 = vsel %vm8276_vm7, %v1542_v39, %v1543_v36  ;;  %v8343_v36 = vld [vmem:[#allocation2 + $0x120] sm:$0x7]  ;;  %v6081_v39 = vcombine.low %v446_v11, %v449_v54  ;;  %v6139_v23 = vcombine.low %v1250_v2, %v1253_v4  ;;  %v8424_v42 = vld [vmem:[#allocation2 + $0x12c] sm:$0x8] }
  0xe4   : > { %6526 = vmatpush3.bf16.msra.mxu0 %v7418_v31  ;;  %v1105_v31 = vrot.slane %v8214_v24, 7  ;;  %v6171_v22 = vcombine.low %v1541_v7, %v1544_v8  ;;  %v8373_v2 = vrot.slane %v1263_v28, 4  ;;  %v1557_v4 = vrot.slane %v8343_v36, 7  ;;  %v8378_v7 = vld [vmem:[#allocation2 + $0xbc] sm:$0xf] }
  0xe5   : > { %6527 = vmatprep.subr.bf16.mxu0 %v7422_v37  ;;  %6590 = vmatpush3.bf16.msra.mxu1 %v7427_v47  ;;  %v8231_v37 = vld [vmem:[#allocation2 + $0x88] sm:$0x1]  ;;  %v8248_v47 = vld [vmem:[#allocation2 + $0x104] sm:$0x8]  ;;  %v8396_v8 = vld [vmem:[#allocation2 + $0xb0] sm:$0x1]  ;;  %v1264_v13 = vsel %vm8145_vm2, %v9537_v62, %v1263_v28 }
  0xe6   : > { %737 = vmatmul.mubr.bf16.gmra.mrb[12].mxu0 %v6077_v40  ;;  %850 = vmatmul.mubr.bf16.gmra.mrb[12].mxu1 %v6077_v40  ;;  %v6115_v40 = vrot.slane %v8220_v29, 11  ;;  %v1410_v29 = vrot.slane %v8355_v27, 5  ;;  %v8508_v28 = vld [vmem:[#allocation2 + $0xc4] sm:$0x1]  ;;  %v8518_v36 = vld [vmem:[#allocation2 + $0xd4] sm:$0x3] }
  0xe7   : > { %746 = vmatprep.mubr.bf16.mxu0 %v7881_v0  ;;  %859 = vmatprep.mubr.bf16.mxu1 %v7881_v0 }
  0xe8   : > { %6528 = vmatpush3.bf16.msra.mxu0 %v7424_v46  ;;  %6591 = vmatprep.subr.bf16.mxu1 %v7429_v51  ;;  %v6147_v46 = vrot.slane %v8225_v32, 9  ;;  %v1399_v51 = vrot.slane %v8231_v37, 5  ;;  %v1106_v11 = vsel %vm8276_vm7, %v6115_v40, %v1105_v31  ;;  %v8409_v37 = vld [vmem:[#allocation2 + $0xb8] sm:$0xc] }
  0xe9   : > { %6529 = vmatprep.subr.bf16.mxu0 %v7428_v49  ;;  %6592 = vmatpush3.bf16.msra.mxu1 %v7431_v57  ;;  %v1107_v49 = vrot.slane %v1105_v31, 4  ;;  %v8262_v57 = vld [vmem:[#allocation2 + $0x10c] sm:$0x7] }
  0xea   : > { %6593 = vmatprep.subr.bf16.mxu1 %v7432_v59  ;;  %v6080_v59 = vcombine.low %v439_v43, %v442_v44  ;;  %v1550_v12 = vrot.slane %v8262_v57, 7  ;;  %v8369_v44 = vld [vmem:[#allocation2 + $0xa8] sm:$0x7]  ;;  %v1397_v30 = vsel %vm8347_vm8, %v6147_v46, %v1396_v34  ;;  %v1400_v31 = vsel %vm8347_vm8, %v8256_v50, %v1399_v51  ;;  %v8411_v46 = vld [vmem:[#allocation2 + $0xc0] sm:$0x3] }
  0xeb   : > { %v1109_v54 = vsel %vm8276_vm7, %v1107_v49, %v1108_v45  ;;  %v6117_v45 = vrot.slane %v8357_v35, 11  ;;  %v8394_v49 = vld [vmem:[#allocation2 + $0xa8] sm:$0xe]  ;;  %v1122_v34 = vrot.slane %v8369_v44, 7  ;;  %v1270_v50 = vrot.slane %v8378_v7, 6 }
  0xec   : > { %6530 = vmatpush3.bf16.msra.mxu0 %v7430_v55  ;;  %v6132_v55 = vrot.slane %v8236_v41, 10  ;;  %v6123_v51 = vcombine.low %v1106_v11, %v1109_v54  ;;  %v1551_v41 = vsel %vm8276_vm7, %v1549_v9, %v1550_v12  ;;  %v1413_v57 = vrot.slane %v8396_v8, 5  ;;  %v7436_v12 = vld [vmem:[#allocation10 + $0x148] sm:$0xff]  }
  0xed   : > { %6594 = vmatpush3.bf16.msra.mxu1 %v7433_v5  ;;  %6643 = vmatprep.subr.bf16.mxu0 %v7434_v6  ;;  %v1258_v6 = vrot.slane %v1256_v52, 4  ;;  %v6134_v9 = vrot.slane %v8409_v37, 10  ;;  %v8448_v11 = vrot.slane %v1270_v50, 4  ;;  %v9542_v7 = vrot.slane %v8424_v42, 11 }
  0xee   : > { %747 = vmatmul.mubr.bf16.gmra.mrb[16].mxu0 %v6078_v60  ;;  %860 = vmatmul.mubr.bf16.gmra.mrb[16].mxu1 %v6078_v60  ;;  %v6164_v60 = vrot.slane %v8248_v47, 11  ;;  %v1257_v25 = vsel %vm8145_vm2, %v6132_v55, %v1256_v52  ;;  %v8426_v52 = vld [vmem:[#allocation2 + $0x130] sm:$0xf]  ;;  %v8428_v55 = vld [vmem:[#allocation2 + $0x134] sm:$0x7] }
  0xef   : > { %756 = vmatprep.mubr.bf16.mxu0 %v7881_v0  ;;  %869 = vmatprep.mubr.bf16.mxu1 %v7881_v0  ;;  %v1260_v32 = vsel %vm8145_vm2, %v1258_v6, %v1259_v56  ;;  %v7435_v56 = vld [vmem:[#allocation10 + $0x100] sm:$0xff]   ;;  %v1561_v47 = vrot.slane %v8426_v52, 7  ;;  %v1271_v27 = vsel %vm8145_vm2, %v6134_v9, %v1270_v50  ;;  %v9543_v37 = vrot.slane %v8428_v55, 7  ;;  %v8614_v55 = vld [vmem:[#allocation2 + $0xe8] sm:$0x3] }
  0xf0   : > { %6707 = vmatprep.subr.bf16.mxu1 %v7441_v53  ;;  %v1554_v53 = vrot.slane %v8327_v20, 7  ;;  %v1548_v38 = vsel %vm8276_vm7, %v6164_v60, %v1547_v61  ;;  %v8437_v60 = vrot.slane %v1410_v29, 4  ;;  %v6155_v61 = vcombine.low %v1397_v30, %v1400_v31  ;;  %v7443_v31 = vld [vmem:[#allocation10 + $0x180] sm:$0xff]   ;;  %v8470_v30 = vld [vmem:[#allocation2 + $0xbc] sm:$0x7] }
  0xf1   : > { %v6140_v6 = vcombine.low %v1257_v25, %v1260_v32  ;;  %v6172_v25 = vcombine.low %v1548_v38, %v1551_v41  ;;  %v8459_v32 = vsel %vm8276_vm7, %v6116_v16, %v1112_v10  ;;  %v8472_v38 = vld [vmem:[#allocation2 + $0xbc] sm:$0xe]  ;;  %v1404_v10 = vsel %vm8347_vm8, %v9535_v63, %v1403_v17  ;;  %v7446_v9 = vld [vmem:[#allocation10 + $0x120] sm:$0xff]  }
  0xf2   : > { %v1556_v40 = vrot.slane %v1554_v53, 4  ;;  %v1414_v35 = vsel %vm8347_vm8, %v8437_v60, %v1413_v57 }
  0xf4   : > { %v1558_v15 = vsel %vm8276_vm7, %v1556_v40, %v1557_v4  ;;  %v8521_v4 = vld [vmem:[#allocation2 + $0x140] sm:$0x8] }
  0xf6   : > { %757 = vmatmul.mubr.bf16.gmra.mrb[20].mxu0 %v6079_v26  ;;  %870 = vmatmul.mubr.bf16.gmra.mrb[20].mxu1 %v6079_v26  ;;  %v8338_v26 = vrot.slane %v1403_v17, 4  ;;  %v7438_v17 = vld [vmem:[#allocation10 + $0x150] sm:$0xff]  }
  0xf7   : > { %766 = vmatprep.mubr.bf16.mxu0 %v7881_v0  ;;  %879 = vmatprep.mubr.bf16.mxu1 %v7881_v0 }
  0xfe   : > { %767 = vmatmul.mubr.bf16.gmra.mrb[24].mxu0 %v6080_v59  ;;  %880 = vmatmul.mubr.bf16.gmra.mrb[24].mxu1 %v6080_v59  ;;  %v8353_v59 = vld [vmem:[#allocation2 + $0xa4] sm:$0xf] }
  0xff   : > { %776 = vmatprep.mubr.bf16.mxu0 %v7881_v0  ;;  %889 = vmatprep.mubr.bf16.mxu1 %v7881_v0  ;;  %v1115_v0 = vrot.slane %v8272_v1, 7  ;;  %v1119_v24 = vrot.slane %v8353_v59, 7  ;;  %v9536_v1 = vrot.slane %v8292_v14, 5  ;;  %v9538_v14 = vrot.slane %v8314_v3, 6  ;;  %v8512_v3 = vld [vmem:[#allocation2 + $0xd0] sm:$0xf] }
 0x100   : > { %v8576_v59 = vld [vmem:[#allocation2 + $0xd4] sm:$0xf] }
 0x101   : > { %v8432_v48 = vrot.slane %v1119_v24, 4  ;;  %v8466_v54 = vsel %vm8276_vm7, %v8331_v21, %v1115_v0  ;;  %v1407_v16 = vsel %vm8347_vm8, %v8338_v26, %v9536_v1  ;;  %v7437_v21 = vld [vmem:[#allocation10 + $0x108] sm:$0xff]   ;;  %v1267_v26 = vsel %vm8145_vm2, %v8373_v2, %v9538_v14 }
 0x102   : > { %v6124_v20 = vcombine.low %v8459_v32, %v8466_v54  ;;  %v1277_v2 = vrot.slane %v8512_v3, 6  ;;  %v6141_v32 = vcombine.low %v1264_v13, %v1267_v26  ;;  %v8539_v14 = vld [vmem:[#allocation2 + $0xc8] sm:$0x8]  ;;  %v1120_v26 = vsel %vm8276_vm7, %v6117_v45, %v1119_v24  ;;  %v7453_v45 = vld [vmem:[#allocation10 + $0x198] sm:$0xff]  }
 0x103   : > { %v6119_v13 = vrot.slane %v8539_v14, 11  ;;  %v1123_v54 = vsel %vm8276_vm7, %v8432_v48, %v1122_v34  ;;  %v1562_v34 = vsel %vm8276_vm7, %v9542_v7, %v1561_v47  ;;  %v8606_v48 = vld [vmem:[#allocation2 + $0xd8] sm:$0x1]  ;;  %v1424_v42 = vrot.slane %v8576_v59, 5 }
 0x104   : > { %v6125_v60 = vcombine.low %v1120_v26, %v1123_v54  ;;  %v8621_v54 = vld [vmem:[#allocation2 + $0x158] sm:$0xf] }
 0x106   : > { %777 = vmatmul.mubr.bf16.gmra.mrb[28].mxu0 %v6081_v39  ;;  %890 = vmatmul.mubr.bf16.gmra.mrb[28].mxu1 %v6081_v39  ;;  %v8444_v39 = vld [vmem:[#allocation2 + $0xc0] sm:$0xf] }
 0x107   : > { %2819 = vmatprep.mubr.bf16.mxu0 %v6139_v23  ;;  %2916 = vmatprep.mubr.bf16.mxu1 %v6171_v22  ;;  %v8442_v23 = vld [vmem:[#allocation2 + $0xb8] sm:$0xf]  ;;  %v8468_v22 = vld [vmem:[#allocation2 + $0xb4] sm:$0x8]  ;;  %v9505_v41 = vrot.slane %v8444_v39, 5 }
 0x108   : > { %v1126_v0 = vrot.slane %v8442_v23, 7  ;;  %v6118_v40 = vrot.slane %v8468_v22, 11  ;;  %v8640_v23 = vld [vmem:[#allocation2 + $0x15c] sm:$0x7]  ;;  %v1575_v22 = vrot.slane %v8621_v54, 7 }
 0x109   : > { %v8534_v1 = vrot.slane %v9505_v41, 4  ;;  %v8547_v41 = vld [vmem:[#allocation2 + $0xcc] sm:$0xf]  ;;  %v1578_v7 = vrot.slane %v8640_v23, 7  ;;  %v1510_v23 = vld [vmem:[#allocation2 + $0x170] sm:$0x7] }
 0x10a   : > { %v1133_v44 = vrot.slane %v8547_v41, 7  ;;  %v1127_v26 = vsel %vm8276_vm7, %v6118_v40, %v1126_v0 }
 0x10e   : > { %2820 = vmatmul.mubr.bf16.vlgmr.msra.gmra.mrb[32].mxu0 %v6123_v51  ;;  %2917 = vmatmul.mubr.bf16.vlgmr.msra.gmra.mrb[32].mxu1 %v6155_v61  ;;  %v9539_v51 = vrot.slane %v8325_v19, 11  ;;  %v7447_v61 = vld [vmem:[#allocation10 + $0x188] sm:$0xff]   ;;  %v6156_v19 = vcombine.low %v1404_v10, %v1407_v16  ;;  %v7439_v10 = vld [vmem:[#allocation10 + $0x110] sm:$0xff]  }
 0x10f   : > { %6644 = vmatpush3.bf16.msra.mxu0 %v7435_v56  ;;  %2827 = vmatprep.mubr.bf16.mxu0 %v6140_v6  ;;  %v8510_v56 = vld [vmem:[#allocation2 + $0xcc] sm:$0xc]  ;;  %v8526_v6 = vrot.slane %v1126_v0, 4  ;;  %v8536_v16 = vld [vmem:[#allocation2 + $0x148] sm:$0x7]  ;;  %v7455_v0 = vld [vmem:[#allocation10 + $0x1e0] sm:$0xff]  }
 0x110   : > { %v1555_v18 = vsel %vm8276_vm7, %v9539_v51, %v1554_v53  ;;  %2924 = vmatprep.mubr.bf16.mxu1 %v6172_v25  ;;  %6645 = vmatprep.subr.bf16.mxu0 %v7436_v12  ;;  %v1563_v53 = vrot.slane %v1561_v47, 4  ;;  %v8530_v12 = vld [vmem:[#allocation2 + $0x144] sm:$0xf]  ;;  %v8549_v25 = vld [vmem:[#allocation2 + $0xd0] sm:$0x7] }
 0x111   : > { %6708 = vmatpush3.bf16.msra.mxu1 %v7443_v31  ;;  %v6173_v63 = vcombine.low %v1555_v18, %v1558_v15  ;;  %v1568_v62 = vrot.slane %v8530_v12, 7  ;;  %v7440_v31 = vld [vmem:[#allocation10 + $0x158] sm:$0xff]   ;;  %v7449_v18 = vld [vmem:[#allocation10 + $0x1d0] sm:$0xff]   ;;  %v1279_v15 = vrot.slane %v1277_v2, 4  ;;  %v1136_v24 = vrot.slane %v8549_v25, 7 }
 0x112   : > { %6709 = vmatprep.subr.bf16.mxu1 %v7445_v58  ;;  %v7451_v58 = vld [vmem:[#allocation10 + $0x190] sm:$0xff]   ;;  %v1565_v50 = vsel %vm8276_vm7, %v1563_v53, %v9543_v37  ;;  %v8612_v47 = vld [vmem:[#allocation2 + $0xe0] sm:$0xc]  ;;  %v7460_v25 = vld [vmem:[#allocation10 + $0x178] sm:$0xff]  }
 0x113   : > { %6646 = vmatpush3.bf16.msra.mxu0 %v7437_v21  ;;  %v8553_v21 = vrot.slane %v1568_v62, 4  ;;  %v8557_v51 = vld [vmem:[#allocation2 + $0xd0] sm:$0xe]  ;;  %v6174_v53 = vcombine.low %v1562_v34, %v1565_v50  ;;  %v6136_v3 = vrot.slane %v8612_v47, 10  ;;  %v7458_v50 = vld [vmem:[#allocation10 + $0x1e8] sm:$0xff]  }
 0x114   : > { %6647 = vmatprep.subr.bf16.mxu0 %v7438_v17  ;;  %v7452_v17 = vld [vmem:[#allocation10 + $0x1d8] sm:$0xff]   ;;  %v6151_v52 = vrot.slane %v8557_v51, 9  ;;  %v7454_v37 = vld [vmem:[#allocation10 + $0x170] sm:$0xff]  }
 0x115   : > { %6710 = vmatpush3.bf16.msra.mxu1 %v7447_v61  ;;  %v9540_v61 = vrot.slane %v8394_v49, 9  ;;  %v9541_v49 = vrot.slane %v8411_v46, 6  ;;  %v8608_v46 = vld [vmem:[#allocation2 + $0xe4] sm:$0xf] }
 0x116   : > { %2828 = vmatmul.mubr.bf16.gmra.mrb[36].mxu0 %v6124_v20  ;;  %2925 = vmatmul.mubr.bf16.gmra.mrb[36].mxu1 %v6156_v19  ;;  %v7442_v19 = vld [vmem:[#allocation10 + $0x118] sm:$0xff]   ;;  %v1425_v41 = vsel %vm8347_vm8, %v6151_v52, %v1424_v42 }
 0x117   : > { %v1411_v20 = vsel %vm8347_vm8, %v9540_v61, %v1410_v29  ;;  %2835 = vmatprep.mubr.bf16.mxu0 %v6141_v32  ;;  %2932 = vmatprep.mubr.bf16.mxu1 %v6173_v63  ;;  %v7444_v29 = vld [vmem:[#allocation10 + $0x160] sm:$0xff]   ;;  %v1274_v8 = vsel %vm8145_vm2, %v8448_v11, %v9541_v49  ;;  %v1135_v32 = vrot.slane %v1133_v44, 4  ;;  %v1284_v63 = vrot.slane %v8608_v46, 6 }
 0x118   : > { %6648 = vmatpush3.bf16.msra.mxu0 %v7439_v10  ;;  %6711 = vmatprep.subr.bf16.mxu1 %v7449_v18  ;;  %v6157_v57 = vcombine.low %v1411_v20, %v1414_v35  ;;  %v6142_v11 = vcombine.low %v1271_v27, %v1274_v8  ;;  %v8619_v10 = vld [vmem:[#allocation2 + $0x154] sm:$0x8]  ;;  %v9544_v18 = vrot.slane %v8470_v30, 7  ;;  %v9546_v61 = vrot.slane %v8472_v38, 9  ;;  %v8643_v35 = vld [vmem:[#allocation2 + $0xdc] sm:$0x8] }
 0x119   : > { %6649 = vmatprep.subr.bf16.mxu0 %v7440_v31  ;;  %6712 = vmatpush3.bf16.msra.mxu1 %v7451_v58  ;;  %v7448_v31 = vld [vmem:[#allocation10 + $0x168] sm:$0xff]   ;;  %v9547_v30 = vrot.slane %v8508_v28, 5  ;;  %v1427_v27 = vrot.slane %v8606_v48, 5  ;;  %v8661_v28 = vld [vmem:[#allocation2 + $0xe0] sm:$0xf]  ;;  %v1577_v8 = vrot.slane %v1575_v22, 4  ;;  %v1285_v52 = vsel %vm8145_vm2, %v6136_v3, %v1284_v63 }
 0x11a   : > { %6713 = vmatprep.subr.bf16.mxu1 %v7452_v17  ;;  %v1130_v58 = vsel %vm8276_vm7, %v8526_v6, %v9544_v18  ;;  %v9545_v17 = vrot.slane %v8444_v39, 5  ;;  %v9548_v39 = vrot.slane %v8510_v56, 10  ;;  %v9549_v6 = vrot.slane %v8518_v36, 6  ;;  %v8663_v49 = vld [vmem:[#allocation2 + $0xe4] sm:$0x7]  ;;  %v7456_v18 = vld [vmem:[#allocation10 + $0x130] sm:$0xff]  }
 0x11b   : > { %v1421_v40 = vsel %vm8347_vm8, %v8534_v1, %v9547_v30  ;;  %v7457_v1 = vld [vmem:[#allocation10 + $0x1a0] sm:$0xff]   ;;  %v1426_v56 = vrot.slane %v1424_v42, 4  ;;  %v1287_v36 = vrot.slane %v8614_v55, 6  ;;  %v6120_v34 = vrot.slane %v8643_v35, 11  ;;  %v8726_v30 = vld [vmem:[#allocation2 + $0xf0] sm:$0x8] }
 0x11c   : > { %v1418_v20 = vsel %vm8347_vm8, %v9546_v61, %v9545_v17  ;;  %6650 = vmatpush3.bf16.msra.mxu0 %v7442_v19  ;;  %v1278_v38 = vsel %vm8145_vm2, %v9548_v39, %v1277_v2  ;;  %v1281_v19 = vsel %vm8145_vm2, %v1279_v15, %v9549_v6  ;;  %v6168_v2 = vrot.slane %v8619_v10, 11  ;;  %v8670_v15 = vld [vmem:[#allocation2 + $0xe8] sm:$0xf]  ;;  %v1219_v61 = vld [vmem:[#allocation2 + $0xfc] sm:$0x3] }
 0x11d   : > { %6651 = vmatprep.subr.bf16.mxu0 %v7444_v29  ;;  %6714 = vmatpush3.bf16.msra.mxu1 %v7453_v45  ;;  %v7450_v29 = vld [vmem:[#allocation10 + $0x128] sm:$0xff]   ;;  %v1286_v45 = vrot.slane %v1284_v63, 4  ;;  %v9550_v48 = vrot.slane %v8521_v4, 11  ;;  %v1140_v55 = vrot.slane %v8661_v28, 7  ;;  %v1431_v12 = vrot.slane %v8670_v15, 5 }
 0x11e   : > { %2836 = vmatmul.mubr.bf16.gmra.mrb[40].mxu0 %v6125_v60  ;;  %2933 = vmatmul.mubr.bf16.gmra.mrb[40].mxu1 %v6157_v57  ;;  %v9551_v57 = vrot.slane %v8536_v16, 7  ;;  %v7459_v4 = vld [vmem:[#allocation10 + $0x1a8] sm:$0xff]   ;;  %v6158_v10 = vcombine.low %v1418_v20, %v1421_v40  ;;  %v1134_v17 = vsel %vm8276_vm7, %v6119_v13, %v1133_v44  ;;  %v1428_v44 = vsel %vm8347_vm8, %v1426_v56, %v1427_v27  ;;  %v8739_v6 = vld [vmem:[#allocation2 + $0xf8] sm:$0x7] }
 0x11f   : > { %2843 = vmatprep.mubr.bf16.mxu0 %v6142_v11  ;;  %2940 = vmatprep.mubr.bf16.mxu1 %v6174_v53  ;;  %v1569_v60 = vsel %vm8276_vm7, %v9550_v48, %v1568_v62  ;;  %v1143_v11 = vrot.slane %v8663_v49, 7  ;;  %v8691_v53 = vld [vmem:[#allocation2 + $0xe4] sm:$0xe]  ;;  %v6126_v62 = vcombine.low %v1127_v26, %v1130_v58  ;;  %v8694_v16 = vld [vmem:[#allocation2 + $0xec] sm:$0x1]  ;;  %v1142_v59 = vrot.slane %v1140_v55, 4 }
 0x120   : > { %v1572_v47 = vsel %vm8276_vm7, %v8553_v21, %v9551_v57  ;;  %6652 = vmatpush3.bf16.msra.mxu0 %v7446_v9  ;;  %6715 = vmatprep.subr.bf16.mxu1 %v7455_v0  ;;  %v6143_v21 = vcombine.low %v1278_v38, %v1281_v19  ;;  %v8706_v26 = vld [vmem:[#allocation2 + $0xf4] sm:$0xc]  ;;  %v6152_v14 = vrot.slane %v8691_v53, 9  ;;  %v1218_v58 = vld [vmem:[#allocation2 + $0xf8] sm:$0xf]  ;;  %v1288_v42 = vsel %vm8145_vm2, %v1286_v45, %v1287_v36 }
 0x121   : > { %6653 = vmatprep.subr.bf16.mxu0 %v7448_v31  ;;  %6716 = vmatpush3.bf16.msra.mxu1 %v7457_v1  ;;  %v6175_v9 = vcombine.low %v1569_v60, %v1572_v47  ;;  %v1137_v31 = vsel %vm8276_vm7, %v1135_v32, %v1136_v24  ;;  %v1291_v51 = vrot.slane %v1218_v58, 6  ;;  %v1508_v24 = vld [vmem:[#allocation2 + $0x168] sm:$0x8]  ;;  %v1509_v32 = vld [vmem:[#allocation2 + $0x16c] sm:$0xf]  ;;  %v1434_v20 = vrot.slane %v8694_v16, 5 }
 0x122   : > { %6717 = vmatprep.subr.bf16.mxu1 %v7458_v50  ;;  %v6127_v13 = vcombine.low %v1134_v17, %v1137_v31  ;;  %v1582_v0 = vrot.slane %v1509_v32, 7  ;;  %v1576_v40 = vsel %vm8276_vm7, %v6168_v2, %v1575_v22  ;;  %v1579_v46 = vsel %vm8276_vm7, %v1577_v8, %v1578_v7  ;;  %v8737_v38 = vld [vmem:[#allocation2 + $0xf4] sm:$0xf]  ;;  %v8741_v56 = vld [vmem:[#allocation2 + $0xf8] sm:$0xe]  ;;  %v7466_v32 = vld [vmem:[#allocation10 + $0x240] sm:$0xff]  }
 0x123   : > { %v1433_v63 = vrot.slane %v1431_v12, 4  ;;  %v6137_v39 = vrot.slane %v8706_v26, 10  ;;  %v6159_v19 = vcombine.low %v1425_v41, %v1428_v44  ;;  %v1293_v27 = vrot.slane %v1291_v51, 4  ;;  %v7461_v22 = vld [vmem:[#allocation10 + $0x1f0] sm:$0xff]   ;;  %v1362_v45 = vld [vmem:[#allocation2 + $0xfc] sm:$0xf] }
 0x124   : > { %6654 = vmatpush3.bf16.msra.mxu0 %v7450_v29  ;;  %v1294_v1 = vrot.slane %v1219_v61, 6  ;;  %v6169_v54 = vrot.slane %v1508_v24, 11  ;;  %v1584_v3 = vrot.slane %v1582_v0, 4  ;;  %v1585_v36 = vrot.slane %v1510_v23, 7  ;;  %v7462_v50 = vld [vmem:[#allocation10 + $0x138] sm:$0xff]  }
 0x125   : > { %6655 = vmatprep.subr.bf16.mxu0 %v7454_v37  ;;  %6718 = vmatpush3.bf16.msra.mxu1 %v7459_v4  ;;  %v6121_v2 = vrot.slane %v8726_v30, 11  ;;  %v1147_v29 = vrot.slane %v8737_v38, 7  ;;  %v6144_v8 = vcombine.low %v1285_v52, %v1288_v42  ;;  %v6176_v7 = vcombine.low %v1576_v40, %v1579_v46  ;;  %v1363_v48 = vld [vmem:[#allocation2 + $0x100] sm:$0x1]  ;;  %v7464_v17 = vld [vmem:[#allocation10 + $0x1f8] sm:$0xff]  }
 0x126   : > { %2844 = vmatmul.mubr.bf16.gmra.mrb[44].mxu0 %v6126_v62  ;;  %2941 = vmatmul.mubr.bf16.gmra.mrb[44].mxu1 %v6158_v10  ;;  %v1150_v37 = vrot.slane %v8739_v6, 7  ;;  %v6153_v60 = vrot.slane %v8741_v56, 9  ;;  %v1438_v57 = vrot.slane %v1362_v45, 5  ;;  %v1141_v47 = vsel %vm8276_vm7, %v6120_v34, %v1140_v55  ;;  %v7463_v10 = vld [vmem:[#allocation10 + $0x1b0] sm:$0xff]   ;;  %v1220_v55 = vld [vmem:[#allocation2 + $0x108] sm:$0xc] }
 0x127   : > { %2851 = vmatprep.mubr.bf16.mxu0 %v6143_v21  ;;  %2948 = vmatprep.mubr.bf16.mxu1 %v6175_v9  ;;  %v1144_v53 = vsel %vm8276_vm7, %v1142_v59, %v1143_v11  ;;  %v1432_v4 = vsel %vm8347_vm8, %v6152_v14, %v1431_v12  ;;  %v1149_v62 = vrot.slane %v1147_v29, 4  ;;  %v1435_v35 = vsel %vm8347_vm8, %v1433_v63, %v1434_v20  ;;  %v1221_v11 = vld [vmem:[#allocation2 + $0x10c] sm:$0xf]  ;;  %v1222_v12 = vld [vmem:[#allocation2 + $0x110] sm:$0x3] }
 0x128   : > { %6656 = vmatpush3.bf16.msra.mxu0 %v7456_v18  ;;  %6719 = vmatprep.subr.bf16.mxu1 %v7461_v22  ;;  %v1292_v28 = vsel %vm8145_vm2, %v6137_v39, %v1291_v51  ;;  %v1295_v49 = vsel %vm8145_vm2, %v1293_v27, %v1294_v1  ;;  %v1583_v34 = vsel %vm8276_vm7, %v6169_v54, %v1582_v0  ;;  %v1440_v16 = vrot.slane %v1438_v57, 4  ;;  %v1511_v9 = vld [vmem:[#allocation2 + $0x17c] sm:$0x8]  ;;  %v1512_v58 = vld [vmem:[#allocation2 + $0x180] sm:$0xf] }
 0x129   : > { %6657 = vmatprep.subr.bf16.mxu0 %v7460_v25  ;;  %v1586_v15 = vsel %vm8276_vm7, %v1584_v3, %v1585_v36  ;;  %6720 = vmatpush3.bf16.msra.mxu1 %v7463_v10  ;;  %v1441_v18 = vrot.slane %v1363_v48, 5  ;;  %v1298_v21 = vrot.slane %v1221_v11, 6  ;;  %v6128_v31 = vcombine.low %v1141_v47, %v1144_v53  ;;  %v1513_v61 = vld [vmem:[#allocation2 + $0x184] sm:$0x7]  ;;  %v7465_v25 = vld [vmem:[#allocation10 + $0x1b8] sm:$0xff]  }
 0x12a   : > { %v6160_v26 = vcombine.low %v1432_v4, %v1435_v35  ;;  %v6145_v41 = vcombine.low %v1292_v28, %v1295_v49  ;;  %v6138_v14 = vrot.slane %v1220_v55, 10  ;;  %v1301_v59 = vrot.slane %v1222_v12, 6  ;;  %v1073_v24 = vld [vmem:[#allocation2 + $0x104] sm:$0x8]  ;;  %6721 = vmatprep.subr.bf16.mxu1 %v7464_v17  ;;  %v1074_v23 = vld [vmem:[#allocation2 + $0x108] sm:$0xf] }
 0x12b   : > { %v1300_v44 = vrot.slane %v1298_v21, 4  ;;  %v1589_v51 = vrot.slane %v1512_v58, 7  ;;  %v1148_v52 = vsel %vm8276_vm7, %v6121_v2, %v1147_v29  ;;  %v6170_v42 = vrot.slane %v1511_v9, 11  ;;  %v1075_v0 = vld [vmem:[#allocation2 + $0x10c] sm:$0x7] }
 0x12c   : > { %6658 = vmatpush3.bf16.msra.mxu0 %v7462_v50  ;;  %v1592_v20 = vrot.slane %v1513_v61, 7  ;;  %v1151_v30 = vsel %vm8276_vm7, %v1149_v62, %v1150_v37  ;;  %v1439_v40 = vsel %vm8347_vm8, %v6153_v60, %v1438_v57  ;;  %v1154_v63 = vrot.slane %v1074_v23, 7  ;;  %v1364_v39 = vld [vmem:[#allocation2 + $0x10c] sm:$0xe]  ;;  %v1365_v38 = vld [vmem:[#allocation2 + $0x110] sm:$0xf] }
 0x12d   : > { %6722 = vmatpush3.bf16.msra.mxu1 %v7465_v25  ;;  %v1591_v46 = vrot.slane %v1589_v51, 4  ;;  %6771 = vmatprep.subr.bf16.mxu0 %v7466_v32  ;;  %v1442_v6 = vsel %vm8347_vm8, %v1440_v16, %v1441_v18  ;;  %v1157_v27 = vrot.slane %v1075_v0, 7  ;;  %v1366_v1 = vld [vmem:[#allocation2 + $0x114] sm:$0x1]  ;;  %v1445_v54 = vrot.slane %v1365_v38, 5 }
 0x12e   : > { %2852 = vmatmul.mubr.bf16.gmra.mrb[48].mxu0 %v6127_v13  ;;  %2949 = vmatmul.mubr.bf16.gmra.mrb[48].mxu1 %v6159_v19  ;;  %v6177_v13 = vcombine.low %v1583_v34, %v1586_v15  ;;  %v6122_v19 = vrot.slane %v1073_v24, 11  ;;  %v1299_v56 = vsel %vm8145_vm2, %v6138_v14, %v1298_v21  ;;  %v1302_v22 = vsel %vm8145_vm2, %v1300_v44, %v1301_v59  ;;  %v1779_v60 = vld [vmem:[#allocation2 + $0x168] sm:$0x8]  ;;  %v1780_v57 = vld [vmem:[#allocation2 + $0x16c] sm:$0xf] }
 0x12f   : > { %2859 = vmatprep.mubr.bf16.mxu0 %v6144_v8  ;;  %2956 = vmatprep.mubr.bf16.mxu1 %v6176_v7  ;;  %v1156_v3 = vrot.slane %v1154_v63, 4  ;;  %v6154_v36 = vrot.slane %v1364_v39, 9  ;;  %v1590_v2 = vsel %vm8276_vm7, %v6170_v42, %v1589_v51  ;;  %v1593_v29 = vsel %vm8276_vm7, %v1591_v46, %v1592_v20  ;;  %v1781_v47 = vld [vmem:[#allocation2 + $0x170] sm:$0x7]  ;;  %v2068_v35 = vld [vmem:[#allocation2 + $0x174] sm:$0xf] }
 0x130   : > { %v1447_v45 = vrot.slane %v1445_v54, 4  ;;  %v1448_v8 = vrot.slane %v1366_v1, 5  ;;  %v6129_v7 = vcombine.low %v1148_v52, %v1151_v30  ;;  %v6161_v37 = vcombine.low %v1439_v40, %v1442_v6  ;;  %v2067_v10 = vld [vmem:[#allocation2 + $0x170] sm:$0xe]  ;;  %v2069_v34 = vld [vmem:[#allocation2 + $0x178] sm:$0x1] }
 0x131   : > { %v6146_v50 = vcombine.low %v1299_v56, %v1302_v22  ;;  %v6178_v48 = vcombine.low %v1590_v2, %v1593_v29  ;;  %v6195_v53 = vrot.slane %v1779_v60, 11  ;;  %v1829_v4 = vrot.slane %v1780_v57, 7  ;;  %v1634_v11 = vld [vmem:[#allocation2 + $0xf8] sm:$0xe]  ;;  %v1635_v9 = vld [vmem:[#allocation2 + $0xfc] sm:$0xf] }
 0x132   : > { %v1832_v62 = vrot.slane %v1781_v47, 7  ;;  %v1155_v28 = vsel %vm8276_vm7, %v6122_v19, %v1154_v63  ;;  %v1158_v49 = vsel %vm8276_vm7, %v1156_v3, %v1157_v27  ;;  %v6227_v15 = vrot.slane %v2067_v10, 9  ;;  %v1636_v17 = vld [vmem:[#allocation2 + $0x100] sm:$0x1]  ;;  %v1923_v58 = vld [vmem:[#allocation2 + $0x16c] sm:$0xc] }
 0x133   : > { %v2117_v55 = vrot.slane %v2068_v35, 5  ;;  %v1446_v12 = vsel %vm8347_vm8, %v6154_v36, %v1445_v54  ;;  %v1449_v16 = vsel %vm8347_vm8, %v1447_v45, %v1448_v8  ;;  %v1831_v18 = vrot.slane %v1829_v4, 4  ;;  %v1924_v59 = vld [vmem:[#allocation2 + $0x170] sm:$0xf]  ;;  %v1925_v51 = vld [vmem:[#allocation2 + $0x174] sm:$0x3] }
 0x134   : > { %v2120_v21 = vrot.slane %v2069_v34, 5  ;;  %v1684_v14 = vrot.slane %v1635_v9, 5  ;;  %v6130_v61 = vcombine.low %v1155_v28, %v1158_v49  ;;  %v1687_v44 = vrot.slane %v1636_v17, 5  ;;  %v1782_v40 = vld [vmem:[#allocation2 + $0x17c] sm:$0x8] }
 0x135   : > { %v1833_v25 = vsel %vm8276_vm7, %v1831_v18, %v1832_v62  ;;  %v6162_v24 = vcombine.low %v1446_v12, %v1449_v16  ;;  %v6211_v42 = vrot.slane %v1923_v58, 10  ;;  %v1973_v0 = vrot.slane %v1924_v59, 6  ;;  %v1783_v46 = vld [vmem:[#allocation2 + $0x180] sm:$0xf]  ;;  %v1784_v63 = vld [vmem:[#allocation2 + $0x184] sm:$0x7] }
 0x136   : > { %2860 = vmatmul.mubr.bf16.gmra.mrb[52].mxu0 %v6128_v31  ;;  %2957 = vmatmul.mubr.bf16.gmra.mrb[52].mxu1 %v6160_v26  ;;  %v1830_v31 = vsel %vm8276_vm7, %v6195_v53, %v1829_v4  ;;  %v2118_v26 = vsel %vm8347_vm8, %v6227_v15, %v2117_v55  ;;  %v1686_v52 = vrot.slane %v1684_v14, 4  ;;  %v1976_v30 = vrot.slane %v1925_v51, 6  ;;  %v2070_v19 = vld [vmem:[#allocation2 + $0x184] sm:$0xe]  ;;  %v2071_v27 = vld [vmem:[#allocation2 + $0x188] sm:$0xf] }
 0x137   : > { %2867 = vmatprep.mubr.bf16.mxu0 %v6145_v41  ;;  %2964 = vmatprep.mubr.bf16.mxu1 %v6177_v13  ;;  %v2119_v41 = vrot.slane %v2117_v55, 4  ;;  %v6179_v13 = vrot.slane %v1634_v11, 9  ;;  %v6203_v20 = vcombine.low %v1830_v31, %v1833_v25  ;;  %v1975_v38 = vrot.slane %v1973_v0, 4  ;;  %v2072_v56 = vld [vmem:[#allocation2 + $0x18c] sm:$0x1]  ;;  %v7467_v53 = vld [vmem:[#allocation10 + $0x200] sm:$0xff]  }
 0x138   : > { %v6196_v6 = vrot.slane %v1782_v40, 11  ;;  %v1836_v1 = vrot.slane %v1783_v46, 7  ;;  %v1839_v54 = vrot.slane %v1784_v63, 7  ;;  %v6228_v22 = vrot.slane %v2070_v19, 9  ;;  %v1637_v8 = vld [vmem:[#allocation2 + $0x10c] sm:$0xe] }
 0x139   : > { %v2121_v32 = vsel %vm8347_vm8, %v2119_v41, %v2120_v21  ;;  %v1685_v39 = vsel %vm8347_vm8, %v6179_v13, %v1684_v14  ;;  %v2124_v3 = vrot.slane %v2071_v27, 5  ;;  %v1688_v36 = vsel %vm8347_vm8, %v1686_v52, %v1687_v44  ;;  %v1639_v57 = vld [vmem:[#allocation2 + $0x114] sm:$0x1]  ;;  %v1926_v47 = vld [vmem:[#allocation2 + $0x180] sm:$0xc]  ;;  %v7468_v12 = vld [vmem:[#allocation10 + $0x248] sm:$0xff]  }
 0x13a   : > { %v6235_v23 = vcombine.low %v2118_v26, %v2121_v32  ;;  %v1974_v2 = vsel %vm8145_vm2, %v6211_v42, %v1973_v0  ;;  %v1977_v29 = vsel %vm8145_vm2, %v1975_v38, %v1976_v30  ;;  %v2127_v45 = vrot.slane %v2072_v56, 5  ;;  %v1927_v28 = vld [vmem:[#allocation2 + $0x184] sm:$0xf]  ;;  %v1928_v55 = vld [vmem:[#allocation2 + $0x188] sm:$0x3]  ;;  %v7470_v42 = vld [vmem:[#allocation10 + $0x250] sm:$0xff]  }
 0x13b   : > { %v2125_v60 = vsel %vm8347_vm8, %v6228_v22, %v2124_v3  ;;  %v2126_v4 = vrot.slane %v2124_v3, 4  ;;  %v6180_v62 = vrot.slane %v1637_v8, 9  ;;  %v1694_v35 = vrot.slane %v1639_v57, 5  ;;  %v1785_v41 = vld [vmem:[#allocation2 + $0x190] sm:$0x8]  ;;  %v7475_v59 = vld [vmem:[#allocation10 + $0x280] sm:$0xff]  }
 0x13c   : > { %v6187_v49 = vcombine.low %v1685_v39, %v1688_v36  ;;  %v6219_v34 = vcombine.low %v1974_v2, %v1977_v29  ;;  %v1980_v11 = vrot.slane %v1927_v28, 6  ;;  %v6212_v9 = vrot.slane %v1926_v47, 10  ;;  %v1786_v25 = vld [vmem:[#allocation2 + $0x194] sm:$0xf]  ;;  %v1787_v13 = vld [vmem:[#allocation2 + $0x198] sm:$0x7] }
 0x13d   : > { %v2128_v18 = vsel %vm8347_vm8, %v2126_v4, %v2127_v45  ;;  %v1983_v26 = vrot.slane %v1928_v55, 6  ;;  %v6197_v44 = vrot.slane %v1785_v41, 11  ;;  %v1843_v51 = vrot.slane %v1786_v25, 7  ;;  %v2073_v32 = vld [vmem:[#allocation2 + $0x198] sm:$0xe]  ;;  %v7477_v36 = vld [vmem:[#allocation10 + $0x2c8] sm:$0xff]  }
 0x13e   : > { %2868 = vmatmul.mubr.bf16.gmra.mrb[56].mxu0 %v6129_v7  ;;  %2965 = vmatmul.mubr.bf16.gmra.mrb[56].mxu1 %v6161_v37  ;;  %v1638_v7 = vld [vmem:[#allocation2 + $0x110] sm:$0xf]  ;;  %v7473_v37 = vld [vmem:[#allocation10 + $0x2c0] sm:$0xff]   ;;  %v6236_v17 = vcombine.low %v2125_v60, %v2128_v18  ;;  %v1982_v31 = vrot.slane %v1980_v11, 4  ;;  %v2074_v52 = vld [vmem:[#allocation2 + $0x19c] sm:$0xf] }
 0x13f   : > { %2875 = vmatprep.mubr.bf16.mxu0 %v6146_v50  ;;  %2972 = vmatprep.mubr.bf16.mxu1 %v6178_v48  ;;  %v1837_v50 = vsel %vm8276_vm7, %v6196_v6, %v1836_v1  ;;  %v1838_v48 = vrot.slane %v1836_v1, 4  ;;  %v1691_v10 = vrot.slane %v1638_v7, 5  ;;  %v2075_v0 = vld [vmem:[#allocation2 + $0x1a0] sm:$0x1]  ;;  %v6229_v30 = vrot.slane %v2073_v32, 9  ;;  %v7472_v47 = vld [vmem:[#allocation10 + $0x258] sm:$0xff]  }
 0x140   : > { %6835 = vmatprep.subr.bf16.mxu1 %v7473_v37  ;;  %v2131_v40 = vrot.slane %v2074_v52, 5  ;;  %v1640_v46 = vld [vmem:[#allocation2 + $0x120] sm:$0xe]  ;;  %v1844_v39 = vsel %vm8276_vm7, %v6197_v44, %v1843_v51  ;;  %v1845_v38 = vrot.slane %v1843_v51, 4  ;;  %v2134_v6 = vrot.slane %v2075_v0, 5  ;;  %v7474_v18 = vld [vmem:[#allocation10 + $0x218] sm:$0xff]  }
 0x141   : > { %v1840_v15 = vsel %vm8276_vm7, %v1838_v48, %v1839_v54  ;;  %v1693_v21 = vrot.slane %v1691_v10, 4  ;;  %v1692_v14 = vsel %vm8347_vm8, %v6180_v62, %v1691_v10  ;;  %v1641_v19 = vld [vmem:[#allocation2 + $0x124] sm:$0xf]  ;;  %v1642_v27 = vld [vmem:[#allocation2 + $0x128] sm:$0x1]  ;;  %v6181_v56 = vrot.slane %v1640_v46, 9 }
 0x142   : > { %v6204_v16 = vcombine.low %v1837_v50, %v1840_v15  ;;  %v2132_v1 = vsel %vm8347_vm8, %v6229_v30, %v2131_v40  ;;  %v2133_v54 = vrot.slane %v2131_v40, 4  ;;  %v1698_v22 = vrot.slane %v1641_v19, 5  ;;  %v1929_v3 = vld [vmem:[#allocation2 + $0x194] sm:$0xc]  ;;  %v1930_v8 = vld [vmem:[#allocation2 + $0x198] sm:$0xf] }
 0x143   : > { %v1695_v58 = vsel %vm8347_vm8, %v1693_v21, %v1694_v35  ;;  %v1701_v45 = vrot.slane %v1642_v27, 5  ;;  %v1931_v7 = vld [vmem:[#allocation2 + $0x19c] sm:$0x3]  ;;  %v6213_v37 = vrot.slane %v1929_v3, 10  ;;  %v7471_v50 = vld [vmem:[#allocation10 + $0x210] sm:$0xff]   ;;  %v1987_v4 = vrot.slane %v1930_v8, 6 }
 0x144   : > { %v6188_v63 = vcombine.low %v1692_v14, %v1695_v58  ;;  %v2135_v60 = vsel %vm8347_vm8, %v2133_v54, %v2134_v6  ;;  %v1700_v57 = vrot.slane %v1698_v22, 4  ;;  %v1990_v62 = vrot.slane %v1931_v7, 6  ;;  %v1788_v28 = vld [vmem:[#allocation2 + $0x1a4] sm:$0x8]  ;;  %v1644_v25 = vld [vmem:[#allocation2 + $0x138] sm:$0xf] }
 0x145   : > { %v1699_v10 = vsel %vm8347_vm8, %v6181_v56, %v1698_v22  ;;  %v1988_v15 = vsel %vm8145_vm2, %v6213_v37, %v1987_v4  ;;  %v1989_v55 = vrot.slane %v1987_v4, 4  ;;  %v1645_v32 = vld [vmem:[#allocation2 + $0x13c] sm:$0x1]  ;;  %v1932_v52 = vld [vmem:[#allocation2 + $0x1a8] sm:$0xc]  ;;  %v1705_v0 = vrot.slane %v1644_v25, 5 }
 0x146   : > { %2876 = vmatmul.mubr.bf16.gmra.mrb[60].mxu0 %v6130_v61  ;;  %2973 = vmatmul.mubr.bf16.gmra.mrb[60].mxu1 %v6162_v24  ;;  %v7469_v61 = vld [vmem:[#allocation10 + $0x208] sm:$0xff]   ;;  %v1846_v24 = vrot.slane %v1787_v13, 7  ;;  %v1702_v35 = vsel %vm8347_vm8, %v1700_v57, %v1701_v45  ;;  %v1708_v30 = vrot.slane %v1645_v32, 5  ;;  %v7478_v46 = vld [vmem:[#allocation10 + $0x220] sm:$0xff]   ;;  %v7481_v56 = vld [vmem:[#allocation10 + $0x2d0] sm:$0xff]  }
 0x147   : > { %3013 = vmatprep.mubr.bf16.mxu0 %v6203_v20  ;;  %3110 = vmatprep.mubr.bf16.mxu1 %v6235_v23  ;;  %v1981_v20 = vsel %vm8145_vm2, %v6212_v9, %v1980_v11  ;;  %v1984_v23 = vsel %vm8145_vm2, %v1982_v31, %v1983_v26  ;;  %v6198_v11 = vrot.slane %v1788_v28, 11  ;;  %v6189_v41 = vcombine.low %v1699_v10, %v1702_v35  ;;  %v7479_v13 = vld [vmem:[#allocation10 + $0x288] sm:$0xff]   ;;  %v1791_v7 = vld [vmem:[#allocation2 + $0x1b8] sm:$0x8]  ;;  %v1792_v37 = vld [vmem:[#allocation2 + $0x1bc] sm:$0xf] }
 0x148   : > { %v6220_v2 = vcombine.low %v1981_v20, %v1984_v23  ;;  %v1847_v29 = vsel %vm8276_vm7, %v1845_v38, %v1846_v24  ;;  %v1991_v14 = vsel %vm8145_vm2, %v1989_v55, %v1990_v62  ;;  %v1933_v40 = vld [vmem:[#allocation2 + $0x1ac] sm:$0xf]  ;;  %v6214_v38 = vrot.slane %v1932_v52, 10  ;;  %v2080_v10 = vld [vmem:[#allocation2 + $0x1c4] sm:$0xf] }
 0x149   : > { %v6205_v48 = vcombine.low %v1844_v39, %v1847_v29  ;;  %v6221_v44 = vcombine.low %v1988_v15, %v1991_v14  ;;  %v1934_v39 = vld [vmem:[#allocation2 + $0x1b0] sm:$0x3]  ;;  %v1994_v6 = vrot.slane %v1933_v40, 6  ;;  %v7480_v19 = vld [vmem:[#allocation10 + $0x268] sm:$0xff]   ;;  %v1707_v54 = vrot.slane %v1705_v0, 4  ;;  %v7487_v40 = vld [vmem:[#allocation10 + $0x2e0] sm:$0xff]  }
 0x14a   : > { %v2081_v35 = vld [vmem:[#allocation2 + $0x1c8] sm:$0x1]  ;;  %v2145_v55 = vrot.slane %v2080_v10, 5 }
 0x14b   : > { %v1996_v3 = vrot.slane %v1994_v6, 4  ;;  %v1709_v29 = vsel %vm8347_vm8, %v1707_v54, %v1708_v30  ;;  %v1995_v45 = vsel %vm8145_vm2, %v6214_v38, %v1994_v6  ;;  %v1795_v38 = vld [vmem:[#allocation2 + $0x1d0] sm:$0xf] }
 0x14c   : > { %v1864_v54 = vrot.slane %v1795_v38, 7  ;;  %v1653_v38 = vld [vmem:[#allocation2 + $0x174] sm:$0xf] }
 0x14e   : > { %3014 = vmatmul.mubr.bf16.vlgmr.msra.gmra.mrb[64].mxu0 %v6187_v49  ;;  %3111 = vmatmul.mubr.bf16.vlgmr.msra.gmra.mrb[64].mxu1 %v6219_v34  ;;  %v1789_v49 = vld [vmem:[#allocation2 + $0x1a8] sm:$0xf]  ;;  %v1790_v34 = vld [vmem:[#allocation2 + $0x1ac] sm:$0x7] }
 0x14f   : > { %6772 = vmatpush3.bf16.msra.mxu0 %v7467_v53  ;;  %3021 = vmatprep.mubr.bf16.mxu0 %v6204_v16  ;;  %v6237_v53 = vcombine.low %v2132_v1, %v2135_v60  ;;  %v2077_v16 = vld [vmem:[#allocation2 + $0x1b0] sm:$0xf]  ;;  %v1850_v21 = vrot.slane %v1789_v49, 7  ;;  %v1853_v9 = vrot.slane %v1790_v34, 7  ;;  %v1857_v60 = vrot.slane %v1792_v37, 7 }
 0x150   : > { %3118 = vmatprep.mubr.bf16.mxu1 %v6236_v17  ;;  %6773 = vmatprep.subr.bf16.mxu0 %v7468_v12  ;;  %v2076_v12 = vld [vmem:[#allocation2 + $0x1ac] sm:$0xe]  ;;  %v2078_v17 = vld [vmem:[#allocation2 + $0x1b4] sm:$0x1]  ;;  %v2138_v26 = vrot.slane %v2077_v16, 5  ;;  %v7484_v16 = vld [vmem:[#allocation10 + $0x2d8] sm:$0xff]  }
 0x151   : > { %6836 = vmatpush3.bf16.msra.mxu1 %v7475_v59  ;;  %v6230_v31 = vrot.slane %v2076_v12, 9  ;;  %v2141_v58 = vrot.slane %v2078_v17, 5  ;;  %v1851_v59 = vsel %vm8276_vm7, %v6198_v11, %v1850_v21  ;;  %v1852_v51 = vrot.slane %v1850_v21, 4  ;;  %v7483_v49 = vld [vmem:[#allocation10 + $0x290] sm:$0xff]   ;;  %v1646_v12 = vld [vmem:[#allocation2 + $0x148] sm:$0xe] }
 0x152   : > { %6837 = vmatprep.subr.bf16.mxu1 %v7477_v36  ;;  %v2140_v20 = vrot.slane %v2138_v26, 4  ;;  %v1997_v36 = vrot.slane %v1934_v39, 6  ;;  %v1859_v15 = vrot.slane %v1857_v60, 4  ;;  %v2148_v11 = vrot.slane %v2081_v35, 5  ;;  %v1648_v21 = vld [vmem:[#allocation2 + $0x150] sm:$0x1] }
 0x153   : > { %6774 = vmatpush3.bf16.msra.mxu0 %v7469_v61  ;;  %v1643_v61 = vld [vmem:[#allocation2 + $0x134] sm:$0xe]  ;;  %v2139_v24 = vsel %vm8347_vm8, %v6230_v31, %v2138_v26  ;;  %v7485_v17 = vld [vmem:[#allocation10 + $0x298] sm:$0xff]   ;;  %v1794_v39 = vld [vmem:[#allocation2 + $0x1cc] sm:$0x8] }
 0x154   : > { %6775 = vmatprep.subr.bf16.mxu0 %v7470_v42  ;;  %v7476_v42 = vld [vmem:[#allocation10 + $0x260] sm:$0xff]   ;;  %v6182_v23 = vrot.slane %v1643_v61, 9  ;;  %v2142_v1 = vsel %vm8347_vm8, %v2140_v20, %v2141_v58  ;;  %v1998_v8 = vsel %vm8145_vm2, %v1996_v3, %v1997_v36  ;;  %v1935_v58 = vld [vmem:[#allocation2 + $0x1bc] sm:$0xc]  ;;  %v2083_v3 = vld [vmem:[#allocation2 + $0x1d8] sm:$0xf] }
 0x155   : > { %6838 = vmatpush3.bf16.msra.mxu1 %v7479_v13  ;;  %v6238_v22 = vcombine.low %v2139_v24, %v2142_v1  ;;  %v6222_v62 = vcombine.low %v1995_v45, %v1998_v8  ;;  %v1936_v61 = vld [vmem:[#allocation2 + $0x1c0] sm:$0xf]  ;;  %v1715_v13 = vrot.slane %v1648_v21, 5  ;;  %v7486_v24 = vld [vmem:[#allocation10 + $0x270] sm:$0xff]   ;;  %v6200_v1 = vrot.slane %v1794_v39, 11 }
 0x156   : > { %3022 = vmatmul.mubr.bf16.gmra.mrb[68].mxu0 %v6188_v63  ;;  %3119 = vmatmul.mubr.bf16.gmra.mrb[68].mxu1 %v6220_v2  ;;  %v1854_v63 = vsel %vm8276_vm7, %v1852_v51, %v1853_v9  ;;  %v1706_v2 = vsel %vm8347_vm8, %v6182_v23, %v1705_v0  ;;  %v6183_v9 = vrot.slane %v1646_v12, 9  ;;  %v2001_v51 = vrot.slane %v1936_v61, 6  ;;  %v2084_v36 = vld [vmem:[#allocation2 + $0x1dc] sm:$0x1]  ;;  %v1649_v37 = vld [vmem:[#allocation2 + $0x15c] sm:$0xe] }
 0x157   : > { %3029 = vmatprep.mubr.bf16.mxu0 %v6205_v48  ;;  %3126 = vmatprep.mubr.bf16.mxu1 %v6237_v53  ;;  %v6206_v27 = vcombine.low %v1851_v59, %v1854_v63  ;;  %v6199_v48 = vrot.slane %v1791_v7, 11  ;;  %v7482_v53 = vld [vmem:[#allocation10 + $0x228] sm:$0xff]   ;;  %v6190_v4 = vcombine.low %v1706_v2, %v1709_v29  ;;  %v6215_v59 = vrot.slane %v1935_v58, 10  ;;  %v1938_v35 = vld [vmem:[#allocation2 + $0x1d0] sm:$0xc] }
 0x158   : > { %6776 = vmatpush3.bf16.msra.mxu0 %v7471_v50  ;;  %v1793_v50 = vld [vmem:[#allocation2 + $0x1c0] sm:$0x7]  ;;  %6839 = vmatprep.subr.bf16.mxu1 %v7481_v56  ;;  %v2003_v30 = vrot.slane %v2001_v51, 4  ;;  %v2082_v56 = vld [vmem:[#allocation2 + $0x1d4] sm:$0xe]  ;;  %v1865_v29 = vsel %vm8276_vm7, %v6200_v1, %v1864_v54  ;;  %v1866_v45 = vrot.slane %v1864_v54, 4 }
 0x159   : > { %6777 = vmatprep.subr.bf16.mxu0 %v7472_v47  ;;  %v1860_v57 = vrot.slane %v1793_v50, 7  ;;  %v2079_v47 = vld [vmem:[#allocation2 + $0x1c0] sm:$0xe]  ;;  %v1858_v34 = vsel %vm8276_vm7, %v6199_v48, %v1857_v60  ;;  %6840 = vmatpush3.bf16.msra.mxu1 %v7483_v49  ;;  %v2002_v0 = vsel %vm8145_vm2, %v6215_v59, %v2001_v51  ;;  %v6232_v2 = vrot.slane %v2082_v56, 9  ;;  %v7488_v50 = vld [vmem:[#allocation10 + $0x230] sm:$0xff]   ;;  %v7490_v12 = vld [vmem:[#allocation10 + $0x2e8] sm:$0xff]  }
 0x15a   : > { %v6231_v28 = vrot.slane %v2079_v47, 9  ;;  %6841 = vmatprep.subr.bf16.mxu1 %v7484_v16  ;;  %v2152_v8 = vrot.slane %v2083_v3, 5  ;;  %v2155_v7 = vrot.slane %v2084_v36, 5  ;;  %v1650_v48 = vld [vmem:[#allocation2 + $0x160] sm:$0xf]  ;;  %v1726_v54 = vrot.slane %v1653_v38, 5 }
 0x15b   : > { %v1861_v31 = vsel %vm8276_vm7, %v1859_v15, %v1860_v57  ;;  %v1651_v60 = vld [vmem:[#allocation2 + $0x164] sm:$0x1]  ;;  %v6184_v57 = vrot.slane %v1649_v37, 9  ;;  %v1719_v10 = vrot.slane %v1650_v48, 5  ;;  %v1940_v15 = vld [vmem:[#allocation2 + $0x1d8] sm:$0x3] }
 0x15c   : > { %6778 = vmatpush3.bf16.msra.mxu0 %v7474_v18  ;;  %v1647_v18 = vld [vmem:[#allocation2 + $0x14c] sm:$0xf]  ;;  %v2146_v26 = vsel %vm8347_vm8, %v6231_v28, %v2145_v55  ;;  %v6207_v25 = vcombine.low %v1858_v34, %v1861_v31  ;;  %v7489_v47 = vld [vmem:[#allocation10 + $0x2a0] sm:$0xff]   ;;  %v1939_v28 = vld [vmem:[#allocation2 + $0x1d4] sm:$0xf]  ;;  %v1722_v34 = vrot.slane %v1651_v60, 5 }
 0x15d   : > { %6779 = vmatprep.subr.bf16.mxu0 %v7476_v42  ;;  %v1712_v14 = vrot.slane %v1647_v18, 5  ;;  %6842 = vmatpush3.bf16.msra.mxu1 %v7485_v17  ;;  %v1720_v18 = vsel %vm8347_vm8, %v6184_v57, %v1719_v10  ;;  %v1721_v21 = vrot.slane %v1719_v10, 4  ;;  %v1799_v59 = vld [vmem:[#allocation2 + $0x1e8] sm:$0x7]  ;;  %v1941_v56 = vld [vmem:[#allocation2 + $0x1e4] sm:$0xc] }
 0x15e   : > { %3030 = vmatmul.mubr.bf16.gmra.mrb[72].mxu0 %v6189_v41  ;;  %3127 = vmatmul.mubr.bf16.gmra.mrb[72].mxu1 %v6221_v44  ;;  %v2147_v41 = vrot.slane %v2145_v55, 4  ;;  %v1937_v44 = vld [vmem:[#allocation2 + $0x1c4] sm:$0x3]  ;;  %v6216_v55 = vrot.slane %v1938_v35, 10  ;;  %v7494_v48 = vld [vmem:[#allocation10 + $0x238] sm:$0xff]   ;;  %v7495_v35 = vld [vmem:[#allocation10 + $0x2b0] sm:$0xff]  }
 0x15f   : > { %3037 = vmatprep.mubr.bf16.mxu0 %v6206_v27  ;;  %3134 = vmatprep.mubr.bf16.mxu1 %v6238_v22  ;;  %v1714_v52 = vrot.slane %v1712_v14, 4  ;;  %v2004_v42 = vrot.slane %v1937_v44, 6  ;;  %v1713_v23 = vsel %vm8347_vm8, %v6183_v9, %v1712_v14  ;;  %v1796_v27 = vld [vmem:[#allocation2 + $0x1d4] sm:$0x7]  ;;  %v2011_v9 = vrot.slane %v1940_v15, 6 }
 0x160   : > { %6780 = vmatpush3.bf16.msra.mxu0 %v7478_v46  ;;  %v2149_v32 = vsel %vm8347_vm8, %v2147_v41, %v2148_v11  ;;  %6843 = vmatprep.subr.bf16.mxu1 %v7487_v40  ;;  %v1867_v22 = vrot.slane %v1796_v27, 7  ;;  %v2008_v11 = vrot.slane %v1939_v28, 6  ;;  %v7491_v41 = vld [vmem:[#allocation10 + $0x2a8] sm:$0xff]   ;;  %v1723_v14 = vsel %vm8347_vm8, %v1721_v21, %v1722_v34  ;;  %v1798_v44 = vld [vmem:[#allocation2 + $0x1e4] sm:$0xf]  ;;  %v7496_v21 = vld [vmem:[#allocation10 + $0x2f8] sm:$0xff]  }
 0x161   : > { %6781 = vmatprep.subr.bf16.mxu0 %v7480_v19  ;;  %v6239_v20 = vcombine.low %v2146_v26, %v2149_v32  ;;  %v1716_v46 = vsel %vm8347_vm8, %v1714_v52, %v1715_v13  ;;  %v2005_v63 = vsel %vm8145_vm2, %v2003_v30, %v2004_v42  ;;  %6844 = vmatpush3.bf16.msra.mxu1 %v7489_v47  ;;  %v1797_v13 = vld [vmem:[#allocation2 + $0x1e0] sm:$0x8]  ;;  %v1871_v32 = vrot.slane %v1798_v44, 7  ;;  %v2085_v42 = vld [vmem:[#allocation2 + $0x1e8] sm:$0xe] }
 0x162   : > { %v6191_v6 = vcombine.low %v1713_v23, %v1716_v46  ;;  %v6223_v19 = vcombine.low %v2002_v0, %v2005_v63  ;;  %v2009_v31 = vsel %vm8145_vm2, %v6216_v55, %v2008_v11  ;;  %v2010_v26 = vrot.slane %v2008_v11, 4  ;;  %6845 = vmatprep.subr.bf16.mxu1 %v7490_v12  ;;  %v2087_v23 = vld [vmem:[#allocation2 + $0x1f0] sm:$0x1]  ;;  %v1652_v40 = vld [vmem:[#allocation2 + $0x170] sm:$0xe] }
 0x163   : > { %v6192_v58 = vcombine.low %v1720_v18, %v1723_v14  ;;  %v6201_v51 = vrot.slane %v1797_v13, 11  ;;  %v1874_v52 = vrot.slane %v1799_v59, 7  ;;  %v6233_v0 = vrot.slane %v2085_v42, 9  ;;  %v1801_v34 = vld [vmem:[#allocation2 + $0x1f8] sm:$0xf] }
 0x164   : > { %6782 = vmatpush3.bf16.msra.mxu0 %v7482_v53  ;;  %v1868_v53 = vsel %vm8276_vm7, %v1866_v45, %v1867_v22  ;;  %v2012_v61 = vsel %vm8145_vm2, %v2010_v26, %v2011_v9  ;;  %v1873_v63 = vrot.slane %v1871_v32, 4  ;;  %v2162_v39 = vrot.slane %v2087_v23, 5  ;;  %v7493_v22 = vld [vmem:[#allocation10 + $0x2f0] sm:$0xff]   ;;  %v1802_v15 = vld [vmem:[#allocation2 + $0x1fc] sm:$0x7] }
 0x165   : > { %6783 = vmatprep.subr.bf16.mxu0 %v7486_v24  ;;  %v6208_v49 = vcombine.low %v1865_v29, %v1868_v53  ;;  %6846 = vmatpush3.bf16.msra.mxu1 %v7491_v41  ;;  %v7492_v24 = vld [vmem:[#allocation10 + $0x278] sm:$0xff]   ;;  %v1872_v46 = vsel %vm8276_vm7, %v6201_v51, %v1871_v32  ;;  %v6185_v1 = vrot.slane %v1652_v40, 9  ;;  %v1943_v29 = vld [vmem:[#allocation2 + $0x1ec] sm:$0x3]  ;;  %v6217_v45 = vrot.slane %v1941_v56, 10 }
 0x166   : > { %3038 = vmatmul.mubr.bf16.gmra.mrb[76].mxu0 %v6190_v4  ;;  %3135 = vmatmul.mubr.bf16.gmra.mrb[76].mxu1 %v6222_v62  ;;  %v2153_v4 = vsel %vm8347_vm8, %v6232_v2, %v2152_v8  ;;  %v2154_v62 = vrot.slane %v2152_v8, 4  ;;  %v1875_v3 = vsel %vm8276_vm7, %v1873_v63, %v1874_v52  ;;  %v1942_v2 = vld [vmem:[#allocation2 + $0x1e8] sm:$0xf]  ;;  %v2018_v47 = vrot.slane %v1943_v29, 6  ;;  %v2088_v18 = vld [vmem:[#allocation2 + $0x1fc] sm:$0xe] }
 0x167   : > { %3045 = vmatprep.mubr.bf16.mxu0 %v6207_v25  ;;  %3142 = vmatprep.mubr.bf16.mxu1 %v6239_v20  ;;  %v6224_v25 = vcombine.low %v2009_v31, %v2012_v61  ;;  %v2086_v20 = vld [vmem:[#allocation2 + $0x1ec] sm:$0xf]  ;;  %v6209_v8 = vcombine.low %v1872_v46, %v1875_v3  ;;  %v1727_v37 = vsel %vm8347_vm8, %v6185_v1, %v1726_v54  ;;  %v2015_v57 = vrot.slane %v1942_v2, 6  ;;  %v2089_v9 = vld [vmem:[#allocation2 + $0x200] sm:$0xf]  ;;  %v7497_v26 = vld [vmem:[#allocation10 + $0x2b8] sm:$0xff]  }
 0x168   : > { %6784 = vmatpush3.bf16.msra.mxu0 %v7488_v50  ;;  %v2156_v16 = vsel %vm8347_vm8, %v2154_v62, %v2155_v7  ;;  %v2159_v30 = vrot.slane %v2086_v20, 5  ;;  %v1728_v50 = vrot.slane %v1726_v54, 4  ;;  %6847 = vmatprep.subr.bf16.mxu1 %v7493_v22  ;;  %v1878_v12 = vrot.slane %v1801_v34, 7  ;;  %v1656_v13 = vld [vmem:[#allocation2 + $0x188] sm:$0xf]  ;;  %v7498_v1 = vld [vmem:[#allocation2 + $0xf0] sm:$0xff]  }
 0x169   : > { %v6240_v17 = vcombine.low %v2153_v4, %v2156_v16  ;;  %6785 = vmatprep.subr.bf16.mxu0 %v7492_v24  ;;  %v2016_v62 = vsel %vm8145_vm2, %v6217_v45, %v2015_v57  ;;  %v2017_v10 = vrot.slane %v2015_v57, 4  ;;  %6848 = vmatpush3.bf16.msra.mxu1 %v7495_v35  ;;  %v1881_v16 = vrot.slane %v1802_v15, 7  ;;  %v1657_v44 = vld [vmem:[#allocation2 + $0x18c] sm:$0x1]  ;;  %v1944_v42 = vld [vmem:[#allocation2 + $0x1f8] sm:$0xc] }
 0x16a   : > { %v2161_v27 = vrot.slane %v2159_v30, 4  ;;  %v6234_v31 = vrot.slane %v2088_v18, 9  ;;  %v1880_v14 = vrot.slane %v1878_v12, 4  ;;  %6849 = vmatprep.subr.bf16.mxu1 %v7496_v21  ;;  %v1733_v52 = vrot.slane %v1656_v13, 5  ;;  %v1945_v20 = vld [vmem:[#allocation2 + $0x1fc] sm:$0xf] }
 0x16b   : > { %v2019_v28 = vsel %vm8145_vm2, %v2017_v10, %v2018_v47  ;;  %v6218_v40 = vrot.slane %v1944_v42, 10  ;;  %v2022_v46 = vrot.slane %v1945_v20, 6  ;;  %v7501_v54 = vld [vmem:[#allocation10 + $0x340] sm:$0xff]   ;;  %v3336_v29 = vld [vmem:[#allocation2 + $0x8] sm:$0xf]  ;;  %v7504_v21 = vld [vmem:[#allocation2 + $0x14] sm:$0xff]  }
 0x16c   : > { %v2163_v7 = vsel %vm8347_vm8, %v2161_v27, %v2162_v39  ;;  %6786 = vmatpush3.bf16.msra.mxu0 %v7494_v48  ;;  %v6225_v55 = vcombine.low %v2016_v62, %v2019_v28  ;;  %v1882_v51 = vsel %vm8276_vm7, %v1880_v14, %v1881_v16  ;;  %v1735_v5 = vrot.slane %v1733_v52, 4  ;;  %v3335_v2 = vld [vmem:[#allocation2 + $0x4] sm:$0xc]  ;;  %v3337_v45 = vld [vmem:[#allocation2 + $0xc] sm:$0x3]  ;;  %v7508_v13 = vld [vmem:[#allocation2 + $0x118] sm:$0xff]  }
 0x16d   : > { %6850 = vmatpush3.bf16.msra.mxu1 %v7497_v26  ;;  %v2024_v27 = vrot.slane %v2022_v46, 4  ;;  %6899 = vmatprep.subr.bf16.mxu0 %v7501_v54  ;;  %v7499_v48 = vld [vmem:[#allocation2] sm:$0xff]   ;;  %v7507_v16 = vld [vmem:[#allocation10 + $0x308] sm:$0xff]   ;;  %v7516_v54 = vld [vmem:[#allocation10 + $0x358] sm:$0xff]  }
 0x16e   : > { %3046 = vmatmul.mubr.bf16.gmra.mrb[80].mxu0 %v6191_v6  ;;  %3143 = vmatmul.mubr.bf16.gmra.mrb[80].mxu1 %v6223_v19  ;;  %v1654_v6 = vld [vmem:[#allocation2 + $0x178] sm:$0x1]  ;;  %v2160_v19 = vsel %vm8347_vm8, %v6233_v0, %v2159_v30  ;;  %v1736_v0 = vrot.slane %v1657_v44, 5  ;;  %v1946_v30 = vld [vmem:[#allocation2 + $0x200] sm:$0x3]  ;;  %v7503_v34 = vld [vmem:[#allocation2 + $0x104] sm:$0xff]  }
 0x16f   : > { %3053 = vmatprep.mubr.bf16.mxu0 %v6208_v49  ;;  %3150 = vmatprep.mubr.bf16.mxu1 %v6240_v17  ;;  %v1729_v36 = vrot.slane %v1654_v6, 5  ;;  %v6241_v60 = vcombine.low %v2160_v19, %v2163_v7  ;;  %v1800_v49 = vld [vmem:[#allocation2 + $0x1f4] sm:$0x8]  ;;  %v2090_v17 = vld [vmem:[#allocation2 + $0x204] sm:$0x1]  ;;  %v2025_v38 = vrot.slane %v1946_v30, 6  ;;  %v2023_v19 = vsel %vm8145_vm2, %v6218_v40, %v2022_v46 }
 0x170   : > { %v6202_v11 = vrot.slane %v1800_v49, 11  ;;  %v2169_v61 = vrot.slane %v2090_v17, 5  ;;  %v1737_v56 = vsel %vm8347_vm8, %v1735_v5, %v1736_v0  ;;  %v3385_v7 = vrot.slane %v3336_v29, 6  ;;  %v7502_v57 = vld [vmem:[#allocation10 + $0x300] sm:$0xff]   ;;  %v3342_v17 = vld [vmem:[#allocation2 + $0x30] sm:$0xf] }
 0x171   : > { %v1730_v53 = vsel %vm8347_vm8, %v1728_v50, %v1729_v36  ;;  %v2026_v3 = vsel %vm8145_vm2, %v2024_v27, %v2025_v38  ;;  %v3340_v62 = vld [vmem:[#allocation2 + $0x20] sm:$0x3]  ;;  %v3399_v14 = vrot.slane %v3342_v17, 6  ;;  %v3345_v42 = vld [vmem:[#allocation2 + $0x44] sm:$0xf]  ;;  %v7509_v0 = vld [vmem:[#allocation2 + $0x28] sm:$0xff]  }
 0x172   : > { %v6193_v4 = vcombine.low %v1727_v37, %v1730_v53  ;;  %v1879_v41 = vsel %vm8276_vm7, %v6202_v11, %v1878_v12  ;;  %v6226_v36 = vcombine.low %v2023_v19, %v2026_v3  ;;  %v3388_v37 = vrot.slane %v3337_v45, 6  ;;  %v3338_v53 = vld [vmem:[#allocation2 + $0x18] sm:$0xc]  ;;  %v7506_v11 = vld [vmem:[#allocation10 + $0x348] sm:$0xff]   ;;  %v7505_v26 = vld [vmem:[#allocation2 + $0x20] sm:$0xff]  }
 0x173   : > { %v6210_v23 = vcombine.low %v1879_v41, %v1882_v51  ;;  %v3387_v50 = vrot.slane %v3385_v7, 4  ;;  %v6318_v35 = vrot.slane %v3338_v53, 10  ;;  %v3395_v49 = vrot.slane %v3340_v62, 6  ;;  %v3346_v20 = vld [vmem:[#allocation2 + $0x48] sm:$0x3]  ;;  %v7510_v46 = vld [vmem:[#allocation2 + $0x34] sm:$0xff]  }
 0x174   : > { %v3406_v30 = vrot.slane %v3345_v42, 6  ;;  %v3409_v40 = vrot.slane %v3346_v20, 6  ;;  %v7513_v19 = vld [vmem:[#allocation2 + $0x12c] sm:$0xff]   ;;  %v7518_v29 = vld [vmem:[#allocation10 + $0x318] sm:$0xff]  }
 0x175   : > { %v3389_v47 = vsel %vm8145_vm2, %v3387_v50, %v3388_v37  ;;  %v3348_v37 = vld [vmem:[#allocation2 + $0x58] sm:$0xf]  ;;  %v7515_v53 = vld [vmem:[#allocation2 + $0x48] sm:$0xff]  }
 0x176   : > { %3054 = vmatmul.mubr.bf16.gmra.mrb[84].mxu0 %v6192_v58  ;;  %3151 = vmatmul.mubr.bf16.gmra.mrb[84].mxu1 %v6224_v25  ;;  %v2166_v58 = vrot.slane %v2089_v9, 5  ;;  %v1655_v25 = vld [vmem:[#allocation2 + $0x184] sm:$0xe]  ;;  %v3341_v9 = vld [vmem:[#allocation2 + $0x2c] sm:$0xc]  ;;  %v3408_v5 = vrot.slane %v3406_v30, 4 }
 0x177   : > { %3061 = vmatprep.mubr.bf16.mxu0 %v6209_v8  ;;  %3158 = vmatprep.mubr.bf16.mxu1 %v6241_v60  ;;  %v6186_v59 = vrot.slane %v1655_v25, 9  ;;  %v6317_v8 = vrot.slane %v3335_v2, 10  ;;  %v7500_v60 = vld [vmem:[#allocation2 + $0xc] sm:$0xff]   ;;  %v6319_v41 = vrot.slane %v3341_v9, 10  ;;  %v3401_v25 = vrot.slane %v3399_v14, 4  ;;  %v7517_v2 = vld [vmem:[#allocation10 + $0x3c0] sm:$0xff]  }
 0x178   : > { %v2167_v24 = vsel %vm8347_vm8, %v6234_v31, %v2166_v58  ;;  %v2168_v32 = vrot.slane %v2166_v58, 4  ;;  %v3343_v31 = vld [vmem:[#allocation2 + $0x34] sm:$0x3]  ;;  %6963 = vmatprep.subr.bf16.mxu1 %v7517_v2  ;;  %v7525_v9 = vld [vmem:[#allocation10 + $0x320] sm:$0xff]  }
 0x179   : > { %v1734_v39 = vsel %vm8347_vm8, %v6186_v59, %v1733_v52  ;;  %v3386_v43 = vsel %vm8145_vm2, %v6317_v8, %v3385_v7  ;;  %v3402_v58 = vrot.slane %v3343_v31, 6  ;;  %v7511_v59 = vld [vmem:[#allocation10 + $0x350] sm:$0xff]   ;;  %v3344_v52 = vld [vmem:[#allocation2 + $0x40] sm:$0xc] }
 0x17a   : > { %v2170_v63 = vsel %vm8347_vm8, %v2168_v32, %v2169_v61  ;;  %v6194_v22 = vcombine.low %v1734_v39, %v1737_v56  ;;  %v6325_v10 = vcombine.low %v3386_v43, %v3389_v47  ;;  %v3400_v61 = vsel %vm8145_vm2, %v6319_v41, %v3399_v14  ;;  %v8938_v32 = vld [vmem:[%s9486_s6] ss:$0 sm:$0xff]  ;;  %v3347_v7 = vld [vmem:[#allocation2 + $0x54] sm:$0xc]  ;;  %v3349_v43 = vld [vmem:[#allocation2 + $0x5c] sm:$0x3] }
 0x17b   : > { %v6242_v6 = vcombine.low %v2167_v24, %v2170_v63  ;;  %v3403_v44 = vsel %vm8145_vm2, %v3401_v25, %v3402_v58  ;;  %v7512_v24 = vld [vmem:[#allocation10 + $0x310] sm:$0xff]   ;;  %v7519_v8 = vld [vmem:[#allocation10 + $0x380] sm:$0xff]   ;;  %v6321_v50 = vrot.slane %v3347_v7, 10  ;;  %v3416_v47 = vrot.slane %v3349_v43, 6  ;;  %v3350_v14 = vld [vmem:[#allocation2 + $0x68] sm:$0xc] }
 0x17c   : > { %v6327_v51 = vcombine.low %v3400_v61, %v3403_v44  ;;  %v7521_v41 = vld [vmem:[#allocation2 + $0x50] sm:$0xff]   ;;  %v3351_v58 = vld [vmem:[#allocation2 + $0x6c] sm:$0xf]  ;;  %v6322_v44 = vrot.slane %v3350_v14, 10  ;;  %v8979_v2 = vld [vmem:[%s9486_s6 + $0x3] ss:$0 sm:$0xff] }
 0x17d   : > { %v3352_v61 = vld [vmem:[#allocation2 + $0x70] sm:$0x3]  ;;  %v7534_v7 = vld [vmem:[#allocation10 + $0x3d8] sm:$0xff]  }
 0x17e   : > { %3062 = vmatmul.mubr.bf16.gmra.mrb[88].mxu0 %v6193_v4  ;;  %3159 = vmatmul.mubr.bf16.gmra.mrb[88].mxu1 %v6225_v55  ;;  %v3339_v4 = vld [vmem:[#allocation2 + $0x1c] sm:$0xf]  ;;  %v7539_v14 = vld [vmem:[#allocation10 + $0x370] sm:$0xff]  }
 0x17f   : > { %3069 = vmatprep.mubr.bf16.mxu0 %v6210_v23  ;;  %3166 = vmatprep.mubr.bf16.mxu1 %v6242_v6  ;;  %v3392_v28 = vrot.slane %v3339_v4, 6  ;;  %v6320_v23 = vrot.slane %v3344_v52, 10  ;;  %v7527_v52 = vld [vmem:[#allocation2 + $0x154] sm:$0xff]  }
 0x181   : > { %v3393_v15 = vsel %vm8145_vm2, %v6318_v35, %v3392_v28  ;;  %v3394_v55 = vrot.slane %v3392_v28, 4  ;;  %v3407_v39 = vsel %vm8145_vm2, %v6320_v23, %v3406_v30  ;;  %v7520_v35 = vld [vmem:[#allocation2 + $0x140] sm:$0xff]  }
 0x183   : > { %v3396_v12 = vsel %vm8145_vm2, %v3394_v55, %v3395_v49 }
 0x184   : > { %v6326_v18 = vcombine.low %v3393_v15, %v3396_v12 }
 0x186   : > { %3070 = vmatmul.mubr.bf16.gmra.mrb[92].mxu0 %v6194_v22  ;;  %3167 = vmatmul.mubr.bf16.gmra.mrb[92].mxu1 %v6226_v36 }
 0x187   : > { %4689 = vmatprep.mubr.bf16.mxu1 %v7498_v1  ;;  %4592 = vmatprep.mubr.bf16.mxu0 %v6325_v10  ;;  %v3410_v1 = vsel %vm8145_vm2, %v3408_v5, %v3409_v40  ;;  %v7530_v5 = vld [vmem:[#allocation10 + $0x368] sm:$0xff]  }
 0x188   : > { %v6328_v36 = vcombine.low %v3407_v39, %v3410_v1  ;;  %v7532_v1 = vld [vmem:[#allocation10 + $0x328] sm:$0xff]  }
 0x18e   : > { %4593 = vmatmul.mubr.bf16.vlgmr.msra.gmra.mrb[96].mxu0 %v7499_v48  ;;  %4690 = vmatmul.mubr.bf16.vlgmr.msra.gmra.mrb[96].mxu1 %v7500_v60  ;;  %v3413_v48 = vrot.slane %v3348_v37, 6 }
 0x18f   : > { %6900 = vmatpush3.bf16.msra.mxu0 %v7502_v57  ;;  %4697 = vmatprep.mubr.bf16.mxu1 %v7503_v34  ;;  %v7514_v57 = vld [vmem:[#allocation2 + $0x3c] sm:$0xff]  }
 0x190   : > { %6901 = vmatprep.subr.bf16.mxu0 %v7506_v11  ;;  %4600 = vmatprep.mubr.bf16.mxu0 %v6326_v18  ;;  %v3414_v62 = vsel %vm8145_vm2, %v6321_v50, %v3413_v48  ;;  %v3415_v10 = vrot.slane %v3413_v48, 4  ;;  %v7523_v34 = vld [vmem:[#allocation10 + $0x360] sm:$0xff]   ;;  %v7524_v11 = vld [vmem:[#allocation10 + $0x3c8] sm:$0xff]   ;;  %v3353_v50 = vld [vmem:[#allocation2 + $0x7c] sm:$0xc] }
 0x191   : > { %6964 = vmatpush3.bf16.msra.mxu1 %v7519_v8  ;;  %v3354_v48 = vld [vmem:[#allocation2 + $0x80] sm:$0xf] }
 0x192   : > { %v3417_v55 = vsel %vm8145_vm2, %v3415_v10, %v3416_v47  ;;  %6965 = vmatprep.subr.bf16.mxu1 %v7524_v11  ;;  %v6323_v10 = vrot.slane %v3353_v50, 10 }
 0x193   : > { %6902 = vmatpush3.bf16.msra.mxu0 %v7507_v16 }
 0x194   : > { %6903 = vmatprep.subr.bf16.mxu0 %v7511_v59  ;;  %v3420_v59 = vrot.slane %v3351_v58, 6 }
 0x196   : > { %4601 = vmatmul.mubr.bf16.gmra.mrb[100].mxu0 %v7504_v21  ;;  %4698 = vmatmul.mubr.bf16.gmra.mrb[100].mxu1 %v7505_v26  ;;  %v6329_v21 = vcombine.low %v3414_v62, %v3417_v55  ;;  %v7526_v26 = vld [vmem:[#allocation10 + $0x388] sm:$0xff]   ;;  %v3421_v23 = vsel %vm8145_vm2, %v6322_v44, %v3420_v59  ;;  %v3355_v62 = vld [vmem:[#allocation2 + $0x84] sm:$0x3]  ;;  %v7536_v55 = vld [vmem:[#allocation10 + $0x398] sm:$0xff]  }
 0x197   : > { %4705 = vmatprep.mubr.bf16.mxu1 %v7508_v13  ;;  %4608 = vmatprep.mubr.bf16.mxu0 %v6327_v51  ;;  %v7522_v13 = vld [vmem:[#allocation2 + $0x5c] sm:$0xff]   ;;  %v3423_v51 = vrot.slane %v3352_v61, 6 }
 0x198   : > { %6904 = vmatpush3.bf16.msra.mxu0 %v7512_v24  ;;  %6966 = vmatpush3.bf16.msra.mxu1 %v7526_v26  ;;  %v7537_v61 = vld [vmem:[#allocation2 + $0x78] sm:$0xff]  }
 0x199   : > { %6905 = vmatprep.subr.bf16.mxu0 %v7516_v54  ;;  %v7528_v54 = vld [vmem:[#allocation2 + $0x64] sm:$0xff]  }
 0x19c   : > { %6906 = vmatpush3.bf16.msra.mxu0 %v7518_v29 }
 0x19d   : > { %6907 = vmatprep.subr.bf16.mxu0 %v7523_v34  ;;  %v3427_v34 = vrot.slane %v3354_v48, 6  ;;  %v7544_v48 = vld [vmem:[#allocation2 + $0x17c] sm:$0xff]  }
 0x19e   : > { %4609 = vmatmul.mubr.bf16.gmra.mrb[104].mxu0 %v7509_v0  ;;  %4706 = vmatmul.mubr.bf16.gmra.mrb[104].mxu1 %v7510_v46  ;;  %v3422_v0 = vrot.slane %v3420_v59, 4 }
 0x19f   : > { %4616 = vmatprep.mubr.bf16.mxu0 %v6328_v36  ;;  %4713 = vmatprep.mubr.bf16.mxu1 %v7513_v19 }
 0x1a0   : > { %6908 = vmatpush3.bf16.msra.mxu0 %v7525_v9  ;;  %v3424_v39 = vsel %vm8145_vm2, %v3422_v0, %v3423_v51  ;;  %v3428_v9 = vsel %vm8145_vm2, %v6323_v10, %v3427_v34 }
 0x1a1   : > { %v708_v63 = vpop.f32.mrb[0].mxu0  ;;  %v8962_v17 = vpop.f32.mrb[0].mxu1  ;;  %v6330_v19 = vcombine.low %v3421_v23, %v3424_v39  ;;  %6909 = vmatprep.subr.bf16.mxu0 %v7530_v5 }
 0x1a2   : > { %v987_v38 = vadd.f32 %v8938_v32, %v708_v63  ;;  %v8943_v6 = vpop.f32.mrb[1].mxu0  ;;  %9552 = vst [vmem:[#allocation34_spill] sm:$0xff] %v8962_v17  ;;  %v823_v36 = vpop.f32.mrb[1].mxu1  ;;  %v7590_v17 = vld [vmem:[#allocation13 + $0x50] sm:$0xff]  }
 0x1a3   : > { %v712_v27 = vpop.f32.mrb[2].mxu0  ;;  %v8984_v8 = vpop.f32.mrb[2].mxu1 }
 0x1a4   : > { %v1003_v56 = vmax.f32 %v987_v38, 0.0  ;;  %v988_v22 = vadd.f32 %v8938_v32, %v712_v27  ;;  %v8948_v3 = vpop.f32.mrb[3].mxu0  ;;  %v7531_v38 = vld [vmem:[#allocation10 + $0x3d0] sm:$0xff]   ;;  %6910 = vmatpush3.bf16.msra.mxu0 %v7532_v1  ;;  %9553 = vst [vmem:[#allocation35_spill] sm:$0xff] %v8984_v8  ;;  %v827_v43 = vpop.f32.mrb[3].mxu1 }
 0x1a5   : > { %6967 = vmatprep.subr.bf16.mxu1 %v7531_v38  ;;  %6911 = vmatprep.subr.bf16.mxu0 %v7539_v14  ;;  %v7543_v38 = vld [vmem:[#allocation10 + $0x3e8] sm:$0xff]   ;;  %v7549_v14 = vld [vmem:[#allocation10 + $0x338] sm:$0xff]  }
 0x1a6   : > { %v1004_v45 = vmax.f32 %v988_v22, 0.0  ;;  %4617 = vmatmul.mubr.bf16.gmra.mrb[108].mxu0 %v7514_v57  ;;  %4714 = vmatmul.mubr.bf16.gmra.mrb[108].mxu1 %v7515_v53  ;;  %v7533_v22 = vld [vmem:[#allocation10 + $0x390] sm:$0xff]  }
 0x1a7   : > { %4624 = vmatprep.mubr.bf16.mxu0 %v6329_v21  ;;  %4721 = vmatprep.mubr.bf16.mxu1 %v7520_v35  ;;  %v7535_v35 = vld [vmem:[#allocation2 + $0x168] sm:$0xff]  }
 0x1a8   : > { %v8950_v60 = vpack.c.bf16 %v1004_v45, %v1003_v56  ;;  %v7529_v56 = vld [vmem:[#allocation2 + $0x70] sm:$0xff]   ;;  %v5044_v45 = vadd.f32 %v8979_v2, %v823_v36  ;;  %6968 = vmatpush3.bf16.msra.mxu1 %v7533_v22 }
 0x1a9   : > { %v718_v4 = vpop.f32.mrb[4].mxu0  ;;  %6969 = vmatprep.subr.bf16.mxu1 %v7534_v7  ;;  %v9001_v51 = vpop.f32.mrb[4].mxu1  ;;  %v3356_v36 = vld [vmem:[#allocation2 + $0x90] sm:$0xc] }
 0x1aa   : > { %v989_v28 = vadd.f32 %v8938_v32, %v718_v4  ;;  %v8955_v49 = vpop.f32.mrb[5].mxu0  ;;  %v5060_v57 = vmax.f32 %v5044_v45, 0.0  ;;  %v5045_v4 = vadd.f32 %v8979_v2, %v827_v43  ;;  %9554 = vst [vmem:[#allocation36_spill] sm:$0xff] %v9001_v51  ;;  %v3357_v45 = vld [vmem:[#allocation2 + $0x94] sm:$0xf]  ;;  %v6324_v43 = vrot.slane %v3356_v36, 10 }
 0x1ab   : > { %v722_v15 = vpop.f32.mrb[6].mxu0  ;;  %v3434_v50 = vrot.slane %v3357_v45, 6 }
 0x1ac   : > { %v1005_v12 = vmax.f32 %v989_v28, 0.0  ;;  %v990_v16 = vadd.f32 %v8938_v32, %v722_v15  ;;  %v8960_v18 = vpop.f32.mrb[7].mxu0  ;;  %v3430_v15 = vrot.slane %v3355_v62, 6  ;;  %v5061_v11 = vmax.f32 %v5045_v4, 0.0  ;;  %6970 = vmatpush3.bf16.msra.mxu1 %v7536_v55 }
 0x1ad   : > { %v3435_v62 = vsel %vm8145_vm2, %v6324_v43, %v3434_v50  ;;  %v3436_v10 = vrot.slane %v3434_v50, 4  ;;  %v7556_v50 = vld [vmem:[#allocation2 + $0x1ec] sm:$0xff]  }
 0x1ae   : > { %v1006_v31 = vmax.f32 %v990_v16, 0.0  ;;  %4625 = vmatmul.mubr.bf16.gmra.mrb[112].mxu0 %v7521_v41  ;;  %4722 = vmatmul.mubr.bf16.gmra.mrb[112].mxu1 %v7522_v13  ;;  %v8995_v26 = vpack.c.bf16 %v5061_v11, %v5060_v57  ;;  %v7538_v13 = vld [vmem:[#allocation2 + $0x84] sm:$0xff]   ;;  %v7547_v11 = vld [vmem:[#allocation2 + $0x98] sm:$0xff]  }
 0x1af   : > { %4729 = vmatprep.mubr.bf16.mxu1 %v7527_v52  ;;  %4632 = vmatprep.mubr.bf16.mxu0 %v6330_v19  ;;  %v833_v52 = vpop.f32.mrb[5].mxu1 }
 0x1b0   : > { %v8964_v25 = vpack.c.bf16 %v1006_v31, %v1005_v12  ;;  %v3429_v31 = vrot.slane %v3427_v34, 4  ;;  %v5046_v23 = vadd.f32 %v8979_v2, %v833_v52  ;;  %v7546_v34 = vld [vmem:[#allocation2 + $0x8c] sm:$0xff]  }
 0x1b1   : > { %v728_v24 = vpop.f32.mrb[8].mxu0  ;;  %v7551_v52 = vld [vmem:[#allocation10 + $0x3b0] sm:$0xff]  }
 0x1b2   : > { %v991_v42 = vadd.f32 %v8938_v32, %v728_v24  ;;  %v8967_v20 = vpop.f32.mrb[9].mxu0  ;;  %v3431_v58 = vsel %vm8145_vm2, %v3429_v31, %v3430_v15  ;;  %v7540_v24 = vld [vmem:[#allocation10 + $0x330] sm:$0xff]   ;;  %v5062_v19 = vmax.f32 %v5046_v23, 0.0 }
 0x1b3   : > { %v732_v30 = vpop.f32.mrb[10].mxu0  ;;  %v6331_v59 = vcombine.low %v3428_v9, %v3431_v58  ;;  %6912 = vmatpush3.bf16.msra.mxu0 %v7540_v24  ;;  %v7548_v9 = vld [vmem:[#allocation10 + $0x378] sm:$0xff]  }
 0x1b4   : > { %v1007_v40 = vmax.f32 %v991_v42, 0.0  ;;  %v992_v46 = vadd.f32 %v8938_v32, %v732_v30  ;;  %v8972_v63 = vpop.f32.mrb[11].mxu0  ;;  %v7541_v42 = vld [vmem:[#allocation10 + $0x3e0] sm:$0xff]   ;;  %v9004_v30 = vpop.f32.mrb[6].mxu1  ;;  %6913 = vmatprep.subr.bf16.mxu0 %v7548_v9 }
 0x1b5   : > { %9555 = vst [vmem:[#allocation37_spill] sm:$0xff] %v9004_v30  ;;  %6971 = vmatprep.subr.bf16.mxu1 %v7541_v42  ;;  %v837_v5 = vpop.f32.mrb[7].mxu1  ;;  %v3790_v30 = vld [vmem:[#allocation2 + $0x274] sm:$0xf] }
 0x1b6   : > { %v1008_v27 = vmax.f32 %v992_v46, 0.0  ;;  %4633 = vmatmul.mubr.bf16.gmra.mrb[116].mxu0 %v7528_v54  ;;  %4730 = vmatmul.mubr.bf16.gmra.mrb[116].mxu1 %v7529_v56  ;;  %v7542_v46 = vld [vmem:[#allocation10 + $0x3a0] sm:$0xff]   ;;  %v9019_v15 = vpop.f32.mrb[8].mxu1 }
 0x1b7   : > { %4737 = vmatprep.mubr.bf16.mxu1 %v7535_v35  ;;  %4640 = vmatprep.mubr.bf16.mxu0 %v6331_v59  ;;  %v7545_v35 = vld [vmem:[#allocation10 + $0x3a8] sm:$0xff]   ;;  %9557 = vst [vmem:[#allocation39_spill] sm:$0xff] %v9019_v15  ;;  %v7550_v59 = vld [vmem:[#allocation10 + $0x3f0] sm:$0xff]  }
 0x1b8   : > { %v8981_v29 = vpack.c.bf16 %v1008_v27, %v1007_v40  ;;  %v5047_v27 = vadd.f32 %v8979_v2, %v837_v5  ;;  %6972 = vmatpush3.bf16.msra.mxu1 %v7542_v46  ;;  %6914 = vmatpush3.bf16.msra.mxu0 %v7549_v14  ;;  %v7552_v46 = vld [vmem:[#allocation10 + $0x3f8] sm:$0xff]  }
 0x1b9   : > { %v738_v37 = vpop.f32.mrb[12].mxu0  ;;  %6973 = vmatprep.subr.bf16.mxu1 %v7543_v38  ;;  %v7553_v38 = vld [vmem:[#allocation2 + $0x1e0] sm:$0xff]  }
 0x1ba   : > { %v993_v47 = vadd.f32 %v8938_v32, %v738_v37  ;;  %v8987_v53 = vpop.f32.mrb[13].mxu0  ;;  %v5063_v7 = vmax.f32 %v5047_v27, 0.0  ;;  %v3358_v37 = vld [vmem:[#allocation2 + $0x98] sm:$0x3] }
 0x1bb   : > { %v742_v28 = vpop.f32.mrb[14].mxu0 }
 0x1bc   : > { %v994_v12 = vadd.f32 %v8938_v32, %v742_v28  ;;  %v8991_v16 = vpop.f32.mrb[15].mxu0  ;;  %v1009_v21 = vmax.f32 %v993_v47, 0.0  ;;  %v3437_v47 = vrot.slane %v3358_v37, 6  ;;  %v9013_v4 = vpack.c.bf16 %v5063_v7, %v5062_v19  ;;  %6974 = vmatpush3.bf16.msra.mxu1 %v7545_v35  ;;  %v7555_v37 = vld [vmem:[#allocation2 + $0xfc] sm:$0xff]  }
 0x1bd   : > { %6975 = vmatprep.subr.bf16.mxu1 %v7550_v59  ;;  %v9506_v19 = vmov 0.0  }
 0x1be   : > { %v1010_v41 = vmax.f32 %v994_v12, 0.0  ;;  %4641 = vmatmul.mubr.bf16.gmra.mrb[120].mxu0 %v7537_v61  ;;  %4738 = vmatmul.mubr.bf16.gmra.mrb[120].mxu1 %v7538_v13  ;;  %9556 = vst [vmem:[#allocation38_spill] sm:$0xff] %v9013_v4  ;;  %v3438_v55 = vsel %vm8145_vm2, %v3436_v10, %v3437_v47  ;;  %v843_v12 = vpop.f32.mrb[9].mxu1  ;;  %v3789_v4 = vld [vmem:[#allocation2 + $0x270] sm:$0xc] }
 0x1bf   : > { %4745 = vmatprep.mubr.bf16.mxu1 %v7544_v48  ;;  %v5048_v31 = vadd.f32 %v8979_v2, %v843_v12  ;;  %v9025_v61 = vpop.f32.mrb[10].mxu1  ;;  %7180 = vmatprep.subr.bf16.mxu0 %v9506_v19  ;;  %v3770_v12 = vld [vmem:[#allocation2 + $0x1ec] sm:$0x3] }
 0x1c0   : > { %v8999_v44 = vpack.c.bf16 %v1010_v41, %v1009_v21  ;;  %v6332_v21 = vcombine.low %v3435_v62, %v3438_v55  ;;  %9558 = vst [vmem:[#allocation40_spill] sm:$0xff] %v9025_v61  ;;  %v847_v23 = vpop.f32.mrb[11].mxu1  ;;  %6976 = vmatpush3.bf16.msra.mxu1 %v7551_v52  ;;  %v7557_v62 = vld [vmem:[#allocation12] sm:$0xff]  }
 0x1c1   : > { %v748_v0 = vpop.f32.mrb[16].mxu0  ;;  %v5064_v13 = vmax.f32 %v5048_v31, 0.0  ;;  %v9030_v5 = vpop.f32.mrb[12].mxu1  ;;  %6977 = vmatprep.subr.bf16.mxu1 %v7552_v46  ;;  %v3768_v55 = vld [vmem:[#allocation2 + $0x1e4] sm:$0xc] }
 0x1c2   : > { %v995_v40 = vadd.f32 %v8938_v32, %v748_v0  ;;  %v9007_v39 = vpop.f32.mrb[17].mxu0  ;;  %4648 = vmatprep.mubr.bf16.mxu0 %v6332_v21  ;;  %v5049_v0 = vadd.f32 %v8979_v2, %v847_v23  ;;  %9559 = vst [vmem:[#allocation41_spill] sm:$0xff] %v9030_v5  ;;  %v853_v36 = vpop.f32.mrb[13].mxu1  ;;  %v6365_v9 = vrot.slane %v3768_v55, 10 }
 0x1c3   : > { %v752_v1 = vpop.f32.mrb[18].mxu0  ;;  %v5050_v7 = vadd.f32 %v8979_v2, %v853_v36  ;;  %v9037_v43 = vpop.f32.mrb[14].mxu1 }
 0x1c4   : > { %v1011_v54 = vmax.f32 %v995_v40, 0.0  ;;  %v996_v56 = vadd.f32 %v8938_v32, %v752_v1  ;;  %v9011_v22 = vpop.f32.mrb[19].mxu0  ;;  %9560 = vst [vmem:[#allocation42_spill] sm:$0xff] %v9037_v43  ;;  %v857_v10 = vpop.f32.mrb[15].mxu1 }
 0x1c5   : > { %v5066_v47 = vmax.f32 %v5050_v7, 0.0  ;;  %v9045_v14 = vpop.f32.mrb[16].mxu1  ;;  %v7560_v7 = vld [vmem:[#allocation2 + $0x200] sm:$0xff]  }
 0x1c6   : > { %v1012_v57 = vmax.f32 %v996_v56, 0.0  ;;  %4746 = vmatmul.mubr.bf16.gmra.mrb[124].mxu1 %v7547_v11  ;;  %4649 = vmatmul.mubr.bf16.gmra.mrb[124].mxu0 %v7546_v34  ;;  %v5065_v56 = vmax.f32 %v5049_v0, 0.0  ;;  %v5051_v34 = vadd.f32 %v8979_v2, %v857_v10  ;;  %v3769_v11 = vld [vmem:[#allocation2 + $0x1e8] sm:$0xf]  ;;  %9562 = vst [vmem:[#allocation44_spill] sm:$0xff] %v9045_v14  ;;  %v863_v52 = vpop.f32.mrb[17].mxu1 }
 0x1c7   : > { %4786 = vmatprep.mubr.bf16.mxu0 %v7553_v38  ;;  %4883 = vmatprep.mubr.bf16.mxu1 %v7556_v50  ;;  %v3818_v31 = vrot.slane %v3769_v11, 6  ;;  %v5052_v46 = vadd.f32 %v8979_v2, %v863_v52  ;;  %v3772_v52 = vld [vmem:[#allocation2 + $0x1fc] sm:$0xf] }
 0x1c8   : > { %v9017_v28 = vpack.c.bf16 %v1012_v57, %v1011_v54  ;;  %v7554_v54 = vld [vmem:[#allocation10 + $0x3b8] sm:$0xff]   ;;  %v9039_v48 = vpack.c.bf16 %v5065_v56, %v5064_v13  ;;  %v5067_v59 = vmax.f32 %v5051_v34, 0.0  ;;  %v7559_v56 = vld [vmem:[#allocation2 + $0x110] sm:$0xff]   ;;  %v7561_v34 = vld [vmem:[#allocation12 + $0x8] sm:$0xff]  }
 0x1c9   : > { %v758_v41 = vpop.f32.mrb[20].mxu0  ;;  %6978 = vmatpush3.bf16.msra.mxu1 %v7554_v54  ;;  %v7558_v13 = vld [vmem:[#allocation2 + $0x1f4] sm:$0xff]   ;;  %v3819_v0 = vsel %vm8145_vm2, %v6365_v9, %v3818_v31  ;;  %v5068_v50 = vmax.f32 %v5052_v46, 0.0 }
 0x1ca   : > { %v997_v58 = vadd.f32 %v8938_v32, %v758_v41  ;;  %v9027_v42 = vpop.f32.mrb[21].mxu0  ;;  %9561 = vst [vmem:[#allocation43_spill] sm:$0xff] %v9039_v48  ;;  %v3821_v41 = vrot.slane %v3770_v12, 6  ;;  %v9058_v36 = vpack.c.bf16 %v5067_v59, %v5066_v47 }
 0x1cb   : > { %v762_v40 = vpop.f32.mrb[22].mxu0 }
 0x1cc   : > { %v1013_v24 = vmax.f32 %v997_v58, 0.0  ;;  %v998_v27 = vadd.f32 %v8938_v32, %v762_v40  ;;  %v9034_v1 = vpop.f32.mrb[23].mxu0  ;;  %v3820_v40 = vrot.slane %v3818_v31, 4  ;;  %9564 = vst [vmem:[#allocation46_spill] sm:$0xff] %v9058_v36 }
 0x1ce   : > { %v1014_v45 = vmax.f32 %v998_v27, 0.0  ;;  %4787 = vmatmul.mubr.bf16.vlgmr.msra.gmra.mrb[128].mxu0 %v7555_v37  ;;  %v9054_v27 = vpop.f32.mrb[18].mxu1  ;;  %v3822_v37 = vsel %vm8145_vm2, %v3820_v40, %v3821_v41 }
 0x1cf   : > { %7181 = vmatpush3.bf16.msra.mxu0 %v7557_v62  ;;  %9563 = vst [vmem:[#allocation45_spill] sm:$0xff] %v9054_v27  ;;  %4794 = vmatprep.mubr.bf16.mxu0 %v7558_v13  ;;  %v6373_v55 = vcombine.low %v3819_v0, %v3822_v37  ;;  %v3771_v13 = vld [vmem:[#allocation2 + $0x1f8] sm:$0xc] }
 0x1d0   : > { %v9041_v57 = vpack.c.bf16 %v1014_v45, %v1013_v24  ;;  %7182 = vmatprep.subr.bf16.mxu0 %v9506_v19  ;;  %v867_v45 = vpop.f32.mrb[19].mxu1  ;;  %v6366_v40 = vrot.slane %v3771_v13, 10  ;;  %v7563_v13 = vld [vmem:[#allocation2 + $0x124] sm:$0xff]  }
 0x1d1   : > { %v768_v35 = vpop.f32.mrb[24].mxu0  ;;  %v5053_v10 = vadd.f32 %v8979_v2, %v867_v45  ;;  %4884 = vmatmul.mubr.bf16.vlgmr.msra.gmra.mrb[128].mxu1 %v6373_v55 }
 0x1d2   : > { %v999_v21 = vadd.f32 %v8938_v32, %v768_v35  ;;  %v9047_v58 = vpop.f32.mrb[25].mxu0  ;;  %v9063_v35 = vpop.f32.mrb[20].mxu1  ;;  %4891 = vmatprep.mubr.bf16.mxu1 %v7560_v7 }
 0x1d3   : > { %v772_v23 = vpop.f32.mrb[26].mxu0  ;;  %9565 = vst [vmem:[#allocation47_spill] sm:$0xff] %v9063_v35  ;;  %v873_v11 = vpop.f32.mrb[21].mxu1  ;;  %v5069_v9 = vmax.f32 %v5053_v10, 0.0  ;;  %7183 = vmatpush3.bf16.msra.mxu0 %v7561_v34 }
 0x1d4   : > { %v1015_v24 = vmax.f32 %v999_v21, 0.0  ;;  %v1000_v38 = vadd.f32 %v8938_v32, %v772_v23  ;;  %v9056_v54 = vpop.f32.mrb[27].mxu0  ;;  %v5054_v47 = vadd.f32 %v8979_v2, %v873_v11  ;;  %v9068_v31 = vpop.f32.mrb[22].mxu1  ;;  %v3773_v23 = vld [vmem:[#allocation2 + $0x200] sm:$0x3]  ;;  %7184 = vmatprep.subr.bf16.mxu0 %v9506_v19 }
 0x1d5   : > { %9566 = vst [vmem:[#allocation48_spill] sm:$0xff] %v9068_v31  ;;  %v877_v59 = vpop.f32.mrb[23].mxu1  ;;  %v9071_v0 = vpack.c.bf16 %v5069_v9, %v5068_v50 }
 0x1d6   : > { %v1016_v62 = vmax.f32 %v1000_v38, 0.0  ;;  %4795 = vmatmul.mubr.bf16.gmra.mrb[132].mxu0 %v7559_v56  ;;  %v5070_v46 = vmax.f32 %v5054_v47, 0.0  ;;  %v3825_v38 = vrot.slane %v3772_v52, 6  ;;  %v9074_v45 = vpop.f32.mrb[24].mxu1  ;;  %v7562_v47 = vld [vmem:[#allocation2 + $0x208] sm:$0xff]  }
 0x1d7   : > { %9567 = vst [vmem:[#allocation49_spill] sm:$0xff] %v9071_v0  ;;  %9568 = vst [vmem:[#allocation50_spill] sm:$0xff] %v9074_v45  ;;  %v883_v56 = vpop.f32.mrb[25].mxu1  ;;  %4802 = vmatprep.mubr.bf16.mxu0 %v7562_v47 }
 0x1d8   : > { %v9065_v21 = vpack.c.bf16 %v1016_v62, %v1015_v24  ;;  %v5055_v24 = vadd.f32 %v8979_v2, %v877_v59  ;;  %v3828_v62 = vrot.slane %v3773_v23, 6  ;;  %v3826_v50 = vsel %vm8145_vm2, %v6366_v40, %v3825_v38  ;;  %v7564_v23 = vld [vmem:[#allocation2 + $0x214] sm:$0xff]  }
 0x1d9   : > { %v778_v12 = vpop.f32.mrb[28].mxu0  ;;  %v3827_v11 = vrot.slane %v3825_v38, 4  ;;  %v5056_v7 = vadd.f32 %v8979_v2, %v883_v56 }
 0x1da   : > { %v1001_v41 = vadd.f32 %v8938_v32, %v778_v12  ;;  %v9076_v37 = vpop.f32.mrb[29].mxu0  ;;  %v5071_v55 = vmax.f32 %v5055_v24, 0.0  ;;  %v9082_v12 = vpop.f32.mrb[26].mxu1 }
 0x1db   : > { %v782_v34 = vpop.f32.mrb[30].mxu0  ;;  %9569 = vst [vmem:[#allocation51_spill] sm:$0xff] %v9082_v12  ;;  %v887_v52 = vpop.f32.mrb[27].mxu1  ;;  %v3829_v24 = vsel %vm8145_vm2, %v3827_v11, %v3828_v62  ;;  %v5072_v19 = vmax.f32 %v5056_v7, 0.0  ;;  %v3775_v11 = vld [vmem:[#allocation2 + $0x210] sm:$0xf] }
 0x1dc   : > { %v1017_v10 = vmax.f32 %v1001_v41, 0.0  ;;  %v9084_v9 = vpop.f32.mrb[31].mxu0  ;;  %v1002_v59 = vadd.f32 %v8938_v32, %v782_v34  ;;  %v9087_v41 = vpack.c.bf16 %v5071_v55, %v5070_v46  ;;  %v5057_v40 = vadd.f32 %v8979_v2, %v887_v52  ;;  %v9092_v38 = vpop.f32.mrb[28].mxu1  ;;  %v7565_v34 = vld [vmem:[#allocation12 + $0x10] sm:$0xff]   ;;  %v3774_v46 = vld [vmem:[#allocation2 + $0x20c] sm:$0xc] }
 0x1dd   : > { %9571 = vst [vmem:[#allocation53_spill] sm:$0xff] %v9092_v38  ;;  %v6374_v56 = vcombine.low %v3826_v50, %v3829_v24  ;;  %v893_v45 = vpop.f32.mrb[29].mxu1  ;;  %v3776_v7 = vld [vmem:[#allocation2 + $0x214] sm:$0x3]  ;;  %v6367_v52 = vrot.slane %v3774_v46, 10  ;;  %7185 = vmatpush3.bf16.msra.mxu0 %v7565_v34 }
 0x1de   : > { %9570 = vst [vmem:[#allocation52_spill] sm:$0xff] %v9087_v41  ;;  %v1018_v12 = vmax.f32 %v1002_v59, 0.0  ;;  %v5073_v31 = vmax.f32 %v5057_v40, 0.0  ;;  %v5058_v35 = vadd.f32 %v8979_v2, %v893_v45  ;;  %v9095_v32 = vpop.f32.mrb[30].mxu1  ;;  %4803 = vmatmul.mubr.bf16.gmra.mrb[136].mxu0 %v7563_v13  ;;  %v3832_v59 = vrot.slane %v3775_v11, 6 }
 0x1df   : > { %9572 = vst [vmem:[#allocation54_spill] sm:$0xff] %v9095_v32  ;;  %4892 = vmatmul.mubr.bf16.gmra.mrb[132].mxu1 %v6374_v56  ;;  %v897_v62 = vpop.f32.mrb[31].mxu1  ;;  %v3835_v32 = vrot.slane %v3776_v7, 6  ;;  %v9574_v13 = vmov 0.0  }
 0x1e0   : > { %v9097_v41 = vpack.c.bf16 %v1018_v12, %v1017_v10  ;;  %v9099_v47 = vpack.c.bf16 %v5073_v31, %v5072_v19  ;;  %v5074_v50 = vmax.f32 %v5058_v35, 0.0  ;;  %4899 = vmatprep.mubr.bf16.mxu1 %v7564_v23  ;;  %v5059_v45 = vadd.f32 %v8979_v2, %v897_v62  ;;  %v7566_v12 = vld [vmem:[#allocation2 + $0x21c] sm:$0xff]   ;;  %7186 = vmatprep.subr.bf16.mxu0 %v9574_v13 }
 0x1e1   : > { %v6531_v55 = vpop.f32.mrb[32].mxu0  ;;  %v6595_v24 = vpop.f32.mrb[32].mxu1  ;;  %v3833_v19 = vsel %vm8145_vm2, %v6367_v52, %v3832_v59  ;;  %v3834_v31 = vrot.slane %v3832_v59, 4  ;;  %4810 = vmatprep.mubr.bf16.mxu0 %v7566_v12  ;;  %v7567_v62 = vld [vmem:[#allocation2 + $0x138] sm:$0xff]   ;;  %v3777_v59 = vld [vmem:[#allocation2 + $0x220] sm:$0xc] }
 0x1e2   : > { %9573 = vst [vmem:[#allocation55_spill] sm:$0xff] %v9099_v47  ;;  %v6532_v40 = vpop.f32.mrb[33].mxu0  ;;  %v6596_v56 = vpop.f32.mrb[33].mxu1  ;;  %v5075_v0 = vmax.f32 %v5059_v45, 0.0  ;;  %v7568_v45 = vld [vmem:[#allocation2 + $0x228] sm:$0xff]   ;;  %v7569_v52 = vld [vmem:[#allocation12 + $0x18] sm:$0xff]  }
 0x1e3   : > { %v6533_v38 = vadd.f32 %v6532_v40, %v6531_v55  ;;  %v6534_v10 = vpop.f32.mrb[34].mxu0  ;;  %v6597_v35 = vadd.f32 %v6596_v56, %v6595_v24  ;;  %v6598_v23 = vpop.f32.mrb[34].mxu1  ;;  %v3836_v55 = vsel %vm8145_vm2, %v3834_v31, %v3835_v32  ;;  %v6368_v12 = vrot.slane %v3777_v59, 10  ;;  %7187 = vmatpush3.bf16.msra.mxu0 %v7569_v52  ;;  %v7573_v52 = vld [vmem:[#allocation12 + $0x20] sm:$0xff]  }
 0x1e4   : > { %v6535_v34 = vpop.f32.mrb[35].mxu0  ;;  %v6599_v2 = vpop.f32.mrb[35].mxu1  ;;  %v9105_v11 = vpack.c.bf16 %v5075_v0, %v5074_v50  ;;  %v6375_v27 = vcombine.low %v3833_v19, %v3836_v55  ;;  %7188 = vmatprep.subr.bf16.mxu0 %v9574_v13 }
 0x1e5   : > { %v6536_v46 = vadd.f32 %v6535_v34, %v6534_v10  ;;  %v9109_v7 = vadd.f32 %v6597_v35, %v6533_v38  ;;  %v6600_v40 = vadd.f32 %v6599_v2, %v6598_v23  ;;  %v3778_v10 = vld [vmem:[#allocation2 + $0x224] sm:$0xf]  ;;  %v3779_v34 = vld [vmem:[#allocation2 + $0x228] sm:$0x3]  ;;  %v7570_v2 = vld [vmem:[#allocation2 + $0x230] sm:$0xff]  }
 0x1e6   : > { %9575 = vst [vmem:[#allocation56_spill] sm:$0xff] %v9105_v11  ;;  %4811 = vmatmul.mubr.bf16.gmra.mrb[140].mxu0 %v7567_v62  ;;  %v3839_v0 = vrot.slane %v3778_v10, 6  ;;  %v3842_v50 = vrot.slane %v3779_v34, 6  ;;  %v7571_v11 = vld [vmem:[#allocation2 + $0x14c] sm:$0xff]  }
 0x1e7   : > { %v9111_v56 = vadd.f32 %v6600_v40, %v6536_v46  ;;  %4900 = vmatmul.mubr.bf16.gmra.mrb[136].mxu1 %v6375_v27  ;;  %4818 = vmatprep.mubr.bf16.mxu0 %v7570_v2  ;;  %v7574_v2 = vld [vmem:[#allocation2 + $0x244] sm:$0xff]  }
 0x1e8   : > { %4907 = vmatprep.mubr.bf16.mxu1 %v7568_v45  ;;  %v3840_v46 = vsel %vm8145_vm2, %v6368_v12, %v3839_v0  ;;  %v3841_v55 = vrot.slane %v3839_v0, 4  ;;  %v3780_v12 = vld [vmem:[#allocation2 + $0x234] sm:$0xc]  ;;  %v3781_v0 = vld [vmem:[#allocation2 + $0x238] sm:$0xf]  ;;  %7189 = vmatpush3.bf16.msra.mxu0 %v7573_v52 }
 0x1e9   : > { %v6537_v47 = vpop.f32.mrb[36].mxu0  ;;  %v6601_v24 = vpop.f32.mrb[36].mxu1  ;;  %7190 = vmatprep.subr.bf16.mxu0 %v9574_v13 }
 0x1ea   : > { %v6538_v14 = vpop.f32.mrb[37].mxu0  ;;  %v6602_v38 = vpop.f32.mrb[37].mxu1  ;;  %v3843_v45 = vsel %vm8145_vm2, %v3841_v55, %v3842_v50 }
 0x1eb   : > { %v6539_v32 = vadd.f32 %v6538_v14, %v6537_v47  ;;  %v6540_v31 = vpop.f32.mrb[38].mxu0  ;;  %v6603_v35 = vadd.f32 %v6602_v38, %v6601_v24  ;;  %v6604_v19 = vpop.f32.mrb[38].mxu1  ;;  %v7572_v47 = vld [vmem:[#allocation2 + $0x23c] sm:$0xff]   ;;  %v6376_v10 = vcombine.low %v3840_v46, %v3843_v45 }
 0x1ec   : > { %v6541_v23 = vpop.f32.mrb[39].mxu0  ;;  %v6605_v59 = vpop.f32.mrb[39].mxu1  ;;  %v3782_v38 = vld [vmem:[#allocation2 + $0x23c] sm:$0x3] }
 0x1ed   : > { %v6542_v40 = vadd.f32 %v6541_v23, %v6540_v31  ;;  %v9116_v27 = vadd.f32 %v6603_v35, %v6539_v32  ;;  %v6606_v14 = vadd.f32 %v6605_v59, %v6604_v19  ;;  %v6369_v31 = vrot.slane %v3780_v12, 10 }
 0x1ee   : > { %v3846_v23 = vrot.slane %v3781_v0, 6  ;;  %v3849_v32 = vrot.slane %v3782_v38, 6  ;;  %4819 = vmatmul.mubr.bf16.gmra.mrb[144].mxu0 %v7571_v11  ;;  %v7577_v11 = vld [vmem:[#allocation12 + $0x28] sm:$0xff]  }
 0x1ef   : > { %v9120_v34 = vadd.f32 %v6606_v14, %v6542_v40  ;;  %4908 = vmatmul.mubr.bf16.gmra.mrb[140].mxu1 %v6376_v10  ;;  %4826 = vmatprep.mubr.bf16.mxu0 %v7574_v2  ;;  %v7576_v10 = vld [vmem:[#allocation2 + $0x250] sm:$0xff]   ;;  %v3783_v0 = vld [vmem:[#allocation2 + $0x248] sm:$0xc]  ;;  %v3784_v38 = vld [vmem:[#allocation2 + $0x24c] sm:$0xf] }
 0x1f0   : > { %v3847_v50 = vsel %vm8145_vm2, %v6369_v31, %v3846_v23  ;;  %v3848_v46 = vrot.slane %v3846_v23, 4  ;;  %4915 = vmatprep.mubr.bf16.mxu1 %v7572_v47  ;;  %v3853_v47 = vrot.slane %v3784_v38, 6  ;;  %7191 = vmatpush3.bf16.msra.mxu0 %v7577_v11  ;;  %v7581_v38 = vld [vmem:[#allocation12 + $0x30] sm:$0xff]  }
 0x1f1   : > { %v6543_v62 = vpop.f32.mrb[40].mxu0  ;;  %v6607_v24 = vpop.f32.mrb[40].mxu1  ;;  %7192 = vmatprep.subr.bf16.mxu0 %v9574_v13 }
 0x1f2   : > { %v6544_v35 = vpop.f32.mrb[41].mxu0  ;;  %v6608_v19 = vpop.f32.mrb[41].mxu1 }
 0x1f3   : > { %v6545_v59 = vadd.f32 %v6544_v35, %v6543_v62  ;;  %v6609_v36 = vadd.f32 %v6608_v19, %v6607_v24  ;;  %v6546_v43 = vpop.f32.mrb[42].mxu0  ;;  %v6610_v5 = vpop.f32.mrb[42].mxu1  ;;  %v3850_v62 = vsel %vm8145_vm2, %v3848_v46, %v3849_v32  ;;  %v7575_v24 = vld [vmem:[#allocation2 + $0x160] sm:$0xff]   ;;  %v3785_v35 = vld [vmem:[#allocation2 + $0x250] sm:$0x3]  ;;  %v6370_v19 = vrot.slane %v3783_v0, 10 }
 0x1f4   : > { %v6547_v55 = vpop.f32.mrb[43].mxu0  ;;  %v6611_v40 = vpop.f32.mrb[43].mxu1  ;;  %v6377_v23 = vcombine.low %v3847_v50, %v3850_v62  ;;  %v7578_v32 = vld [vmem:[#allocation2 + $0x258] sm:$0xff]   ;;  %v3855_v46 = vrot.slane %v3853_v47, 4  ;;  %7193 = vmatpush3.bf16.msra.mxu0 %v7581_v38 }
 0x1f5   : > { %v9125_v14 = vadd.f32 %v6609_v36, %v6545_v59  ;;  %v6548_v45 = vadd.f32 %v6547_v55, %v6546_v43  ;;  %v6612_v52 = vadd.f32 %v6611_v40, %v6610_v5  ;;  %v3856_v5 = vrot.slane %v3785_v35, 6  ;;  %7194 = vmatprep.subr.bf16.mxu0 %v9574_v13 }
 0x1f6   : > { %4827 = vmatmul.mubr.bf16.gmra.mrb[148].mxu0 %v7575_v24  ;;  %v3854_v11 = vsel %vm8145_vm2, %v6370_v19, %v3853_v47  ;;  %v7580_v24 = vld [vmem:[#allocation2 + $0x264] sm:$0xff]  }
 0x1f7   : > { %v9129_v12 = vadd.f32 %v6612_v52, %v6548_v45  ;;  %4916 = vmatmul.mubr.bf16.gmra.mrb[144].mxu1 %v6377_v23  ;;  %v3857_v0 = vsel %vm8145_vm2, %v3855_v46, %v3856_v5  ;;  %4834 = vmatprep.mubr.bf16.mxu0 %v7578_v32 }
 0x1f8   : > { %4923 = vmatprep.mubr.bf16.mxu1 %v7576_v10 }
 0x1f9   : > { %v6549_v31 = vpop.f32.mrb[44].mxu0  ;;  %v6613_v36 = vpop.f32.mrb[44].mxu1 }
 0x1fa   : > { %v6550_v59 = vpop.f32.mrb[45].mxu0  ;;  %v6614_v2 = vpop.f32.mrb[45].mxu1 }
 0x1fb   : > { %v6551_v43 = vadd.f32 %v6550_v59, %v6549_v31  ;;  %v6552_v55 = vpop.f32.mrb[46].mxu0  ;;  %v6615_v40 = vadd.f32 %v6614_v2, %v6613_v36  ;;  %v6616_v45 = vpop.f32.mrb[46].mxu1  ;;  %v3786_v31 = vld [vmem:[#allocation2 + $0x25c] sm:$0xc]  ;;  %v7579_v36 = vld [vmem:[#allocation2 + $0x174] sm:$0xff]  }
 0x1fc   : > { %v6553_v52 = vpop.f32.mrb[47].mxu0  ;;  %v6617_v61 = vpop.f32.mrb[47].mxu1  ;;  %v3787_v59 = vld [vmem:[#allocation2 + $0x260] sm:$0xf]  ;;  %v3788_v2 = vld [vmem:[#allocation2 + $0x264] sm:$0x3] }
 0x1fd   : > { %v6554_v48 = vadd.f32 %v6553_v52, %v6552_v55  ;;  %v9132_v50 = vadd.f32 %v6615_v40, %v6551_v43  ;;  %v6618_v62 = vadd.f32 %v6617_v61, %v6616_v45  ;;  %v6371_v23 = vrot.slane %v3786_v31, 10  ;;  %v7582_v55 = vld [vmem:[#allocation2 + $0x26c] sm:$0xff]  }
 0x1fe   : > { %v3860_v43 = vrot.slane %v3787_v59, 6  ;;  %v6378_v40 = vcombine.low %v3854_v11, %v3857_v0  ;;  %v3863_v32 = vrot.slane %v3788_v2, 6  ;;  %4835 = vmatmul.mubr.bf16.gmra.mrb[152].mxu0 %v7579_v36  ;;  %v7585_v0 = vld [vmem:[#allocation12 + $0x38] sm:$0xff]   ;;  %v7586_v36 = vld [vmem:[#allocation13 + $0x40] sm:$0xff]  }
 0x1ff   : > { %v9138_v35 = vadd.f32 %v6618_v62, %v6554_v48  ;;  %4842 = vmatprep.mubr.bf16.mxu0 %v7582_v55  ;;  %7195 = vmatpush3.bf16.msra.mxu0 %v7585_v0 }
 0x200   : > { %v3862_v5 = vrot.slane %v3860_v43, 4  ;;  %4924 = vmatmul.mubr.bf16.gmra.mrb[148].mxu1 %v6378_v40  ;;  %v3861_v11 = vsel %vm8145_vm2, %v6371_v23, %v3860_v43  ;;  %v7584_v40 = vld [vmem:[#allocation2 + $0x278] sm:$0xff]   ;;  %7036 = vmatprep.subr.bf16.mxu1 %v7586_v36 }
 0x201   : > { %v6555_v61 = vpop.f32.mrb[48].mxu0  ;;  %v6619_v10 = vpop.f32.mrb[48].mxu1  ;;  %4931 = vmatprep.mubr.bf16.mxu1 %v7580_v24 }
 0x202   : > { %v6556_v19 = vpop.f32.mrb[49].mxu0  ;;  %v6620_v47 = vpop.f32.mrb[49].mxu1  ;;  %v3864_v2 = vsel %vm8145_vm2, %v3862_v5, %v3863_v32 }
 0x203   : > { %v6557_v46 = vadd.f32 %v6556_v19, %v6555_v61  ;;  %v6621_v48 = vadd.f32 %v6620_v47, %v6619_v10  ;;  %v6558_v45 = vpop.f32.mrb[50].mxu0  ;;  %v6622_v52 = vpop.f32.mrb[50].mxu1  ;;  %v3791_v10 = vld [vmem:[#allocation2 + $0x278] sm:$0x3]  ;;  %v6372_v19 = vrot.slane %v3789_v4, 10  ;;  %v3867_v47 = vrot.slane %v3790_v30, 6 }
 0x204   : > { %v6559_v62 = vpop.f32.mrb[51].mxu0  ;;  %v6623_v15 = vpop.f32.mrb[51].mxu1  ;;  %v7588_v30 = vld [vmem:[#allocation13 + $0x48] sm:$0xff]  }
 0x205   : > { %v9141_v31 = vadd.f32 %v6621_v48, %v6557_v46  ;;  %v6560_v38 = vadd.f32 %v6559_v62, %v6558_v45  ;;  %v6624_v59 = vadd.f32 %v6623_v15, %v6622_v52  ;;  %v7583_v46 = vld [vmem:[#allocation2 + $0x188] sm:$0xff]   ;;  %v3870_v15 = vrot.slane %v3791_v10, 6  ;;  %v7587_v45 = vld [vmem:[#allocation13] sm:$0xff]  }
 0x206   : > { %v3869_v48 = vrot.slane %v3867_v47, 4  ;;  %v6379_v52 = vcombine.low %v3861_v11, %v3864_v2  ;;  %7037 = vmatpush3.bf16.msra.mxu1 %v7587_v45  ;;  %v7589_v4 = vld [vmem:[#allocation13 + $0x8] sm:$0xff]   ;;  %4843 = vmatmul.mubr.bf16.gmra.mrb[156].mxu0 %v7583_v46  ;;  %v5092_v11 = vld [vmem:[%s317_s3] sm:$0x1]  ;;  %v3868_v2 = vsel %vm8145_vm2, %v6372_v19, %v3867_v47  ;;  %v7592_v46 = vld [vmem:[#allocation13 + $0x58] sm:$0xff]  }
 0x207   : > { %v9147_v61 = vadd.f32 %v6624_v59, %v6560_v38  ;;  %7038 = vmatprep.subr.bf16.mxu1 %v7588_v30  ;;  %7196 = vmatprep.mubr.msk.bf16.mxu0 %vm7883_vm9, %v9574_v13  ;;  %v7595_v30 = vld [vmem:[#allocation13 + $0x20] sm:$0xff]  }
 0x208   : > { %4932 = vmatmul.mubr.bf16.gmra.mrb[152].mxu1 %v6379_v52  ;;  %v3871_v36 = vsel %vm8145_vm2, %v3869_v48, %v3870_v15  ;;  %v7594_v48 = vld [vmem:[#allocation13 + $0x60] sm:$0xff]  }
 0x209   : > { %v6561_v23 = vpop.f32.mrb[52].mxu0  ;;  %v6625_v43 = vpop.f32.mrb[52].mxu1  ;;  %4939 = vmatprep.mubr.bf16.mxu1 %v7584_v40 }
 0x20a   : > { %v6562_v24 = vpop.f32.mrb[53].mxu0  ;;  %v6626_v62 = vpop.f32.mrb[53].mxu1  ;;  %7039 = vmatpush3.bf16.msra.mxu1 %v7589_v4 }
 0x20b   : > { %v6563_v5 = vadd.f32 %v6562_v24, %v6561_v23  ;;  %v6627_v32 = vadd.f32 %v6626_v62, %v6625_v43  ;;  %v6564_v55 = vpop.f32.mrb[54].mxu0  ;;  %v6628_v38 = vpop.f32.mrb[54].mxu1  ;;  %v7591_v43 = vld [vmem:[#allocation13 + $0x10] sm:$0xff]   ;;  %7040 = vmatprep.subr.bf16.mxu1 %v7590_v17  ;;  %v6380_v24 = vcombine.low %v3868_v2, %v3871_v36  ;;  %v5093_v62 = vpack.c.bf16 %v5092_v11, %v5092_v11  ;;  %v7597_v36 = vld [vmem:[#allocation13 + $0x28] sm:$0xff]  }
 0x20c   : > { %v6565_v59 = vpop.f32.mrb[55].mxu0  ;;  %v6629_v0 = vpop.f32.mrb[55].mxu1 }
 0x20d   : > { %v9149_v10 = vadd.f32 %v6627_v32, %v6563_v5  ;;  %v6566_v51 = vadd.f32 %v6565_v59, %v6564_v55  ;;  %v6630_v8 = vadd.f32 %v6629_v0, %v6628_v38  ;;  %v7596_v0 = vld [vmem:[#allocation13 + $0x68] sm:$0xff]  }
 0x20e   : > { %7041 = vmatpush3.bf16.msra.mxu1 %v7591_v43  ;;  %7197 = vmatmul.mubr.bf16.vlgmr.msra.gmra.mrb[160].mxu0 %v5093_v62  ;;  %v7598_v62 = vld [vmem:[#allocation13 + $0x70] sm:$0xff]  }
 0x20f   : > { %v9160_v23 = vadd.f32 %v6630_v8, %v6566_v51  ;;  %v7593_v51 = vld [vmem:[#allocation13 + $0x18] sm:$0xff]   ;;  %7042 = vmatprep.subr.bf16.mxu1 %v7592_v46  ;;  %5714 = vmatprep.mubr.bf16.mxu0 %v8995_v26  ;;  %v7602_v26 = vld [vmem:[#allocation13 + $0xc0] sm:$0xff]  }
 0x210   : > { %4940 = vmatmul.mubr.bf16.gmra.mrb[156].mxu1 %v6380_v24  ;;  %7100 = vmatprep.subr.bf16.mxu0 %v7602_v26 }
 0x211   : > { %v6567_v45 = vpop.f32.mrb[56].mxu0  ;;  %v6631_v52 = vpop.f32.mrb[56].mxu1 }
 0x212   : > { %v6568_v40 = vpop.f32.mrb[57].mxu0  ;;  %v6632_v5 = vpop.f32.mrb[57].mxu1  ;;  %7043 = vmatpush3.bf16.msra.mxu1 %v7593_v51  ;;  %v7600_v51 = vld [vmem:[#allocation13 + $0x78] sm:$0xff]  }
 0x213   : > { %v6569_v32 = vadd.f32 %v6568_v40, %v6567_v45  ;;  %v6633_v19 = vadd.f32 %v6632_v5, %v6631_v52  ;;  %v6570_v47 = vpop.f32.mrb[58].mxu0  ;;  %v6634_v33 = vpop.f32.mrb[58].mxu1  ;;  %7044 = vmatprep.subr.bf16.mxu1 %v7594_v48  ;;  %v7605_v48 = vld [vmem:[#allocation13 + $0x88] sm:$0xff]  }
 0x214   : > { %v6571_v15 = vpop.f32.mrb[59].mxu0  ;;  %v6635_v8 = vpop.f32.mrb[59].mxu1 }
 0x215   : > { %v9163_v13 = vadd.f32 %v6633_v19, %v6569_v32  ;;  %v6572_v55 = vadd.f32 %v6571_v15, %v6570_v47  ;;  %v6636_v38 = vadd.f32 %v6635_v8, %v6634_v33  ;;  %v7599_v47 = vld [vmem:[#allocation13 + $0x30] sm:$0xff]   ;;  %v7603_v33 = vld [vmem:[#allocation13 + $0x80] sm:$0xff]   ;;  %v7604_v15 = vld [vmem:[#allocation13 + $0xc8] sm:$0xff]  }
 0x216   : > { %7045 = vmatpush3.bf16.msra.mxu1 %v7595_v30  ;;  %7101 = vmatpush3.bf16.msra.mxu0 %v7603_v33  ;;  %v7608_v33 = vld [vmem:[#allocation13 + $0xd8] sm:$0xff]  }
 0x217   : > { %v9166_v17 = vadd.f32 %v6636_v38, %v6572_v55  ;;  %7046 = vmatprep.subr.bf16.mxu1 %v7596_v0  ;;  %7102 = vmatprep.subr.bf16.mxu0 %v7604_v15  ;;  %v7609_v15 = vld [vmem:[#allocation13 + $0x98] sm:$0xff]  }
 0x219   : > { %v6573_v4 = vpop.f32.mrb[60].mxu0  ;;  %v6637_v59 = vpop.f32.mrb[60].mxu1 }
 0x21a   : > { %v6574_v11 = vpop.f32.mrb[61].mxu0  ;;  %v6638_v2 = vpop.f32.mrb[61].mxu1  ;;  %7047 = vmatpush3.bf16.msra.mxu1 %v7597_v36  ;;  %7103 = vmatpush3.bf16.msra.mxu0 %v7605_v48 }
 0x21b   : > { %v6575_v43 = vadd.f32 %v6574_v11, %v6573_v4  ;;  %v6639_v45 = vadd.f32 %v6638_v2, %v6637_v59  ;;  %v6576_v52 = vpop.f32.mrb[62].mxu0  ;;  %v6640_v40 = vpop.f32.mrb[62].mxu1  ;;  %7048 = vmatprep.subr.bf16.mxu1 %v7598_v62  ;;  %v7601_v59 = vld [vmem:[#allocation13 + $0x38] sm:$0xff]   ;;  %v9176_v62 = vld [vmem:[%s9486_s6 + $0x1] ss:$0 sm:$0xff] }
 0x21c   : > { %v6577_v46 = vpop.f32.mrb[63].mxu0  ;;  %v6641_v24 = vpop.f32.mrb[63].mxu1 }
 0x21d   : > { %v9168_v5 = vadd.f32 %v6639_v45, %v6575_v43  ;;  %v6578_v32 = vadd.f32 %v6577_v46, %v6576_v52  ;;  %v6642_v19 = vadd.f32 %v6641_v24, %v6640_v40  ;;  %v7606_v24 = vld [vmem:[#allocation13 + $0xd0] sm:$0xff]  }
 0x21e   : > { %7049 = vmatpush3.bf16.msra.mxu1 %v7599_v47  ;;  %7104 = vmatprep.subr.bf16.mxu0 %v7606_v24 }
 0x21f   : > { %v9170_v8 = vadd.f32 %v6642_v19, %v6578_v32  ;;  %7050 = vmatprep.subr.bf16.mxu1 %v7600_v51  ;;  %v7607_v19 = vld [vmem:[#allocation13 + $0x90] sm:$0xff]  }
 0x220   : > { %7105 = vmatpush3.bf16.msra.mxu0 %v7607_v19 }
 0x221   : > { %v6659_v55 = vpop.f32.mrb[64].mxu0  ;;  %v6723_v38 = vpop.f32.mrb[64].mxu1  ;;  %7106 = vmatprep.subr.bf16.mxu0 %v7608_v33 }
 0x222   : > { %v6660_v30 = vpop.f32.mrb[65].mxu0  ;;  %v6724_v4 = vpop.f32.mrb[65].mxu1  ;;  %7051 = vmatpush3.bf16.msra.mxu1 %v7601_v59 }
 0x223   : > { %v6661_v11 = vadd.f32 %v6660_v30, %v6659_v55  ;;  %v6662_v2 = vpop.f32.mrb[66].mxu0  ;;  %v6725_v0 = vadd.f32 %v6724_v4, %v6723_v38  ;;  %v6726_v43 = vpop.f32.mrb[66].mxu1 }
 0x224   : > { %v6663_v45 = vpop.f32.mrb[67].mxu0  ;;  %v6727_v52 = vpop.f32.mrb[67].mxu1  ;;  %7107 = vmatpush3.bf16.msra.mxu0 %v7609_v15 }
 0x225   : > { %v3016_v40 = vadd.f32 %v6661_v11, %v9109_v7  ;;  %v6664_v46 = vadd.f32 %v6663_v45, %v6662_v2  ;;  %v6728_v36 = vadd.f32 %v6727_v52, %v6726_v43 }
 0x227   : > { %v3019_v26 = vadd.f32 %v6664_v46, %v9111_v56  ;;  %v3113_v32 = vadd.f32 %v6725_v0, %v3016_v40 }
 0x229   : > { %v3175_v47 = vadd.f32 %v3113_v32, %v8943_v6  ;;  %v3116_v7 = vadd.f32 %v6728_v36, %v3019_v26  ;;  %v6665_v48 = vpop.f32.mrb[68].mxu0  ;;  %v6729_v55 = vpop.f32.mrb[68].mxu1  ;;  %v7610_v26 = vld [vmem:[#allocation13 + $0xe0] sm:$0xff]  }
 0x22a   : > { %v6666_v51 = vpop.f32.mrb[69].mxu0  ;;  %v6730_v38 = vpop.f32.mrb[69].mxu1  ;;  %v7611_v32 = vld [vmem:[#allocation13 + $0xa0] sm:$0xff]   ;;  %7108 = vmatprep.subr.bf16.mxu0 %v7610_v26 }
 0x22b   : > { %v3176_v30 = vadd.f32 %v3116_v7, %v8948_v3  ;;  %v6667_v4 = vadd.f32 %v6666_v51, %v6665_v48  ;;  %v6668_v11 = vpop.f32.mrb[70].mxu0  ;;  %v6731_v56 = vadd.f32 %v6730_v38, %v6729_v55  ;;  %v6732_v2 = vpop.f32.mrb[70].mxu1  ;;  %v3199_v0 = vadd.f32 %v9176_v62, %v3175_v47  ;;  %7109 = vmatpush3.bf16.msra.mxu0 %v7611_v32 }
 0x22c   : > { %v6669_v43 = vpop.f32.mrb[71].mxu0  ;;  %v6733_v45 = vpop.f32.mrb[71].mxu1 }
 0x22d   : > { %v3024_v59 = vadd.f32 %v6667_v4, %v9116_v27  ;;  %v6670_v6 = vadd.f32 %v6669_v43, %v6668_v11  ;;  %v6734_v52 = vadd.f32 %v6733_v45, %v6732_v2  ;;  %v3200_v40 = vadd.f32 %v9176_v62, %v3176_v30  ;;  %v7612_v11 = vld [vmem:[#allocation13 + $0xe8] sm:$0xff]  }
 0x22e   : > { %v3215_v46 = vmax.f32 %v3199_v0, 0.0  ;;  %v7613_v2 = vld [vmem:[#allocation13 + $0xa8] sm:$0xff]   ;;  %7110 = vmatprep.subr.bf16.mxu0 %v7612_v11 }
 0x22f   : > { %v3027_v36 = vadd.f32 %v6670_v6, %v9120_v34  ;;  %v3121_v24 = vadd.f32 %v6731_v56, %v3024_v59  ;;  %v3216_v3 = vmax.f32 %v3200_v40, 0.0  ;;  %7111 = vmatpush3.bf16.msra.mxu0 %v7613_v2  ;;  %v7616_v2 = vld [vmem:[#allocation13 + $0x100] sm:$0xff]  }
 0x230   : > { %7200 = vmatprep.subr.bf16.mxu1 %v7616_v2 }
 0x231   : > { %v3177_v19 = vadd.f32 %v3121_v24, %v8955_v49  ;;  %v3124_v33 = vadd.f32 %v6734_v52, %v3027_v36  ;;  %v6671_v47 = vpop.f32.mrb[72].mxu0  ;;  %v6735_v7 = vpop.f32.mrb[72].mxu1  ;;  %v3231_v48 = vpack.c.bf16 %v3216_v3, %v3215_v46  ;;  %v7614_v46 = vld [vmem:[#allocation13 + $0xf0] sm:$0xff]  }
 0x232   : > { %v6672_v27 = vpop.f32.mrb[73].mxu0  ;;  %v6736_v55 = vpop.f32.mrb[73].mxu1  ;;  %v7615_v36 = vld [vmem:[#allocation13 + $0xb0] sm:$0xff]   ;;  %7112 = vmatprep.subr.bf16.mxu0 %v7614_v46 }
 0x233   : > { %v3178_v51 = vadd.f32 %v3124_v33, %v8960_v18  ;;  %v6673_v15 = vadd.f32 %v6672_v27, %v6671_v47  ;;  %v6674_v38 = vpop.f32.mrb[74].mxu0  ;;  %5617 = vmatprep.mubr.bf16.mxu1 %v3231_v48  ;;  %v6737_v34 = vadd.f32 %v6736_v55, %v6735_v7  ;;  %v6738_v30 = vpop.f32.mrb[74].mxu1  ;;  %v3201_v4 = vadd.f32 %v9176_v62, %v3177_v19  ;;  %v7617_v55 = vld [vmem:[#allocation13 + $0xf8] sm:$0xff]  }
 0x234   : > { %v6675_v56 = vpop.f32.mrb[75].mxu0  ;;  %5618 = vmatmul.mubr.bf16.vlgmr.msra.gmra.mrb[160].mxu1 %v8950_v60  ;;  %v6739_v49 = vpop.f32.mrb[75].mxu1  ;;  %7113 = vmatpush3.bf16.msra.mxu0 %v7615_v36 }
 0x235   : > { %v3032_v0 = vadd.f32 %v6673_v15, %v9125_v14  ;;  %v6676_v43 = vadd.f32 %v6675_v56, %v6674_v38  ;;  %v6740_v45 = vadd.f32 %v6739_v49, %v6738_v30  ;;  %v3202_v59 = vadd.f32 %v9176_v62, %v3178_v51  ;;  %v7618_v15 = vld [vmem:[#allocation13 + $0xb8] sm:$0xff]   ;;  %7114 = vmatprep.subr.bf16.mxu0 %v7617_v55 }
 0x236   : > { %v3217_v52 = vmax.f32 %v3201_v4, 0.0  ;;  %7201 = vmatpush3.bf16.msra.mxu1 %v7616_v2 }
 0x237   : > { %v3035_v18 = vadd.f32 %v6676_v43, %v9129_v12  ;;  %v3129_v6 = vadd.f32 %v6737_v34, %v3032_v0  ;;  %v3218_v40 = vmax.f32 %v3202_v59, 0.0 }
 0x238   : > { %7115 = vmatpush3.bf16.msra.mxu0 %v7618_v15 }
 0x239   : > { %v3179_v24 = vadd.f32 %v3129_v6, %v8967_v20  ;;  %v3132_v60 = vadd.f32 %v6740_v45, %v3035_v18  ;;  %v6677_v3 = vpop.f32.mrb[76].mxu0  ;;  %v6741_v26 = vpop.f32.mrb[76].mxu1  ;;  %v3232_v32 = vpack.c.bf16 %v3218_v40, %v3217_v52 }
 0x23a   : > { %v6678_v14 = vpop.f32.mrb[77].mxu0  ;;  %v6742_v19 = vpop.f32.mrb[77].mxu1 }
 0x23b   : > { %v3180_v33 = vadd.f32 %v3132_v60, %v8972_v63  ;;  %v6679_v47 = vadd.f32 %v6678_v14, %v6677_v3  ;;  %v6680_v7 = vpop.f32.mrb[78].mxu0  ;;  %5625 = vmatprep.mubr.bf16.mxu1 %v3232_v32  ;;  %v6743_v12 = vadd.f32 %v6742_v19, %v6741_v26  ;;  %v6744_v48 = vpop.f32.mrb[78].mxu1  ;;  %v3203_v27 = vadd.f32 %v9176_v62, %v3179_v24 }
 0x23c   : > { %v6681_v51 = vpop.f32.mrb[79].mxu0  ;;  %5626 = vmatmul.mubr.bf16.gmra.mrb[164].mxu1 %v8964_v25  ;;  %v6745_v20 = vpop.f32.mrb[79].mxu1 }
 0x23d   : > { %v3040_v38 = vadd.f32 %v6679_v47, %v9132_v50  ;;  %v6682_v34 = vadd.f32 %v6681_v51, %v6680_v7  ;;  %v6746_v30 = vadd.f32 %v6745_v20, %v6744_v48  ;;  %v3204_v4 = vadd.f32 %v9176_v62, %v3180_v33  ;;  %v7619_v47 = vld [vmem:[#allocation13 + $0x108] sm:$0xff]  }
 0x23e   : > { %v3219_v56 = vmax.f32 %v3203_v27, 0.0  ;;  %7202 = vmatprep.subr.bf16.mxu1 %v7619_v47 }
 0x23f   : > { %v3043_v63 = vadd.f32 %v6682_v34, %v9138_v35  ;;  %v3137_v11 = vadd.f32 %v6743_v12, %v3040_v38  ;;  %v3220_v49 = vmax.f32 %v3204_v4, 0.0  ;;  %7203 = vmatpush3.bf16.msra.mxu1 %v7619_v47 }
 0x241   : > { %v3181_v0 = vadd.f32 %v3137_v11, %v8987_v53  ;;  %v3140_v43 = vadd.f32 %v6746_v30, %v3043_v63  ;;  %v6683_v25 = vpop.f32.mrb[80].mxu0  ;;  %v6747_v45 = vpop.f32.mrb[80].mxu1  ;;  %v3233_v59 = vpack.c.bf16 %v3220_v49, %v3219_v56 }
 0x242   : > { %v6684_v50 = vpop.f32.mrb[81].mxu0  ;;  %v6748_v18 = vpop.f32.mrb[81].mxu1 }
 0x243   : > { %v3182_v6 = vadd.f32 %v3140_v43, %v8991_v16  ;;  %v6685_v52 = vadd.f32 %v6684_v50, %v6683_v25  ;;  %v6686_v40 = vpop.f32.mrb[82].mxu0  ;;  %5633 = vmatprep.mubr.bf16.mxu1 %v3233_v59  ;;  %v6749_v35 = vadd.f32 %v6748_v18, %v6747_v45  ;;  %v6750_v46 = vpop.f32.mrb[82].mxu1  ;;  %v3205_v36 = vadd.f32 %v9176_v62, %v3181_v0  ;;  %v7620_v43 = vld [vmem:[#allocation13 + $0x110] sm:$0xff]  }
 0x244   : > { %v6687_v24 = vpop.f32.mrb[83].mxu0  ;;  %5634 = vmatmul.mubr.bf16.gmra.mrb[168].mxu1 %v8981_v29  ;;  %v6751_v53 = vpop.f32.mrb[83].mxu1  ;;  %7204 = vmatprep.subr.bf16.mxu1 %v7620_v43 }
 0x245   : > { %v3048_v60 = vadd.f32 %v6685_v52, %v9141_v31  ;;  %v6688_v3 = vadd.f32 %v6687_v24, %v6686_v40  ;;  %v6752_v26 = vadd.f32 %v6751_v53, %v6750_v46  ;;  %v3206_v32 = vadd.f32 %v9176_v62, %v3182_v6  ;;  %7205 = vmatpush3.bf16.msra.mxu1 %v7620_v43 }
 0x246   : > { %v3221_v19 = vmax.f32 %v3205_v36, 0.0 }
 0x247   : > { %v3051_v14 = vadd.f32 %v6688_v3, %v9147_v61  ;;  %v3145_v16 = vadd.f32 %v6749_v35, %v3048_v60  ;;  %v3222_v33 = vmax.f32 %v3206_v32, 0.0 }
 0x249   : > { %v3183_v7 = vadd.f32 %v3145_v16, %v9007_v39  ;;  %v3148_v12 = vadd.f32 %v6752_v26, %v3051_v14  ;;  %v6689_v48 = vpop.f32.mrb[84].mxu0  ;;  %v6753_v27 = vpop.f32.mrb[84].mxu1  ;;  %v3234_v55 = vpack.c.bf16 %v3222_v33, %v3221_v19 }
 0x24a   : > { %v6690_v29 = vpop.f32.mrb[85].mxu0  ;;  %v6754_v51 = vpop.f32.mrb[85].mxu1 }
 0x24b   : > { %v3184_v31 = vadd.f32 %v3148_v12, %v9011_v22  ;;  %v6691_v20 = vadd.f32 %v6690_v29, %v6689_v48  ;;  %v6692_v15 = vpop.f32.mrb[86].mxu0  ;;  %5641 = vmatprep.mubr.bf16.mxu1 %v3234_v55  ;;  %v6755_v61 = vadd.f32 %v6754_v51, %v6753_v27  ;;  %v6756_v38 = vpop.f32.mrb[86].mxu1  ;;  %v3207_v34 = vadd.f32 %v9176_v62, %v3183_v7  ;;  %v7622_v12 = vld [vmem:[#allocation13 + $0x120] sm:$0xff]  }
 0x24c   : > { %v6693_v30 = vpop.f32.mrb[87].mxu0  ;;  %5642 = vmatmul.mubr.bf16.gmra.mrb[172].mxu1 %v8999_v44  ;;  %v6757_v39 = vpop.f32.mrb[87].mxu1 }
 0x24d   : > { %v3056_v4 = vadd.f32 %v6691_v20, %v9149_v10  ;;  %v6694_v63 = vadd.f32 %v6693_v30, %v6692_v15  ;;  %v6758_v11 = vadd.f32 %v6757_v39, %v6756_v38  ;;  %v3208_v56 = vadd.f32 %v9176_v62, %v3184_v31 }
 0x24e   : > { %v3223_v2 = vmax.f32 %v3207_v34, 0.0 }
 0x24f   : > { %v3059_v49 = vadd.f32 %v6694_v63, %v9160_v23  ;;  %v3153_v22 = vadd.f32 %v6755_v61, %v3056_v4  ;;  %v3224_v0 = vmax.f32 %v3208_v56, 0.0  ;;  %v7623_v56 = vld [vmem:[#allocation13 + $0x128] sm:$0xff]  }
 0x251   : > { %v3185_v25 = vadd.f32 %v3153_v22, %v9027_v42  ;;  %v3156_v45 = vadd.f32 %v6758_v11, %v3059_v49  ;;  %v3235_v59 = vpack.c.bf16 %v3224_v0, %v3223_v2  ;;  %v6695_v50 = vpop.f32.mrb[88].mxu0  ;;  %v6759_v40 = vpop.f32.mrb[88].mxu1 }
 0x252   : > { %v6696_v18 = vpop.f32.mrb[89].mxu0  ;;  %v6760_v36 = vpop.f32.mrb[89].mxu1 }
 0x253   : > { %v3186_v44 = vadd.f32 %v3156_v45, %v9034_v1  ;;  %5649 = vmatprep.mubr.bf16.mxu1 %v3235_v59  ;;  %v3209_v10 = vadd.f32 %v9176_v62, %v3185_v25  ;;  %v6697_v23 = vadd.f32 %v6696_v18, %v6695_v50  ;;  %v6698_v6 = vpop.f32.mrb[90].mxu0  ;;  %v7621_v1 = vld [vmem:[#allocation13 + $0x118] sm:$0xff]   ;;  %v6761_v60 = vadd.f32 %v6760_v36, %v6759_v40  ;;  %v6762_v3 = vpop.f32.mrb[90].mxu1  ;;  %v7624_v40 = vld [vmem:[#allocation13 + $0x130] sm:$0xff]  }
 0x254   : > { %5650 = vmatmul.mubr.bf16.gmra.mrb[176].mxu1 %v9017_v28  ;;  %v6699_v35 = vpop.f32.mrb[91].mxu0  ;;  %v6763_v32 = vpop.f32.mrb[91].mxu1  ;;  %7206 = vmatprep.subr.bf16.mxu1 %v7621_v1 }
 0x255   : > { %v3210_v52 = vadd.f32 %v9176_v62, %v3186_v44  ;;  %v3064_v42 = vadd.f32 %v6697_v23, %v9163_v13  ;;  %v6700_v46 = vadd.f32 %v6699_v35, %v6698_v6  ;;  %v3225_v24 = vmax.f32 %v3209_v10, 0.0  ;;  %7207 = vmatpush3.bf16.msra.mxu1 %v7621_v1 }
 0x256   : > { %v6764_v16 = vadd.f32 %v6763_v32, %v6762_v3  ;;  %7208 = vmatprep.subr.bf16.mxu1 %v7622_v12 }
 0x257   : > { %v3226_v53 = vmax.f32 %v3210_v52, 0.0  ;;  %v3067_v26 = vadd.f32 %v6700_v46, %v9166_v17  ;;  %v3161_v28 = vadd.f32 %v6761_v60, %v3064_v42  ;;  %v7625_v60 = vld [vmem:[#allocation13 + $0x138] sm:$0xff]  }
 0x259   : > { %v3236_v14 = vpack.c.bf16 %v3226_v53, %v3225_v24  ;;  %v3187_v19 = vadd.f32 %v3161_v28, %v9047_v58  ;;  %v3164_v33 = vadd.f32 %v6764_v16, %v3067_v26  ;;  %v6701_v7 = vpop.f32.mrb[92].mxu0  ;;  %v6765_v17 = vpop.f32.mrb[92].mxu1  ;;  %7209 = vmatpush3.bf16.msra.mxu1 %v7622_v12 }
 0x25a   : > { %v6702_v48 = vpop.f32.mrb[93].mxu0  ;;  %v6766_v51 = vpop.f32.mrb[93].mxu1  ;;  %7210 = vmatprep.subr.bf16.mxu1 %v7623_v56 }
 0x25b   : > { %5657 = vmatprep.mubr.bf16.mxu1 %v3236_v14  ;;  %v3188_v13 = vadd.f32 %v3164_v33, %v9056_v54  ;;  %v3211_v47 = vadd.f32 %v9176_v62, %v3187_v19  ;;  %v6703_v55 = vadd.f32 %v6702_v48, %v6701_v7  ;;  %v6704_v29 = vpop.f32.mrb[94].mxu0  ;;  %v6767_v20 = vadd.f32 %v6766_v51, %v6765_v17  ;;  %v6768_v58 = vpop.f32.mrb[94].mxu1 }
 0x25c   : > { %5658 = vmatmul.mubr.bf16.gmra.mrb[180].mxu1 %v9041_v57  ;;  %v6705_v31 = vpop.f32.mrb[95].mxu0  ;;  %v6769_v38 = vpop.f32.mrb[95].mxu1 }
 0x25d   : > { %v3212_v27 = vadd.f32 %v9176_v62, %v3188_v13  ;;  %v3227_v15 = vmax.f32 %v3211_v47, 0.0  ;;  %v3072_v57 = vadd.f32 %v6703_v55, %v9168_v5  ;;  %v6706_v54 = vadd.f32 %v6705_v31, %v6704_v29  ;;  %7211 = vmatpush3.bf16.msra.mxu1 %v7623_v56 }
 0x25e   : > { %v6770_v34 = vadd.f32 %v6769_v38, %v6768_v58  ;;  %7212 = vmatprep.subr.bf16.mxu1 %v7624_v40 }
 0x25f   : > { %v3228_v61 = vmax.f32 %v3212_v27, 0.0  ;;  %v3075_v39 = vadd.f32 %v6706_v54, %v9170_v8  ;;  %v3169_v4 = vadd.f32 %v6767_v20, %v3072_v57 }
 0x261   : > { %v3237_v30 = vpack.c.bf16 %v3228_v61, %v3227_v15  ;;  %v3189_v63 = vadd.f32 %v3169_v4, %v9076_v37  ;;  %v3172_v11 = vadd.f32 %v6770_v34, %v3075_v39  ;;  %v6787_v49 = vpop.f32.mrb[96].mxu0  ;;  %v6851_v22 = vpop.f32.mrb[96].mxu1  ;;  %7213 = vmatpush3.bf16.msra.mxu1 %v7624_v40 }
 0x262   : > { %v6788_v0 = vpop.f32.mrb[97].mxu0  ;;  %v6852_v5 = vpop.f32.mrb[97].mxu1  ;;  %7214 = vmatprep.subr.bf16.mxu1 %v7625_v60 }
 0x263   : > { %5665 = vmatprep.mubr.bf16.mxu1 %v3237_v30  ;;  %v3190_v2 = vadd.f32 %v3172_v11, %v9084_v9  ;;  %v3213_v43 = vadd.f32 %v9176_v62, %v3189_v63  ;;  %v6789_v25 = vadd.f32 %v6788_v0, %v6787_v49  ;;  %v6853_v45 = vadd.f32 %v6852_v5, %v6851_v22  ;;  %v6790_v8 = vpop.f32.mrb[98].mxu0  ;;  %v6854_v59 = vpop.f32.mrb[98].mxu1 }
 0x264   : > { %5666 = vmatmul.mubr.bf16.gmra.mrb[184].mxu1 %v9065_v21  ;;  %v6791_v44 = vpop.f32.mrb[99].mxu0  ;;  %v6855_v37 = vpop.f32.mrb[99].mxu1 }
 0x265   : > { %v3214_v50 = vadd.f32 %v9176_v62, %v3190_v2  ;;  %v9232_v21 = vadd.f32 %v6853_v45, %v6789_v25  ;;  %v6792_v10 = vadd.f32 %v6791_v44, %v6790_v8  ;;  %v6856_v18 = vadd.f32 %v6855_v37, %v6854_v59  ;;  %7215 = vmatpush3.bf16.msra.mxu1 %v7625_v60 }
 0x266   : > { %v3229_v23 = vmax.f32 %v3213_v43, 0.0 }
 0x267   : > { %v3230_v9 = vmax.f32 %v3214_v50, 0.0  ;;  %v9234_v6 = vadd.f32 %v6856_v18, %v6792_v10 }
 0x269   : > { %v3238_v52 = vpack.c.bf16 %v3230_v9, %v3229_v23  ;;  %v6793_v35 = vpop.f32.mrb[100].mxu0  ;;  %v6857_v42 = vpop.f32.mrb[100].mxu1 }
 0x26a   : > { %v6794_v46 = vpop.f32.mrb[101].mxu0  ;;  %v6858_v36 = vpop.f32.mrb[101].mxu1 }
 0x26b   : > { %5673 = vmatprep.mubr.bf16.mxu1 %v3238_v52  ;;  %v6795_v24 = vadd.f32 %v6794_v46, %v6793_v35  ;;  %v6859_v53 = vadd.f32 %v6858_v36, %v6857_v42  ;;  %v6796_v1 = vpop.f32.mrb[102].mxu0  ;;  %v6860_v62 = vpop.f32.mrb[102].mxu1 }
 0x26c   : > { %5674 = vmatmul.mubr.bf16.gmra.mrb[188].mxu1 %v9097_v41  ;;  %v6797_v3 = vpop.f32.mrb[103].mxu0  ;;  %v6861_v26 = vpop.f32.mrb[103].mxu1 }
 0x26d   : > { %v9237_v32 = vadd.f32 %v6859_v53, %v6795_v24  ;;  %v6798_v14 = vadd.f32 %v6797_v3, %v6796_v1  ;;  %v6862_v28 = vadd.f32 %v6861_v26, %v6860_v62 }
 0x26f   : > { %v9239_v16 = vadd.f32 %v6862_v28, %v6798_v14 }
 0x271   : > { %v6799_v19 = vpop.f32.mrb[104].mxu0  ;;  %v6863_v33 = vpop.f32.mrb[104].mxu1 }
 0x272   : > { %v6800_v13 = vpop.f32.mrb[105].mxu0  ;;  %v6864_v47 = vpop.f32.mrb[105].mxu1 }
 0x273   : > { %v6801_v7 = vadd.f32 %v6800_v13, %v6799_v19  ;;  %v6865_v12 = vadd.f32 %v6864_v47, %v6863_v33  ;;  %v6802_v48 = vpop.f32.mrb[106].mxu0  ;;  %v6866_v41 = vpop.f32.mrb[106].mxu1 }
 0x274   : > { %v6803_v17 = vpop.f32.mrb[107].mxu0  ;;  %v6867_v27 = vpop.f32.mrb[107].mxu1 }
 0x275   : > { %v9241_v55 = vadd.f32 %v6865_v12, %v6801_v7  ;;  %v6804_v29 = vadd.f32 %v6803_v17, %v6802_v48  ;;  %v6868_v51 = vadd.f32 %v6867_v27, %v6866_v41 }
 0x277   : > { %v9243_v31 = vadd.f32 %v6868_v51, %v6804_v29 }
 0x279   : > { %v6805_v20 = vpop.f32.mrb[108].mxu0  ;;  %v6869_v58 = vpop.f32.mrb[108].mxu1 }
 0x27a   : > { %v6806_v15 = vpop.f32.mrb[109].mxu0  ;;  %v6870_v61 = vpop.f32.mrb[109].mxu1 }
 0x27b   : > { %v6807_v57 = vadd.f32 %v6806_v15, %v6805_v20  ;;  %v6871_v54 = vadd.f32 %v6870_v61, %v6869_v58  ;;  %v6808_v38 = vpop.f32.mrb[110].mxu0  ;;  %v6872_v34 = vpop.f32.mrb[110].mxu1 }
 0x27c   : > { %v6809_v30 = vpop.f32.mrb[111].mxu0  ;;  %v6873_v39 = vpop.f32.mrb[111].mxu1 }
 0x27d   : > { %v9245_v4 = vadd.f32 %v6871_v54, %v6807_v57  ;;  %v6810_v63 = vadd.f32 %v6809_v30, %v6808_v38  ;;  %v6874_v11 = vadd.f32 %v6873_v39, %v6872_v34 }
 0x27f   : > { %v9247_v56 = vadd.f32 %v6874_v11, %v6810_v63 }
 0x281   : > { %v6811_v49 = vpop.f32.mrb[112].mxu0  ;;  %v6875_v22 = vpop.f32.mrb[112].mxu1 }
 0x282   : > { %v6812_v2 = vpop.f32.mrb[113].mxu0  ;;  %v6876_v0 = vpop.f32.mrb[113].mxu1 }
 0x283   : > { %v6813_v5 = vadd.f32 %v6812_v2, %v6811_v49  ;;  %v6877_v43 = vadd.f32 %v6876_v0, %v6875_v22  ;;  %v6814_v25 = vpop.f32.mrb[114].mxu0  ;;  %v6878_v45 = vpop.f32.mrb[114].mxu1 }
 0x284   : > { %v6815_v8 = vpop.f32.mrb[115].mxu0  ;;  %v6879_v59 = vpop.f32.mrb[115].mxu1 }
 0x285   : > { %v9249_v44 = vadd.f32 %v6877_v43, %v6813_v5  ;;  %v6816_v37 = vadd.f32 %v6815_v8, %v6814_v25  ;;  %v6880_v50 = vadd.f32 %v6879_v59, %v6878_v45 }
 0x287   : > { %v9251_v10 = vadd.f32 %v6880_v50, %v6816_v37 }
 0x289   : > { %v6817_v18 = vpop.f32.mrb[116].mxu0  ;;  %v6881_v23 = vpop.f32.mrb[116].mxu1 }
 0x28a   : > { %v6818_v9 = vpop.f32.mrb[117].mxu0  ;;  %v6882_v52 = vpop.f32.mrb[117].mxu1 }
 0x28b   : > { %v6819_v40 = vadd.f32 %v6818_v9, %v6817_v18  ;;  %v6883_v35 = vadd.f32 %v6882_v52, %v6881_v23  ;;  %v6820_v42 = vpop.f32.mrb[118].mxu0  ;;  %v6884_v46 = vpop.f32.mrb[118].mxu1 }
 0x28c   : > { %v6821_v36 = vpop.f32.mrb[119].mxu0  ;;  %v6885_v24 = vpop.f32.mrb[119].mxu1 }
 0x28d   : > { %v9253_v53 = vadd.f32 %v6883_v35, %v6819_v40  ;;  %v6822_v1 = vadd.f32 %v6821_v36, %v6820_v42  ;;  %v6886_v62 = vadd.f32 %v6885_v24, %v6884_v46 }
 0x28f   : > { %v9255_v60 = vadd.f32 %v6886_v62, %v6822_v1 }
 0x291   : > { %v6823_v3 = vpop.f32.mrb[120].mxu0  ;;  %v6887_v26 = vpop.f32.mrb[120].mxu1 }
 0x292   : > { %v6824_v14 = vpop.f32.mrb[121].mxu0  ;;  %v6888_v28 = vpop.f32.mrb[121].mxu1 }
 0x293   : > { %v6825_v19 = vadd.f32 %v6824_v14, %v6823_v3  ;;  %v6889_v33 = vadd.f32 %v6888_v28, %v6887_v26  ;;  %v6826_v13 = vpop.f32.mrb[122].mxu0  ;;  %v6890_v47 = vpop.f32.mrb[122].mxu1  ;;  %v9577_v14 = vld [vmem:[#allocation35_spill] sm:$0xff] }
 0x294   : > { %v6827_v7 = vpop.f32.mrb[123].mxu0  ;;  %v6891_v12 = vpop.f32.mrb[123].mxu1 }
 0x295   : > { %v9257_v48 = vadd.f32 %v6889_v33, %v6825_v19  ;;  %v6828_v41 = vadd.f32 %v6827_v7, %v6826_v13  ;;  %v6892_v17 = vadd.f32 %v6891_v12, %v6890_v47 }
 0x297   : > { %v9259_v27 = vadd.f32 %v6892_v17, %v6828_v41 }
 0x299   : > { %v6893_v29 = vpop.f32.mrb[124].mxu1  ;;  %v6829_v51 = vpop.f32.mrb[124].mxu0 }
 0x29a   : > { %v6894_v20 = vpop.f32.mrb[125].mxu1  ;;  %v6830_v58 = vpop.f32.mrb[125].mxu0 }
 0x29b   : > { %v6895_v15 = vadd.f32 %v6894_v20, %v6893_v29  ;;  %v6896_v61 = vpop.f32.mrb[126].mxu1  ;;  %v6831_v57 = vadd.f32 %v6830_v58, %v6829_v51  ;;  %v6832_v54 = vpop.f32.mrb[126].mxu0 }
 0x29c   : > { %v6897_v38 = vpop.f32.mrb[127].mxu1  ;;  %v6833_v34 = vpop.f32.mrb[127].mxu0 }
 0x29d   : > { %v6898_v30 = vadd.f32 %v6897_v38, %v6896_v61  ;;  %v9261_v39 = vadd.f32 %v6895_v15, %v6831_v57  ;;  %v6834_v63 = vadd.f32 %v6833_v34, %v6832_v54  ;;  %v9578_v54 = vld [vmem:[#allocation36_spill] sm:$0xff] }
 0x29f   : > { %v9263_v11 = vadd.f32 %v6898_v30, %v6834_v63 }
 0x2a1   : > { %v6915_v49 = vpop.f32.mrb[128].mxu0 }
 0x2a2   : > { %v6916_v22 = vpop.f32.mrb[129].mxu0 }
 0x2a3   : > { %v6917_v2 = vadd.f32 %v6916_v22, %v6915_v49  ;;  %v6918_v0 = vpop.f32.mrb[130].mxu0  ;;  %v9579_v49 = vld [vmem:[#allocation37_spill] sm:$0xff] }
 0x2a4   : > { %v6919_v5 = vpop.f32.mrb[131].mxu0  ;;  %v6979_v8 = vpop.f32.mrb[128].mxu1 }
 0x2a5   : > { %v4789_v43 = vadd.f32 %v6917_v2, %v9232_v21  ;;  %v6920_v25 = vadd.f32 %v6919_v5, %v6918_v0  ;;  %v6980_v37 = vpop.f32.mrb[129].mxu1  ;;  %v9271_v21 = vld [vmem:[%s9486_s6 + $0x2] ss:$0 sm:$0xff] }
 0x2a6   : > { %v6981_v18 = vadd.f32 %v6980_v37, %v6979_v8  ;;  %v6982_v23 = vpop.f32.mrb[130].mxu1 }
 0x2a7   : > { %v4792_v45 = vadd.f32 %v6920_v25, %v9234_v6  ;;  %v6983_v40 = vpop.f32.mrb[131].mxu1  ;;  %v9576_v6 = vld [vmem:[#allocation34_spill] sm:$0xff] }
 0x2a8   : > { %v4886_v42 = vadd.f32 %v6981_v18, %v4789_v43  ;;  %v6984_v46 = vadd.f32 %v6983_v40, %v6982_v23  ;;  %v9580_v25 = vld [vmem:[#allocation38_spill] sm:$0xff] }
 0x2a9   : > { %v6921_v59 = vpop.f32.mrb[132].mxu0 }
 0x2aa   : > { %v6922_v50 = vpop.f32.mrb[133].mxu0  ;;  %v4948_v1 = vadd.f32 %v4886_v42, %v9576_v6  ;;  %v4889_v62 = vadd.f32 %v6984_v46, %v4792_v45  ;;  %v9581_v46 = vld [vmem:[#allocation39_spill] sm:$0xff] }
 0x2ab   : > { %v6923_v9 = vadd.f32 %v6922_v50, %v6921_v59  ;;  %v6924_v52 = vpop.f32.mrb[134].mxu0 }
 0x2ac   : > { %v6925_v35 = vpop.f32.mrb[135].mxu0  ;;  %v4972_v26 = vadd.f32 %v9271_v21, %v4948_v1  ;;  %v4949_v28 = vadd.f32 %v4889_v62, %v9577_v14  ;;  %v9582_v62 = vld [vmem:[#allocation40_spill] sm:$0xff] }
 0x2ad   : > { %v4797_v36 = vadd.f32 %v6923_v9, %v9237_v32  ;;  %v6926_v24 = vadd.f32 %v6925_v35, %v6924_v52 }
 0x2ae   : > { %v4973_v32 = vadd.f32 %v9271_v21, %v4949_v28  ;;  %v4988_v29 = vmax.f32 %v4972_v26, 0.0 }
 0x2af   : > { %v4800_v3 = vadd.f32 %v6926_v24, %v9239_v16 }
 0x2b0   : > { %v4989_v58 = vmax.f32 %v4973_v32, 0.0 }
 0x2b1   : > { %v6927_v33 = vpop.f32.mrb[136].mxu0 }
 0x2b2   : > { %v6985_v19 = vpop.f32.mrb[132].mxu1  ;;  %v6928_v47 = vpop.f32.mrb[137].mxu0  ;;  %v5004_v30 = vpack.c.bf16 %v4989_v58, %v4988_v29 }
 0x2b3   : > { %v6986_v13 = vpop.f32.mrb[133].mxu1  ;;  %v6929_v41 = vadd.f32 %v6928_v47, %v6927_v33  ;;  %v6930_v17 = vpop.f32.mrb[138].mxu0  ;;  %v9583_v33 = vld [vmem:[#allocation43_spill] sm:$0xff] }
 0x2b4   : > { %v6987_v7 = vadd.f32 %v6986_v13, %v6985_v19  ;;  %v6988_v12 = vpop.f32.mrb[134].mxu1  ;;  %v6931_v20 = vpop.f32.mrb[139].mxu0  ;;  %5715 = vmatmul.mubr.bf16.vlgmr.msra.gmra.mrb[164].mxu0 %v5004_v30 }
 0x2b5   : > { %v6989_v51 = vpop.f32.mrb[135].mxu1  ;;  %v4805_v61 = vadd.f32 %v6929_v41, %v9241_v55  ;;  %v6932_v57 = vadd.f32 %v6931_v20, %v6930_v17  ;;  %5722 = vmatprep.mubr.bf16.mxu0 %v9580_v25 }
 0x2b6   : > { %v4894_v15 = vadd.f32 %v6987_v7, %v4797_v36  ;;  %v6990_v16 = vadd.f32 %v6989_v51, %v6988_v12 }
 0x2b7   : > { %v4808_v63 = vadd.f32 %v6932_v57, %v9243_v31 }
 0x2b8   : > { %v4950_v38 = vadd.f32 %v4894_v15, %v9578_v54  ;;  %v4897_v34 = vadd.f32 %v6990_v16, %v4800_v3  ;;  %v9584_v16 = vld [vmem:[#allocation41_spill] sm:$0xff] }
 0x2b9   : > { %v6933_v0 = vpop.f32.mrb[140].mxu0 }
 0x2ba   : > { %v4951_v22 = vadd.f32 %v4897_v34, %v9579_v49  ;;  %v6991_v2 = vpop.f32.mrb[136].mxu1  ;;  %v4974_v5 = vadd.f32 %v9271_v21, %v4950_v38  ;;  %v6934_v45 = vpop.f32.mrb[141].mxu0  ;;  %v9585_v34 = vld [vmem:[#allocation42_spill] sm:$0xff] }
 0x2bb   : > { %v6992_v43 = vpop.f32.mrb[137].mxu1  ;;  %v6935_v59 = vadd.f32 %v6934_v45, %v6933_v0  ;;  %v6936_v37 = vpop.f32.mrb[142].mxu0  ;;  %v9586_v0 = vld [vmem:[#allocation46_spill] sm:$0xff] }
 0x2bc   : > { %v6993_v8 = vadd.f32 %v6992_v43, %v6991_v2  ;;  %v6994_v55 = vpop.f32.mrb[138].mxu1  ;;  %v4975_v50 = vadd.f32 %v9271_v21, %v4951_v22  ;;  %v4990_v23 = vmax.f32 %v4974_v5, 0.0  ;;  %v6937_v31 = vpop.f32.mrb[143].mxu0 }
 0x2bd   : > { %v6995_v18 = vpop.f32.mrb[139].mxu1  ;;  %v4813_v40 = vadd.f32 %v6935_v59, %v9245_v4  ;;  %v6938_v42 = vadd.f32 %v6937_v31, %v6936_v37 }
 0x2be   : > { %v4902_v9 = vadd.f32 %v6993_v8, %v4805_v61  ;;  %v6996_v52 = vadd.f32 %v6995_v18, %v6994_v55  ;;  %v4991_v35 = vmax.f32 %v4975_v50, 0.0 }
 0x2bf   : > { %v4816_v1 = vadd.f32 %v6938_v42, %v9247_v56 }
 0x2c0   : > { %v4952_v36 = vadd.f32 %v4902_v9, %v9581_v46  ;;  %v4905_v24 = vadd.f32 %v6996_v52, %v4808_v63  ;;  %v5005_v6 = vpack.c.bf16 %v4991_v35, %v4990_v23  ;;  %v9587_v9 = vld [vmem:[#allocation44_spill] sm:$0xff]  ;;  %v9588_v46 = vld [vmem:[#allocation45_spill] sm:$0xff] }
 0x2c1   : > { %v6939_v14 = vpop.f32.mrb[144].mxu0 }
 0x2c2   : > { %v4953_v3 = vadd.f32 %v4905_v24, %v9582_v62  ;;  %v6997_v26 = vpop.f32.mrb[140].mxu1  ;;  %5723 = vmatmul.mubr.bf16.gmra.mrb[168].mxu0 %v5005_v6  ;;  %v4976_v28 = vadd.f32 %v9271_v21, %v4952_v36  ;;  %v6940_v13 = vpop.f32.mrb[145].mxu0 }
 0x2c3   : > { %v6998_v19 = vpop.f32.mrb[141].mxu1  ;;  %5730 = vmatprep.mubr.bf16.mxu0 %v9583_v33  ;;  %v6941_v32 = vadd.f32 %v6940_v13, %v6939_v14  ;;  %v6942_v7 = vpop.f32.mrb[146].mxu0 }
 0x2c4   : > { %v6999_v4 = vadd.f32 %v6998_v19, %v6997_v26  ;;  %v7000_v47 = vpop.f32.mrb[142].mxu1  ;;  %v4977_v12 = vadd.f32 %v9271_v21, %v4953_v3  ;;  %v4992_v17 = vmax.f32 %v4976_v28, 0.0  ;;  %v6943_v56 = vpop.f32.mrb[147].mxu0  ;;  %v9589_v3 = vld [vmem:[#allocation49_spill] sm:$0xff] }
 0x2c5   : > { %v7001_v41 = vpop.f32.mrb[143].mxu1  ;;  %v4821_v20 = vadd.f32 %v6941_v32, %v9249_v44  ;;  %v6944_v15 = vadd.f32 %v6943_v56, %v6942_v7 }
 0x2c6   : > { %v4910_v29 = vadd.f32 %v6999_v4, %v4813_v40  ;;  %v7002_v51 = vadd.f32 %v7001_v41, %v7000_v47  ;;  %v4993_v58 = vmax.f32 %v4977_v12, 0.0 }
 0x2c7   : > { %v4824_v38 = vadd.f32 %v6944_v15, %v9251_v10 }
 0x2c8   : > { %v4954_v61 = vadd.f32 %v4910_v29, %v9584_v16  ;;  %v4913_v57 = vadd.f32 %v7002_v51, %v4816_v1  ;;  %v5006_v54 = vpack.c.bf16 %v4993_v58, %v4992_v17  ;;  %v9590_v17 = vld [vmem:[#allocation47_spill] sm:$0xff]  ;;  %v9591_v58 = vld [vmem:[#allocation48_spill] sm:$0xff] }
 0x2c9   : > { %v6945_v49 = vpop.f32.mrb[148].mxu0 }
 0x2ca   : > { %v4955_v30 = vadd.f32 %v4913_v57, %v9585_v34  ;;  %v7003_v63 = vpop.f32.mrb[144].mxu1  ;;  %5731 = vmatmul.mubr.bf16.gmra.mrb[172].mxu0 %v5006_v54  ;;  %v4978_v22 = vadd.f32 %v9271_v21, %v4954_v61  ;;  %v6946_v5 = vpop.f32.mrb[149].mxu0 }
 0x2cb   : > { %v7004_v2 = vpop.f32.mrb[145].mxu1  ;;  %5738 = vmatprep.mubr.bf16.mxu0 %v9586_v0  ;;  %v6947_v25 = vadd.f32 %v6946_v5, %v6945_v49  ;;  %v6948_v45 = vpop.f32.mrb[150].mxu0 }
 0x2cc   : > { %v7005_v44 = vadd.f32 %v7004_v2, %v7003_v63  ;;  %v7006_v43 = vpop.f32.mrb[146].mxu1  ;;  %v4979_v8 = vadd.f32 %v9271_v21, %v4955_v30  ;;  %v4994_v59 = vmax.f32 %v4978_v22, 0.0  ;;  %v6949_v10 = vpop.f32.mrb[151].mxu0 }
 0x2cd   : > { %v7007_v55 = vpop.f32.mrb[147].mxu1  ;;  %v4829_v18 = vadd.f32 %v6947_v25, %v9253_v53  ;;  %v6950_v31 = vadd.f32 %v6949_v10, %v6948_v45 }
 0x2ce   : > { %v4918_v37 = vadd.f32 %v7005_v44, %v4821_v20  ;;  %v7008_v50 = vadd.f32 %v7007_v55, %v7006_v43  ;;  %v4995_v23 = vmax.f32 %v4979_v8, 0.0  ;;  %v5205_v8 = vlaneseq  ;;  %v9593_v55 = vld [vmem:[#allocation50_spill] sm:$0xff] }
 0x2cf   : > { %v4832_v42 = vadd.f32 %v6950_v31, %v9255_v60 }
 0x2d0   : > { %v4956_v52 = vadd.f32 %v4918_v37, %v9587_v9  ;;  %v4921_v40 = vadd.f32 %v7008_v50, %v4824_v38  ;;  %v5007_v35 = vpack.c.bf16 %v4995_v23, %v4994_v59  ;;  %v9592_v38 = vld [vmem:[#allocation52_spill] sm:$0xff]  ;;  %v6457_v50 = vld [vmem:[%s9486_s6 + $0x4] sm:$0x1]  ;;  %v9594_v23 = vld [vmem:[#allocation51_spill] sm:$0xff] }
 0x2d1   : > { %v6951_v6 = vpop.f32.mrb[152].mxu0 }
 0x2d2   : > { %v4957_v36 = vadd.f32 %v4921_v40, %v9588_v46  ;;  %5739 = vmatmul.mubr.bf16.gmra.mrb[176].mxu0 %v5007_v35  ;;  %v4980_v1 = vadd.f32 %v9271_v21, %v4956_v52  ;;  %v6952_v26 = vpop.f32.mrb[153].mxu0  ;;  %v9595_v35 = vld [vmem:[#allocation55_spill] sm:$0xff]  ;;  %v5206_v46 = vshrl.u32 %v5205_v8, 7 }
 0x2d3   : > { %v7009_v24 = vpop.f32.mrb[148].mxu1  ;;  %5746 = vmatprep.mubr.bf16.mxu0 %v9589_v3  ;;  %v6953_v28 = vadd.f32 %v6952_v26, %v6951_v6  ;;  %v6954_v19 = vpop.f32.mrb[154].mxu0 }
 0x2d4   : > { %v7010_v62 = vpop.f32.mrb[149].mxu1  ;;  %v4981_v33 = vadd.f32 %v9271_v21, %v4957_v36  ;;  %v4996_v4 = vmax.f32 %v4980_v1, 0.0  ;;  %v6955_v60 = vpop.f32.mrb[155].mxu0 }
 0x2d5   : > { %v7011_v53 = vadd.f32 %v7010_v62, %v7009_v24  ;;  %v7012_v14 = vpop.f32.mrb[150].mxu1  ;;  %v4837_v7 = vadd.f32 %v6953_v28, %v9257_v48  ;;  %v6956_v41 = vadd.f32 %v6955_v60, %v6954_v19 }
 0x2d6   : > { %v7013_v13 = vpop.f32.mrb[151].mxu1  ;;  %v4997_v12 = vmax.f32 %v4981_v33, 0.0 }
 0x2d7   : > { %v4926_v47 = vadd.f32 %v7011_v53, %v4829_v18  ;;  %v7014_v32 = vadd.f32 %v7013_v13, %v7012_v14  ;;  %v4840_v20 = vadd.f32 %v6956_v41, %v9259_v27  ;;  %v5207_v13 = vsub.s32 0, %v5206_v46 }
 0x2d8   : > { %v5008_v51 = vpack.c.bf16 %v4997_v12, %v4996_v4  ;;  %v9596_v4 = vld [vmem:[#allocation53_spill] sm:$0xff]  ;;  %v9597_v12 = vld [vmem:[#allocation54_spill] sm:$0xff] }
 0x2d9   : > { %v4958_v56 = vadd.f32 %v4926_v47, %v9590_v17  ;;  %v4929_v29 = vadd.f32 %v7014_v32, %v4832_v42  ;;  %v6957_v61 = vpop.f32.mrb[156].mxu0 }
 0x2da   : > { %5747 = vmatmul.mubr.bf16.gmra.mrb[180].mxu0 %v5008_v51  ;;  %v6958_v34 = vpop.f32.mrb[157].mxu0 }
 0x2db   : > { %v4959_v15 = vadd.f32 %v4929_v29, %v9591_v58  ;;  %v7015_v16 = vpop.f32.mrb[152].mxu1  ;;  %v4982_v57 = vadd.f32 %v9271_v21, %v4958_v56  ;;  %5754 = vmatprep.mubr.bf16.mxu0 %v9592_v38  ;;  %v6959_v63 = vadd.f32 %v6958_v34, %v6957_v61  ;;  %v6960_v49 = vpop.f32.mrb[158].mxu0  ;;  %v9598_v29 = vld [vmem:[#allocation56_spill] sm:$0xff] }
 0x2dc   : > { %v7016_v54 = vpop.f32.mrb[153].mxu1  ;;  %v6961_v27 = vpop.f32.mrb[159].mxu0 }
 0x2dd   : > { %v7017_v48 = vadd.f32 %v7016_v54, %v7015_v16  ;;  %v7018_v30 = vpop.f32.mrb[154].mxu1  ;;  %v4983_v22 = vadd.f32 %v9271_v21, %v4959_v15  ;;  %v4998_v0 = vmax.f32 %v4982_v57, 0.0  ;;  %v4845_v43 = vadd.f32 %v6959_v63, %v9261_v39 }
 0x2de   : > { %v7019_v2 = vpop.f32.mrb[155].mxu1  ;;  %v6962_v45 = vadd.f32 %v6961_v27, %v6960_v49 }
 0x2df   : > { %v4934_v5 = vadd.f32 %v7017_v48, %v4837_v7  ;;  %v7020_v44 = vadd.f32 %v7019_v2, %v7018_v30  ;;  %v4999_v25 = vmax.f32 %v4983_v22, 0.0 }
 0x2e0   : > { %v4848_v18 = vadd.f32 %v6962_v45, %v9263_v11 }
 0x2e1   : > { %v4960_v59 = vadd.f32 %v4934_v5, %v9593_v55  ;;  %v4937_v10 = vadd.f32 %v7020_v44, %v4840_v20  ;;  %v5009_v37 = vpack.c.bf16 %v4999_v25, %v4998_v0  ;;  %v5194_v52 = vpop.f32.mrb[160].mxu0 }
 0x2e2   : > { %v5195_v42 = vadd.f32 %v6457_v50, %v5194_v52  ;;  %v7198_v36 = vpop.f32.mrb[161].mxu0 }
 0x2e3   : > { %v4961_v31 = vadd.f32 %v4937_v10, %v9594_v23  ;;  %v7021_v9 = vpop.f32.mrb[156].mxu1  ;;  %5755 = vmatmul.mubr.bf16.gmra.mrb[184].mxu0 %v5009_v37  ;;  %v4984_v39 = vadd.f32 %v9271_v21, %v4960_v59  ;;  %v5197_v1 = vpop.f32.mrb[162].mxu0 }
 0x2e4   : > { %v7022_v40 = vpop.f32.mrb[157].mxu1  ;;  %5762 = vmatprep.mubr.bf16.mxu0 %v9595_v35  ;;  %v5200_v11 = vmax.f32 %v5195_v42, 0.0  ;;  %v7199_v26 = vpop.f32.mrb[163].mxu0 }
 0x2e5   : > { %v7023_v24 = vadd.f32 %v7022_v40, %v7021_v9  ;;  %v7024_v6 = vpop.f32.mrb[158].mxu1  ;;  %v4985_v62 = vadd.f32 %v9271_v21, %v4961_v31  ;;  %v5000_v28 = vmax.f32 %v4984_v39, 0.0 }
 0x2e6   : > { %v7025_v3 = vpop.f32.mrb[159].mxu1  ;;  %v5201_v33 = vpack.c.bf16 %v5200_v11, %v5200_v11 }
 0x2e7   : > { %v4942_v53 = vadd.f32 %v7023_v24, %v4845_v43  ;;  %v7026_v14 = vadd.f32 %v7025_v3, %v7024_v6  ;;  %v5001_v19 = vmax.f32 %v4985_v62, 0.0 }
 0x2e8   : > { %v5203_v7 = vpack.i.b16 %v5201_v33, %v5201_v33  ;;  %v9347_v33 = vld [vmem:[%s9486_s6 + $0x5] ss:$0 sm:$0xff] }
 0x2e9   : > { %v4962_v60 = vadd.f32 %v4942_v53, %v9596_v4  ;;  %v4945_v47 = vadd.f32 %v7026_v14, %v4848_v18  ;;  %v5010_v32 = vpack.c.bf16 %v5001_v19, %v5000_v28 }
 0x2ea   : > { %v5208_v56 = vrot.slane %v5203_v7, %v5207_v13 }
 0x2eb   : > { %v4963_v41 = vadd.f32 %v4945_v47, %v9597_v12  ;;  %5763 = vmatmul.mubr.bf16.gmra.mrb[188].mxu0 %v5010_v32  ;;  %v4986_v17 = vadd.f32 %v9271_v21, %v4962_v60 }
 0x2ec   : > { %5770 = vmatprep.mubr.bf16.mxu0 %v9598_v29  ;;  %7216 = vmatprep.mubr.bf16.mxu1 %v5208_v56 }
 0x2ed   : > { %v4987_v51 = vadd.f32 %v9271_v21, %v4963_v41  ;;  %v5002_v20 = vmax.f32 %v4986_v17, 0.0  ;;  %7217 = vmatmul.mubr.bf16.vlgmr.msra.gmra.mrb[192].mxu1 %v5208_v56 }
 0x2ee   : > { %7220 = vmatprep.mubr.bf16.mxu1 %v5208_v56 }
 0x2ef   : > { %v5003_v58 = vmax.f32 %v4987_v51, 0.0 }
 0x2f1   : > { %v5011_v15 = vpack.c.bf16 %v5003_v58, %v5002_v20 }
 0x2f3   : > { %5771 = vmatmul.mubr.bf16.gmra.mrb[192].mxu0 %v5011_v15 }
 0x2f5   : > { %7221 = vmatmul.mubr.bf16.gmra.mrb[196].mxu1 %v5208_v56 }
 0x2f6   : > { %7224 = vmatprep.mubr.bf16.mxu1 %v5208_v56 }
 0x2fd   : > { %7225 = vmatmul.mubr.bf16.gmra.mrb[200].mxu1 %v5208_v56 }
 0x2fe   : > { %7228 = vmatprep.mubr.bf16.mxu1 %v5208_v56 }
 0x305   : > { %7229 = vmatmul.mubr.bf16.gmra.mrb[204].mxu1 %v5208_v56 }
 0x307   : > { %v7052_v16 = vpop.f32.mrb[160].mxu1 }
 0x308   : > { %v7053_v61 = vpop.f32.mrb[161].mxu1 }
 0x309   : > { %v7054_v57 = vadd.f32 %v7053_v61, %v7052_v16  ;;  %v7055_v54 = vpop.f32.mrb[162].mxu1 }
 0x30a   : > { %v7056_v38 = vpop.f32.mrb[163].mxu1 }
 0x30b   : > { %v7057_v34 = vadd.f32 %v7056_v38, %v7055_v54  ;;  %v5620_v60 = vadd.f32 %v7054_v57, %v9347_v33 }
 0x30d   : > { %v5623_v12 = vadd.f32 %v7057_v34, %v9347_v33 }
 0x30f   : > { %v7058_v48 = vpop.f32.mrb[164].mxu1 }
 0x310   : > { %v7059_v21 = vpop.f32.mrb[165].mxu1 }
 0x311   : > { %v7060_v30 = vadd.f32 %v7059_v21, %v7058_v48  ;;  %v7061_v63 = vpop.f32.mrb[166].mxu1 }
 0x312   : > { %v7062_v49 = vpop.f32.mrb[167].mxu1 }
 0x313   : > { %v7063_v22 = vadd.f32 %v7062_v49, %v7061_v63  ;;  %v5628_v20 = vadd.f32 %v7060_v30, %v9347_v33 }
 0x315   : > { %v5631_v61 = vadd.f32 %v7063_v22, %v9347_v33 }
 0x317   : > { %v7064_v2 = vpop.f32.mrb[168].mxu1 }
 0x318   : > { %v7065_v0 = vpop.f32.mrb[169].mxu1 }
 0x319   : > { %v7066_v27 = vadd.f32 %v7065_v0, %v7064_v2  ;;  %v7067_v5 = vpop.f32.mrb[170].mxu1 }
 0x31a   : > { %v7068_v44 = vpop.f32.mrb[171].mxu1 }
 0x31b   : > { %v7069_v43 = vadd.f32 %v7068_v44, %v7067_v5  ;;  %v5636_v34 = vadd.f32 %v7066_v27, %v9347_v33 }
 0x31d   : > { %v5639_v0 = vadd.f32 %v7069_v43, %v9347_v33 }
 0x31f   : > { %v7070_v25 = vpop.f32.mrb[172].mxu1 }
 0x320   : > { %v7071_v45 = vpop.f32.mrb[173].mxu1 }
 0x321   : > { %v7072_v8 = vadd.f32 %v7071_v45, %v7070_v25  ;;  %v7073_v55 = vpop.f32.mrb[174].mxu1 }
 0x322   : > { %v7074_v59 = vpop.f32.mrb[175].mxu1 }
 0x323   : > { %v7075_v10 = vadd.f32 %v7074_v59, %v7073_v55  ;;  %v5644_v22 = vadd.f32 %v7072_v8, %v9347_v33 }
 0x327   : > { %v7076_v37 = vpop.f32.mrb[176].mxu1 }
 0x328   : > { %v7077_v50 = vpop.f32.mrb[177].mxu1 }
 0x329   : > { %v9328_v18 = vadd.f32 %v7077_v50, %v7076_v37  ;;  %v7079_v23 = vpop.f32.mrb[178].mxu1  ;;  %v5647_v50 = vadd.f32 %v7075_v10, %v9347_v33 }
 0x32a   : > { %v7080_v31 = vpop.f32.mrb[179].mxu1 }
 0x32b   : > { %v9330_v9 = vadd.f32 %v7080_v31, %v7079_v23 }
 0x32d   : > { %v5655_v8 = vadd.f32 %v9330_v9, %v9347_v33 }
 0x32f   : > { %v7082_v52 = vpop.f32.mrb[180].mxu1 }
 0x330   : > { %v7083_v39 = vpop.f32.mrb[181].mxu1 }
 0x331   : > { %v9332_v40 = vadd.f32 %v7083_v39, %v7082_v52  ;;  %v7085_v35 = vpop.f32.mrb[182].mxu1  ;;  %v5652_v39 = vadd.f32 %v9328_v18, %v9347_v33 }
 0x332   : > { %v7086_v42 = vpop.f32.mrb[183].mxu1 }
 0x333   : > { %v9334_v46 = vadd.f32 %v7086_v42, %v7085_v35 }
 0x335   : > { %v5663_v18 = vadd.f32 %v9334_v46, %v9347_v33 }
 0x337   : > { %v7088_v36 = vpop.f32.mrb[184].mxu1 }
 0x338   : > { %v7089_v24 = vpop.f32.mrb[185].mxu1 }
 0x339   : > { %v9336_v6 = vadd.f32 %v7089_v24, %v7088_v36  ;;  %v7091_v1 = vpop.f32.mrb[186].mxu1 }
 0x33a   : > { %v7092_v62 = vpop.f32.mrb[187].mxu1 }
 0x33b   : > { %v9338_v3 = vadd.f32 %v7092_v62, %v7091_v1 }
 0x33f   : > { %v7094_v11 = vpop.f32.mrb[188].mxu1 }
 0x340   : > { %v7095_v26 = vpop.f32.mrb[189].mxu1 }
 0x341   : > { %v9340_v53 = vadd.f32 %v7095_v26, %v7094_v11  ;;  %v7097_v14 = vpop.f32.mrb[190].mxu1  ;;  %v5660_v26 = vadd.f32 %v9332_v40, %v9347_v33  ;;  %v5671_v40 = vadd.f32 %v9338_v3, %v9347_v33 }
 0x342   : > { %v7098_v28 = vpop.f32.mrb[191].mxu1 }
 0x343   : > { %v9342_v19 = vadd.f32 %v7098_v28, %v7097_v14 }
 0x387   : > { %v7116_v13 = vpop.f32.mrb[164].mxu0 }
 0x388   : > { %v7117_v4 = vpop.f32.mrb[165].mxu0 }
 0x389   : > { %v7118_v47 = vadd.f32 %v7117_v4, %v7116_v13  ;;  %v7119_v32 = vpop.f32.mrb[166].mxu0 }
 0x38a   : > { %v7120_v7 = vpop.f32.mrb[167].mxu0 }
 0x38b   : > { %v7121_v41 = vadd.f32 %v7120_v7, %v7119_v32  ;;  %v9351_v17 = vadd.f32 %v7118_v47, %v5620_v60  ;;  %v5668_v7 = vadd.f32 %v9336_v6, %v9347_v33 }
 0x38d   : > { %v9353_v56 = vadd.f32 %v7121_v41, %v5623_v12 }
 0x395   : > { %v7122_v29 = vpop.f32.mrb[168].mxu0 }
 0x396   : > { %v7123_v51 = vpop.f32.mrb[169].mxu0 }
 0x397   : > { %v7124_v58 = vadd.f32 %v7123_v51, %v7122_v29  ;;  %v7125_v15 = vpop.f32.mrb[170].mxu0 }
 0x398   : > { %v7126_v16 = vpop.f32.mrb[171].mxu0 }
 0x399   : > { %v7127_v57 = vadd.f32 %v7126_v16, %v7125_v15  ;;  %v5725_v54 = vadd.f32 %v7124_v58, %v5628_v20 }
 0x39b   : > { %v5728_v38 = vadd.f32 %v7127_v57, %v5631_v61 }
 0x39d   : > { %v7128_v48 = vpop.f32.mrb[172].mxu0 }
 0x39e   : > { %v7129_v21 = vpop.f32.mrb[173].mxu0 }
 0x39f   : > { %v7130_v63 = vadd.f32 %v7129_v21, %v7128_v48  ;;  %v7131_v49 = vpop.f32.mrb[174].mxu0 }
 0x3a0   : > { %v7132_v2 = vpop.f32.mrb[175].mxu0 }
 0x3a1   : > { %v7133_v5 = vadd.f32 %v7132_v2, %v7131_v49  ;;  %v9359_v44 = vadd.f32 %v7130_v63, %v5636_v34 }
 0x3a3   : > { %v9361_v30 = vadd.f32 %v7133_v5, %v5639_v0 }
 0x3a5   : > { %v7134_v25 = vpop.f32.mrb[176].mxu0 }
 0x3a6   : > { %v7135_v45 = vpop.f32.mrb[177].mxu0 }
 0x3a7   : > { %v7136_v55 = vadd.f32 %v7135_v45, %v7134_v25  ;;  %v7137_v59 = vpop.f32.mrb[178].mxu0 }
 0x3a8   : > { %v7138_v37 = vpop.f32.mrb[179].mxu0 }
 0x3a9   : > { %v7139_v27 = vadd.f32 %v7138_v37, %v7137_v59  ;;  %v5741_v23 = vadd.f32 %v7136_v55, %v5644_v22 }
 0x3ab   : > { %v9365_v31 = vadd.f32 %v7139_v27, %v5647_v50 }
 0x3ad   : > { %v7140_v52 = vpop.f32.mrb[180].mxu0 }
 0x3ae   : > { %v7141_v43 = vpop.f32.mrb[181].mxu0 }
 0x3af   : > { %v7142_v35 = vadd.f32 %v7141_v43, %v7140_v52  ;;  %v7143_v42 = vpop.f32.mrb[182].mxu0 }
 0x3b0   : > { %v7144_v36 = vpop.f32.mrb[183].mxu0 }
 0x3b1   : > { %v7145_v24 = vadd.f32 %v7144_v36, %v7143_v42  ;;  %v9371_v1 = vadd.f32 %v7142_v35, %v5652_v39 }
 0x3b3   : > { %v9373_v62 = vadd.f32 %v7145_v24, %v5655_v8 }
 0x3b6   : > { %v7146_v10 = vpop.f32.mrb[184].mxu0 }
 0x3b7   : > { %v7147_v11 = vpop.f32.mrb[185].mxu0 }
 0x3b8   : > { %v7148_v14 = vadd.f32 %v7147_v11, %v7146_v10  ;;  %v7149_v28 = vpop.f32.mrb[186].mxu0 }
 0x3b9   : > { %v7150_v13 = vpop.f32.mrb[187].mxu0 }
 0x3ba   : > { %v7151_v4 = vadd.f32 %v7150_v13, %v7149_v28  ;;  %v5757_v60 = vadd.f32 %v7148_v14, %v5660_v26 }
 0x3bc   : > { %v5760_v47 = vadd.f32 %v7151_v4, %v5663_v18 }
 0x3be   : > { %v7152_v9 = vpop.f32.mrb[188].mxu0 }
 0x3bf   : > { %v7153_v32 = vpop.f32.mrb[189].mxu0 }
 0x3c0   : > { %v7154_v12 = vadd.f32 %v7153_v32, %v7152_v9  ;;  %v7155_v41 = vpop.f32.mrb[190].mxu0  ;;  %v7218_v20 = vpop.f32.mrb[192].mxu1 }
 0x3c1   : > { %v7156_v29 = vpop.f32.mrb[191].mxu0  ;;  %v5822_v46 = vadd.f32 %v7218_v20, %v5725_v54  ;;  %v5813_v15 = vpop.f32.mrb[193].mxu1  ;;  %v5676_v54 = vadd.f32 %v9340_v53, %v9347_v33 }
 0x3c2   : > { %v7157_v51 = vadd.f32 %v7156_v29, %v7155_v41  ;;  %v9383_v58 = vadd.f32 %v7154_v12, %v5668_v7  ;;  %v5814_v16 = vadd.f32 %v5813_v15, %v9351_v17  ;;  %v7219_v61 = vpop.f32.mrb[194].mxu1 }
 0x3c3   : > { %v5878_v6 = vmax.f32 %v5822_v46, 0.0  ;;  %v5825_v48 = vadd.f32 %v7219_v61, %v5728_v38  ;;  %v5816_v21 = vpop.f32.mrb[195].mxu1  ;;  %v5679_v38 = vadd.f32 %v9342_v19, %v9347_v33 }
 0x3c4   : > { %v9386_v57 = vadd.f32 %v7157_v51, %v5671_v40  ;;  %v5876_v3 = vmax.f32 %v5814_v16, 0.0  ;;  %v5817_v63 = vadd.f32 %v5816_v21, %v9353_v56 }
 0x3c5   : > { %5894 = vst [vmem:[%s8140_s12 + $0x10] sm:$0xff] %v5878_v6  ;;  %v5879_v2 = vmax.f32 %v5825_v48, 0.0 }
 0x3c6   : > { %v7158_v34 = vpop.f32.mrb[192].mxu0  ;;  %5892 = vst [vmem:[%s8140_s12] sm:$0xff] %v5876_v3  ;;  %v5877_v5 = vmax.f32 %v5817_v63, 0.0 }
 0x3c7   : > { %v7159_v49 = vpop.f32.mrb[193].mxu0  ;;  %5895 = vst [vmem:[%s8140_s12 + $0x18] sm:$0xff] %v5879_v2 }
 0x3c8   : > { %v7160_v0 = vadd.f32 %v7159_v49, %v7158_v34  ;;  %v7161_v17 = vpop.f32.mrb[194].mxu0  ;;  %5893 = vst [vmem:[%s8140_s12 + $0x8] sm:$0xff] %v5877_v5  ;;  %v7222_v56 = vpop.f32.mrb[196].mxu1 }
 0x3c9   : > { %v7162_v25 = vpop.f32.mrb[195].mxu0  ;;  %v5838_v55 = vadd.f32 %v7222_v56, %v5741_v23  ;;  %v5829_v59 = vpop.f32.mrb[197].mxu1 }
 0x3ca   : > { %v7163_v45 = vadd.f32 %v7162_v25, %v7161_v17  ;;  %v5773_v22 = vadd.f32 %v7160_v0, %v5676_v54  ;;  %v5830_v53 = vadd.f32 %v5829_v59, %v9359_v44  ;;  %v7223_v37 = vpop.f32.mrb[198].mxu1 }
 0x3cb   : > { %v5882_v27 = vmax.f32 %v5838_v55, 0.0  ;;  %v5841_v52 = vadd.f32 %v7223_v37, %v9365_v31  ;;  %v5832_v43 = vpop.f32.mrb[199].mxu1 }
 0x3cc   : > { %v5776_v50 = vadd.f32 %v7163_v45, %v5679_v38  ;;  %v5880_v39 = vmax.f32 %v5830_v53, 0.0  ;;  %v5833_v19 = vadd.f32 %v5832_v43, %v9361_v30 }
 0x3cd   : > { %5898 = vst [vmem:[%s8140_s12 + $0x30] sm:$0xff] %v5882_v27  ;;  %v5883_v33 = vmax.f32 %v5841_v52, 0.0 }
 0x3ce   : > { %5896 = vst [vmem:[%s8140_s12 + $0x20] sm:$0xff] %v5880_v39  ;;  %v5881_v35 = vmax.f32 %v5833_v19, 0.0 }
 0x3cf   : > { %5899 = vst [vmem:[%s8140_s12 + $0x38] sm:$0xff] %v5883_v33 }
 0x3d0   : > { %5897 = vst [vmem:[%s8140_s12 + $0x28] sm:$0xff] %v5881_v35  ;;  %v7226_v44 = vpop.f32.mrb[200].mxu1 }
 0x3d1   : > { %v5854_v23 = vadd.f32 %v7226_v44, %v5757_v60  ;;  %v5845_v42 = vpop.f32.mrb[201].mxu1 }
 0x3d2   : > { %v5846_v31 = vadd.f32 %v5845_v42, %v9371_v1  ;;  %v7227_v36 = vpop.f32.mrb[202].mxu1 }
 0x3d3   : > { %v5886_v8 = vmax.f32 %v5854_v23, 0.0  ;;  %v5857_v30 = vadd.f32 %v7227_v36, %v5760_v47  ;;  %v5848_v24 = vpop.f32.mrb[203].mxu1 }
 0x3d4   : > { %v5884_v10 = vmax.f32 %v5846_v31, 0.0  ;;  %v5849_v11 = vadd.f32 %v5848_v24, %v9373_v62 }
 0x3d5   : > { %5902 = vst [vmem:[%s8140_s12 + $0x50] sm:$0xff] %v5886_v8  ;;  %v5887_v26 = vmax.f32 %v5857_v30, 0.0 }
 0x3d6   : > { %5900 = vst [vmem:[%s8140_s12 + $0x40] sm:$0xff] %v5884_v10  ;;  %v5885_v14 = vmax.f32 %v5849_v11, 0.0 }
 0x3d7   : > { %5903 = vst [vmem:[%s8140_s12 + $0x58] sm:$0xff] %v5887_v26 }
 0x3d8   : > { %5901 = vst [vmem:[%s8140_s12 + $0x48] sm:$0xff] %v5885_v14  ;;  %v7230_v28 = vpop.f32.mrb[204].mxu1 }
 0x3d9   : > { %v5870_v1 = vadd.f32 %v7230_v28, %v5773_v22  ;;  %v5861_v13 = vpop.f32.mrb[205].mxu1 }
 0x3da   : > { %v5862_v18 = vadd.f32 %v5861_v13, %v9383_v58  ;;  %v7231_v4 = vpop.f32.mrb[206].mxu1 }
 0x3db   : > { %v5890_v62 = vmax.f32 %v5870_v1, 0.0  ;;  %v5873_v60 = vadd.f32 %v7231_v4, %v5776_v50  ;;  %v5864_v47 = vpop.f32.mrb[207].mxu1 }
 0x3dc   : > { %v5888_v9 = vmax.f32 %v5862_v18, 0.0  ;;  %v5865_v32 = vadd.f32 %v5864_v47, %v9386_v57 }
 0x3dd   : > { %5906 = vst [vmem:[%s8140_s12 + $0x70] sm:$0xff] %v5890_v62  ;;  %v5891_v7 = vmax.f32 %v5873_v60, 0.0 }
 0x3de   : > { %5904 = vst [vmem:[%s8140_s12 + $0x60] sm:$0xff] %v5888_v9  ;;  %v5889_v12 = vmax.f32 %v5865_v32, 0.0 }
 0x3df   : > { %5907 = vst [vmem:[%s8140_s12 + $0x78] sm:$0xff] %v5891_v7 }
 0x3e0   : > { %5905 = vst [vmem:[%s8140_s12 + $0x68] sm:$0xff] %v5889_v12 }
 0x3e1   : > { %7775 = shalt.err (!%p7772_p5)
}
 0x3e2   : > { %s7776_s19 = scalar_lea.hbm %s9422_s17, 2048  ;;  %s7780_s24 = scalar_lea.hbm %s9487_s7, 8192 }
 0x3e3   : > { %p7777_p6 = scmp.ne.s32.totalorder %s9422_s17, %s7776_s19  ;;  %p7781_p11 = scmp.lt.u32.totalorder %s9422_s17, %s9487_s7 }
 0x3e4   : > { %p7782_p13 = scmp.lt.u32.totalorder %s7780_s24, %s7776_s19  ;;  %p7784_p2 = scmp.lt.u32.totalorder %s7776_s19, %s9422_s17 }
 0x3e5   : > { %p7778_p7 = pnand %p7777_p6, %p9599_p0 }
 0x3e6   : > { %p7783_p3 = por %p7782_p13, %p7781_p11 }
 0x3e7   : > { %p7779_p9 = pneg %p7778_p7 }
 0x3e8   : > { %p7785_p8 = por %p7784_p2, %p7783_p3 }
 0x3ea   : > { %p7786_p10 = pnand %p7785_p8, %p7779_p9 }
 0x3ec   : > { %7789 = shalt.err (!%p7786_p10)
}
 0x3ed   : > { %s7885_s11 = smov 128   ;;  %s7886_s18 = smov 8  }
 0x3ee   : > { %7248 = dma.vmem_to_hbm [thread:$0]  (%p9599_p0), %s9416_s9, 2048, %s9422_s17, %s9428_s20, %s7885_s11, %s7885_s11, %s7886_s18  }
 0x3ef PF: > { %s9600_s14 = sld [smem:[#allocation29_spill]]  ;;  %s9601_s21 = sld [smem:[#allocation25_spill]] }
 0x3f0   : > { %s9602_s10 = sld [smem:[#allocation32_spill]] }
 0x3f5   : > { %p7275_p12 = scmp.ge.s32.totalorder %s9600_s14, 2  ;;  %s5939_s13 = sand.u32 1, %s9601_s21  }
 0x3f6   : > { %p9603_p1 = scmp.ne.s32.totalorder %s9602_s10, 0  ;;  %s5940_s27 = scalar_lea.sflag [#allocation9], %s5939_s13 }
 0x3f8   : > { %p7264_p4 = pnand %p7275_p12, %p9603_p1 }
 0x3fa   : > { %7837 = dma.done.wait (!%p7264_p4), %s5940_s27, 2048  }
 0x3fb   : > { %7839 = vsyncadd (!%p7264_p4), %s5940_s27, 4294965248  ;;  %s23_s8 = sadd.s32 1, %s9600_s14   ;;  %s9604_s28 = sld [smem:[#allocation26_spill]] }
 0x3fc   : > { %p20_p5 = scmp.ge.s32.totalorder %s23_s8, 6   ;;  %s9605_s26 = sld [smem:[#allocation33_spill]] }
 0x3fd   : > { %s9606_s27 = sld [smem:[#allocation27_spill]]  ;;  %s9607_s15 = sld [smem:[#allocation28_spill]] }
 0x3fe   : > { %s9608_s29 = sld [smem:[#allocation30_spill]]  ;;  %s9609_s30 = sld [smem:[#allocation31_spill]] }
 0x3ff   : > { %s9610_s24 = smov %s7846_s25  ;;  %22 = sbr.rel (!%p20_p5) target bundleno = 10 (0xa), region = 110 }
 0x401   : > { %s9611_s25 = smov %s9604_s28 }
 0x403   : > { %s9612_s28 = smov %s9607_s15 }
 0x406   :  { %5945 = vsyncpa [#allocation8], 1 }
 0x407   :  { %5947 = vsyncpa [#allocation8 + $0x1], 1 }
 0x408   :  { %5948 = vsyncpa [#allocation11], 1 }
 0x409   :  { %5949 = vsyncpa [#allocation14], 1 }
 0x40a   :  { %5950 = vsyncpa [#allocation9], 1 }
 0x40b   :  { %5952 = vsyncpa [#allocation9 + $0x1], 1 }
 0x40c   :  { %5953 = vsyncmov [#allocation6] }
 0x40f   :  { %s5954_s9 = vpop.sfrf %5953 }
 0x410   :  { %p6514_p0 = scmp.ne.s32.totalorder %s5954_s9, 0 }
 0x412   :  { %5958 = shalt.err (%p6514_p0)  }

</bundles_post_ra>
